<compile_context>
chip_gen: v7x
topology: tpu7x:2x2x1
jax: 0.10.0
libtpu: 0.0.40
codegen_flags: <defaults>
</compile_context>

<pallas_src>
import jax
import jax.numpy as jnp
from jax import lax
from jax.experimental import pallas as pl
from jax.experimental.pallas import tpu as pltpu

_NEG_BIG = -1e30


def _round_up(x: int, m: int) -> int:
    return ((x + m - 1) // m) * m


def _usable_vmem_bytes() -> int:
    """Physical VMEM of this generation minus headroom for compiler scratch."""
    cap = None
    try:
        cap = int(getattr(pltpu.get_tpu_info(), "vmem_capacity_bytes", 0)) or None
    except Exception:
        cap = None
    if cap is None:
        cap = 64 * 1024 * 1024          # conservative (v7x-sized) fallback
    return int(cap * 0.85)              # ~54 MiB on v7x, ~108 MiB on v5e/v6e


def _make_kernel(n_valid: int, tn: int, K: int, tiles_per_split: int,
                 needs_mask: bool, cast_h: bool):
    """Grid-step kernel; all arguments are static Python values."""

    def kernel(h_ref, we_ref, be_ref, wvu_ref, bvu_ref, wa_ref, ba_ref,
               m_ref, l_ref, acc_ref, m_sc, l_sc, acc_sc):
        c = pl.program_id(0)            # split index ("parallel" -> per TensorCore)
        j = pl.program_id(1)            # tile index inside the split ("arbitrary")

        # ---- init running online-softmax state at the start of each split ----
        @pl.when(j == 0)
        def _init():
            m_sc[...] = jnp.full_like(m_sc, _NEG_BIG)
            l_sc[...] = jnp.zeros_like(l_sc)
            acc_sc[...] = jnp.zeros_like(acc_sc)

        # ---- encoder: relu(H @ We + be); H tile cast to bf16 in-kernel ----
        h = h_ref[...]
        if cast_h:
            h = h.astype(jnp.bfloat16)
        he = jnp.dot(h, we_ref[...], preferred_element_type=jnp.float32) + be_ref[...]
        he = jnp.maximum(he, 0.0)                                   # (tn, L) f32

        if needs_mask:
            # Only emitted when the tiling over-covers N (ragged last tile or an
            # overhang tile of the 2-way split).  Zeroing He keeps padded rows
            # finite; their scores are forced to -1e30 below so they vanish.
            row0 = (c * tiles_per_split + j) * tn
            rows = row0 + lax.broadcasted_iota(jnp.int32, (tn, 1), 0)
            valid_rows = rows < n_valid                             # (tn, 1)
            he = jnp.where(valid_rows, he, 0.0)

        he_b = he.astype(jnp.bfloat16)

        # ---- fused gate matmul: [tanh | sigmoid](He @ [Wv|Wu] + [bv|bu]) ----
        z = jnp.dot(he_b, wvu_ref[...], preferred_element_type=jnp.float32) + bvu_ref[...]
        D = wvu_ref.shape[1] // 2
        g = jnp.tanh(z[:, :D]) * jax.nn.sigmoid(z[:, D:])           # (tn, D) f32

        if K == 1:
            # VPU dot + reductions; avoids 1-wide MXU matmuls.
            s = jnp.sum(g * wa_ref[...], axis=-1, keepdims=True) + ba_ref[...]  # (tn,1)
            if needs_mask:
                s = jnp.where(valid_rows, s, _NEG_BIG)
            m_new = jnp.maximum(m_sc[...], jnp.max(s, axis=0, keepdims=True))   # (1,1)
            alpha = jnp.exp(m_sc[...] - m_new)
            p = jnp.exp(s - m_new)                                              # (tn,1)
            l_sc[...] = alpha * l_sc[...] + jnp.sum(p, axis=0, keepdims=True)
            acc_sc[...] = alpha * acc_sc[...] + jnp.sum(p * he, axis=0, keepdims=True)
            m_sc[...] = m_new
        else:
            # Scores kept as (K, tn) so the running state stays (K, 1) — no
            # per-step transposes.  p / He stay f32 for the tiny (K, L) matmul.
            s = lax.dot_general(wa_ref[...], g.astype(jnp.bfloat16),
                                (((1,), (1,)), ((), ())),
                                preferred_element_type=jnp.float32) + ba_ref[...]  # (K,tn)
            if needs_mask:
                cols = row0 + lax.broadcasted_iota(jnp.int32, (1, tn), 1)
                s = jnp.where(cols < n_valid, s, _NEG_BIG)
            m_new = jnp.maximum(m_sc[...], jnp.max(s, axis=-1, keepdims=True))  # (K,1)
            alpha = jnp.exp(m_sc[...] - m_new)
            p = jnp.exp(s - m_new)                                              # (K,tn)
            l_sc[...] = alpha * l_sc[...] + jnp.sum(p, axis=-1, keepdims=True)
            acc_sc[...] = alpha * acc_sc[...] + jnp.dot(
                p, he, preferred_element_type=jnp.float32)                      # (K,L)
            m_sc[...] = m_new

        # ---- emit this split's partial (m, l, acc) on its last tile ----
        @pl.when(j == pl.num_programs(1) - 1)
        def _finalize():
            Kk, Ll = acc_sc.shape
            m_ref[...] = m_sc[...].reshape(1, Kk, 1)
            l_ref[...] = l_sc[...].reshape(1, Kk, 1)
            acc_ref[...] = acc_sc[...].reshape(1, Kk, Ll)

    return kernel


def abmil_forward(H, params, *, block_n=None):
    """H: (1, N, in_features) as the torch module expects; returns M of shape (K, L)."""
    H2 = jnp.squeeze(H, axis=0)                      # squeeze(0) -> (N, F)
    assert H2.ndim == 2, "Expected H to have 2 dimensions after squeeze"

    we, be, wv, bv, wu, bu, wa, ba = params          # we:(F,L) wv,wu:(L,D) wa:(K,D) ba:(1,K)
    N, F = H2.shape
    L = we.shape[1]
    D = wv.shape[1]
    K = wa.shape[0]

    # --- wrapper-side weight prep (tiny, done once): bf16 MXU operands, fused gate ---
    we_bf = we.astype(jnp.bfloat16)                                  # (F, L)
    wvu_bf = jnp.concatenate([wv, wu], axis=1).astype(jnp.bfloat16)  # (L, 2D)
    bvu = jnp.concatenate([bv, bu], axis=1).astype(jnp.float32)      # (1, 2D)
    be32 = be.astype(jnp.float32).reshape(1, L)
    if K == 1:
        wa_in = wa.astype(jnp.float32).reshape(1, D)                 # VPU path
        ba_in = ba.astype(jnp.float32).reshape(1, 1)
    else:
        wa_in = wa.astype(jnp.bfloat16)                              # (K, D)
        ba_in = ba.astype(jnp.float32).reshape(K, 1)

    cast_h = H2.dtype != jnp.bfloat16
    h_isz = H2.dtype.itemsize

    # --- generation-aware tile size (instance rows per grid step) ---
    usable = _usable_vmem_bytes()
    per_row = 2 * F * h_isz + 2 * F + 8 * L + 24 * D + 8 * K + 64    # tile + live values
    resident = 2 * (F * L * 2 + L * 2 * D * 2 + K * D * 2) + 4 * (L + 2 * D + 2 * K)
    fixed = resident + 16 * (K * L + 2 * K) + (2 << 20)              # scratch/outs + slack
    tn_auto = (usable - fixed) // per_row
    tn = tn_auto if block_n is None else block_n
    tn = int(max(16, min(tn, 2048)))
    tn = min(_round_up(tn, 16), _round_up(N, 16))                    # bf16 sublane packing

    nblocks = pl.cdiv(N, tn)
    num_splits = 2 if nblocks >= 2 else 1            # both TensorCores on v7x; ~free elsewhere
    tps = pl.cdiv(nblocks, num_splits)               # tiles per split
    needs_mask = (num_splits * tps * tn) != N

    if num_splits * tps == nblocks:
        h_index_map = lambda c, j: (c * tps + j, 0)
    else:                                            # clamp overhang tile of the split
        h_index_map = lambda c, j: (jnp.minimum(c * tps + j, nblocks - 1), 0)

    vmem_limit = int(usable)

    flops = 2 * N * (F * L + L * 2 * D + D * K + K * L)
    transcendentals = N * (2 * D + K)
    bytes_accessed = (N * F * h_isz + (F * L + L * 2 * D + K * D) * 2
                      + (L + 2 * D + 2 * K) * 4 + num_splits * (K * L + 2 * K) * 4)

    kernel = _make_kernel(N, tn, K, tps, needs_mask, cast_h)

    def _call(single_buffer_weights: bool):
        if single_buffer_weights:
            def resident_spec(shape):
                return pl.BlockSpec(shape, lambda c, j: (0, 0),
                                    pipeline_mode=pl.Buffered(1))
        else:
            def resident_spec(shape):
                return pl.BlockSpec(shape, lambda c, j: (0, 0))

        return pl.pallas_call(
            kernel,
            out_shape=(
                jax.ShapeDtypeStruct((num_splits, K, 1), jnp.float32),   # partial m
                jax.ShapeDtypeStruct((num_splits, K, 1), jnp.float32),   # partial l
                jax.ShapeDtypeStruct((num_splits, K, L), jnp.float32),   # partial acc
            ),
            grid=(num_splits, tps),
            in_specs=[
                pl.BlockSpec((tn, F), h_index_map),   # streamed H tiles (double-buffered)
                resident_spec((F, L)), resident_spec((1, L)),        # We, be
                resident_spec((L, 2 * D)), resident_spec((1, 2 * D)),  # [Wv|Wu], [bv|bu]
                resident_spec(wa_in.shape), resident_spec(ba_in.shape),  # Wa, ba
            ],
            out_specs=(
                pl.BlockSpec((1, K, 1), lambda c, j: (c, 0, 0)),
                pl.BlockSpec((1, K, 1), lambda c, j: (c, 0, 0)),
                pl.BlockSpec((1, K, L), lambda c, j: (c, 0, 0)),
            ),
            scratch_shapes=[
                pltpu.VMEM((K, 1), jnp.float32),      # running max
                pltpu.VMEM((K, 1), jnp.float32),      # running denom
                pltpu.VMEM((K, L), jnp.float32),      # running weighted sum
            ],
            compiler_params=pltpu.CompilerParams(
                dimension_semantics=("parallel", "arbitrary"),
                vmem_limit_bytes=vmem_limit),
            cost_estimate=pl.CostEstimate(
                flops=flops, transcendentals=transcendentals,
                bytes_accessed=bytes_accessed),
        )(H2, we_bf, be32, wvu_bf, bvu, wa_in, ba_in)

    try:
        m_part, l_part, acc_part = _call(True)
    except Exception:
        # Older jax without pl.Buffered(1) support on pallas_call BlockSpecs:
        # fall back to default double-buffered residents (slightly more VMEM).
        m_part, l_part, acc_part = _call(False)

    # --- tiny JAX epilogue: combine the per-split online-softmax states ---
    m_g = jnp.max(m_part, axis=0)                     # (K, 1)
    w = jnp.exp(m_part - m_g)                         # (S, K, 1)
    l_g = jnp.sum(w * l_part, axis=0)                 # (K, 1)
    acc_g = jnp.sum(w * acc_part, axis=0)             # (K, L)
    return acc_g / l_g                                # (K, L)


def init_params(key, in_features, L, D, K):
    """Deterministic synthetic weights.

    Layout: We/Wv/Wu stored as (in, out); Wa stored as (K, D); biases as (1, out).
    """
    ks = jax.random.split(key, 8)
    s = 0.1
    we = s * jax.random.normal(ks[0], (in_features, L), jnp.float32)
    be = s * jax.random.normal(ks[1], (1, L), jnp.float32)
    wv = s * jax.random.normal(ks[2], (L, D), jnp.float32)
    bv = s * jax.random.normal(ks[3], (1, D), jnp.float32)
    wu = s * jax.random.normal(ks[4], (L, D), jnp.float32)
    bu = s * jax.random.normal(ks[5], (1, D), jnp.float32)
    wa = s * jax.random.normal(ks[6], (K, D), jnp.float32)
    ba = s * jax.random.normal(ks[7], (1, K), jnp.float32)
    return (we, be, wv, bv, wu, bu, wa, ba)


def abmil_reference(H, params):
    """Pure-JAX f32 reference mirroring the torch forward (eval mode)."""
    we, be, wv, bv, wu, bu, wa, ba = params
    H2 = jnp.squeeze(H, axis=0)
    He = jax.nn.relu(H2 @ we + be)
    AV = jnp.tanh(He @ wv + bv)
    AU = jax.nn.sigmoid(He @ wu + bu)
    A = (AV * AU) @ wa.T + ba                  # (N, K)
    A = jax.nn.softmax(A.T, axis=1)            # (K, N) — softmax over instances
    return A @ He                              # (K, L)


if __name__ == "__main__":
    key = jax.random.PRNGKey(0)

    # --- Config A: typical ABMIL head (K = 1), auto tile size ---
    N, F, L, D, K = 512, 256, 128, 64, 1
    k1, k2, key = jax.random.split(key, 3)
    H = jax.random.normal(k1, (1, N, F), jnp.float32)
    params = init_params(k2, F, L, D, K)
    M = jax.block_until_ready(abmil_forward(H, params))
    M_ref = abmil_reference(H, params)
    assert M.shape == (K, L)
    assert jnp.allclose(M, M_ref, atol=3e-2, rtol=3e-2), \
        f"A: max abs err {float(jnp.max(jnp.abs(M - M_ref)))}"

    # --- Config B: force several tiles + the 2-way split / combine path ---
    M_b = jax.block_until_ready(abmil_forward(H, params, block_n=128))
    assert jnp.allclose(M_b, M_ref, atol=3e-2, rtol=3e-2), \
        f"B: max abs err {float(jnp.max(jnp.abs(M_b - M_ref)))}"

    # --- Config C: K > 1, ragged bag size (in-kernel masking of the last tile) ---
    N2, F2, L2, D2, K2 = 200, 128, 128, 64, 2
    k3, k4, key = jax.random.split(key, 3)
    Hc = jax.random.normal(k3, (1, N2, F2), jnp.float32)
    params2 = init_params(k4, F2, L2, D2, K2)
    M2 = jax.block_until_ready(abmil_forward(Hc, params2, block_n=64))
    M2_ref = abmil_reference(Hc, params2)
    assert M2.shape == (K2, L2)
    assert jnp.allclose(M2, M2_ref, atol=3e-2, rtol=3e-2), \
        f"C: max abs err {float(jnp.max(jnp.abs(M2 - M2_ref)))}"

    print("KERNEL_OK")
</pallas_src>

<mosaic_0001>
module attributes {stable_mosaic.version = 11 : i64} {
  func.func @kernel(%arg0: i32, %arg1: i32, %arg2: memref<512x256xf32, #tpu.memory_space<vmem>>, %arg3: memref<256x128xbf16, #tpu.memory_space<vmem>>, %arg4: memref<1x128xf32, #tpu.memory_space<vmem>>, %arg5: memref<128x128xbf16, #tpu.memory_space<vmem>>, %arg6: memref<1x128xf32, #tpu.memory_space<vmem>>, %arg7: memref<1x64xf32, #tpu.memory_space<vmem>>, %arg8: memref<1x1xf32, #tpu.memory_space<vmem>>, %arg9: memref<1x1x1xf32, #tpu.memory_space<vmem>>, %arg10: memref<1x1x1xf32, #tpu.memory_space<vmem>>, %arg11: memref<1x1x128xf32, #tpu.memory_space<vmem>>, %arg12: memref<1x1xf32, #tpu.memory_space<vmem>>, %arg13: memref<1x1xf32, #tpu.memory_space<vmem>>, %arg14: memref<1x128xf32, #tpu.memory_space<vmem>>) attributes {dimension_semantics = [#tpu.dimension_semantics<parallel>, #tpu.dimension_semantics<arbitrary>], iteration_bounds = array<i64: 1, 1>, scalar_prefetch = 0 : i64, scratch_operands = 3 : i64, tpu.core_type = #tpu.core_type<tc>, window_params = [{transform_indices = @transform_0, window_bounds = array<i64: 512, 256>}, {pipeline_mode = #tpu.pipeline_mode<synchronous>, transform_indices = @transform_1, window_bounds = array<i64: 256, 128>}, {pipeline_mode = #tpu.pipeline_mode<synchronous>, transform_indices = @transform_2, window_bounds = array<i64: 1, 128>}, {pipeline_mode = #tpu.pipeline_mode<synchronous>, transform_indices = @transform_3, window_bounds = array<i64: 128, 128>}, {pipeline_mode = #tpu.pipeline_mode<synchronous>, transform_indices = @transform_4, window_bounds = array<i64: 1, 128>}, {pipeline_mode = #tpu.pipeline_mode<synchronous>, transform_indices = @transform_5, window_bounds = array<i64: 1, 64>}, {pipeline_mode = #tpu.pipeline_mode<synchronous>, transform_indices = @transform_6, window_bounds = array<i64: 1, 1>}, {transform_indices = @transform_7, window_bounds = array<i64: 1, 1, 1>}, {transform_indices = @transform_8, window_bounds = array<i64: 1, 1, 1>}, {transform_indices = @transform_9, window_bounds = array<i64: 1, 1, 128>}]} {
    %c0_i32 = arith.constant 0 : i32
    %0 = arith.cmpi eq, %arg1, %c0_i32 : i32
    %1 = arith.extui %0 : i1 to i32
    %c0_i32_0 = arith.constant 0 : i32
    %2 = arith.cmpi ne, %1, %c0_i32_0 : i32
    scf.if %2 {
      %cst_37 = arith.constant -1.000000e+30 : f32
      %64 = vector.broadcast %cst_37 : f32 to vector<1x1xf32>
      %c0_38 = arith.constant 0 : index
      %c0_39 = arith.constant 0 : index
      %65 = vector.load %arg12[%c0_38, %c0_39] : memref<1x1xf32, #tpu.memory_space<vmem>>, vector<1x1xf32>
      tpu.vector_store %arg12[%c0_38, %c0_39], %64 {strides = array<i32>} : memref<1x1xf32, #tpu.memory_space<vmem>>, vector<1x1xf32>,
      %cst_40 = arith.constant 0.000000e+00 : f32
      %66 = vector.broadcast %cst_40 : f32 to vector<1x1xf32>
      %c0_41 = arith.constant 0 : index
      %c0_42 = arith.constant 0 : index
      %67 = vector.load %arg13[%c0_41, %c0_42] : memref<1x1xf32, #tpu.memory_space<vmem>>, vector<1x1xf32>
      tpu.vector_store %arg13[%c0_41, %c0_42], %66 {strides = array<i32>} : memref<1x1xf32, #tpu.memory_space<vmem>>, vector<1x1xf32>,
      %cst_43 = arith.constant 0.000000e+00 : f32
      %68 = vector.broadcast %cst_43 : f32 to vector<1x128xf32>
      %c0_44 = arith.constant 0 : index
      %c0_45 = arith.constant 0 : index
      %69 = vector.load %arg14[%c0_44, %c0_45] : memref<1x128xf32, #tpu.memory_space<vmem>>, vector<1x128xf32>
      tpu.vector_store %arg14[%c0_44, %c0_45], %68 {strides = array<i32>} : memref<1x128xf32, #tpu.memory_space<vmem>>, vector<1x128xf32>,
    } else {
    }
    %c0 = arith.constant 0 : index
    %c0_1 = arith.constant 0 : index
    %3 = vector.load %arg2[%c0, %c0_1] : memref<512x256xf32, #tpu.memory_space<vmem>>, vector<512x256xf32>
    %4 = arith.truncf %3 : vector<512x256xf32> to vector<512x256xbf16>
    %c0_2 = arith.constant 0 : index
    %c0_3 = arith.constant 0 : index
    %5 = vector.load %arg3[%c0_2, %c0_3] : memref<256x128xbf16, #tpu.memory_space<vmem>>, vector<256x128xbf16>
    %cst = arith.constant dense<0.000000e+00> : vector<512x128xf32>
    %6 = tpu.matmul %4, %5, %cst {dimension_numbers = #tpu.dot_dimension_numbers<[1], [0], [0], [1], [0, 0, 1, 1], [], []>} : vector<512x256xbf16>, vector<256x128xbf16>, vector<512x128xf32> -> vector<512x128xf32>
    %c0_4 = arith.constant 0 : index
    %c0_5 = arith.constant 0 : index
    %7 = vector.load %arg4[%c0_4, %c0_5] : memref<1x128xf32, #tpu.memory_space<vmem>>, vector<1x128xf32>
    %8 = vector.broadcast %7 : vector<1x128xf32> to vector<512x128xf32>
    %9 = arith.addf %6, %8 : vector<512x128xf32>
    %cst_6 = arith.constant 0.000000e+00 : f32
    %10 = vector.broadcast %cst_6 : f32 to vector<512x128xf32>
    %11 = arith.maximumf %9, %10 : vector<512x128xf32>
    %12 = arith.truncf %11 : vector<512x128xf32> to vector<512x128xbf16>
    %c0_7 = arith.constant 0 : index
    %c0_8 = arith.constant 0 : index
    %13 = vector.load %arg5[%c0_7, %c0_8] : memref<128x128xbf16, #tpu.memory_space<vmem>>, vector<128x128xbf16>
    %cst_9 = arith.constant dense<0.000000e+00> : vector<512x128xf32>
    %14 = tpu.matmul %12, %13, %cst_9 {dimension_numbers = #tpu.dot_dimension_numbers<[1], [0], [0], [1], [0, 0, 1, 1], [], []>} : vector<512x128xbf16>, vector<128x128xbf16>, vector<512x128xf32> -> vector<512x128xf32>
    %c0_10 = arith.constant 0 : index
    %c0_11 = arith.constant 0 : index
    %15 = vector.load %arg6[%c0_10, %c0_11] : memref<1x128xf32, #tpu.memory_space<vmem>>, vector<1x128xf32>
    %16 = vector.broadcast %15 : vector<1x128xf32> to vector<512x128xf32>
    %17 = arith.addf %14, %16 : vector<512x128xf32>
    %18 = vector.extract_strided_slice %17 {offsets = [0, 0], sizes = [512, 64], strides = [1, 1]} : vector<512x128xf32> to vector<512x64xf32>
    %19 = math.tanh %18 : vector<512x64xf32>
    %20 = vector.extract_strided_slice %17 {offsets = [0, 64], sizes = [512, 64], strides = [1, 1]} : vector<512x128xf32> to vector<512x64xf32>
    %21 = arith.negf %20 : vector<512x64xf32>
    %22 = math.exp %21 : vector<512x64xf32>
    %cst_12 = arith.constant 1.000000e+00 : f32
    %23 = vector.broadcast %cst_12 : f32 to vector<512x64xf32>
    %24 = arith.addf %23, %22 : vector<512x64xf32>
    %25 = arith.divf %23, %24 : vector<512x64xf32>
    %26 = arith.mulf %19, %25 : vector<512x64xf32>
    %c0_13 = arith.constant 0 : index
    %c0_14 = arith.constant 0 : index
    %27 = vector.load %arg7[%c0_13, %c0_14] : memref<1x64xf32, #tpu.memory_space<vmem>>, vector<1x64xf32>
    %28 = vector.broadcast %27 : vector<1x64xf32> to vector<512x64xf32>
    %29 = arith.mulf %26, %28 : vector<512x64xf32>
    %cst_15 = arith.constant dense<0.000000e+00> : vector<512xf32>
    %30 = vector.multi_reduction <add>, %29, %cst_15 [1] : vector<512x64xf32> to vector<512xf32>
    %31 = vector.shape_cast %30 : vector<512xf32> to vector<512x1xf32>
    %c0_16 = arith.constant 0 : index
    %c0_17 = arith.constant 0 : index
    %32 = vector.load %arg8[%c0_16, %c0_17] : memref<1x1xf32, #tpu.memory_space<vmem>>, vector<1x1xf32>
    %33 = vector.broadcast %32 : vector<1x1xf32> to vector<512x1xf32>
    %34 = arith.addf %31, %33 : vector<512x1xf32>
    %c0_18 = arith.constant 0 : index
    %c0_19 = arith.constant 0 : index
    %35 = vector.load %arg12[%c0_18, %c0_19] : memref<1x1xf32, #tpu.memory_space<vmem>>, vector<1x1xf32>
    %cst_20 = arith.constant dense<0xFF800000> : vector<1xf32>
    %36 = vector.multi_reduction <maximumf>, %34, %cst_20 [0] : vector<512x1xf32> to vector<1xf32>
    %37 = vector.shape_cast %36 : vector<1xf32> to vector<1x1xf32>
    %38 = arith.maximumf %35, %37 : vector<1x1xf32>
    %c0_21 = arith.constant 0 : index
    %c0_22 = arith.constant 0 : index
    %39 = vector.load %arg12[%c0_21, %c0_22] : memref<1x1xf32, #tpu.memory_space<vmem>>, vector<1x1xf32>
    %40 = arith.subf %39, %38 : vector<1x1xf32>
    %41 = math.exp %40 : vector<1x1xf32>
    %42 = vector.broadcast %38 : vector<1x1xf32> to vector<512x1xf32>
    %43 = arith.subf %34, %42 : vector<512x1xf32>
    %44 = math.exp %43 : vector<512x1xf32>
    %c0_23 = arith.constant 0 : index
    %c0_24 = arith.constant 0 : index
    %45 = vector.load %arg13[%c0_23, %c0_24] : memref<1x1xf32, #tpu.memory_space<vmem>>, vector<1x1xf32>
    %46 = arith.mulf %41, %45 : vector<1x1xf32>
    %cst_25 = arith.constant dense<0.000000e+00> : vector<1xf32>
    %47 = vector.multi_reduction <add>, %44, %cst_25 [0] : vector<512x1xf32> to vector<1xf32>
    %48 = vector.shape_cast %47 : vector<1xf32> to vector<1x1xf32>
    %49 = arith.addf %46, %48 : vector<1x1xf32>
    %c0_26 = arith.constant 0 : index
    %c0_27 = arith.constant 0 : index
    %50 = vector.load %arg13[%c0_26, %c0_27] : memref<1x1xf32, #tpu.memory_space<vmem>>, vector<1x1xf32>
    tpu.vector_store %arg13[%c0_26, %c0_27], %49 {strides = array<i32>} : memref<1x1xf32, #tpu.memory_space<vmem>>, vector<1x1xf32>,
    %c0_28 = arith.constant 0 : index
    %c0_29 = arith.constant 0 : index
    %51 = vector.load %arg14[%c0_28, %c0_29] : memref<1x128xf32, #tpu.memory_space<vmem>>, vector<1x128xf32>
    %52 = vector.broadcast %41 : vector<1x1xf32> to vector<1x128xf32>
    %53 = arith.mulf %52, %51 : vector<1x128xf32>
    %54 = vector.broadcast %44 : vector<512x1xf32> to vector<512x128xf32>
    %55 = arith.mulf %54, %11 : vector<512x128xf32>
    %cst_30 = arith.constant dense<0.000000e+00> : vector<128xf32>
    %56 = vector.multi_reduction <add>, %55, %cst_30 [0] : vector<512x128xf32> to vector<128xf32>
    %57 = vector.shape_cast %56 : vector<128xf32> to vector<1x128xf32>
    %58 = arith.addf %53, %57 : vector<1x128xf32>
    %c0_31 = arith.constant 0 : index
    %c0_32 = arith.constant 0 : index
    %59 = vector.load %arg14[%c0_31, %c0_32] : memref<1x128xf32, #tpu.memory_space<vmem>>, vector<1x128xf32>
    tpu.vector_store %arg14[%c0_31, %c0_32], %58 {strides = array<i32>} : memref<1x128xf32, #tpu.memory_space<vmem>>, vector<1x128xf32>,
    %c0_33 = arith.constant 0 : index
    %c0_34 = arith.constant 0 : index
    %60 = vector.load %arg12[%c0_33, %c0_34] : memref<1x1xf32, #tpu.memory_space<vmem>>, vector<1x1xf32>
    tpu.vector_store %arg12[%c0_33, %c0_34], %38 {strides = array<i32>} : memref<1x1xf32, #tpu.memory_space<vmem>>, vector<1x1xf32>,
    %c0_i32_35 = arith.constant 0 : i32
    %61 = arith.cmpi eq, %arg1, %c0_i32_35 : i32
    %62 = arith.extui %61 : i1 to i32
    %c0_i32_36 = arith.constant 0 : i32
    %63 = arith.cmpi ne, %62, %c0_i32_36 : i32
    scf.if %63 {
      %c0_37 = arith.constant 0 : index
      %c0_38 = arith.constant 0 : index
      %64 = vector.load %arg12[%c0_37, %c0_38] : memref<1x1xf32, #tpu.memory_space<vmem>>, vector<1x1xf32>
      %65 = vector.shape_cast %64 : vector<1x1xf32> to vector<1x1x1xf32>
      %c0_39 = arith.constant 0 : index
      %c0_40 = arith.constant 0 : index
      %c0_41 = arith.constant 0 : index
      %66 = vector.load %arg9[%c0_39, %c0_40, %c0_41] : memref<1x1x1xf32, #tpu.memory_space<vmem>>, vector<1x1x1xf32>
      tpu.vector_store %arg9[%c0_39, %c0_40, %c0_41], %65 {strides = array<i32>} : memref<1x1x1xf32, #tpu.memory_space<vmem>>, vector<1x1x1xf32>,
      %c0_42 = arith.constant 0 : index
      %c0_43 = arith.constant 0 : index
      %67 = vector.load %arg13[%c0_42, %c0_43] : memref<1x1xf32, #tpu.memory_space<vmem>>, vector<1x1xf32>
      %68 = vector.shape_cast %67 : vector<1x1xf32> to vector<1x1x1xf32>
      %c0_44 = arith.constant 0 : index
      %c0_45 = arith.constant 0 : index
      %c0_46 = arith.constant 0 : index
      %69 = vector.load %arg10[%c0_44, %c0_45, %c0_46] : memref<1x1x1xf32, #tpu.memory_space<vmem>>, vector<1x1x1xf32>
      tpu.vector_store %arg10[%c0_44, %c0_45, %c0_46], %68 {strides = array<i32>} : memref<1x1x1xf32, #tpu.memory_space<vmem>>, vector<1x1x1xf32>,
      %c0_47 = arith.constant 0 : index
      %c0_48 = arith.constant 0 : index
      %70 = vector.load %arg14[%c0_47, %c0_48] : memref<1x128xf32, #tpu.memory_space<vmem>>, vector<1x128xf32>
      %71 = vector.shape_cast %70 : vector<1x128xf32> to vector<1x1x128xf32>
      %c0_49 = arith.constant 0 : index
      %c0_50 = arith.constant 0 : index
      %c0_51 = arith.constant 0 : index
      %72 = vector.load %arg11[%c0_49, %c0_50, %c0_51] : memref<1x1x128xf32, #tpu.memory_space<vmem>>, vector<1x1x128xf32>
      tpu.vector_store %arg11[%c0_49, %c0_50, %c0_51], %71 {strides = array<i32>} : memref<1x1x128xf32, #tpu.memory_space<vmem>>, vector<1x1x128xf32>,
    } else {
    }
    return
  }
  func.func @transform_0(%arg0: i32, %arg1: i32) -> (i32, i32) {
    %c1_i32 = arith.constant 1 : i32
    %0 = arith.muli %arg0, %c1_i32 : i32
    %1 = arith.addi %0, %arg1 : i32
    %c0_i32 = arith.constant 0 : i32
    %c0_i32_0 = arith.constant 0 : i32
    return %1, %c0_i32 : i32, i32
  }
  func.func @transform_1(%arg0: i32, %arg1: i32) -> (i32, i32) {
    %c0_i32 = arith.constant 0 : i32
    %c0_i32_0 = arith.constant 0 : i32
    %c0_i32_1 = arith.constant 0 : i32
    return %c0_i32, %c0_i32_0 : i32, i32
  }
  func.func @transform_2(%arg0: i32, %arg1: i32) -> (i32, i32) {
    %c0_i32 = arith.constant 0 : i32
    %c0_i32_0 = arith.constant 0 : i32
    %c0_i32_1 = arith.constant 0 : i32
    return %c0_i32, %c0_i32_0 : i32, i32
  }
  func.func @transform_3(%arg0: i32, %arg1: i32) -> (i32, i32) {
    %c0_i32 = arith.constant 0 : i32
    %c0_i32_0 = arith.constant 0 : i32
    %c0_i32_1 = arith.constant 0 : i32
    return %c0_i32, %c0_i32_0 : i32, i32
  }
  func.func @transform_4(%arg0: i32, %arg1: i32) -> (i32, i32) {
    %c0_i32 = arith.constant 0 : i32
    %c0_i32_0 = arith.constant 0 : i32
    %c0_i32_1 = arith.constant 0 : i32
    return %c0_i32, %c0_i32_0 : i32, i32
  }
  func.func @transform_5(%arg0: i32, %arg1: i32) -> (i32, i32) {
    %c0_i32 = arith.constant 0 : i32
    %c0_i32_0 = arith.constant 0 : i32
    %c0_i32_1 = arith.constant 0 : i32
    return %c0_i32, %c0_i32_0 : i32, i32
  }
  func.func @transform_6(%arg0: i32, %arg1: i32) -> (i32, i32) {
    %c0_i32 = arith.constant 0 : i32
    %c0_i32_0 = arith.constant 0 : i32
    %c0_i32_1 = arith.constant 0 : i32
    return %c0_i32, %c0_i32_0 : i32, i32
  }
  func.func @transform_7(%arg0: i32, %arg1: i32) -> (i32, i32, i32) {
    %c0_i32 = arith.constant 0 : i32
    %c0_i32_0 = arith.constant 0 : i32
    %c0_i32_1 = arith.constant 0 : i32
    return %arg0, %c0_i32, %c0_i32_0 : i32, i32, i32
  }
  func.func @transform_8(%arg0: i32, %arg1: i32) -> (i32, i32, i32) {
    %c0_i32 = arith.constant 0 : i32
    %c0_i32_0 = arith.constant 0 : i32
    %c0_i32_1 = arith.constant 0 : i32
    return %arg0, %c0_i32, %c0_i32_0 : i32, i32, i32
  }
  func.func @transform_9(%arg0: i32, %arg1: i32) -> (i32, i32, i32) {
    %c0_i32 = arith.constant 0 : i32
    %c0_i32_0 = arith.constant 0 : i32
    %c0_i32_1 = arith.constant 0 : i32
    return %arg0, %c0_i32, %c0_i32_0 : i32, i32, i32
  }
}

module attributes {stable_mosaic.version = 11 : i64} {
  func.func @kernel(%arg0: i32, %arg1: i32, %arg2: memref<512x256xf32, #tpu.memory_space<vmem>>, %arg3: memref<256x128xbf16, #tpu.memory_space<vmem>>, %arg4: memref<1x128xf32, #tpu.memory_space<vmem>>, %arg5: memref<128x128xbf16, #tpu.memory_space<vmem>>, %arg6: memref<1x128xf32, #tpu.memory_space<vmem>>, %arg7: memref<1x64xf32, #tpu.memory_space<vmem>>, %arg8: memref<1x1xf32, #tpu.memory_space<vmem>>, %arg9: memref<1x1x1xf32, #tpu.memory_space<vmem>>, %arg10: memref<1x1x1xf32, #tpu.memory_space<vmem>>, %arg11: memref<1x1x128xf32, #tpu.memory_space<vmem>>, %arg12: memref<1x1xf32, #tpu.memory_space<vmem>>, %arg13: memref<1x1xf32, #tpu.memory_space<vmem>>, %arg14: memref<1x128xf32, #tpu.memory_space<vmem>>) attributes {dimension_semantics = [#tpu.dimension_semantics<parallel>, #tpu.dimension_semantics<arbitrary>], iteration_bounds = array<i64: 1, 1>, scalar_prefetch = 0 : i64, scratch_operands = 3 : i64, tpu.core_type = #tpu.core_type<tc>, window_params = [{transform_indices = @transform_0, window_bounds = array<i64: 512, 256>}, {pipeline_mode = #tpu.pipeline_mode<synchronous>, transform_indices = @transform_1, window_bounds = array<i64: 256, 128>}, {pipeline_mode = #tpu.pipeline_mode<synchronous>, transform_indices = @transform_2, window_bounds = array<i64: 1, 128>}, {pipeline_mode = #tpu.pipeline_mode<synchronous>, transform_indices = @transform_3, window_bounds = array<i64: 128, 128>}, {pipeline_mode = #tpu.pipeline_mode<synchronous>, transform_indices = @transform_4, window_bounds = array<i64: 1, 128>}, {pipeline_mode = #tpu.pipeline_mode<synchronous>, transform_indices = @transform_5, window_bounds = array<i64: 1, 64>}, {pipeline_mode = #tpu.pipeline_mode<synchronous>, transform_indices = @transform_6, window_bounds = array<i64: 1, 1>}, {transform_indices = @transform_7, window_bounds = array<i64: 1, 1, 1>}, {transform_indices = @transform_8, window_bounds = array<i64: 1, 1, 1>}, {transform_indices = @transform_9, window_bounds = array<i64: 1, 1, 128>}]} {
    %c0_i32 = arith.constant 0 : i32
    %0 = arith.cmpi eq, %arg1, %c0_i32 : i32
    %1 = arith.extui %0 : i1 to i32
    %c0_i32_0 = arith.constant 0 : i32
    %2 = arith.cmpi ne, %1, %c0_i32_0 : i32
    scf.if %2 {
      %cst_37 = arith.constant -1.000000e+30 : f32
      %64 = vector.broadcast %cst_37 : f32 to vector<1x1xf32>
      %c0_38 = arith.constant 0 : index
      %c0_39 = arith.constant 0 : index
      %65 = vector.load %arg12[%c0_38, %c0_39] : memref<1x1xf32, #tpu.memory_space<vmem>>, vector<1x1xf32>
      tpu.vector_store %arg12[%c0_38, %c0_39], %64 {strides = array<i32>} : memref<1x1xf32, #tpu.memory_space<vmem>>, vector<1x1xf32>,
      %cst_40 = arith.constant 0.000000e+00 : f32
      %66 = vector.broadcast %cst_40 : f32 to vector<1x1xf32>
      %c0_41 = arith.constant 0 : index
      %c0_42 = arith.constant 0 : index
      %67 = vector.load %arg13[%c0_41, %c0_42] : memref<1x1xf32, #tpu.memory_space<vmem>>, vector<1x1xf32>
      tpu.vector_store %arg13[%c0_41, %c0_42], %66 {strides = array<i32>} : memref<1x1xf32, #tpu.memory_space<vmem>>, vector<1x1xf32>,
      %cst_43 = arith.constant 0.000000e+00 : f32
      %68 = vector.broadcast %cst_43 : f32 to vector<1x128xf32>
      %c0_44 = arith.constant 0 : index
      %c0_45 = arith.constant 0 : index
      %69 = vector.load %arg14[%c0_44, %c0_45] : memref<1x128xf32, #tpu.memory_space<vmem>>, vector<1x128xf32>
      tpu.vector_store %arg14[%c0_44, %c0_45], %68 {strides = array<i32>} : memref<1x128xf32, #tpu.memory_space<vmem>>, vector<1x128xf32>,
    } else {
    }
    %c0 = arith.constant 0 : index
    %c0_1 = arith.constant 0 : index
    %3 = vector.load %arg2[%c0, %c0_1] : memref<512x256xf32, #tpu.memory_space<vmem>>, vector<512x256xf32>
    %4 = arith.truncf %3 : vector<512x256xf32> to vector<512x256xbf16>
    %c0_2 = arith.constant 0 : index
    %c0_3 = arith.constant 0 : index
    %5 = vector.load %arg3[%c0_2, %c0_3] : memref<256x128xbf16, #tpu.memory_space<vmem>>, vector<256x128xbf16>
    %cst = arith.constant dense<0.000000e+00> : vector<512x128xf32>
    %6 = tpu.matmul %4, %5, %cst {dimension_numbers = #tpu.dot_dimension_numbers<[1], [0], [0], [1], [0, 0, 1, 1], [], []>} : vector<512x256xbf16>, vector<256x128xbf16>, vector<512x128xf32> -> vector<512x128xf32>
    %c0_4 = arith.constant 0 : index
    %c0_5 = arith.constant 0 : index
    %7 = vector.load %arg4[%c0_4, %c0_5] : memref<1x128xf32, #tpu.memory_space<vmem>>, vector<1x128xf32>
    %8 = vector.broadcast %7 : vector<1x128xf32> to vector<512x128xf32>
    %9 = arith.addf %6, %8 : vector<512x128xf32>
    %cst_6 = arith.constant 0.000000e+00 : f32
    %10 = vector.broadcast %cst_6 : f32 to vector<512x128xf32>
    %11 = arith.maximumf %9, %10 : vector<512x128xf32>
    %12 = arith.truncf %11 : vector<512x128xf32> to vector<512x128xbf16>
    %c0_7 = arith.constant 0 : index
    %c0_8 = arith.constant 0 : index
    %13 = vector.load %arg5[%c0_7, %c0_8] : memref<128x128xbf16, #tpu.memory_space<vmem>>, vector<128x128xbf16>
    %cst_9 = arith.constant dense<0.000000e+00> : vector<512x128xf32>
    %14 = tpu.matmul %12, %13, %cst_9 {dimension_numbers = #tpu.dot_dimension_numbers<[1], [0], [0], [1], [0, 0, 1, 1], [], []>} : vector<512x128xbf16>, vector<128x128xbf16>, vector<512x128xf32> -> vector<512x128xf32>
    %c0_10 = arith.constant 0 : index
    %c0_11 = arith.constant 0 : index
    %15 = vector.load %arg6[%c0_10, %c0_11] : memref<1x128xf32, #tpu.memory_space<vmem>>, vector<1x128xf32>
    %16 = vector.broadcast %15 : vector<1x128xf32> to vector<512x128xf32>
    %17 = arith.addf %14, %16 : vector<512x128xf32>
    %18 = vector.extract_strided_slice %17 {offsets = [0, 0], sizes = [512, 64], strides = [1, 1]} : vector<512x128xf32> to vector<512x64xf32>
    %19 = math.tanh %18 : vector<512x64xf32>
    %20 = vector.extract_strided_slice %17 {offsets = [0, 64], sizes = [512, 64], strides = [1, 1]} : vector<512x128xf32> to vector<512x64xf32>
    %21 = arith.negf %20 : vector<512x64xf32>
    %22 = math.exp %21 : vector<512x64xf32>
    %cst_12 = arith.constant 1.000000e+00 : f32
    %23 = vector.broadcast %cst_12 : f32 to vector<512x64xf32>
    %24 = arith.addf %23, %22 : vector<512x64xf32>
    %25 = arith.divf %23, %24 : vector<512x64xf32>
    %26 = arith.mulf %19, %25 : vector<512x64xf32>
    %c0_13 = arith.constant 0 : index
    %c0_14 = arith.constant 0 : index
    %27 = vector.load %arg7[%c0_13, %c0_14] : memref<1x64xf32, #tpu.memory_space<vmem>>, vector<1x64xf32>
    %28 = vector.broadcast %27 : vector<1x64xf32> to vector<512x64xf32>
    %29 = arith.mulf %26, %28 : vector<512x64xf32>
    %cst_15 = arith.constant dense<0.000000e+00> : vector<512xf32>
    %30 = vector.multi_reduction <add>, %29, %cst_15 [1] : vector<512x64xf32> to vector<512xf32>
    %31 = vector.shape_cast %30 : vector<512xf32> to vector<512x1xf32>
    %c0_16 = arith.constant 0 : index
    %c0_17 = arith.constant 0 : index
    %32 = vector.load %arg8[%c0_16, %c0_17] : memref<1x1xf32, #tpu.memory_space<vmem>>, vector<1x1xf32>
    %33 = vector.broadcast %32 : vector<1x1xf32> to vector<512x1xf32>
    %34 = arith.addf %31, %33 : vector<512x1xf32>
    %c0_18 = arith.constant 0 : index
    %c0_19 = arith.constant 0 : index
    %35 = vector.load %arg12[%c0_18, %c0_19] : memref<1x1xf32, #tpu.memory_space<vmem>>, vector<1x1xf32>
    %cst_20 = arith.constant dense<0xFF800000> : vector<1xf32>
    %36 = vector.multi_reduction <maximumf>, %34, %cst_20 [0] : vector<512x1xf32> to vector<1xf32>
    %37 = vector.shape_cast %36 : vector<1xf32> to vector<1x1xf32>
    %38 = arith.maximumf %35, %37 : vector<1x1xf32>
    %c0_21 = arith.constant 0 : index
    %c0_22 = arith.constant 0 : index
    %39 = vector.load %arg12[%c0_21, %c0_22] : memref<1x1xf32, #tpu.memory_space<vmem>>, vector<1x1xf32>
    %40 = arith.subf %39, %38 : vector<1x1xf32>
    %41 = math.exp %40 : vector<1x1xf32>
    %42 = vector.broadcast %38 : vector<1x1xf32> to vector<512x1xf32>
    %43 = arith.subf %34, %42 : vector<512x1xf32>
    %44 = math.exp %43 : vector<512x1xf32>
    %c0_23 = arith.constant 0 : index
    %c0_24 = arith.constant 0 : index
    %45 = vector.load %arg13[%c0_23, %c0_24] : memref<1x1xf32, #tpu.memory_space<vmem>>, vector<1x1xf32>
    %46 = arith.mulf %41, %45 : vector<1x1xf32>
    %cst_25 = arith.constant dense<0.000000e+00> : vector<1xf32>
    %47 = vector.multi_reduction <add>, %44, %cst_25 [0] : vector<512x1xf32> to vector<1xf32>
    %48 = vector.shape_cast %47 : vector<1xf32> to vector<1x1xf32>
    %49 = arith.addf %46, %48 : vector<1x1xf32>
    %c0_26 = arith.constant 0 : index
    %c0_27 = arith.constant 0 : index
    %50 = vector.load %arg13[%c0_26, %c0_27] : memref<1x1xf32, #tpu.memory_space<vmem>>, vector<1x1xf32>
    tpu.vector_store %arg13[%c0_26, %c0_27], %49 {strides = array<i32>} : memref<1x1xf32, #tpu.memory_space<vmem>>, vector<1x1xf32>,
    %c0_28 = arith.constant 0 : index
    %c0_29 = arith.constant 0 : index
    %51 = vector.load %arg14[%c0_28, %c0_29] : memref<1x128xf32, #tpu.memory_space<vmem>>, vector<1x128xf32>
    %52 = vector.broadcast %41 : vector<1x1xf32> to vector<1x128xf32>
    %53 = arith.mulf %52, %51 : vector<1x128xf32>
    %54 = vector.broadcast %44 : vector<512x1xf32> to vector<512x128xf32>
    %55 = arith.mulf %54, %11 : vector<512x128xf32>
    %cst_30 = arith.constant dense<0.000000e+00> : vector<128xf32>
    %56 = vector.multi_reduction <add>, %55, %cst_30 [0] : vector<512x128xf32> to vector<128xf32>
    %57 = vector.shape_cast %56 : vector<128xf32> to vector<1x128xf32>
    %58 = arith.addf %53, %57 : vector<1x128xf32>
    %c0_31 = arith.constant 0 : index
    %c0_32 = arith.constant 0 : index
    %59 = vector.load %arg14[%c0_31, %c0_32] : memref<1x128xf32, #tpu.memory_space<vmem>>, vector<1x128xf32>
    tpu.vector_store %arg14[%c0_31, %c0_32], %58 {strides = array<i32>} : memref<1x128xf32, #tpu.memory_space<vmem>>, vector<1x128xf32>,
    %c0_33 = arith.constant 0 : index
    %c0_34 = arith.constant 0 : index
    %60 = vector.load %arg12[%c0_33, %c0_34] : memref<1x1xf32, #tpu.memory_space<vmem>>, vector<1x1xf32>
    tpu.vector_store %arg12[%c0_33, %c0_34], %38 {strides = array<i32>} : memref<1x1xf32, #tpu.memory_space<vmem>>, vector<1x1xf32>,
    %c0_i32_35 = arith.constant 0 : i32
    %61 = arith.cmpi eq, %arg1, %c0_i32_35 : i32
    %62 = arith.extui %61 : i1 to i32
    %c0_i32_36 = arith.constant 0 : i32
    %63 = arith.cmpi ne, %62, %c0_i32_36 : i32
    scf.if %63 {
      %c0_37 = arith.constant 0 : index
      %c0_38 = arith.constant 0 : index
      %64 = vector.load %arg12[%c0_37, %c0_38] : memref<1x1xf32, #tpu.memory_space<vmem>>, vector<1x1xf32>
      %65 = vector.shape_cast %64 : vector<1x1xf32> to vector<1x1x1xf32>
      %c0_39 = arith.constant 0 : index
      %c0_40 = arith.constant 0 : index
      %c0_41 = arith.constant 0 : index
      %66 = vector.load %arg9[%c0_39, %c0_40, %c0_41] : memref<1x1x1xf32, #tpu.memory_space<vmem>>, vector<1x1x1xf32>
      tpu.vector_store %arg9[%c0_39, %c0_40, %c0_41], %65 {strides = array<i32>} : memref<1x1x1xf32, #tpu.memory_space<vmem>>, vector<1x1x1xf32>,
      %c0_42 = arith.constant 0 : index
      %c0_43 = arith.constant 0 : index
      %67 = vector.load %arg13[%c0_42, %c0_43] : memref<1x1xf32, #tpu.memory_space<vmem>>, vector<1x1xf32>
      %68 = vector.shape_cast %67 : vector<1x1xf32> to vector<1x1x1xf32>
      %c0_44 = arith.constant 0 : index
      %c0_45 = arith.constant 0 : index
      %c0_46 = arith.constant 0 : index
      %69 = vector.load %arg10[%c0_44, %c0_45, %c0_46] : memref<1x1x1xf32, #tpu.memory_space<vmem>>, vector<1x1x1xf32>
      tpu.vector_store %arg10[%c0_44, %c0_45, %c0_46], %68 {strides = array<i32>} : memref<1x1x1xf32, #tpu.memory_space<vmem>>, vector<1x1x1xf32>,
      %c0_47 = arith.constant 0 : index
      %c0_48 = arith.constant 0 : index
      %70 = vector.load %arg14[%c0_47, %c0_48] : memref<1x128xf32, #tpu.memory_space<vmem>>, vector<1x128xf32>
      %71 = vector.shape_cast %70 : vector<1x128xf32> to vector<1x1x128xf32>
      %c0_49 = arith.constant 0 : index
      %c0_50 = arith.constant 0 : index
      %c0_51 = arith.constant 0 : index
      %72 = vector.load %arg11[%c0_49, %c0_50, %c0_51] : memref<1x1x128xf32, #tpu.memory_space<vmem>>, vector<1x1x128xf32>
      tpu.vector_store %arg11[%c0_49, %c0_50, %c0_51], %71 {strides = array<i32>} : memref<1x1x128xf32, #tpu.memory_space<vmem>>, vector<1x1x128xf32>,
    } else {
    }
    return
  }
  func.func @transform_0(%arg0: i32, %arg1: i32) -> (i32, i32) {
    %c1_i32 = arith.constant 1 : i32
    %0 = arith.muli %arg0, %c1_i32 : i32
    %1 = arith.addi %0, %arg1 : i32
    %c0_i32 = arith.constant 0 : i32
    %c0_i32_0 = arith.constant 0 : i32
    return %1, %c0_i32 : i32, i32
  }
  func.func @transform_1(%arg0: i32, %arg1: i32) -> (i32, i32) {
    %c0_i32 = arith.constant 0 : i32
    %c0_i32_0 = arith.constant 0 : i32
    %c0_i32_1 = arith.constant 0 : i32
    return %c0_i32, %c0_i32_0 : i32, i32
  }
  func.func @transform_2(%arg0: i32, %arg1: i32) -> (i32, i32) {
    %c0_i32 = arith.constant 0 : i32
    %c0_i32_0 = arith.constant 0 : i32
    %c0_i32_1 = arith.constant 0 : i32
    return %c0_i32, %c0_i32_0 : i32, i32
  }
  func.func @transform_3(%arg0: i32, %arg1: i32) -> (i32, i32) {
    %c0_i32 = arith.constant 0 : i32
    %c0_i32_0 = arith.constant 0 : i32
    %c0_i32_1 = arith.constant 0 : i32
    return %c0_i32, %c0_i32_0 : i32, i32
  }
  func.func @transform_4(%arg0: i32, %arg1: i32) -> (i32, i32) {
    %c0_i32 = arith.constant 0 : i32
    %c0_i32_0 = arith.constant 0 : i32
    %c0_i32_1 = arith.constant 0 : i32
    return %c0_i32, %c0_i32_0 : i32, i32
  }
  func.func @transform_5(%arg0: i32, %arg1: i32) -> (i32, i32) {
    %c0_i32 = arith.constant 0 : i32
    %c0_i32_0 = arith.constant 0 : i32
    %c0_i32_1 = arith.constant 0 : i32
    return %c0_i32, %c0_i32_0 : i32, i32
  }
  func.func @transform_6(%arg0: i32, %arg1: i32) -> (i32, i32) {
    %c0_i32 = arith.constant 0 : i32
    %c0_i32_0 = arith.constant 0 : i32
    %c0_i32_1 = arith.constant 0 : i32
    return %c0_i32, %c0_i32_0 : i32, i32
  }
  func.func @transform_7(%arg0: i32, %arg1: i32) -> (i32, i32, i32) {
    %c0_i32 = arith.constant 0 : i32
    %c0_i32_0 = arith.constant 0 : i32
    %c0_i32_1 = arith.constant 0 : i32
    return %arg0, %c0_i32, %c0_i32_0 : i32, i32, i32
  }
  func.func @transform_8(%arg0: i32, %arg1: i32) -> (i32, i32, i32) {
    %c0_i32 = arith.constant 0 : i32
    %c0_i32_0 = arith.constant 0 : i32
    %c0_i32_1 = arith.constant 0 : i32
    return %arg0, %c0_i32, %c0_i32_0 : i32, i32, i32
  }
  func.func @transform_9(%arg0: i32, %arg1: i32) -> (i32, i32, i32) {
    %c0_i32 = arith.constant 0 : i32
    %c0_i32_0 = arith.constant 0 : i32
    %c0_i32_1 = arith.constant 0 : i32
    return %arg0, %c0_i32, %c0_i32_0 : i32, i32, i32
  }
}

</mosaic_0001>

<bundles_post_ra>
// kernel: tpu_custom_call.1
= control target key start
LH: loop header
LB: loop body
LE: loop exit
PB: predicated region body
PF: predicated region fallthrough
CT: control target
= control target key end

     0   :  { %s6382_s0 = inlined_call_operand.hbm [shape: f32[512,256], index: 0, kind: input, shape index: {}]   ;;  %s6383_s1 = inlined_call_operand.hbm [shape: bf16[256,128], index: 1, kind: input, shape index: {}]   ;;  %s6384_s2 = inlined_call_operand.vmem [shape: f32[1,128], index: 2, kind: input, shape index: {}]   ;;  %s6385_s3 = inlined_call_operand.hbm [shape: bf16[128,128], index: 3, kind: input, shape index: {}]   ;;  %s6386_s4 = inlined_call_operand.vmem [shape: f32[1,128], index: 4, kind: input, shape index: {}]   ;;  %s6387_s5 = inlined_call_operand.vmem [shape: f32[1,64], index: 5, kind: input, shape index: {}]   ;;  %s6388_s6 = inlined_call_operand.<no memory space> [shape: f32[1,1], index: 6, kind: input, shape index: {}]   ;;  %s6389_s7 = inlined_call_operand.hbm [shape: f32[1,1,1], index: 7, kind: output, shape index: {0}]   ;;  %s6390_s8 = inlined_call_operand.hbm [shape: f32[1,1,1], index: 8, kind: output, shape index: {1}]   ;;  %s6391_s9 = inlined_call_operand.hbm [shape: f32[1,1,128], index: 9, kind: output, shape index: {2}]  }
   0x1   :  { %v15_v0 = vstv %s6388_s6 }
   0x2   :  { %16 = vst [vmem:[#allocation5] sm:$0x1] %v15_v0 }
   0x3   :  { %17 = vsyncpa [#allocation7], 0 }
   0x4   :  { %18 = vsyncpa [#allocation10], 0 }
   0x5   :  { %19 = vsyncpa [#allocation8], 0 }
   0x6   :  { %20 = vsyncpa [#allocation14], 0  ;;  %s4198_s11 = smov [#allocation9]   ;;  %s4058_s15 = scalar_lea.hbm %s6383_s1, 2048 }
   0x7   :  { %s43_s12 = sshll.u32 %s4198_s11, 4  ;;  %p4059_p0 = scmp.ne.s32.totalorder %s6383_s1, %s4058_s15  ;;  %s44_s12 = int_to_ptr.vmem [resolvable:$true] %s43_s12 }
   0x8   :  { %p4062_p1 = scmp.lt.u32.totalorder %s4058_s15, %s6383_s1 }
   0xa   :  { %p4064_p2 = pnand %p4062_p1, %p4059_p0 }
   0xc   :  { %4067 = shalt.err (!%p4064_p2)
}
   0xd   :  { %s4068_s6 = scalar_lea.vmem %s44_s12, 2048  ;;  %p4073_p4 = scmp.lt.s32.totalorder %s44_s12, %s44_s12 }
   0xe   :  { %p4069_p3 = scmp.ne.s32.totalorder %s44_s12, %s4068_s6  ;;  %p4074_p5 = scmp.lt.s32.totalorder %s4068_s6, %s4068_s6 }
  0x10   :  { %p4075_p6 = por %p4074_p5, %p4073_p4 }
  0x12   :  { %p4076_p7 = pnand %p4075_p6, %p4069_p3 }
  0x14   :  { %4079 = shalt.err (!%p4076_p7)
}
  0x15   :  { %s4199_s20 = smov 64   ;;  %s4200_s21 = smov 4  }
  0x16   :  { %49 = dma.hbm_to_vmem [thread:$0]  %s6383_s1, 2048, %s44_s12, [#allocation10], %s4199_s20, %s4199_s20, %s4200_s21  }
  0x17   :  { %s4201_s24 = smov [#allocation6]   ;;  %s4080_s28 = scalar_lea.hbm %s6382_s0, 16384 }
  0x18   :  { %s31_s25 = sshll.u32 %s4201_s24, 4  ;;  %p4081_p8 = scmp.ne.s32.totalorder %s6382_s0, %s4080_s28  ;;  %s32_s25 = int_to_ptr.vmem [resolvable:$true] %s31_s25 }
  0x19   :  { %p4084_p9 = scmp.lt.u32.totalorder %s4080_s28, %s6382_s0 }
  0x1b   :  { %p4086_p10 = pnand %p4084_p9, %p4081_p8 }
  0x1d   :  { %4089 = shalt.err (!%p4086_p10)
}
  0x1e   :  { %s4090_s13 = scalar_lea.vmem %s32_s25, 16384  ;;  %p4095_p12 = scmp.lt.s32.totalorder %s32_s25, %s32_s25 }
  0x1f   :  { %p4091_p11 = scmp.ne.s32.totalorder %s32_s25, %s4090_s13  ;;  %p4096_p13 = scmp.lt.s32.totalorder %s4090_s13, %s4090_s13 }
  0x21   :  { %p4097_p0 = por %p4096_p13, %p4095_p12 }
  0x23   :  { %p4098_p1 = pnand %p4097_p0, %p4091_p11 }
  0x25   :  { %4101 = shalt.err (!%p4098_p1)
}
  0x26   :  { %s4202_s1 = smov 256   ;;  %s4203_s12 = smov 16  }
  0x27   :  { %37 = dma.hbm_to_vmem [thread:$0]  %s6382_s0, 16384, %s32_s25, [#allocation7], %s4202_s1, %s4202_s1, %s4203_s12  }
  0x28   :  { %s4204_s16 = smov [#allocation11]   ;;  %s4102_s6 = scalar_lea.hbm %s6385_s3, 1024 }
  0x29   :  { %s57_s17 = sshll.u32 %s4204_s16, 4  ;;  %p4103_p2 = scmp.ne.s32.totalorder %s6385_s3, %s4102_s6  ;;  %s58_s17 = int_to_ptr.vmem [resolvable:$true] %s57_s17 }
  0x2a   :  { %p4106_p3 = scmp.lt.u32.totalorder %s4102_s6, %s6385_s3 }
  0x2c   :  { %p4108_p4 = pnand %p4106_p3, %p4103_p2 }
  0x2e   :  { %4111 = shalt.err (!%p4108_p4)
}
  0x2f   :  { %s4112_s27 = scalar_lea.vmem %s58_s17, 1024  ;;  %p4117_p6 = scmp.lt.s32.totalorder %s58_s17, %s58_s17 }
  0x30   :  { %p4113_p5 = scmp.ne.s32.totalorder %s58_s17, %s4112_s27  ;;  %p4118_p7 = scmp.lt.s32.totalorder %s4112_s27, %s4112_s27 }
  0x32   :  { %p4119_p8 = por %p4118_p7, %p4117_p6 }
  0x34   :  { %p4120_p9 = pnand %p4119_p8, %p4113_p5 }
  0x36   :  { %4123 = shalt.err (!%p4120_p9)
}
  0x37   :  { %63 = dma.hbm_to_vmem [thread:$0]  %s6385_s3, 1024, %s58_s17, [#allocation10], %s4199_s20, %s4199_s20, %s4200_s21  }
  0x38   :  { %4190 = dma.done.wait [#allocation7], 16384  }
  0x39   :  { %4191 = vsyncadd [#allocation7], 4294950912 }
  0x3a   :  { %4192 = dma.done.wait [#allocation10], 3072  }
  0x3b   :  { %4193 = vsyncadd [#allocation10], 4294964224  ;;  %v4205_v1 = vmov 0   ;;  %v3518_v2 = vld [vmem:[#allocation9] sm:$0xff]   ;;  %v3519_v3 = vld [vmem:[#allocation9 + $0x8] sm:$0xff]   ;;  %vm2001_vm0 = vcmask 523264  }
  0x3c   :  { %417 = vmatprep.subr.bf16.mxu0 %v4205_v1  ;;  %3471 = vmatprep.subr.bf16.mxu1 %v4205_v1  ;;  %v3520_v4 = vld [vmem:[#allocation9 + $0x10] sm:$0xff]   ;;  %v3521_v5 = vld [vmem:[#allocation9 + $0x18] sm:$0xff]   ;;  %v3522_v6 = vld [vmem:[#allocation9 + $0x20] sm:$0xff]   ;;  %vm86_vm1 = vcmask 0   ;;  %vm2266_vm2 = vcmask 7168   ;;  %s4209_s1 = smov [#allocation12]  }
  0x3d   :  { %3516 = vset.pattern.permute.xlu1 %v4205_v1  ;;  %3517 = vset.pattern.permute.xlu0 %v4205_v1  ;;  %v91_v7 = vld [vmem:[#allocation6 + $0x8] sm:$0xff]  ;;  %v93_v8 = vld [vmem:[#allocation6 + $0x18] sm:$0xff]  ;;  %v3524_v11 = vld [vmem:[#allocation9 + $0x30] sm:$0xff]   ;;  %s3222_s12 = sshll.u32 %s4209_s1, 4  ;;  %s6222_s12 = int_to_ptr.vmem [resolvable:$true] %s3222_s12 }
  0x3e   :  { %418 = vmatpush1.bf16.msra.mxu0 %v3518_v2  ;;  %3487 = vmatpush1.bf16.msra.mxu1 %v3518_v2  ;;  %v219_v9 = vpack.c.bf16 %v93_v8, %v91_v7  ;;  %v3523_v10 = vld [vmem:[#allocation9 + $0x28] sm:$0xff]   ;;  %v3525_v12 = vld [vmem:[#allocation9 + $0x38] sm:$0xff]   ;;  %v3526_v13 = vld [vmem:[#allocation9 + $0x40] sm:$0xff]  }
  0x3f   :  { %419 = vmatprep.subr.bf16.mxu0 %v4205_v1  ;;  %3472 = vmatprep.subr.bf16.mxu1 %v4205_v1  ;;  %v3527_v14 = vld [vmem:[#allocation9 + $0x48] sm:$0xff]   ;;  %v3528_v15 = vld [vmem:[#allocation9 + $0x50] sm:$0xff]   ;;  %v3529_v16 = vld [vmem:[#allocation9 + $0x58] sm:$0xff]  }
  0x40   :  { %449 = vmatprep.mubr.bf16.mxu0 %v219_v9  ;;  %v3530_v17 = vld [vmem:[#allocation9 + $0x60] sm:$0xff]   ;;  %v3531_v18 = vld [vmem:[#allocation9 + $0x68] sm:$0xff]   ;;  %v3532_v19 = vld [vmem:[#allocation9 + $0x70] sm:$0xff]  }
  0x41   :  { %v3533_v20 = vld [vmem:[#allocation9 + $0x78] sm:$0xff]   ;;  %v90_v21 = vld [vmem:[#allocation6] sm:$0xff]  ;;  %v92_v22 = vld [vmem:[#allocation6 + $0x10] sm:$0xff] }
  0x42   :  { %420 = vmatpush1.bf16.msra.mxu0 %v3519_v3  ;;  %3488 = vmatpush1.bf16.msra.mxu1 %v3519_v3  ;;  %v95_v23 = vld [vmem:[#allocation6 + $0x28] sm:$0xff]  ;;  %v97_v24 = vld [vmem:[#allocation6 + $0x38] sm:$0xff]  ;;  %v218_v25 = vpack.c.bf16 %v92_v22, %v90_v21  ;;  %v94_v27 = vld [vmem:[#allocation6 + $0x20] sm:$0xff] }
  0x43   :  { %421 = vmatprep.subr.bf16.mxu0 %v4205_v1  ;;  %3473 = vmatprep.subr.bf16.mxu1 %v4205_v1  ;;  %v221_v26 = vpack.c.bf16 %v97_v24, %v95_v23  ;;  %v96_v28 = vld [vmem:[#allocation6 + $0x30] sm:$0xff]  ;;  %v99_v29 = vld [vmem:[#allocation6 + $0x48] sm:$0xff]  ;;  %v101_v30 = vld [vmem:[#allocation6 + $0x58] sm:$0xff] }
  0x44   :  { %v220_v31 = vpack.c.bf16 %v96_v28, %v94_v27  ;;  %v223_v32 = vpack.c.bf16 %v101_v30, %v99_v29  ;;  %v98_v33 = vld [vmem:[#allocation6 + $0x40] sm:$0xff]  ;;  %v100_v34 = vld [vmem:[#allocation6 + $0x50] sm:$0xff]  ;;  %v103_v35 = vld [vmem:[#allocation6 + $0x68] sm:$0xff] }
  0x45   :  { %v105_v36 = vld [vmem:[#allocation6 + $0x78] sm:$0xff]  ;;  %v222_v37 = vpack.c.bf16 %v100_v34, %v98_v33  ;;  %v102_v39 = vld [vmem:[#allocation6 + $0x60] sm:$0xff]  ;;  %v104_v40 = vld [vmem:[#allocation6 + $0x70] sm:$0xff] }
  0x46   :  { %422 = vmatpush1.bf16.msra.mxu0 %v3520_v4  ;;  %3489 = vmatpush1.bf16.msra.mxu1 %v3520_v4  ;;  %v225_v38 = vpack.c.bf16 %v105_v36, %v103_v35  ;;  %v107_v41 = vld [vmem:[#allocation6 + $0x88] sm:$0xff]  ;;  %v109_v42 = vld [vmem:[#allocation6 + $0x98] sm:$0xff]  ;;  %v224_v43 = vpack.c.bf16 %v104_v40, %v102_v39  ;;  %v106_v45 = vld [vmem:[#allocation6 + $0x80] sm:$0xff] }
  0x47   :  { %423 = vmatprep.subr.bf16.mxu0 %v4205_v1  ;;  %3474 = vmatprep.subr.bf16.mxu1 %v4205_v1  ;;  %v227_v44 = vpack.c.bf16 %v109_v42, %v107_v41  ;;  %v108_v46 = vld [vmem:[#allocation6 + $0x90] sm:$0xff]  ;;  %v111_v47 = vld [vmem:[#allocation6 + $0xa8] sm:$0xff]  ;;  %v113_v48 = vld [vmem:[#allocation6 + $0xb8] sm:$0xff] }
  0x48   :  { %v226_v49 = vpack.c.bf16 %v108_v46, %v106_v45  ;;  %v229_v50 = vpack.c.bf16 %v113_v48, %v111_v47  ;;  %v187_v51 = vld [vmem:[#allocation6 + $0x308] sm:$0xff]  ;;  %v189_v52 = vld [vmem:[#allocation6 + $0x318] sm:$0xff]  ;;  %v186_v54 = vld [vmem:[#allocation6 + $0x300] sm:$0xff] }
  0x49   :  { %v267_v53 = vpack.c.bf16 %v189_v52, %v187_v51  ;;  %v188_v55 = vld [vmem:[#allocation6 + $0x310] sm:$0xff]  ;;  %v110_v56 = vld [vmem:[#allocation6 + $0xa0] sm:$0xff]  ;;  %v115_v59 = vld [vmem:[#allocation6 + $0xc8] sm:$0xff] }
  0x4a   :  { %424 = vmatpush1.bf16.msra.mxu0 %v3521_v5  ;;  %3490 = vmatpush1.bf16.msra.mxu1 %v3521_v5  ;;  %v112_v57 = vld [vmem:[#allocation6 + $0xb0] sm:$0xff]  ;;  %v266_v58 = vpack.c.bf16 %v188_v55, %v186_v54  ;;  %v117_v60 = vld [vmem:[#allocation6 + $0xd8] sm:$0xff]  ;;  %v191_v63 = vld [vmem:[#allocation6 + $0x328] sm:$0xff] }
  0x4b   :  { %425 = vmatprep.subr.bf16.mxu0 %v4205_v1  ;;  %3475 = vmatprep.subr.bf16.mxu1 %v4205_v1  ;;  %v228_v61 = vpack.c.bf16 %v112_v57, %v110_v56  ;;  %v231_v62 = vpack.c.bf16 %v117_v60, %v115_v59  ;;  %v193_v0 = vld [vmem:[#allocation6 + $0x338] sm:$0xff]  ;;  %v190_v2 = vld [vmem:[#allocation6 + $0x320] sm:$0xff]  ;;  %v192_v3 = vld [vmem:[#allocation6 + $0x330] sm:$0xff] }
  0x4c   :  { %641 = vmatprep.mubr.bf16.mxu1 %v267_v53  ;;  %v114_v4 = vld [vmem:[#allocation6 + $0xc0] sm:$0xff]  ;;  %v116_v5 = vld [vmem:[#allocation6 + $0xd0] sm:$0xff]  ;;  %v119_v7 = vld [vmem:[#allocation6 + $0xe8] sm:$0xff] }
  0x4d   :  { %v121_v8 = vld [vmem:[#allocation6 + $0xf8] sm:$0xff]  ;;  %v230_v9 = vpack.c.bf16 %v116_v5, %v114_v4  ;;  %v122_v23 = vld [vmem:[#allocation6 + $0x100] sm:$0xff]  ;;  %v199_v24 = vld [vmem:[#allocation6 + $0x368] sm:$0xff] }
  0x4e   :  { %426 = vmatpush1.bf16.msra.mxu0 %v3522_v6  ;;  %3491 = vmatpush1.bf16.msra.mxu1 %v3522_v6  ;;  %v268_v6 = vpack.c.bf16 %v192_v3, %v190_v2  ;;  %v198_v27 = vld [vmem:[#allocation6 + $0x360] sm:$0xff]  ;;  %v200_v28 = vld [vmem:[#allocation6 + $0x370] sm:$0xff]  ;;  %v205_v33 = vld [vmem:[#allocation6 + $0x398] sm:$0xff] }
  0x4f   :  { %427 = vmatprep.subr.bf16.mxu0 %v4205_v1  ;;  %3476 = vmatprep.subr.bf16.mxu1 %v4205_v1  ;;  %v3534_v29 = vld [vmem:[#allocation11] sm:$0xff]   ;;  %v124_v30 = vld [vmem:[#allocation6 + $0x110] sm:$0xff]  ;;  %v127_v34 = vld [vmem:[#allocation6 + $0x128] sm:$0xff] }
  0x50   :  { %v129_v35 = vld [vmem:[#allocation6 + $0x138] sm:$0xff]  ;;  %v202_v39 = vld [vmem:[#allocation6 + $0x380] sm:$0xff]  ;;  %v204_v40 = vld [vmem:[#allocation6 + $0x390] sm:$0xff] }
  0x51   :  { %v237_v41 = vpack.c.bf16 %v129_v35, %v127_v34  ;;  %v207_v42 = vld [vmem:[#allocation6 + $0x3a8] sm:$0xff]  ;;  %v274_v45 = vpack.c.bf16 %v204_v40, %v202_v39  ;;  %v126_v47 = vld [vmem:[#allocation6 + $0x120] sm:$0xff]  ;;  %v128_v48 = vld [vmem:[#allocation6 + $0x130] sm:$0xff] }
  0x52   :  { %428 = vmatpush1.bf16.msra.mxu0 %v3523_v10  ;;  %3492 = vmatpush1.bf16.msra.mxu1 %v3523_v10  ;;  %v233_v10 = vpack.c.bf16 %v121_v8, %v119_v7  ;;  %v133_v51 = vld [vmem:[#allocation6 + $0x158] sm:$0xff]  ;;  %v236_v52 = vpack.c.bf16 %v128_v48, %v126_v47  ;;  %v206_v53 = vld [vmem:[#allocation6 + $0x3a0] sm:$0xff]  ;;  %v208_v54 = vld [vmem:[#allocation6 + $0x3b0] sm:$0xff] }
  0x53   :  { %429 = vmatprep.subr.bf16.mxu0 %v4205_v1  ;;  %3477 = vmatprep.subr.bf16.mxu1 %v4205_v1  ;;  %v211_v56 = vld [vmem:[#allocation6 + $0x3c8] sm:$0xff]  ;;  %v213_v57 = vld [vmem:[#allocation6 + $0x3d8] sm:$0xff]  ;;  %v130_v60 = vld [vmem:[#allocation6 + $0x140] sm:$0xff] }
  0x54   :  { %v279_v59 = vpack.c.bf16 %v213_v57, %v211_v56  ;;  %v210_v2 = vld [vmem:[#allocation6 + $0x3c0] sm:$0xff]  ;;  %v212_v3 = vld [vmem:[#allocation6 + $0x3d0] sm:$0xff]  ;;  %v139_v7 = vld [vmem:[#allocation6 + $0x188] sm:$0xff] }
  0x55   :  { %v134_v4 = vld [vmem:[#allocation6 + $0x160] sm:$0xff]  ;;  %v136_v5 = vld [vmem:[#allocation6 + $0x170] sm:$0xff]  ;;  %v141_v8 = vld [vmem:[#allocation6 + $0x198] sm:$0xff] }
  0x56   :  { %430 = vmatpush1.bf16.msra.mxu0 %v3524_v11  ;;  %3493 = vmatpush1.bf16.msra.mxu1 %v3524_v11  ;;  %v195_v11 = vld [vmem:[#allocation6 + $0x348] sm:$0xff]  ;;  %v148_v34 = vld [vmem:[#allocation6 + $0x1d0] sm:$0xff]  ;;  %v150_v39 = vld [vmem:[#allocation6 + $0x1e0] sm:$0xff] }
  0x57   :  { %431 = vmatprep.subr.bf16.mxu0 %v4205_v1  ;;  %3478 = vmatprep.subr.bf16.mxu1 %v4205_v1  ;;  %v151_v35 = vld [vmem:[#allocation6 + $0x1e8] sm:$0xff]  ;;  %v152_v40 = vld [vmem:[#allocation6 + $0x1f0] sm:$0xff]  ;;  %v161_v48 = vld [vmem:[#allocation6 + $0x238] sm:$0xff] }
  0x58   :  { %v159_v47 = vld [vmem:[#allocation6 + $0x228] sm:$0xff]  ;;  %v162_v57 = vld [vmem:[#allocation6 + $0x240] sm:$0xff] }
  0x5a   :  { %432 = vmatpush1.bf16.msra.mxu0 %v3525_v12  ;;  %3494 = vmatpush1.bf16.msra.mxu1 %v3525_v12  ;;  %v197_v12 = vld [vmem:[#allocation6 + $0x358] sm:$0xff] }
  0x5b   :  { %433 = vmatprep.subr.bf16.mxu0 %v4205_v1  ;;  %3479 = vmatprep.subr.bf16.mxu1 %v4205_v1 }
  0x5e   :  { %434 = vmatpush1.bf16.msra.mxu0 %v3526_v13  ;;  %3495 = vmatpush1.bf16.msra.mxu1 %v3526_v13  ;;  %v271_v13 = vpack.c.bf16 %v197_v12, %v195_v11  ;;  %v243_v11 = vpack.c.bf16 %v141_v8, %v139_v7  ;;  %v3539_v12 = vld [vmem:[#allocation11 + $0x28] sm:$0xff]   ;;  %v177_v8 = vld [vmem:[#allocation6 + $0x2b8] sm:$0xff] }
  0x5f   :  { %435 = vmatprep.subr.bf16.mxu0 %v4205_v1  ;;  %3480 = vmatprep.subr.bf16.mxu1 %v4205_v1  ;;  %v175_v7 = vld [vmem:[#allocation6 + $0x2a8] sm:$0xff] }
  0x62   :  { %436 = vmatpush1.bf16.msra.mxu0 %v3527_v14  ;;  %3496 = vmatpush1.bf16.msra.mxu1 %v3527_v14  ;;  %v194_v14 = vld [vmem:[#allocation6 + $0x340] sm:$0xff] }
  0x63   :  { %437 = vmatprep.subr.bf16.mxu0 %v4205_v1  ;;  %3481 = vmatprep.subr.bf16.mxu1 %v4205_v1 }
  0x66   :  { %438 = vmatpush1.bf16.msra.mxu0 %v3528_v15  ;;  %3497 = vmatpush1.bf16.msra.mxu1 %v3528_v15  ;;  %v196_v15 = vld [vmem:[#allocation6 + $0x350] sm:$0xff] }
  0x67   :  { %439 = vmatprep.subr.bf16.mxu0 %v4205_v1  ;;  %3482 = vmatprep.subr.bf16.mxu1 %v4205_v1 }
  0x6a   :  { %440 = vmatpush1.bf16.msra.mxu0 %v3529_v16  ;;  %3498 = vmatpush1.bf16.msra.mxu1 %v3529_v16  ;;  %v118_v16 = vld [vmem:[#allocation6 + $0xe0] sm:$0xff] }
  0x6b   :  { %441 = vmatprep.subr.bf16.mxu0 %v4205_v1  ;;  %3483 = vmatprep.subr.bf16.mxu1 %v4205_v1 }
  0x6e   :  { %442 = vmatpush1.bf16.msra.mxu0 %v3530_v17  ;;  %3499 = vmatpush1.bf16.msra.mxu1 %v3530_v17  ;;  %v120_v17 = vld [vmem:[#allocation6 + $0xf0] sm:$0xff] }
  0x6f   :  { %443 = vmatprep.subr.bf16.mxu0 %v4205_v1  ;;  %3484 = vmatprep.subr.bf16.mxu1 %v4205_v1  ;;  %v232_v21 = vpack.c.bf16 %v120_v17, %v118_v16  ;;  %v214_v16 = vld [vmem:[#allocation6 + $0x3e0] sm:$0xff]  ;;  %v216_v17 = vld [vmem:[#allocation6 + $0x3f0] sm:$0xff] }
  0x72   :  { %444 = vmatpush1.bf16.msra.mxu0 %v3531_v18  ;;  %3500 = vmatpush1.bf16.msra.mxu1 %v3531_v18  ;;  %v270_v18 = vpack.c.bf16 %v196_v15, %v194_v14  ;;  %v217_v14 = vld [vmem:[#allocation6 + $0x3f8] sm:$0xff] }
  0x73   :  { %445 = vmatprep.subr.bf16.mxu0 %v4205_v1  ;;  %3485 = vmatprep.subr.bf16.mxu1 %v4205_v1 }
  0x76   :  { %446 = vmatpush1.bf16.msra.mxu0 %v3532_v19  ;;  %3501 = vmatpush1.bf16.msra.mxu1 %v3532_v19  ;;  %v123_v19 = vld [vmem:[#allocation6 + $0x108] sm:$0xff] }
  0x77   :  { %447 = vmatprep.subr.bf16.mxu0 %v4205_v1  ;;  %3486 = vmatprep.subr.bf16.mxu1 %v4205_v1  ;;  %v269_v1 = vpack.c.bf16 %v193_v0, %v191_v63  ;;  %v137_v63 = vld [vmem:[#allocation6 + $0x178] sm:$0xff] }
  0x7a   :  { %448 = vmatpush1.bf16.msra.mxu0 %v3533_v20  ;;  %3502 = vmatpush1.bf16.msra.mxu1 %v3533_v20  ;;  %v125_v20 = vld [vmem:[#allocation6 + $0x118] sm:$0xff] }
  0x7b   :  { %v235_v22 = vpack.c.bf16 %v125_v20, %v123_v19  ;;  %3391 = vmatprep.subr.bf16.mxu1 %v3534_v29  ;;  %v140_v19 = vld [vmem:[#allocation6 + $0x190] sm:$0xff]  ;;  %v280_v20 = vpack.c.bf16 %v216_v17, %v214_v16  ;;  %v178_v17 = vld [vmem:[#allocation6 + $0x2c0] sm:$0xff] }
  0x7d   :  { %450 = vmatmul.mubr.bf16.vlgmr.msra.gmra.mrb[0].mxu0 %v218_v25  ;;  %642 = vmatmul.mubr.bf16.vlgmr.msra.gmra.mrb[0].mxu1 %v266_v58  ;;  %v201_v25 = vld [vmem:[#allocation6 + $0x378] sm:$0xff]  ;;  %v276_v58 = vpack.c.bf16 %v208_v54, %v206_v53  ;;  %v163_v53 = vld [vmem:[#allocation6 + $0x248] sm:$0xff] }
  0x7e   :  { %457 = vmatprep.mubr.bf16.mxu0 %v221_v26  ;;  %649 = vmatprep.mubr.bf16.mxu1 %v269_v1  ;;  %v273_v26 = vpack.c.bf16 %v201_v25, %v199_v24  ;;  %v165_v54 = vld [vmem:[#allocation6 + $0x258] sm:$0xff] }
  0x7f   :  { %3392 = vmatpush3.bf16.msra.mxu1 %v3534_v29  ;;  %v147_v29 = vld [vmem:[#allocation6 + $0x1c8] sm:$0xff]  ;;  %v255_v56 = vpack.c.bf16 %v165_v54, %v163_v53 }
  0x85   :  { %458 = vmatmul.mubr.bf16.gmra.mrb[4].mxu0 %v220_v31  ;;  %650 = vmatmul.mubr.bf16.gmra.mrb[4].mxu1 %v268_v6  ;;  %v272_v31 = vpack.c.bf16 %v200_v28, %v198_v27  ;;  %v278_v6 = vpack.c.bf16 %v212_v3, %v210_v2  ;;  %v142_v27 = vld [vmem:[#allocation6 + $0x1a0] sm:$0xff]  ;;  %v144_v28 = vld [vmem:[#allocation6 + $0x1b0] sm:$0xff]  ;;  %v173_v2 = vld [vmem:[#allocation6 + $0x298] sm:$0xff] }
  0x86   :  { %465 = vmatprep.mubr.bf16.mxu0 %v223_v32  ;;  %657 = vmatprep.mubr.bf16.mxu1 %v271_v13  ;;  %v203_v32 = vld [vmem:[#allocation6 + $0x388] sm:$0xff] }
  0x87   :  { %v275_v36 = vpack.c.bf16 %v205_v33, %v203_v32  ;;  %v215_v13 = vld [vmem:[#allocation6 + $0x3e8] sm:$0xff]  ;;  %v146_v33 = vld [vmem:[#allocation6 + $0x1c0] sm:$0xff] }
  0x88   :  { %v281_v15 = vpack.c.bf16 %v217_v14, %v215_v13  ;;  %v179_v13 = vld [vmem:[#allocation6 + $0x2c8] sm:$0xff]  ;;  %v181_v14 = vld [vmem:[#allocation6 + $0x2d8] sm:$0xff] }
  0x89   :  { %v263_v16 = vpack.c.bf16 %v181_v14, %v179_v13 }
  0x8d   :  { %466 = vmatmul.mubr.bf16.gmra.mrb[8].mxu0 %v222_v37  ;;  %658 = vmatmul.mubr.bf16.gmra.mrb[8].mxu1 %v270_v18  ;;  %v3535_v37 = vld [vmem:[#allocation11 + $0x8] sm:$0xff]   ;;  %v138_v18 = vld [vmem:[#allocation6 + $0x180] sm:$0xff] }
  0x8e   :  { %473 = vmatprep.mubr.bf16.mxu0 %v225_v38  ;;  %665 = vmatprep.mubr.bf16.mxu1 %v273_v26  ;;  %v234_v38 = vpack.c.bf16 %v124_v30, %v122_v23  ;;  %v3540_v23 = vld [vmem:[#allocation11 + $0x30] sm:$0xff]   ;;  %v242_v24 = vpack.c.bf16 %v140_v19, %v138_v18  ;;  %v3541_v26 = vld [vmem:[#allocation11 + $0x38] sm:$0xff]   ;;  %v183_v19 = vld [vmem:[#allocation6 + $0x2e8] sm:$0xff] }
  0x8f   :  { %3393 = vmatprep.subr.bf16.mxu1 %v3535_v37  ;;  %v149_v30 = vld [vmem:[#allocation6 + $0x1d8] sm:$0xff]  ;;  %v180_v18 = vld [vmem:[#allocation6 + $0x2d0] sm:$0xff] }
  0x90   :  { %3394 = vmatpush3.bf16.msra.mxu1 %v3535_v37  ;;  %v247_v32 = vpack.c.bf16 %v149_v30, %v147_v29  ;;  %v246_v37 = vpack.c.bf16 %v148_v34, %v146_v33 }
  0x95   :  { %474 = vmatmul.mubr.bf16.gmra.mrb[12].mxu0 %v224_v43  ;;  %666 = vmatmul.mubr.bf16.gmra.mrb[12].mxu1 %v272_v31  ;;  %v209_v43 = vld [vmem:[#allocation6 + $0x3b8] sm:$0xff]  ;;  %v244_v31 = vpack.c.bf16 %v144_v28, %v142_v27 }
  0x96   :  { %481 = vmatprep.mubr.bf16.mxu0 %v227_v44  ;;  %673 = vmatprep.mubr.bf16.mxu1 %v275_v36  ;;  %v3536_v44 = vld [vmem:[#allocation11 + $0x10] sm:$0xff]   ;;  %v277_v46 = vpack.c.bf16 %v209_v43, %v207_v42  ;;  %v153_v36 = vld [vmem:[#allocation6 + $0x1f8] sm:$0xff]  ;;  %v248_v43 = vpack.c.bf16 %v152_v40, %v150_v39 }
  0x97   :  { %3395 = vmatprep.subr.bf16.mxu1 %v3536_v44  ;;  %v157_v42 = vld [vmem:[#allocation6 + $0x218] sm:$0xff] }
  0x98   :  { %3396 = vmatpush3.bf16.msra.mxu1 %v3536_v44 }
  0x9d   :  { %482 = vmatmul.mubr.bf16.gmra.mrb[16].mxu0 %v226_v49  ;;  %v3537_v49 = vld [vmem:[#allocation11 + $0x18] sm:$0xff]   ;;  %674 = vmatmul.mubr.bf16.gmra.mrb[16].mxu1 %v274_v45  ;;  %v154_v45 = vld [vmem:[#allocation6 + $0x200] sm:$0xff] }
  0x9e   :  { %489 = vmatprep.mubr.bf16.mxu0 %v229_v50  ;;  %v131_v50 = vld [vmem:[#allocation6 + $0x148] sm:$0xff]  ;;  %681 = vmatprep.mubr.bf16.mxu1 %v277_v46  ;;  %v156_v46 = vld [vmem:[#allocation6 + $0x210] sm:$0xff] }
  0x9f   :  { %v239_v55 = vpack.c.bf16 %v133_v51, %v131_v50  ;;  %3397 = vmatprep.subr.bf16.mxu1 %v3537_v49  ;;  %v253_v50 = vpack.c.bf16 %v161_v48, %v159_v47  ;;  %v158_v51 = vld [vmem:[#allocation6 + $0x220] sm:$0xff] }
  0xa0   :  { %3398 = vmatpush3.bf16.msra.mxu1 %v3537_v49  ;;  %v250_v49 = vpack.c.bf16 %v156_v46, %v154_v45 }
  0xa5   :  { %490 = vmatmul.mubr.bf16.gmra.mrb[20].mxu0 %v228_v61  ;;  %v132_v61 = vld [vmem:[#allocation6 + $0x150] sm:$0xff]  ;;  %682 = vmatmul.mubr.bf16.gmra.mrb[20].mxu1 %v276_v58 }
  0xa6   :  { %497 = vmatprep.mubr.bf16.mxu0 %v231_v62  ;;  %v135_v62 = vld [vmem:[#allocation6 + $0x168] sm:$0xff]  ;;  %v238_v0 = vpack.c.bf16 %v132_v61, %v130_v60  ;;  %689 = vmatprep.mubr.bf16.mxu1 %v279_v59  ;;  %v164_v58 = vld [vmem:[#allocation6 + $0x250] sm:$0xff]  ;;  %v169_v60 = vld [vmem:[#allocation6 + $0x278] sm:$0xff] }
  0xa7   :  { %v241_v1 = vpack.c.bf16 %v137_v63, %v135_v62  ;;  %v167_v59 = vld [vmem:[#allocation6 + $0x268] sm:$0xff]  ;;  %v254_v61 = vpack.c.bf16 %v164_v58, %v162_v57  ;;  %v166_v63 = vld [vmem:[#allocation6 + $0x260] sm:$0xff] }
  0xa8   :  { %v257_v62 = vpack.c.bf16 %v169_v60, %v167_v59 }
  0xad   :  { %498 = vmatmul.mubr.bf16.gmra.mrb[24].mxu0 %v230_v9  ;;  %v3538_v9 = vld [vmem:[#allocation11 + $0x20] sm:$0xff]   ;;  %690 = vmatmul.mubr.bf16.gmra.mrb[24].mxu1 %v278_v6  ;;  %v172_v6 = vld [vmem:[#allocation6 + $0x290] sm:$0xff] }
  0xae   :  { %505 = vmatprep.mubr.bf16.mxu0 %v233_v10  ;;  %v240_v10 = vpack.c.bf16 %v136_v5, %v134_v4  ;;  %3399 = vmatprep.subr.bf16.mxu1 %v3538_v9  ;;  %v170_v5 = vld [vmem:[#allocation6 + $0x280] sm:$0xff] }
  0xaf   :  { %3400 = vmatpush3.bf16.msra.mxu1 %v3538_v9  ;;  %697 = vmatprep.mubr.bf16.mxu1 %v281_v15  ;;  %v258_v9 = vpack.c.bf16 %v172_v6, %v170_v5 }
  0xb0   :  { %3401 = vmatprep.subr.bf16.mxu1 %v3539_v12 }
  0xb3   :  { %3402 = vmatpush3.bf16.msra.mxu1 %v3539_v12  ;;  %v176_v12 = vld [vmem:[#allocation6 + $0x2b0] sm:$0xff] }
  0xb4   :  { %3403 = vmatprep.subr.bf16.mxu1 %v3540_v23 }
  0xb5   :  { %506 = vmatmul.mubr.bf16.gmra.mrb[28].mxu0 %v232_v21  ;;  %v143_v21 = vld [vmem:[#allocation6 + $0x1a8] sm:$0xff]  ;;  %698 = vmatmul.mubr.bf16.gmra.mrb[28].mxu1 %v280_v20  ;;  %v185_v20 = vld [vmem:[#allocation6 + $0x2f8] sm:$0xff] }
  0xb6   :  { %513 = vmatprep.mubr.bf16.mxu0 %v235_v22  ;;  %v145_v22 = vld [vmem:[#allocation6 + $0x1b8] sm:$0xff] }
  0xb7   :  { %v245_v25 = vpack.c.bf16 %v145_v22, %v143_v21  ;;  %3404 = vmatpush3.bf16.msra.mxu1 %v3540_v23  ;;  %v262_v21 = vpack.c.bf16 %v180_v18, %v178_v17  ;;  %v265_v22 = vpack.c.bf16 %v185_v20, %v183_v19  ;;  %v182_v23 = vld [vmem:[#allocation6 + $0x2e0] sm:$0xff] }
  0xb8   :  { %3405 = vmatprep.subr.bf16.mxu1 %v3541_v26 }
  0xbb   :  { %3406 = vmatpush3.bf16.msra.mxu1 %v3541_v26  ;;  %v4343_v26 = vld [vmem:[%s6384_s2] ss:$0 sm:$0xff] }
  0xbd   :  { %514 = vmatmul.mubr.bf16.gmra.mrb[32].mxu0 %v234_v38  ;;  %v249_v38 = vpack.c.bf16 %v153_v36, %v151_v35 }
  0xbe   :  { %521 = vmatprep.mubr.bf16.mxu0 %v237_v41  ;;  %v155_v41 = vld [vmem:[#allocation6 + $0x208] sm:$0xff] }
  0xbf   :  { %v251_v44 = vpack.c.bf16 %v157_v42, %v155_v41 }
  0xc5   :  { %522 = vmatmul.mubr.bf16.gmra.mrb[36].mxu0 %v236_v52  ;;  %v160_v52 = vld [vmem:[#allocation6 + $0x230] sm:$0xff] }
  0xc6   :  { %529 = vmatprep.mubr.bf16.mxu0 %v239_v55  ;;  %v252_v55 = vpack.c.bf16 %v160_v52, %v158_v51 }
  0xcd   :  { %530 = vmatmul.mubr.bf16.gmra.mrb[40].mxu0 %v238_v0  ;;  %v168_v0 = vld [vmem:[#allocation6 + $0x270] sm:$0xff] }
  0xce   :  { %537 = vmatprep.mubr.bf16.mxu0 %v241_v1  ;;  %v171_v1 = vld [vmem:[#allocation6 + $0x288] sm:$0xff]  ;;  %v256_v3 = vpack.c.bf16 %v168_v0, %v166_v63 }
  0xcf   :  { %v259_v4 = vpack.c.bf16 %v173_v2, %v171_v1 }
  0xd5   :  { %538 = vmatmul.mubr.bf16.gmra.mrb[44].mxu0 %v240_v10  ;;  %v261_v10 = vpack.c.bf16 %v177_v8, %v175_v7 }
  0xd6   :  { %545 = vmatprep.mubr.bf16.mxu0 %v243_v11  ;;  %v174_v11 = vld [vmem:[#allocation6 + $0x2a0] sm:$0xff] }
  0xd7   :  { %v260_v15 = vpack.c.bf16 %v176_v12, %v174_v11 }
  0xdd   :  { %546 = vmatmul.mubr.bf16.gmra.mrb[48].mxu0 %v242_v24  ;;  %v184_v24 = vld [vmem:[#allocation6 + $0x2f0] sm:$0xff] }
  0xde   :  { %553 = vmatprep.mubr.bf16.mxu0 %v245_v25  ;;  %v264_v25 = vpack.c.bf16 %v184_v24, %v182_v23 }
  0xe5   :  { %554 = vmatmul.mubr.bf16.gmra.mrb[52].mxu0 %v244_v31 }
  0xe6   :  { %561 = vmatprep.mubr.bf16.mxu0 %v247_v32 }
  0xed   :  { %562 = vmatmul.mubr.bf16.gmra.mrb[56].mxu0 %v246_v37 }
  0xee   :  { %569 = vmatprep.mubr.bf16.mxu0 %v249_v38 }
  0xf5   :  { %570 = vmatmul.mubr.bf16.gmra.mrb[60].mxu0 %v248_v43 }
  0xf6   :  { %577 = vmatprep.mubr.bf16.mxu0 %v251_v44 }
  0xfd   :  { %578 = vmatmul.mubr.bf16.gmra.mrb[64].mxu0 %v250_v49 }
  0xfe   :  { %585 = vmatprep.mubr.bf16.mxu0 %v253_v50 }
 0x105   :  { %586 = vmatmul.mubr.bf16.gmra.mrb[68].mxu0 %v252_v55 }
 0x106   :  { %593 = vmatprep.mubr.bf16.mxu0 %v255_v56 }
 0x10d   :  { %594 = vmatmul.mubr.bf16.gmra.mrb[72].mxu0 %v254_v61 }
 0x10e   :  { %601 = vmatprep.mubr.bf16.mxu0 %v257_v62 }
 0x115   :  { %602 = vmatmul.mubr.bf16.gmra.mrb[76].mxu0 %v256_v3 }
 0x116   :  { %609 = vmatprep.mubr.bf16.mxu0 %v259_v4 }
 0x11d   :  { %610 = vmatmul.mubr.bf16.gmra.mrb[80].mxu0 %v258_v9 }
 0x11e   :  { %617 = vmatprep.mubr.bf16.mxu0 %v261_v10 }
 0x125   :  { %618 = vmatmul.mubr.bf16.gmra.mrb[84].mxu0 %v260_v15 }
 0x126   :  { %625 = vmatprep.mubr.bf16.mxu0 %v263_v16 }
 0x12d   :  { %626 = vmatmul.mubr.bf16.gmra.mrb[88].mxu0 %v262_v21 }
 0x12e   :  { %633 = vmatprep.mubr.bf16.mxu0 %v265_v22 }
 0x135   :  { %634 = vmatmul.mubr.bf16.gmra.mrb[92].mxu0 %v264_v25 }
 0x150   :  { %v451_v27 = vpop.f32.mrb[0].mxu0 }
 0x151   :  { %v4346_v28 = vadd.f32 %v4343_v26, %v451_v27  ;;  %v453_v29 = vpop.f32.mrb[1].mxu0 }
 0x152   :  { %v454_v30 = vpop.f32.mrb[2].mxu0 }
 0x153   :  { %6554 = vst [vmem:[#allocation20_spill] sm:$0xff] %v4346_v28  ;;  %v4349_v31 = vadd.f32 %v4343_v26, %v454_v30  ;;  %v456_v32 = vpop.f32.mrb[3].mxu0  ;;  %v6424_v33 = vmax.f32 %v4346_v28, 0.0 }
 0x155   :  { %6555 = vst [vmem:[#allocation21_spill] sm:$0xff] %v4349_v31  ;;  %v6425_v34 = vmax.f32 %v4349_v31, 0.0 }
 0x157   :  { %v770_v35 = vpack.c.bf16 %v6425_v34, %v6424_v33 }
 0x158   :  { %v459_v36 = vpop.f32.mrb[4].mxu0 }
 0x159   :  { %v4358_v37 = vadd.f32 %v4343_v26, %v459_v36  ;;  %v461_v38 = vpop.f32.mrb[5].mxu0  ;;  %3407 = vmatprep.mubr.bf16.mxu1 %v770_v35 }
 0x15a   :  { %v462_v39 = vpop.f32.mrb[6].mxu0  ;;  %v4435_v38 = vpop.f32.mrb[0].mxu1 }
 0x15b   :  { %6556 = vst [vmem:[#allocation22_spill] sm:$0xff] %v4358_v37  ;;  %v4361_v40 = vadd.f32 %v4343_v26, %v462_v39  ;;  %v464_v41 = vpop.f32.mrb[7].mxu0  ;;  %v6421_v42 = vmax.f32 %v4358_v37, 0.0 }
 0x15d   :  { %6557 = vst [vmem:[#allocation23_spill] sm:$0xff] %v4361_v40  ;;  %v6420_v43 = vmax.f32 %v4361_v40, 0.0 }
 0x15f   :  { %v771_v44 = vpack.c.bf16 %v6420_v43, %v6421_v42 }
 0x160   :  { %v467_v45 = vpop.f32.mrb[8].mxu0 }
 0x161   :  { %v4370_v46 = vadd.f32 %v4343_v26, %v467_v45  ;;  %v469_v47 = vpop.f32.mrb[9].mxu0  ;;  %3408 = vmatmul.mubr.bf16.vlgmr.msra.gmra.mrb[32].mxu1 %v771_v44  ;;  %v645_v44 = vpop.f32.mrb[1].mxu1 }
 0x162   :  { %v470_v48 = vpop.f32.mrb[10].mxu0  ;;  %v4439_v45 = vpop.f32.mrb[2].mxu1 }
 0x163   :  { %6558 = vst [vmem:[#allocation24_spill] sm:$0xff] %v4370_v46  ;;  %v4373_v49 = vadd.f32 %v4343_v26, %v470_v48  ;;  %v472_v50 = vpop.f32.mrb[11].mxu0  ;;  %v6417_v51 = vmax.f32 %v4370_v46, 0.0  ;;  %v648_v48 = vpop.f32.mrb[3].mxu1 }
 0x165   :  { %6559 = vst [vmem:[#allocation25_spill] sm:$0xff] %v4373_v49  ;;  %v6416_v52 = vmax.f32 %v4373_v49, 0.0 }
 0x167   :  { %v772_v53 = vpack.c.bf16 %v6416_v52, %v6417_v51 }
 0x168   :  { %v475_v54 = vpop.f32.mrb[12].mxu0 }
 0x169   :  { %v4382_v55 = vadd.f32 %v4343_v26, %v475_v54  ;;  %v477_v56 = vpop.f32.mrb[13].mxu0  ;;  %3411 = vmatprep.mubr.bf16.mxu1 %v772_v53  ;;  %v4445_v53 = vpop.f32.mrb[4].mxu1 }
 0x16a   :  { %v478_v57 = vpop.f32.mrb[14].mxu0 }
 0x16b   :  { %6560 = vst [vmem:[#allocation26_spill] sm:$0xff] %v4382_v55  ;;  %v4385_v58 = vadd.f32 %v4343_v26, %v478_v57  ;;  %v480_v59 = vpop.f32.mrb[15].mxu0  ;;  %v6413_v60 = vmax.f32 %v4382_v55, 0.0  ;;  %v653_v57 = vpop.f32.mrb[5].mxu1 }
 0x16d   :  { %6561 = vst [vmem:[#allocation27_spill] sm:$0xff] %v4385_v58  ;;  %v6412_v61 = vmax.f32 %v4385_v58, 0.0 }
 0x16f   :  { %v773_v62 = vpack.c.bf16 %v6412_v61, %v6413_v60 }
 0x170   :  { %v483_v63 = vpop.f32.mrb[16].mxu0 }
 0x171   :  { %v4394_v0 = vadd.f32 %v4343_v26, %v483_v63  ;;  %v485_v1 = vpop.f32.mrb[17].mxu0  ;;  %3412 = vmatmul.mubr.bf16.gmra.mrb[36].mxu1 %v773_v62  ;;  %v4450_v62 = vpop.f32.mrb[6].mxu1 }
 0x172   :  { %v486_v2 = vpop.f32.mrb[18].mxu0 }
 0x173   :  { %6562 = vst [vmem:[#allocation28_spill] sm:$0xff] %v4394_v0  ;;  %v4397_v3 = vadd.f32 %v4343_v26, %v486_v2  ;;  %v488_v4 = vpop.f32.mrb[19].mxu0  ;;  %v6409_v5 = vmax.f32 %v4394_v0, 0.0  ;;  %v656_v2 = vpop.f32.mrb[7].mxu1 }
 0x175   :  { %6563 = vst [vmem:[#allocation29_spill] sm:$0xff] %v4397_v3  ;;  %v6408_v6 = vmax.f32 %v4397_v3, 0.0 }
 0x177   :  { %v774_v7 = vpack.c.bf16 %v6408_v6, %v6409_v5 }
 0x178   :  { %v491_v8 = vpop.f32.mrb[20].mxu0 }
 0x179   :  { %v4406_v9 = vadd.f32 %v4343_v26, %v491_v8  ;;  %v493_v10 = vpop.f32.mrb[21].mxu0  ;;  %3415 = vmatprep.mubr.bf16.mxu1 %v774_v7 }
 0x17a   :  { %v494_v11 = vpop.f32.mrb[22].mxu0 }
 0x17b   :  { %6564 = vst [vmem:[#allocation30_spill] sm:$0xff] %v4406_v9  ;;  %v4409_v12 = vadd.f32 %v4343_v26, %v494_v11  ;;  %v496_v13 = vpop.f32.mrb[23].mxu0  ;;  %v6405_v14 = vmax.f32 %v4406_v9, 0.0 }
 0x17d   :  { %6565 = vst [vmem:[#allocation31_spill] sm:$0xff] %v4409_v12  ;;  %v6402_v15 = vmax.f32 %v4409_v12, 0.0 }
 0x17f   :  { %v775_v16 = vpack.c.bf16 %v6402_v15, %v6405_v14 }
 0x180   :  { %v499_v17 = vpop.f32.mrb[24].mxu0 }
 0x181   :  { %v4418_v18 = vadd.f32 %v4343_v26, %v499_v17  ;;  %v501_v19 = vpop.f32.mrb[25].mxu0  ;;  %3416 = vmatmul.mubr.bf16.gmra.mrb[40].mxu1 %v775_v16  ;;  %v4464_v16 = vpop.f32.mrb[8].mxu1 }
 0x182   :  { %v502_v20 = vpop.f32.mrb[26].mxu0  ;;  %v661_v19 = vpop.f32.mrb[9].mxu1 }
 0x183   :  { %6566 = vst [vmem:[#allocation32_spill] sm:$0xff] %v4418_v18  ;;  %v4421_v21 = vadd.f32 %v4343_v26, %v502_v20  ;;  %v504_v22 = vpop.f32.mrb[27].mxu0  ;;  %v6401_v23 = vmax.f32 %v4418_v18, 0.0 }
 0x185   :  { %6567 = vst [vmem:[#allocation33_spill] sm:$0xff] %v4421_v21  ;;  %v6400_v24 = vmax.f32 %v4421_v21, 0.0 }
 0x187   :  { %v776_v25 = vpack.c.bf16 %v6400_v24, %v6401_v23 }
 0x188   :  { %v507_v27 = vpop.f32.mrb[28].mxu0 }
 0x189   :  { %v4430_v29 = vadd.f32 %v4343_v26, %v507_v27  ;;  %v509_v30 = vpop.f32.mrb[29].mxu0  ;;  %3419 = vmatprep.mubr.bf16.mxu1 %v776_v25  ;;  %v4469_v25 = vpop.f32.mrb[10].mxu1 }
 0x18a   :  { %v510_v32 = vpop.f32.mrb[30].mxu0  ;;  %v664_v27 = vpop.f32.mrb[11].mxu1 }
 0x18b   :  { %6568 = vst [vmem:[#allocation34_spill] sm:$0xff] %v4430_v29  ;;  %v4433_v35 = vadd.f32 %v4343_v26, %v510_v32  ;;  %v512_v36 = vpop.f32.mrb[31].mxu0  ;;  %v6399_v39 = vmax.f32 %v4430_v29, 0.0 }
 0x18c   :  { %v4473_v36 = vpop.f32.mrb[12].mxu1 }
 0x18d   :  { %6569 = vst [vmem:[#allocation35_spill] sm:$0xff] %v4433_v35  ;;  %v6398_v41 = vmax.f32 %v4433_v35, 0.0  ;;  %v669_v44 = vpop.f32.mrb[13].mxu1 }
 0x18e   :  { %v4479_v48 = vpop.f32.mrb[14].mxu1 }
 0x18f   :  { %v777_v47 = vpack.c.bf16 %v6398_v41, %v6399_v39 }
 0x190   :  { %v515_v50 = vpop.f32.mrb[32].mxu0 }
 0x191   :  { %v4448_v54 = vadd.f32 %v4343_v26, %v515_v50  ;;  %v517_v56 = vpop.f32.mrb[33].mxu0  ;;  %3420 = vmatmul.mubr.bf16.gmra.mrb[44].mxu1 %v777_v47 }
 0x192   :  { %v518_v59 = vpop.f32.mrb[34].mxu0  ;;  %v672_v56 = vpop.f32.mrb[15].mxu1 }
 0x193   :  { %6570 = vst [vmem:[#allocation36_spill] sm:$0xff] %v4448_v54  ;;  %v4453_v63 = vadd.f32 %v4343_v26, %v518_v59  ;;  %v520_v1 = vpop.f32.mrb[35].mxu0  ;;  %v6395_v4 = vmax.f32 %v4448_v54, 0.0 }
 0x194   :  { %v4484_v1 = vpop.f32.mrb[16].mxu1 }
 0x195   :  { %6571 = vst [vmem:[#allocation37_spill] sm:$0xff] %v4453_v63  ;;  %v6394_v7 = vmax.f32 %v4453_v63, 0.0 }
 0x197   :  { %v778_v8 = vpack.c.bf16 %v6394_v7, %v6395_v4 }
 0x198   :  { %v523_v10 = vpop.f32.mrb[36].mxu0 }
 0x199   :  { %v4462_v11 = vadd.f32 %v4343_v26, %v523_v10  ;;  %v525_v13 = vpop.f32.mrb[37].mxu0  ;;  %3423 = vmatprep.mubr.bf16.mxu1 %v778_v8  ;;  %v677_v8 = vpop.f32.mrb[17].mxu1 }
 0x19a   :  { %v526_v17 = vpop.f32.mrb[38].mxu0 }
 0x19b   :  { %6572 = vst [vmem:[#allocation38_spill] sm:$0xff] %v4462_v11  ;;  %v4467_v20 = vadd.f32 %v4343_v26, %v526_v17  ;;  %v528_v22 = vpop.f32.mrb[39].mxu0  ;;  %v6393_v30 = vmax.f32 %v4462_v11, 0.0  ;;  %v4489_v17 = vpop.f32.mrb[18].mxu1 }
 0x19c   :  { %v680_v19 = vpop.f32.mrb[19].mxu1 }
 0x19d   :  { %6573 = vst [vmem:[#allocation39_spill] sm:$0xff] %v4467_v20  ;;  %v6392_v32 = vmax.f32 %v4467_v20, 0.0  ;;  %v4493_v44 = vpop.f32.mrb[20].mxu1 }
 0x19f   :  { %v779_v47 = vpack.c.bf16 %v6392_v32, %v6393_v30 }
 0x1a0   :  { %v531_v50 = vpop.f32.mrb[40].mxu0 }
 0x1a1   :  { %v4482_v57 = vadd.f32 %v4343_v26, %v531_v50  ;;  %v533_v59 = vpop.f32.mrb[41].mxu0  ;;  %3424 = vmatmul.mubr.bf16.gmra.mrb[48].mxu1 %v779_v47  ;;  %v685_v50 = vpop.f32.mrb[21].mxu1 }
 0x1a2   :  { %v534_v2 = vpop.f32.mrb[42].mxu0  ;;  %v4499_v56 = vpop.f32.mrb[22].mxu1 }
 0x1a3   :  { %6574 = vst [vmem:[#allocation40_spill] sm:$0xff] %v4482_v57  ;;  %v4487_v10 = vadd.f32 %v4343_v26, %v534_v2  ;;  %v536_v13 = vpop.f32.mrb[43].mxu0  ;;  %v6397_v22 = vmax.f32 %v4482_v57, 0.0  ;;  %v688_v2 = vpop.f32.mrb[23].mxu1 }
 0x1a4   :  { %v4504_v19 = vpop.f32.mrb[24].mxu1 }
 0x1a5   :  { %6575 = vst [vmem:[#allocation41_spill] sm:$0xff] %v4487_v10  ;;  %v6396_v27 = vmax.f32 %v4487_v10, 0.0  ;;  %v693_v30 = vpop.f32.mrb[25].mxu1 }
 0x1a6   :  { %v4509_v4 = vpop.f32.mrb[26].mxu1 }
 0x1a7   :  { %v780_v47 = vpack.c.bf16 %v6396_v27, %v6397_v22  ;;  %v696_v27 = vpop.f32.mrb[27].mxu1 }
 0x1a8   :  { %v539_v59 = vpop.f32.mrb[44].mxu0  ;;  %v4513_v41 = vpop.f32.mrb[28].mxu1 }
 0x1a9   :  { %v4502_v8 = vadd.f32 %v4343_v26, %v539_v59  ;;  %v541_v13 = vpop.f32.mrb[45].mxu0  ;;  %3427 = vmatprep.mubr.bf16.mxu1 %v780_v47  ;;  %v701_v59 = vpop.f32.mrb[29].mxu1 }
 0x1aa   :  { %v542_v32 = vpop.f32.mrb[46].mxu0  ;;  %v4519_v30 = vpop.f32.mrb[30].mxu1 }
 0x1ab   :  { %6576 = vst [vmem:[#allocation42_spill] sm:$0xff] %v4502_v8  ;;  %v4507_v50 = vadd.f32 %v4343_v26, %v542_v32  ;;  %v544_v7 = vpop.f32.mrb[47].mxu0  ;;  %v6404_v22 = vmax.f32 %v4502_v8, 0.0  ;;  %v704_v13 = vpop.f32.mrb[31].mxu1 }
 0x1ad   :  { %6577 = vst [vmem:[#allocation43_spill] sm:$0xff] %v4507_v50  ;;  %v6403_v2 = vmax.f32 %v4507_v50, 0.0 }
 0x1af   :  { %v781_v47 = vpack.c.bf16 %v6403_v2, %v6404_v22 }
 0x1b0   :  { %v547_v32 = vpop.f32.mrb[48].mxu0 }
 0x1b1   :  { %v4522_v7 = vadd.f32 %v4343_v26, %v547_v32  ;;  %v549_v27 = vpop.f32.mrb[49].mxu0  ;;  %3428 = vmatmul.mubr.bf16.gmra.mrb[52].mxu1 %v781_v47 }
 0x1b2   :  { %v550_v39 = vpop.f32.mrb[50].mxu0 }
 0x1b3   :  { %6578 = vst [vmem:[#allocation44_spill] sm:$0xff] %v4522_v7  ;;  %v4525_v24 = vadd.f32 %v4343_v26, %v550_v39  ;;  %v552_v23 = vpop.f32.mrb[51].mxu0  ;;  %v6407_v59 = vmax.f32 %v4522_v7, 0.0 }
 0x1b5   :  { %6579 = vst [vmem:[#allocation45_spill] sm:$0xff] %v4525_v24  ;;  %v6406_v15 = vmax.f32 %v4525_v24, 0.0 }
 0x1b7   :  { %v782_v2 = vpack.c.bf16 %v6406_v15, %v6407_v59 }
 0x1b8   :  { %v555_v13 = vpop.f32.mrb[52].mxu0 }
 0x1b9   :  { %v4534_v32 = vadd.f32 %v4343_v26, %v555_v13  ;;  %v557_v27 = vpop.f32.mrb[53].mxu0  ;;  %3431 = vmatprep.mubr.bf16.mxu1 %v782_v2 }
 0x1ba   :  { %v558_v47 = vpop.f32.mrb[54].mxu0 }
 0x1bb   :  { %6580 = vst [vmem:[#allocation46_spill] sm:$0xff] %v4534_v32  ;;  %v4537_v39 = vadd.f32 %v4343_v26, %v558_v47  ;;  %v560_v23 = vpop.f32.mrb[55].mxu0  ;;  %v6411_v22 = vmax.f32 %v4534_v32, 0.0 }
 0x1bd   :  { %6581 = vst [vmem:[#allocation47_spill] sm:$0xff] %v4537_v39  ;;  %v6410_v14 = vmax.f32 %v4537_v39, 0.0 }
 0x1bf   :  { %v783_v15 = vpack.c.bf16 %v6410_v14, %v6411_v22 }
 0x1c0   :  { %v563_v59 = vpop.f32.mrb[56].mxu0 }
 0x1c1   :  { %v4546_v13 = vadd.f32 %v4343_v26, %v563_v59  ;;  %v565_v27 = vpop.f32.mrb[57].mxu0  ;;  %3432 = vmatmul.mubr.bf16.gmra.mrb[56].mxu1 %v783_v15 }
 0x1c2   :  { %v566_v2 = vpop.f32.mrb[58].mxu0 }
 0x1c3   :  { %6582 = vst [vmem:[#allocation48_spill] sm:$0xff] %v4546_v13  ;;  %v4549_v47 = vadd.f32 %v4343_v26, %v566_v2  ;;  %v568_v23 = vpop.f32.mrb[59].mxu0  ;;  %v6415_v6 = vmax.f32 %v4546_v13, 0.0 }
 0x1c5   :  { %6583 = vst [vmem:[#allocation49_spill] sm:$0xff] %v4549_v47  ;;  %v6414_v5 = vmax.f32 %v4549_v47, 0.0 }
 0x1c7   :  { %v784_v14 = vpack.c.bf16 %v6414_v5, %v6415_v6 }
 0x1c8   :  { %v571_v22 = vpop.f32.mrb[60].mxu0 }
 0x1c9   :  { %v4558_v59 = vadd.f32 %v4343_v26, %v571_v22  ;;  %v573_v27 = vpop.f32.mrb[61].mxu0  ;;  %3435 = vmatprep.mubr.bf16.mxu1 %v784_v14 }
 0x1ca   :  { %v574_v15 = vpop.f32.mrb[62].mxu0 }
 0x1cb   :  { %6584 = vst [vmem:[#allocation50_spill] sm:$0xff] %v4558_v59  ;;  %v4561_v2 = vadd.f32 %v4343_v26, %v574_v15  ;;  %v576_v23 = vpop.f32.mrb[63].mxu0  ;;  %v6419_v61 = vmax.f32 %v4558_v59, 0.0 }
 0x1cd   :  { %6585 = vst [vmem:[#allocation51_spill] sm:$0xff] %v4561_v2  ;;  %v6418_v60 = vmax.f32 %v4561_v2, 0.0 }
 0x1cf   :  { %v785_v5 = vpack.c.bf16 %v6418_v60, %v6419_v61 }
 0x1d0   :  { %v579_v6 = vpop.f32.mrb[64].mxu0 }
 0x1d1   :  { %3436 = vmatmul.mubr.bf16.gmra.mrb[60].mxu1 %v785_v5  ;;  %v4570_v22 = vadd.f32 %v4343_v26, %v579_v6  ;;  %v581_v14 = vpop.f32.mrb[65].mxu0 }
 0x1d2   :  { %v582_v27 = vpop.f32.mrb[66].mxu0 }
 0x1d3   :  { %6586 = vst [vmem:[#allocation52_spill] sm:$0xff] %v4570_v22  ;;  %v6423_v15 = vmax.f32 %v4570_v22, 0.0  ;;  %v4574_v23 = vadd.f32 %v4343_v26, %v582_v27  ;;  %v584_v52 = vpop.f32.mrb[67].mxu0 }
 0x1d5   :  { %6587 = vst [vmem:[#allocation53_spill] sm:$0xff] %v4574_v23  ;;  %v6422_v51 = vmax.f32 %v4574_v23, 0.0 }
 0x1d7   :  { %v786_v60 = vpack.c.bf16 %v6422_v51, %v6423_v15 }
 0x1d8   :  { %v587_v61 = vpop.f32.mrb[68].mxu0 }
 0x1d9   :  { %v4582_v5 = vadd.f32 %v4343_v26, %v587_v61  ;;  %v589_v6 = vpop.f32.mrb[69].mxu0  ;;  %3439 = vmatprep.mubr.bf16.mxu1 %v786_v60 }
 0x1da   :  { %v590_v14 = vpop.f32.mrb[70].mxu0 }
 0x1db   :  { %6588 = vst [vmem:[#allocation54_spill] sm:$0xff] %v4582_v5  ;;  %v6427_v43 = vmax.f32 %v4582_v5, 0.0  ;;  %v4586_v27 = vadd.f32 %v4343_v26, %v590_v14  ;;  %v592_v52 = vpop.f32.mrb[71].mxu0 }
 0x1dd   :  { %6589 = vst [vmem:[#allocation55_spill] sm:$0xff] %v4586_v27  ;;  %v6426_v42 = vmax.f32 %v4586_v27, 0.0 }
 0x1df   :  { %v787_v51 = vpack.c.bf16 %v6426_v42, %v6427_v43 }
 0x1e0   :  { %v595_v15 = vpop.f32.mrb[72].mxu0 }
 0x1e1   :  { %v4594_v61 = vadd.f32 %v4343_v26, %v595_v15  ;;  %v597_v6 = vpop.f32.mrb[73].mxu0  ;;  %3440 = vmatmul.mubr.bf16.gmra.mrb[64].mxu1 %v787_v51 }
 0x1e2   :  { %v598_v60 = vpop.f32.mrb[74].mxu0 }
 0x1e3   :  { %6590 = vst [vmem:[#allocation56_spill] sm:$0xff] %v4594_v61  ;;  %v6431_v33 = vmax.f32 %v4594_v61, 0.0  ;;  %v4598_v14 = vadd.f32 %v4343_v26, %v598_v60  ;;  %v600_v52 = vpop.f32.mrb[75].mxu0 }
 0x1e5   :  { %6591 = vst [vmem:[#allocation57_spill] sm:$0xff] %v4598_v14  ;;  %v6430_v34 = vmax.f32 %v4598_v14, 0.0 }
 0x1e7   :  { %v788_v42 = vpack.c.bf16 %v6430_v34, %v6431_v33 }
 0x1e8   :  { %v603_v43 = vpop.f32.mrb[76].mxu0 }
 0x1e9   :  { %v4606_v15 = vadd.f32 %v4343_v26, %v603_v43  ;;  %v605_v6 = vpop.f32.mrb[77].mxu0  ;;  %3443 = vmatprep.mubr.bf16.mxu1 %v788_v42 }
 0x1ea   :  { %v606_v51 = vpop.f32.mrb[78].mxu0 }
 0x1eb   :  { %6592 = vst [vmem:[#allocation58_spill] sm:$0xff] %v4606_v15  ;;  %v6435_v27 = vmax.f32 %v4606_v15, 0.0  ;;  %v4610_v60 = vadd.f32 %v4343_v26, %v606_v51  ;;  %v608_v52 = vpop.f32.mrb[79].mxu0 }
 0x1ed   :  { %6593 = vst [vmem:[#allocation59_spill] sm:$0xff] %v4610_v60  ;;  %v6434_v5 = vmax.f32 %v4610_v60, 0.0 }
 0x1ef   :  { %v789_v34 = vpack.c.bf16 %v6434_v5, %v6435_v27 }
 0x1f0   :  { %v611_v33 = vpop.f32.mrb[80].mxu0 }
 0x1f1   :  { %v4618_v43 = vadd.f32 %v4343_v26, %v611_v33  ;;  %v613_v6 = vpop.f32.mrb[81].mxu0  ;;  %3444 = vmatmul.mubr.bf16.gmra.mrb[68].mxu1 %v789_v34 }
 0x1f2   :  { %v614_v42 = vpop.f32.mrb[82].mxu0 }
 0x1f3   :  { %6594 = vst [vmem:[#allocation60_spill] sm:$0xff] %v4618_v43  ;;  %v6439_v14 = vmax.f32 %v4618_v43, 0.0  ;;  %v4622_v51 = vadd.f32 %v4343_v26, %v614_v42  ;;  %v616_v52 = vpop.f32.mrb[83].mxu0 }
 0x1f5   :  { %6595 = vst [vmem:[#allocation61_spill] sm:$0xff] %v4622_v51  ;;  %v6438_v61 = vmax.f32 %v4622_v51, 0.0 }
 0x1f7   :  { %v790_v5 = vpack.c.bf16 %v6438_v61, %v6439_v14 }
 0x1f8   :  { %v619_v27 = vpop.f32.mrb[84].mxu0 }
 0x1f9   :  { %v4630_v33 = vadd.f32 %v4343_v26, %v619_v27  ;;  %v621_v6 = vpop.f32.mrb[85].mxu0  ;;  %3447 = vmatprep.mubr.bf16.mxu1 %v790_v5 }
 0x1fa   :  { %v622_v34 = vpop.f32.mrb[86].mxu0 }
 0x1fb   :  { %6596 = vst [vmem:[#allocation62_spill] sm:$0xff] %v4630_v33  ;;  %v6444_v60 = vmax.f32 %v4630_v33, 0.0  ;;  %v4634_v42 = vadd.f32 %v4343_v26, %v622_v34  ;;  %v624_v52 = vpop.f32.mrb[87].mxu0  ;;  %v4651_v33 = vadd.f32 %v4343_v26, %v4435_v38 }
 0x1fd   :  { %6597 = vst [vmem:[#allocation63_spill] sm:$0xff] %v4634_v42  ;;  %v6443_v15 = vmax.f32 %v4634_v42, 0.0  ;;  %6600 = vst [vmem:[#allocation66_spill] sm:$0xff] %v4651_v33 }
 0x1ff   :  { %v791_v61 = vpack.c.bf16 %v6443_v15, %v6444_v60  ;;  %v4655_v15 = vadd.f32 %v4343_v26, %v4439_v45  ;;  %v6450_v60 = vmax.f32 %v4651_v33, 0.0 }
 0x200   :  { %v627_v14 = vpop.f32.mrb[88].mxu0 }
 0x201   :  { %v4642_v27 = vadd.f32 %v4343_v26, %v627_v14  ;;  %v629_v6 = vpop.f32.mrb[89].mxu0  ;;  %3448 = vmatmul.mubr.bf16.gmra.mrb[72].mxu1 %v791_v61  ;;  %6601 = vst [vmem:[#allocation67_spill] sm:$0xff] %v4655_v15  ;;  %v6449_v38 = vmax.f32 %v4655_v15, 0.0 }
 0x202   :  { %v630_v5 = vpop.f32.mrb[90].mxu0 }
 0x203   :  { %6598 = vst [vmem:[#allocation64_spill] sm:$0xff] %v4642_v27  ;;  %v6467_v51 = vmax.f32 %v4642_v27, 0.0  ;;  %v4646_v34 = vadd.f32 %v4343_v26, %v630_v5  ;;  %v632_v52 = vpop.f32.mrb[91].mxu0 }
 0x205   :  { %6599 = vst [vmem:[#allocation65_spill] sm:$0xff] %v4646_v34  ;;  %v6448_v43 = vmax.f32 %v4646_v34, 0.0 }
 0x207   :  { %v792_v61 = vpack.c.bf16 %v6448_v43, %v6467_v51  ;;  %v4673_v43 = vadd.f32 %v4343_v26, %v4445_v53 }
 0x208   :  { %v635_v14 = vpop.f32.mrb[92].mxu0 }
 0x209   :  { %v4662_v6 = vadd.f32 %v4343_v26, %v635_v14  ;;  %v637_v5 = vpop.f32.mrb[93].mxu0  ;;  %3451 = vmatprep.mubr.bf16.mxu1 %v792_v61  ;;  %6604 = vst [vmem:[#allocation70_spill] sm:$0xff] %v4673_v43  ;;  %v4677_v61 = vadd.f32 %v4343_v26, %v4450_v62  ;;  %v794_v14 = vpack.c.bf16 %v6449_v38, %v6450_v60  ;;  %v6453_v62 = vmax.f32 %v4673_v43, 0.0 }
 0x20a   :  { %v638_v52 = vpop.f32.mrb[94].mxu0  ;;  %v4685_v5 = vadd.f32 %v4343_v26, %v4464_v16  ;;  %v4705_v60 = vadd.f32 %v4343_v26, %v4473_v36 }
 0x20b   :  { %6602 = vst [vmem:[#allocation68_spill] sm:$0xff] %v4662_v6  ;;  %v6454_v42 = vmax.f32 %v4662_v6, 0.0  ;;  %v4668_v45 = vadd.f32 %v4343_v26, %v638_v52  ;;  %v640_v27 = vpop.f32.mrb[95].mxu0  ;;  %6605 = vst [vmem:[#allocation71_spill] sm:$0xff] %v4677_v61  ;;  %v6452_v52 = vmax.f32 %v4677_v61, 0.0 }
 0x20c   :  { %6606 = vst [vmem:[#allocation72_spill] sm:$0xff] %v4685_v5  ;;  %v4689_v27 = vadd.f32 %v4343_v26, %v4469_v25  ;;  %v6458_v38 = vmax.f32 %v4685_v5, 0.0  ;;  %6608 = vst [vmem:[#allocation74_spill] sm:$0xff] %v4705_v60  ;;  %v6457_v36 = vmax.f32 %v4705_v60, 0.0 }
 0x20d   :  { %6603 = vst [vmem:[#allocation69_spill] sm:$0xff] %v4668_v45  ;;  %v6451_v34 = vmax.f32 %v4668_v45, 0.0  ;;  %v795_v25 = vpack.c.bf16 %v6452_v52, %v6453_v62  ;;  %v4721_v52 = vadd.f32 %v4343_v26, %v4489_v17  ;;  %v4737_v17 = vadd.f32 %v4343_v26, %v4499_v56 }
 0x20e   :  { %6607 = vst [vmem:[#allocation73_spill] sm:$0xff] %v4689_v27  ;;  %v6455_v16 = vmax.f32 %v4689_v27, 0.0 }
 0x20f   :  { %v793_v53 = vpack.c.bf16 %v6451_v34, %v6454_v42  ;;  %v4709_v34 = vadd.f32 %v4343_v26, %v4479_v48  ;;  %6611 = vst [vmem:[#allocation77_spill] sm:$0xff] %v4721_v52  ;;  %v6459_v42 = vmax.f32 %v4721_v52, 0.0  ;;  %6613 = vst [vmem:[#allocation79_spill] sm:$0xff] %v4737_v17 }
 0x211   :  { %3452 = vmatmul.mubr.bf16.gmra.mrb[76].mxu1 %v793_v53  ;;  %6609 = vst [vmem:[#allocation75_spill] sm:$0xff] %v4709_v34  ;;  %v4717_v53 = vadd.f32 %v4343_v26, %v4484_v1  ;;  %v6456_v62 = vmax.f32 %v4709_v34, 0.0 }
 0x212   :  { %3455 = vmatprep.mubr.bf16.mxu1 %v794_v14  ;;  %v796_v14 = vpack.c.bf16 %v6455_v16, %v6458_v38  ;;  %v4733_v16 = vadd.f32 %v4343_v26, %v4493_v44 }
 0x213   :  { %6610 = vst [vmem:[#allocation76_spill] sm:$0xff] %v4717_v53  ;;  %v6460_v48 = vmax.f32 %v4717_v53, 0.0  ;;  %v797_v1 = vpack.c.bf16 %v6456_v62, %v6457_v36  ;;  %v4749_v62 = vadd.f32 %v4343_v26, %v4509_v4  ;;  %v6463_v36 = vmax.f32 %v4737_v17, 0.0 }
 0x214   :  { %6612 = vst [vmem:[#allocation78_spill] sm:$0xff] %v4733_v16  ;;  %v6464_v44 = vmax.f32 %v4733_v16, 0.0  ;;  %v4765_v4 = vadd.f32 %v4343_v26, %v4519_v30 }
 0x215   :  { %6615 = vst [vmem:[#allocation81_spill] sm:$0xff] %v4749_v62  ;;  %v6461_v38 = vmax.f32 %v4749_v62, 0.0 }
 0x216   :  { %6617 = vst [vmem:[#allocation83_spill] sm:$0xff] %v4765_v4 }
 0x219   :  { %3456 = vmatmul.mubr.bf16.gmra.mrb[80].mxu1 %v795_v25  ;;  %v798_v25 = vpack.c.bf16 %v6459_v42, %v6460_v48  ;;  %v4761_v42 = vadd.f32 %v4343_v26, %v4513_v41  ;;  %v6465_v48 = vmax.f32 %v4765_v4, 0.0 }
 0x21a   :  { %3459 = vmatprep.mubr.bf16.mxu1 %v796_v14  ;;  %v4745_v14 = vadd.f32 %v4343_v26, %v4504_v19  ;;  %v799_v19 = vpack.c.bf16 %v6463_v36, %v6464_v44  ;;  %v4780_v26 = vld [vmem:[%s6386_s4] ss:$0 sm:$0xff] }
 0x21b   :  { %6616 = vst [vmem:[#allocation82_spill] sm:$0xff] %v4761_v42 }
 0x21c   :  { %6614 = vst [vmem:[#allocation80_spill] sm:$0xff] %v4745_v14  ;;  %v6462_v56 = vmax.f32 %v4745_v14, 0.0 }
 0x221   :  { %3460 = vmatmul.mubr.bf16.gmra.mrb[84].mxu1 %v797_v1  ;;  %v800_v1 = vpack.c.bf16 %v6461_v38, %v6462_v56 }
 0x222   :  { %3463 = vmatprep.mubr.bf16.mxu1 %v798_v25  ;;  %v6466_v25 = vmax.f32 %v4761_v42, 0.0 }
 0x224   :  { %v801_v41 = vpack.c.bf16 %v6465_v48, %v6466_v25 }
 0x229   :  { %3464 = vmatmul.mubr.bf16.gmra.mrb[88].mxu1 %v799_v19 }
 0x22a   :  { %3467 = vmatprep.mubr.bf16.mxu1 %v800_v1 }
 0x231   :  { %3468 = vmatmul.mubr.bf16.gmra.mrb[92].mxu1 %v801_v41 }
 0x234   :  { %v3409_v30 = vpop.f32.mrb[32].mxu1 }
 0x235   :  { %v4783_v38 = vadd.f32 %v3409_v30, %v4780_v26  ;;  %v907_v56 = vpop.f32.mrb[33].mxu1 }
 0x236   :  { %v3410_v36 = vpop.f32.mrb[34].mxu1  ;;  %v4790_v48 = vadd.f32 %v4780_v26, %v907_v56 }
 0x237   :  { %v3287_v19 = vmul.f32 -1.442695, %v4783_v38  ;;  %v4787_v1 = vadd.f32 %v3410_v36, %v4780_v26  ;;  %v910_v44 = vpop.f32.mrb[35].mxu1 }
 0x238   :  { %v3285_v25 = vmul.f32 -1.442695, %v4790_v48  ;;  %v4795_v30 = vadd.f32 %v4780_v26, %v910_v44 }
 0x239   :  { %3542 = vpow2.f32 %v3287_v19  ;;  %v3288_v41 = vmul.f32 -1.442695, %v4787_v1 }
 0x23a   :  { %v3286_v51 = vmul.f32 -1.442695, %v4795_v30 }
 0x23b   :  { %3544 = vpow2.f32 %v3288_v41 }
 0x23c   :  { %3546 = vpow2.f32 %v3285_v25 }
 0x23d   :  { %3548 = vpow2.f32 %v3286_v51 }
 0x243   :  { %v3543_v4 = vpop.eup %3542 }
 0x244   :  { %v3413_v36 = vpop.f32.mrb[36].mxu1  ;;  %v1420_v42 = vadd.f32 1.0, %v3543_v4 }
 0x245   :  { %v4799_v62 = vadd.f32 %v3413_v36, %v4780_v26  ;;  %v923_v56 = vpop.f32.mrb[37].mxu1  ;;  %v3545_v19 = vpop.eup %3544 }
 0x246   :  { %v4802_v14 = vadd.f32 %v4780_v26, %v923_v56  ;;  %v3414_v17 = vpop.f32.mrb[38].mxu1  ;;  %3550 = vrcp.f32 %v1420_v42  ;;  %v1421_v41 = vadd.f32 1.0, %v3545_v19  ;;  %v3547_v36 = vpop.eup %3546 }
 0x247   :  { %v3291_v44 = vmul.f32 -1.442695, %v4799_v62  ;;  %v4806_v25 = vadd.f32 %v3414_v17, %v4780_v26  ;;  %v926_v16 = vpop.f32.mrb[39].mxu1  ;;  %v1418_v19 = vadd.f32 1.0, %v3547_v36  ;;  %v3549_v52 = vpop.eup %3548 }
 0x248   :  { %v3289_v51 = vmul.f32 -1.442695, %v4802_v14  ;;  %v4810_v4 = vadd.f32 %v4780_v26, %v926_v16  ;;  %3552 = vrcp.f32 %v1421_v41  ;;  %v1419_v17 = vadd.f32 1.0, %v3549_v52 }
 0x249   :  { %3554 = vpow2.f32 %v3291_v44  ;;  %v3292_v56 = vmul.f32 -1.442695, %v4806_v25 }
 0x24a   :  { %3556 = vpow2.f32 %v3289_v51  ;;  %v3290_v42 = vmul.f32 -1.442695, %v4810_v4 }
 0x24b   :  { %3558 = vpow2.f32 %v3292_v56 }
 0x24c   :  { %3560 = vpow2.f32 %v3290_v42 }
 0x24d   :  { %3562 = vrcp.f32 %v1418_v19 }
 0x24e   :  { %3564 = vrcp.f32 %v1419_v17 }
 0x250   :  { %v3551_v53 = vpop.eup %3550 }
 0x251   :  { %1678 = vrot.lane.b32.xlu1 %v3551_v53, %s4199_s20 }
 0x252   :  { %v3553_v34 = vpop.eup %3552 }
 0x253   :  { %v3555_v16 = vpop.eup %3554 }
 0x254   :  { %v3417_v60 = vpop.f32.mrb[40].mxu1  ;;  %v1424_v41 = vadd.f32 1.0, %v3555_v16  ;;  %v3557_v36 = vpop.eup %3556 }
 0x255   :  { %v4816_v44 = vadd.f32 %v3417_v60, %v4780_v26  ;;  %1680 = vrot.lane.b32.xlu1 %v3553_v34, %s4199_s20  ;;  %v939_v51 = vpop.f32.mrb[41].mxu1  ;;  %v3559_v19 = vpop.eup %3558  ;;  %v1422_v17 = vadd.f32 1.0, %v3557_v36 }
 0x256   :  { %v4820_v56 = vadd.f32 %v4780_v26, %v939_v51  ;;  %v3418_v42 = vpop.f32.mrb[42].mxu1  ;;  %3566 = vrcp.f32 %v1424_v41  ;;  %v1425_v16 = vadd.f32 1.0, %v3559_v19  ;;  %v3561_v60 = vpop.eup %3560 }
 0x257   :  { %v3295_v52 = vmul.f32 -1.442695, %v4816_v44  ;;  %v942_v53 = vpop.f32.mrb[43].mxu1  ;;  %v4824_v27 = vadd.f32 %v3418_v42, %v4780_v26  ;;  %v3563_v51 = vpop.eup %3562  ;;  %v1423_v61 = vadd.f32 1.0, %v3561_v60 }
 0x258   :  { %v3293_v34 = vmul.f32 -1.442695, %v4820_v56  ;;  %v4828_v5 = vadd.f32 %v4780_v26, %v942_v53  ;;  %1674 = vrot.lane.b32.xlu0 %v3563_v51, %s4199_s20  ;;  %v3565_v36 = vpop.eup %3564 }
 0x259   :  { %3568 = vpow2.f32 %v3295_v52  ;;  %v3296_v41 = vmul.f32 -1.442695, %v4824_v27 }
 0x25a   :  { %3570 = vrcp.f32 %v1425_v16  ;;  %v3294_v42 = vmul.f32 -1.442695, %v4828_v5 }
 0x25b   :  { %3572 = vrcp.f32 %v1422_v17 }
 0x25c   :  { %3574 = vpow2.f32 %v3293_v34  ;;  %1676 = vrot.lane.b32.xlu0 %v3565_v36, %s4199_s20 }
 0x25d   :  { %3576 = vrcp.f32 %v1423_v61 }
 0x25e   :  { %3578 = vpow2.f32 %v3296_v41 }
 0x25f   :  { %3580 = vpow2.f32 %v3294_v42 }
 0x260   :  { %v3567_v52 = vpop.eup %3566 }
 0x261   :  { %1686 = vrot.lane.b32.xlu0 %v3567_v52, %s4199_s20 }
 0x263   :  { %v3569_v53 = vpop.eup %3568 }
 0x264   :  { %v3421_v19 = vpop.f32.mrb[44].mxu1  ;;  %v3571_v16 = vpop.eup %3570  ;;  %v1428_v60 = vadd.f32 1.0, %v3569_v53 }
 0x265   :  { %v4836_v51 = vadd.f32 %v3421_v19, %v4780_v26  ;;  %v955_v17 = vpop.f32.mrb[45].mxu1  ;;  %1688 = vrot.lane.b32.xlu1 %v3571_v16, %s4199_s20  ;;  %v3573_v41 = vpop.eup %3572 }
 0x266   :  { %v4840_v34 = vadd.f32 %v4780_v26, %v955_v17  ;;  %v3422_v61 = vpop.f32.mrb[46].mxu1  ;;  %3582 = vrcp.f32 %v1428_v60  ;;  %v3575_v43 = vpop.eup %3574  ;;  %1682 = vrot.lane.b32.xlu0 %v3573_v41, %s4199_s20 }
 0x267   :  { %v3299_v42 = vmul.f32 -1.442695, %v4836_v51  ;;  %v958_v36 = vpop.f32.mrb[47].mxu1  ;;  %v4846_v53 = vadd.f32 %v3422_v61, %v4780_v26  ;;  %v3577_v19 = vpop.eup %3576  ;;  %v1426_v15 = vadd.f32 1.0, %v3575_v43 }
 0x268   :  { %v3297_v52 = vmul.f32 -1.442695, %v4840_v34  ;;  %v3579_v16 = vpop.eup %3578  ;;  %v4849_v17 = vadd.f32 %v4780_v26, %v958_v36 }
 0x269   :  { %3584 = vpow2.f32 %v3299_v42  ;;  %1684 = vrot.lane.b32.xlu1 %v3577_v19, %s4199_s20  ;;  %v1429_v60 = vadd.f32 1.0, %v3579_v16  ;;  %v3581_v33 = vpop.eup %3580  ;;  %v3300_v45 = vmul.f32 -1.442695, %v4846_v53 }
 0x26a   :  { %3586 = vrcp.f32 %v1426_v15  ;;  %v1427_v41 = vadd.f32 1.0, %v3581_v33  ;;  %v3298_v61 = vmul.f32 -1.442695, %v4849_v17 }
 0x26b   :  { %3588 = vpow2.f32 %v3297_v52 }
 0x26c   :  { %3590 = vrcp.f32 %v1429_v60 }
 0x26d   :  { %3592 = vpow2.f32 %v3300_v45 }
 0x26e   :  { %3594 = vrcp.f32 %v1427_v41 }
 0x26f   :  { %3596 = vpow2.f32 %v3298_v61 }
 0x270   :  { %v3583_v6 = vpop.eup %3582 }
 0x271   :  { %1694 = vrot.lane.b32.xlu0 %v3583_v6, %s4199_s20 }
 0x273   :  { %v3585_v43 = vpop.eup %3584 }
 0x274   :  { %v1432_v42 = vadd.f32 1.0, %v3585_v43  ;;  %v3425_v36 = vpop.f32.mrb[48].mxu1  ;;  %v3587_v19 = vpop.eup %3586 }
 0x275   :  { %v4856_v15 = vadd.f32 %v3425_v36, %v4780_v26  ;;  %v971_v52 = vpop.f32.mrb[49].mxu1  ;;  %v3589_v16 = vpop.eup %3588  ;;  %1690 = vrot.lane.b32.xlu0 %v3587_v19, %s4199_s20 }
 0x276   :  { %3598 = vrcp.f32 %v1432_v42  ;;  %v4859_v33 = vadd.f32 %v4780_v26, %v971_v52  ;;  %v3426_v45 = vpop.f32.mrb[50].mxu1  ;;  %v3591_v60 = vpop.eup %3590  ;;  %v1430_v41 = vadd.f32 1.0, %v3589_v16 }
 0x277   :  { %v3303_v6 = vmul.f32 -1.442695, %v4856_v15  ;;  %v4864_v61 = vadd.f32 %v3426_v45, %v4780_v26  ;;  %v974_v43 = vpop.f32.mrb[51].mxu1  ;;  %1696 = vrot.lane.b32.xlu1 %v3591_v60, %s4199_s20  ;;  %v3593_v52 = vpop.eup %3592 }
 0x278   :  { %v3301_v36 = vmul.f32 -1.442695, %v4859_v33  ;;  %3600 = vrcp.f32 %v1430_v41  ;;  %v4869_v42 = vadd.f32 %v4780_v26, %v974_v43  ;;  %v3595_v23 = vpop.eup %3594  ;;  %v1433_v16 = vadd.f32 1.0, %v3593_v52 }
 0x279   :  { %3602 = vpow2.f32 %v3303_v6  ;;  %v3304_v19 = vmul.f32 -1.442695, %v4864_v61  ;;  %v3597_v22 = vpop.eup %3596 }
 0x27a   :  { %3604 = vpow2.f32 %v3301_v36  ;;  %v1431_v45 = vadd.f32 1.0, %v3597_v22  ;;  %v3302_v60 = vmul.f32 -1.442695, %v4869_v42 }
 0x27b   :  { %1692 = vrot.lane.b32.xlu1 %v3595_v23, %s4199_s20  ;;  %3606 = vrcp.f32 %v1433_v16 }
 0x27c   :  { %3608 = vpow2.f32 %v3304_v19 }
 0x27d   :  { %3610 = vrcp.f32 %v1431_v45 }
 0x27e   :  { %3612 = vpow2.f32 %v3302_v60 }
 0x280   :  { %v3599_v2 = vpop.eup %3598 }
 0x281   :  { %1702 = vrot.lane.b32.xlu0 %v3599_v2, %s4199_s20 }
 0x282   :  { %v3601_v41 = vpop.eup %3600 }
 0x283   :  { %v3603_v6 = vpop.eup %3602 }
 0x284   :  { %v3429_v43 = vpop.f32.mrb[52].mxu1  ;;  %v3605_v59 = vpop.eup %3604  ;;  %v1436_v47 = vadd.f32 1.0, %v3603_v6 }
 0x285   :  { %v4876_v36 = vadd.f32 %v3429_v43, %v4780_v26  ;;  %v987_v52 = vpop.f32.mrb[53].mxu1  ;;  %1698 = vrot.lane.b32.xlu0 %v3601_v41, %s4199_s20  ;;  %v1434_v22 = vadd.f32 1.0, %v3605_v59  ;;  %v3607_v16 = vpop.eup %3606 }
 0x286   :  { %v4880_v23 = vadd.f32 %v4780_v26, %v987_v52  ;;  %v3430_v19 = vpop.f32.mrb[54].mxu1  ;;  %3614 = vrcp.f32 %v1436_v47  ;;  %v3609_v60 = vpop.eup %3608  ;;  %1704 = vrot.lane.b32.xlu1 %v3607_v16, %s4199_s20 }
 0x287   :  { %v3307_v2 = vmul.f32 -1.442695, %v4876_v36  ;;  %v990_v45 = vpop.f32.mrb[55].mxu1  ;;  %v4885_v6 = vadd.f32 %v3430_v19, %v4780_v26  ;;  %3616 = vrcp.f32 %v1434_v22  ;;  %v1437_v43 = vadd.f32 1.0, %v3609_v60  ;;  %v3611_v59 = vpop.eup %3610 }
 0x288   :  { %v3305_v41 = vmul.f32 -1.442695, %v4880_v23  ;;  %v4889_v52 = vadd.f32 %v4780_v26, %v990_v45  ;;  %v3613_v13 = vpop.eup %3612 }
 0x289   :  { %3618 = vpow2.f32 %v3307_v2  ;;  %v1435_v47 = vadd.f32 1.0, %v3613_v13  ;;  %v3308_v39 = vmul.f32 -1.442695, %v4885_v6 }
 0x28a   :  { %3620 = vrcp.f32 %v1437_v43  ;;  %1700 = vrot.lane.b32.xlu1 %v3611_v59, %s4199_s20  ;;  %v3306_v19 = vmul.f32 -1.442695, %v4889_v52 }
 0x28b   :  { %3622 = vpow2.f32 %v3305_v41 }
 0x28c   :  { %3624 = vrcp.f32 %v1435_v47 }
 0x28d   :  { %3626 = vpow2.f32 %v3308_v39 }
 0x28e   :  { %3628 = vpow2.f32 %v3306_v19 }
 0x290   :  { %v3615_v22 = vpop.eup %3614 }
 0x291   :  { %1710 = vrot.lane.b32.xlu0 %v3615_v22, %s4199_s20  ;;  %v3617_v16 = vpop.eup %3616 }
 0x293   :  { %v3619_v2 = vpop.eup %3618 }
 0x294   :  { %v3433_v45 = vpop.f32.mrb[56].mxu1  ;;  %v3621_v60 = vpop.eup %3620  ;;  %v1440_v32 = vadd.f32 1.0, %v3619_v2 }
 0x295   :  { %v4896_v13 = vadd.f32 %v3433_v45, %v4780_v26  ;;  %v1003_v43 = vpop.f32.mrb[57].mxu1  ;;  %1712 = vrot.lane.b32.xlu1 %v3621_v60, %s4199_s20  ;;  %1706 = vrot.lane.b32.xlu0 %v3617_v16, %s4199_s20  ;;  %v3623_v59 = vpop.eup %3622 }
 0x296   :  { %v4900_v41 = vadd.f32 %v4780_v26, %v1003_v43  ;;  %v3434_v39 = vpop.f32.mrb[58].mxu1  ;;  %3630 = vrcp.f32 %v1440_v32  ;;  %v1438_v22 = vadd.f32 1.0, %v3623_v59  ;;  %v3625_v24 = vpop.eup %3624 }
 0x297   :  { %v3311_v47 = vmul.f32 -1.442695, %v4896_v13  ;;  %v1006_v19 = vpop.f32.mrb[59].mxu1  ;;  %v4906_v45 = vadd.f32 %v3434_v39, %v4780_v26  ;;  %v3627_v60 = vpop.eup %3626 }
 0x298   :  { %6618 = vst [vmem:[#allocation84_spill] sm:$0xff] %v4900_v41  ;;  %v3309_v2 = vmul.f32 -1.442695, %v4900_v41  ;;  %v4909_v43 = vadd.f32 %v4780_v26, %v1006_v19  ;;  %v1441_v16 = vadd.f32 1.0, %v3627_v60  ;;  %v3629_v32 = vpop.eup %3628 }
 0x299   :  { %3632 = vpow2.f32 %v3311_v47  ;;  %1708 = vrot.lane.b32.xlu1 %v3625_v24, %s4199_s20  ;;  %v3312_v7 = vmul.f32 -1.442695, %v4906_v45  ;;  %v1439_v59 = vadd.f32 1.0, %v3629_v32 }
 0x29a   :  { %6619 = vst [vmem:[#allocation85_spill] sm:$0xff] %v4909_v43  ;;  %3634 = vrcp.f32 %v1438_v22  ;;  %v3310_v50 = vmul.f32 -1.442695, %v4909_v43 }
 0x29b   :  { %3636 = vpow2.f32 %v3309_v2 }
 0x29c   :  { %3638 = vrcp.f32 %v1441_v16 }
 0x29d   :  { %3640 = vpow2.f32 %v3312_v7 }
 0x29e   :  { %3642 = vrcp.f32 %v1439_v59 }
 0x29f   :  { %3644 = vpow2.f32 %v3310_v50 }
 0x2a0   :  { %v3631_v39 = vpop.eup %3630 }
 0x2a1   :  { %1718 = vrot.lane.b32.xlu0 %v3631_v39, %s4199_s20 }
 0x2a3   :  { %v3633_v47 = vpop.eup %3632 }
 0x2a4   :  { %v1444_v19 = vadd.f32 1.0, %v3633_v47  ;;  %v3437_v8 = vpop.f32.mrb[60].mxu1  ;;  %v3635_v24 = vpop.eup %3634 }
 0x2a5   :  { %v4916_v22 = vadd.f32 %v3437_v8, %v4780_v26  ;;  %v1019_v2 = vpop.f32.mrb[61].mxu1  ;;  %v3637_v60 = vpop.eup %3636  ;;  %1714 = vrot.lane.b32.xlu0 %v3635_v24, %s4199_s20 }
 0x2a6   :  { %3646 = vrcp.f32 %v1444_v19  ;;  %v4919_v16 = vadd.f32 %v4780_v26, %v1019_v2  ;;  %v3438_v7 = vpop.f32.mrb[62].mxu1  ;;  %v3639_v32 = vpop.eup %3638  ;;  %v1442_v50 = vadd.f32 1.0, %v3637_v60 }
 0x2a7   :  { %6620 = vst [vmem:[#allocation86_spill] sm:$0xff] %v4916_v22  ;;  %v3315_v59 = vmul.f32 -1.442695, %v4916_v22  ;;  %v4924_v39 = vadd.f32 %v3438_v7, %v4780_v26  ;;  %v1022_v47 = vpop.f32.mrb[63].mxu1  ;;  %1720 = vrot.lane.b32.xlu1 %v3639_v32, %s4199_s20  ;;  %v3641_v2 = vpop.eup %3640 }
 0x2a8   :  { %6621 = vst [vmem:[#allocation87_spill] sm:$0xff] %v4919_v16  ;;  %v3313_v8 = vmul.f32 -1.442695, %v4919_v16  ;;  %3648 = vrcp.f32 %v1442_v50  ;;  %v4929_v19 = vadd.f32 %v4780_v26, %v1022_v47  ;;  %v3643_v10 = vpop.eup %3642  ;;  %v1445_v60 = vadd.f32 1.0, %v3641_v2 }
 0x2a9   :  { %6622 = vst [vmem:[#allocation88_spill] sm:$0xff] %v4924_v39  ;;  %3650 = vpow2.f32 %v3315_v59  ;;  %v3316_v24 = vmul.f32 -1.442695, %v4924_v39  ;;  %v3645_v57 = vpop.eup %3644 }
 0x2aa   :  { %6623 = vst [vmem:[#allocation89_spill] sm:$0xff] %v4929_v19  ;;  %3652 = vpow2.f32 %v3313_v8  ;;  %v1443_v7 = vadd.f32 1.0, %v3645_v57  ;;  %v3314_v32 = vmul.f32 -1.442695, %v4929_v19 }
 0x2ab   :  { %1716 = vrot.lane.b32.xlu1 %v3643_v10, %s4199_s20  ;;  %3654 = vrcp.f32 %v1445_v60 }
 0x2ac   :  { %3656 = vpow2.f32 %v3316_v24 }
 0x2ad   :  { %3658 = vrcp.f32 %v1443_v7 }
 0x2ae   :  { %3660 = vpow2.f32 %v3314_v32 }
 0x2b0   :  { %v3647_v20 = vpop.eup %3646 }
 0x2b1   :  { %1726 = vrot.lane.b32.xlu0 %v3647_v20, %s4199_s20 }
 0x2b2   :  { %v3649_v50 = vpop.eup %3648 }
 0x2b3   :  { %v3651_v59 = vpop.eup %3650 }
 0x2b4   :  { %v3441_v47 = vpop.f32.mrb[64].mxu1  ;;  %v3653_v11 = vpop.eup %3652  ;;  %v1448_v63 = vadd.f32 1.0, %v3651_v59 }
 0x2b5   :  { %1722 = vrot.lane.b32.xlu0 %v3649_v50, %s4199_s20  ;;  %v1035_v8 = vpop.f32.mrb[65].mxu1  ;;  %v1446_v2 = vadd.f32 1.0, %v3653_v11  ;;  %v3655_v60 = vpop.eup %3654  ;;  %v4971_v29 = vadd.f32 %v3441_v47, %v4780_v26 }
 0x2b6   :  { %v3442_v10 = vpop.f32.mrb[66].mxu1  ;;  %3662 = vrcp.f32 %v1448_v63  ;;  %v3657_v54 = vpop.eup %3656  ;;  %1728 = vrot.lane.b32.xlu1 %v3655_v60, %s4199_s20  ;;  %v4980_v3 = vadd.f32 %v4780_v26, %v1035_v8 }
 0x2b7   :  { %v1038_v57 = vpop.f32.mrb[67].mxu1  ;;  %v1449_v24 = vadd.f32 1.0, %v3657_v54  ;;  %v3659_v7 = vpop.eup %3658  ;;  %3664 = vrcp.f32 %v1446_v2  ;;  %6625 = vst [vmem:[#allocation91_spill] sm:$0xff] %v4971_v29 }
 0x2b8   :  { %v3661_v20 = vpop.eup %3660  ;;  %v4975_v18 = vadd.f32 %v4780_v26, %v1038_v57  ;;  %6627 = vst [vmem:[#allocation93_spill] sm:$0xff] %v4980_v3  ;;  %v3317_v8 = vmul.f32 -1.442695, %v4980_v3 }
 0x2b9   :  { %3666 = vrcp.f32 %v1449_v24  ;;  %v1447_v32 = vadd.f32 1.0, %v3661_v20 }
 0x2ba   :  { %1724 = vrot.lane.b32.xlu1 %v3659_v7, %s4199_s20  ;;  %6626 = vst [vmem:[#allocation92_spill] sm:$0xff] %v4975_v18  ;;  %v3318_v47 = vmul.f32 -1.442695, %v4975_v18 }
 0x2bb   :  { %3668 = vrcp.f32 %v1447_v32 }
 0x2bc   :  { %3670 = vtanh.f32 %v4783_v38 }
 0x2bd   :  { %3672 = vtanh.f32 %v4790_v48  ;;  %v4968_v48 = vld [vmem:[%s6387_s5] ss:$0 sm:$0xff] }
 0x2be   :  { %3674 = vtanh.f32 %v4787_v1 }
 0x2bf   :  { %3676 = vtanh.f32 %v4795_v30 }
 0x2c0   :  { %v3663_v59 = vpop.eup %3662 }
 0x2c1   :  { %1734 = vrot.lane.b32.xlu0 %v3663_v59, %s4199_s20  ;;  %v3665_v11 = vpop.eup %3664 }
 0x2c3   :  { %v3667_v63 = vpop.eup %3666  ;;  %v1679_v59 = vpop.permute.xlu1 %1678 }
 0x2c4   :  { %v4939_v50 = vpop.f32.mrb[68].mxu1  ;;  %1736 = vrot.lane.b32.xlu1 %v3667_v63, %s4199_s20  ;;  %v4963_v63 = vadd.f32 %v3442_v10, %v4780_v26 }
 0x2c5   :  { %v4941_v35 = vpop.f32.mrb[69].mxu1  ;;  %1730 = vrot.lane.b32.xlu0 %v3665_v11, %s4199_s20  ;;  %v3669_v60 = vpop.eup %3668 }
 0x2c6   :  { %v4945_v54 = vpop.f32.mrb[70].mxu1  ;;  %v3671_v11 = vpop.eup %3670  ;;  %6624 = vst [vmem:[#allocation90_spill] sm:$0xff] %v4963_v63  ;;  %v3320_v1 = vmul.f32 -1.442695, %v4963_v63  ;;  %v5055_v39 = vadd.f32 %v4780_v26, %v4941_v35 }
 0x2c7   :  { %v4947_v2 = vpop.f32.mrb[71].mxu1  ;;  %v1868_v38 = vmul.f32 %v3671_v11, %v1679_v59  ;;  %v3673_v21 = vpop.eup %3672  ;;  %v3319_v11 = vmul.f32 -1.442695, %v4971_v29  ;;  %v5045_v29 = vadd.f32 %v4939_v50, %v4780_v26 }
 0x2c8   :  { %1732 = vrot.lane.b32.xlu1 %v3669_v60, %s4199_s20  ;;  %v1681_v12 = vpop.permute.xlu1 %1680  ;;  %v3675_v9 = vpop.eup %3674  ;;  %3678 = vpow2.f32 %v3320_v1 }
 0x2c9   :  { %v1939_v10 = vmul.f32 %v4968_v48, %v1868_v38  ;;  %v3677_v0 = vpop.eup %3676  ;;  %v1869_v58 = vmul.f32 %v3675_v9, %v1681_v12  ;;  %3680 = vpow2.f32 %v3319_v11 }
 0x2ca   :  { %v1675_v60 = vpop.permute.xlu0 %1674  ;;  %3682 = vpow2.f32 %v3318_v47 }
 0x2cb   :  { %v1866_v30 = vmul.f32 %v3673_v21, %v1675_v60  ;;  %v2008_v57 = vsel %vm2001_vm0, %v1939_v10, 0.0  ;;  %v1940_v12 = vmul.f32 %v4968_v48, %v1869_v58  ;;  %3684 = vpow2.f32 %v3317_v8 }
 0x2cd   :  { %v1937_v21 = vmul.f32 %v4968_v48, %v1866_v30 }
 0x2ce   :  { %v1677_v59 = vpop.permute.xlu0 %1676 }
 0x2cf   :  { %v1867_v38 = vmul.f32 %v3677_v0, %v1677_v59  ;;  %v2002_v9 = vsel %vm2001_vm0, %v1937_v21, 0.0  ;;  %v2011_v0 = vsel %vm2001_vm0, %v1940_v12, 0.0 }
 0x2d1   :  { %v1938_v30 = vmul.f32 %v4968_v48, %v1867_v38 }
 0x2d2   :  { %v3679_v59 = vpop.eup %3678 }
 0x2d3   :  { %v2005_v11 = vsel %vm2001_vm0, %v1938_v30, 0.0  ;;  %v3681_v58 = vpop.eup %3680 }
 0x2d4   :  { %v4951_v24 = vpop.f32.mrb[72].mxu1  ;;  %v3683_v46 = vpop.eup %3682  ;;  %v1452_v38 = vadd.f32 1.0, %v3681_v58 }
 0x2d5   :  { %v4954_v7 = vpop.f32.mrb[73].mxu1  ;;  %v1451_v8 = vadd.f32 1.0, %v3683_v46  ;;  %v3685_v40 = vpop.eup %3684 }
 0x2d6   :  { %v4956_v20 = vpop.f32.mrb[74].mxu1 }
 0x2d7   :  { %v4958_v32 = vpop.f32.mrb[75].mxu1 }
 0x2e4   :  { %v4985_v60 = vpop.f32.mrb[76].mxu1  ;;  %2009 = vadd.xlane.f32.xlu0 %v2008_v57 }
 0x2e5   :  { %v4987_v55 = vpop.f32.mrb[77].mxu1 }
 0x2e6   :  { %v4989_v49 = vpop.f32.mrb[78].mxu1 }
 0x2e7   :  { %v4992_v1 = vpop.f32.mrb[79].mxu1 }
 0x2e8   :  { %2003 = vadd.xlane.f32.xlu0 %v2002_v9  ;;  %v1453_v9 = vadd.f32 1.0, %v3679_v59 }
 0x2ea   :  { %3686 = vrcp.f32 %v1453_v9 }
 0x2eb   :  { %3688 = vrcp.f32 %v1452_v38 }
 0x2ec   :  { %v4998_v10 = vpop.f32.mrb[80].mxu1  ;;  %2012 = vadd.xlane.f32.xlu0 %v2011_v0  ;;  %2006 = vadd.xlane.f32.xlu1 %v2005_v11  ;;  %v1450_v11 = vadd.f32 1.0, %v3685_v40  ;;  %3690 = vrcp.f32 %v1451_v8 }
 0x2ed   :  { %v5001_v57 = vpop.f32.mrb[81].mxu1 }
 0x2ee   :  { %v5003_v47 = vpop.f32.mrb[82].mxu1  ;;  %3692 = vrcp.f32 %v1450_v11 }
 0x2ef   :  { %v5005_v21 = vpop.f32.mrb[83].mxu1  ;;  %3694 = vtanh.f32 %v4806_v25 }
 0x2f0   :  { %3696 = vtanh.f32 %v4799_v62  ;;  %v5050_v62 = vadd.f32 %v4780_v26, %v4947_v2 }
 0x2f1   :  { %3698 = vtanh.f32 %v4810_v4 }
 0x2f2   :  { %3700 = vtanh.f32 %v4802_v14  ;;  %v3322_v50 = vmul.f32 -1.442695, %v5050_v62 }
 0x2f4   :  { %v5007_v12 = vpop.f32.mrb[84].mxu1  ;;  %v3687_v58 = vpop.eup %3686 }
 0x2f5   :  { %v5009_v37 = vpop.f32.mrb[85].mxu1  ;;  %v3689_v31 = vpop.eup %3688 }
 0x2f6   :  { %v5011_v30 = vpop.f32.mrb[86].mxu1  ;;  %v3691_v3 = vpop.eup %3690 }
 0x2f7   :  { %v5013_v0 = vpop.f32.mrb[87].mxu1 }
 0x2f8   :  { %v3693_v8 = vpop.eup %3692 }
 0x2fc   :  { %v5015_v28 = vpop.f32.mrb[88].mxu1 }
 0x2fd   :  { %v5017_v59 = vpop.f32.mrb[89].mxu1  ;;  %1744 = vrot.lane.b32.xlu1 %v3687_v58, %s4199_s20  ;;  %v1687_v58 = vpop.permute.xlu0 %1686 }
 0x2fe   :  { %v5019_v9 = vpop.f32.mrb[90].mxu1 }
 0x2ff   :  { %v5022_v46 = vpop.f32.mrb[91].mxu1 }
 0x301   :  { %1740 = vrot.lane.b32.xlu1 %v3691_v3, %s4199_s20  ;;  %v5041_v3 = vadd.f32 %v4945_v54, %v4780_v26  ;;  %v1683_v19 = vpop.permute.xlu0 %1682  ;;  %v3323_v54 = vmul.f32 -1.442695, %v5045_v29 }
 0x302   :  { %1742 = vrot.lane.b32.xlu0 %v3689_v31, %s4199_s20  ;;  %v1689_v31 = vpop.permute.xlu1 %1688 }
 0x303   :  { %6628 = vst [vmem:[#allocation94_spill] sm:$0xff] %v5041_v3  ;;  %v3324_v63 = vmul.f32 -1.442695, %v5041_v3 }
 0x304   :  { %v5026_v40 = vpop.f32.mrb[92].mxu1 }
 0x305   :  { %v5028_v38 = vpop.f32.mrb[93].mxu1  ;;  %3702 = vpow2.f32 %v3324_v63 }
 0x306   :  { %v5030_v11 = vpop.f32.mrb[94].mxu1  ;;  %1738 = vrot.lane.b32.xlu0 %v3693_v8, %s4199_s20  ;;  %v3695_v8 = vpop.eup %3694  ;;  %3704 = vpow2.f32 %v3323_v54 }
 0x307   :  { %v5033_v18 = vpop.f32.mrb[95].mxu1  ;;  %v3697_v25 = vpop.eup %3696  ;;  %v1873_v4 = vmul.f32 %v3695_v8, %v1689_v31  ;;  %3706 = vpow2.f32 %v3322_v50 }
 0x308   :  { %v1872_v14 = vmul.f32 %v3697_v25, %v1687_v58  ;;  %v1685_v16 = vpop.permute.xlu1 %1684  ;;  %v3699_v22 = vpop.eup %3698  ;;  %v3321_v58 = vmul.f32 -1.442695, %v5055_v39 }
 0x309   :  { %v3701_v3 = vpop.eup %3700  ;;  %v1871_v41 = vmul.f32 %v3699_v22, %v1685_v16  ;;  %v1944_v2 = vmul.f32 %v4968_v48, %v1873_v4 }
 0x30a   :  { %v1870_v43 = vmul.f32 %v3701_v3, %v1683_v19  ;;  %v1943_v31 = vmul.f32 %v4968_v48, %v1872_v14  ;;  %3708 = vpow2.f32 %v3321_v58 }
 0x30b   :  { %v2023_v8 = vsel %vm2001_vm0, %v1944_v2, 0.0  ;;  %v1942_v25 = vmul.f32 %v4968_v48, %v1871_v41 }
 0x30c   :  { %v2020_v35 = vsel %vm2001_vm0, %v1943_v31, 0.0  ;;  %v1941_v63 = vmul.f32 %v4968_v48, %v1870_v43 }
 0x30d   :  { %v2017_v22 = vsel %vm2001_vm0, %v1942_v25, 0.0  ;;  %v1697_v25 = vpop.permute.xlu1 %1696 }
 0x30e   :  { %v2014_v19 = vsel %vm2001_vm0, %v1941_v63, 0.0  ;;  %v1695_v63 = vpop.permute.xlu0 %1694 }
 0x30f   :  { %v3703_v16 = vpop.eup %3702 }
 0x310   :  { %v3705_v3 = vpop.eup %3704  ;;  %v1457_v4 = vadd.f32 1.0, %v3703_v16 }
 0x311   :  { %v3707_v14 = vpop.eup %3706  ;;  %v1456_v54 = vadd.f32 1.0, %v3705_v3  ;;  %v1693_v3 = vpop.permute.xlu1 %1692 }
 0x312   :  { %3710 = vrcp.f32 %v1457_v4  ;;  %v1455_v41 = vadd.f32 1.0, %v3707_v14 }
 0x313   :  { %3712 = vrcp.f32 %v1456_v54  ;;  %v5091_v54 = vadd.f32 %v4780_v26, %v4954_v7 }
 0x314   :  { %v3709_v50 = vpop.eup %3708  ;;  %3714 = vrcp.f32 %v1455_v41 }
 0x315   :  { %v1454_v2 = vadd.f32 1.0, %v3709_v50 }
 0x317   :  { %3716 = vrcp.f32 %v1454_v2 }
 0x318   :  { %3718 = vtanh.f32 %v4824_v27  ;;  %v5086_v27 = vadd.f32 %v4780_v26, %v4958_v32 }
 0x319   :  { %3720 = vtanh.f32 %v4816_v44 }
 0x31a   :  { %3722 = vtanh.f32 %v4828_v5 }
 0x31b   :  { %3724 = vtanh.f32 %v4820_v56 }
 0x31c   :  { %v3711_v43 = vpop.eup %3710 }
 0x31d   :  { %v3713_v31 = vpop.eup %3712 }
 0x31e   :  { %v3715_v58 = vpop.eup %3714 }
 0x325   :  { %2024 = vadd.xlane.f32.xlu0 %v2023_v8  ;;  %2021 = vadd.xlane.f32.xlu1 %v2020_v35  ;;  %v3717_v8 = vpop.eup %3716  ;;  %v5077_v35 = vadd.f32 %v4956_v20, %v4780_v26  ;;  %v1691_v20 = vpop.permute.xlu0 %1690 }
 0x326   :  { %v3719_v16 = vpop.eup %3718 }
 0x327   :  { %v3721_v5 = vpop.eup %3720  ;;  %v1877_v44 = vmul.f32 %v3719_v16, %v1697_v25 }
 0x328   :  { %v1876_v56 = vmul.f32 %v3721_v5, %v1695_v63  ;;  %v3723_v14 = vpop.eup %3722 }
 0x329   :  { %2018 = vadd.xlane.f32.xlu0 %v2017_v22  ;;  %2015 = vadd.xlane.f32.xlu1 %v2014_v19  ;;  %v5081_v22 = vadd.f32 %v4951_v24, %v4780_v26  ;;  %v3328_v19 = vmul.f32 -1.442695, %v5077_v35  ;;  %v3326_v24 = vmul.f32 -1.442695, %v5086_v27  ;;  %v3725_v41 = vpop.eup %3724  ;;  %v1875_v50 = vmul.f32 %v3723_v14, %v1693_v3 }
 0x32a   :  { %v1948_v32 = vmul.f32 %v4968_v48, %v1877_v44  ;;  %v1874_v2 = vmul.f32 %v3725_v41, %v1691_v20 }
 0x32b   :  { %v3327_v4 = vmul.f32 -1.442695, %v5081_v22  ;;  %3726 = vpow2.f32 %v3328_v19 }
 0x32c   :  { %v1945_v25 = vmul.f32 %v4968_v48, %v1874_v2  ;;  %v5113_v2 = vadd.f32 %v4989_v49, %v4780_v26 }
 0x32d   :  { %3728 = vpow2.f32 %v3327_v4 }
 0x32e   :  { %3730 = vpow2.f32 %v3326_v24  ;;  %v2026_v19 = vsel %vm2001_vm0, %v1945_v25, 0.0 }
 0x335   :  { %v3727_v16 = vpop.eup %3726 }
 0x336   :  { %v1461_v44 = vadd.f32 1.0, %v3727_v16 }
 0x337   :  { %v3729_v5 = vpop.eup %3728 }
 0x338   :  { %v1460_v3 = vadd.f32 1.0, %v3729_v5 }
 0x33a   :  { %1752 = vrot.lane.b32.xlu1 %v3711_v43, %s4199_s20  ;;  %v1947_v43 = vmul.f32 %v4968_v48, %v1876_v56  ;;  %v3731_v56 = vpop.eup %3730 }
 0x33b   :  { %v1459_v4 = vadd.f32 1.0, %v3731_v56 }
 0x33c   :  { %v2032_v7 = vsel %vm2001_vm0, %v1947_v43, 0.0  ;;  %v1705_v43 = vpop.permute.xlu1 %1704 }
 0x33e   :  { %1748 = vrot.lane.b32.xlu1 %v3715_v58, %s4199_s20  ;;  %v2035_v58 = vsel %vm2001_vm0, %v1948_v32, 0.0 }
 0x33f   :  { %1750 = vrot.lane.b32.xlu0 %v3713_v31, %s4199_s20  ;;  %v3325_v31 = vmul.f32 -1.442695, %v5091_v54 }
 0x340   :  { %v1701_v25 = vpop.permute.xlu1 %1700 }
 0x341   :  { %3732 = vpow2.f32 %v3325_v31  ;;  %v1703_v31 = vpop.permute.xlu0 %1702 }
 0x342   :  { %3734 = vrcp.f32 %v1461_v44 }
 0x343   :  { %1746 = vrot.lane.b32.xlu0 %v3717_v8, %s4199_s20  ;;  %v1946_v8 = vmul.f32 %v4968_v48, %v1875_v50  ;;  %3736 = vrcp.f32 %v1460_v3 }
 0x344   :  { %3738 = vrcp.f32 %v1459_v4 }
 0x345   :  { %v2029_v63 = vsel %vm2001_vm0, %v1946_v8, 0.0 }
 0x34b   :  { %v3733_v20 = vpop.eup %3732 }
 0x34c   :  { %v1458_v14 = vadd.f32 1.0, %v3733_v20  ;;  %v3735_v24 = vpop.eup %3734 }
 0x34d   :  { %v3737_v41 = vpop.eup %3736 }
 0x34e   :  { %3740 = vrcp.f32 %v1458_v14  ;;  %v3739_v50 = vpop.eup %3738 }
 0x34f   :  { %3742 = vtanh.f32 %v4846_v53 }
 0x350   :  { %3744 = vtanh.f32 %v4836_v51  ;;  %v5123_v51 = vld [vmem:[%s6386_s4] ss:$0 sm:$0xff] }
 0x351   :  { %3746 = vtanh.f32 %v4849_v17  ;;  %v5132_v16 = vadd.f32 %v5123_v51, %v4987_v55  ;;  %v5140_v20 = vadd.f32 %v5123_v51, %v4998_v10 }
 0x352   :  { %3748 = vtanh.f32 %v4840_v34  ;;  %v5127_v34 = vadd.f32 %v5123_v51, %v4992_v1 }
 0x353   :  { %v3329_v4 = vmul.f32 -1.442695, %v5132_v16 }
 0x358   :  { %v3741_v32 = vpop.eup %3740 }
 0x359   :  { %v3743_v8 = vpop.eup %3742 }
 0x35a   :  { %v3745_v49 = vpop.eup %3744  ;;  %v1881_v53 = vmul.f32 %v3743_v8, %v1705_v43 }
 0x35b   :  { %v1880_v17 = vmul.f32 %v3745_v49, %v1703_v31 }
 0x35c   :  { %v1952_v1 = vmul.f32 %v4968_v48, %v1881_v53 }
 0x35d   :  { %v1951_v3 = vmul.f32 %v4968_v48, %v1880_v17 }
 0x35e   :  { %v2047_v55 = vsel %vm2001_vm0, %v1952_v1, 0.0 }
 0x362   :  { %2036 = vadd.xlane.f32.xlu0 %v2035_v58  ;;  %2033 = vadd.xlane.f32.xlu1 %v2032_v7  ;;  %v5117_v58 = vadd.f32 %v4985_v60, %v4780_v26  ;;  %v3332_v7 = vmul.f32 -1.442695, %v5113_v2  ;;  %v1699_v26 = vpop.permute.xlu0 %1698  ;;  %v3747_v60 = vpop.eup %3746 }
 0x363   :  { %v3749_v5 = vpop.eup %3748  ;;  %v1879_v44 = vmul.f32 %v3747_v60, %v1701_v25 }
 0x364   :  { %3750 = vpow2.f32 %v3332_v7  ;;  %v1878_v56 = vmul.f32 %v3749_v5, %v1699_v26 }
 0x365   :  { %v1950_v14 = vmul.f32 %v4968_v48, %v1879_v44 }
 0x366   :  { %2030 = vadd.xlane.f32.xlu0 %v2029_v63  ;;  %2027 = vadd.xlane.f32.xlu1 %v2026_v19  ;;  %v3331_v63 = vmul.f32 -1.442695, %v5117_v58  ;;  %v3330_v19 = vmul.f32 -1.442695, %v5127_v34 }
 0x367   :  { %v2041_v10 = vsel %vm2001_vm0, %v1950_v14, 0.0  ;;  %v5164_v14 = vadd.f32 %v5123_v51, %v5003_v47  ;;  %v5176_v47 = vadd.f32 %v5123_v51, %v5011_v30 }
 0x368   :  { %3752 = vpow2.f32 %v3331_v63 }
 0x369   :  { %3754 = vpow2.f32 %v3330_v19 }
 0x36a   :  { %3756 = vpow2.f32 %v3329_v4 }
 0x36e   :  { %v3751_v43 = vpop.eup %3750 }
 0x36f   :  { %v1465_v49 = vadd.f32 1.0, %v3751_v43 }
 0x372   :  { %v3753_v7 = vpop.eup %3752 }
 0x373   :  { %v3755_v53 = vpop.eup %3754  ;;  %v1464_v17 = vadd.f32 1.0, %v3753_v7 }
 0x374   :  { %v1463_v25 = vadd.f32 1.0, %v3755_v53  ;;  %v3757_v63 = vpop.eup %3756  ;;  %v5186_v53 = vadd.f32 %v5123_v51, %v5013_v0 }
 0x377   :  { %1760 = vrot.lane.b32.xlu1 %v3735_v24, %s4199_s20  ;;  %v2044_v24 = vsel %vm2001_vm0, %v1951_v3, 0.0 }
 0x37b   :  { %1756 = vrot.lane.b32.xlu1 %v3739_v50, %s4199_s20  ;;  %v3335_v50 = vmul.f32 -1.442695, %v5140_v20 }
 0x37c   :  { %1758 = vrot.lane.b32.xlu0 %v3737_v41, %s4199_s20  ;;  %v1949_v41 = vmul.f32 %v4968_v48, %v1878_v56 }
 0x37d   :  { %3758 = vpow2.f32 %v3335_v50  ;;  %v5170_v50 = vadd.f32 %v5123_v51, %v5005_v21  ;;  %v5181_v21 = vadd.f32 %v5123_v51, %v5007_v12  ;;  %v5193_v12 = vadd.f32 %v5123_v51, %v5009_v37 }
 0x37e   :  { %v2038_v31 = vsel %vm2001_vm0, %v1949_v41, 0.0  ;;  %v3336_v41 = vmul.f32 -1.442695, %v5164_v14 }
 0x380   :  { %1754 = vrot.lane.b32.xlu0 %v3741_v32, %s4199_s20  ;;  %v5149_v32 = vadd.f32 %v5123_v51, %v5001_v57  ;;  %v1462_v57 = vadd.f32 1.0, %v3757_v63 }
 0x382   :  { %v3333_v8 = vmul.f32 -1.442695, %v5149_v32 }
 0x384   :  { %3760 = vpow2.f32 %v3333_v8 }
 0x385   :  { %3762 = vrcp.f32 %v1465_v49 }
 0x386   :  { %3764 = vrcp.f32 %v1464_v17 }
 0x387   :  { %3766 = vrcp.f32 %v1463_v25  ;;  %v3759_v26 = vpop.eup %3758 }
 0x388   :  { %3768 = vrcp.f32 %v1462_v57  ;;  %v1468_v60 = vadd.f32 1.0, %v3759_v26  ;;  %v3339_v57 = vmul.f32 -1.442695, %v5181_v21 }
 0x38a   :  { %3770 = vrcp.f32 %v1468_v60  ;;  %v3338_v60 = vmul.f32 -1.442695, %v5186_v53 }
 0x38e   :  { %v3761_v19 = vpop.eup %3760 }
 0x38f   :  { %v3763_v5 = vpop.eup %3762  ;;  %v1466_v44 = vadd.f32 1.0, %v3761_v19 }
 0x390   :  { %v3765_v1 = vpop.eup %3764 }
 0x391   :  { %v3767_v56 = vpop.eup %3766  ;;  %3772 = vrcp.f32 %v1466_v44 }
 0x392   :  { %v3769_v3 = vpop.eup %3768  ;;  %3774 = vtanh.f32 %v4856_v15 }
 0x393   :  { %3776 = vtanh.f32 %v4859_v33  ;;  %v3334_v33 = vmul.f32 -1.442695, %v5170_v50 }
 0x394   :  { %v3771_v4 = vpop.eup %3770  ;;  %3778 = vtanh.f32 %v4864_v61 }
 0x395   :  { %3780 = vtanh.f32 %v4869_v42  ;;  %v3340_v42 = vmul.f32 -1.442695, %v5176_v47 }
 0x396   :  { %3782 = vpow2.f32 %v3336_v41  ;;  %v5208_v41 = vadd.f32 %v5123_v51, %v5017_v59 }
 0x397   :  { %3784 = vpow2.f32 %v3334_v33 }
 0x398   :  { %3786 = vpow2.f32 %v3340_v42 }
 0x399   :  { %3788 = vpow2.f32 %v3339_v57 }
 0x39a   :  { %3790 = vpow2.f32 %v3338_v60 }
 0x39f   :  { %2048 = vadd.xlane.f32.xlu0 %v2047_v55  ;;  %2045 = vadd.xlane.f32.xlu1 %v2044_v24  ;;  %v3773_v55 = vpop.eup %3772  ;;  %v1711_v24 = vpop.permute.xlu0 %1710 }
 0x3a3   :  { %2042 = vadd.xlane.f32.xlu0 %v2041_v10  ;;  %2039 = vadd.xlane.f32.xlu1 %v2038_v31  ;;  %v3775_v10 = vpop.eup %3774  ;;  %v1707_v15 = vpop.permute.xlu0 %1706 }
 0x3a4   :  { %v1884_v43 = vmul.f32 %v3775_v10, %v1711_v24  ;;  %v1713_v31 = vpop.permute.xlu1 %1712  ;;  %v3777_v61 = vpop.eup %3776 }
 0x3a5   :  { %v1882_v8 = vmul.f32 %v3777_v61, %v1707_v15  ;;  %v3779_v49 = vpop.eup %3778  ;;  %v3341_v15 = vmul.f32 -1.442695, %v5208_v41 }
 0x3a6   :  { %v1955_v7 = vmul.f32 %v4968_v48, %v1884_v43  ;;  %v1885_v17 = vmul.f32 %v3779_v49, %v1713_v31  ;;  %v3781_v26 = vpop.eup %3780 }
 0x3a7   :  { %v1953_v63 = vmul.f32 %v4968_v48, %v1882_v8 }
 0x3a8   :  { %v1709_v30 = vpop.permute.xlu1 %1708  ;;  %v2056_v25 = vsel %vm2001_vm0, %v1955_v7, 0.0  ;;  %v1956_v0 = vmul.f32 %v4968_v48, %v1885_v17 }
 0x3a9   :  { %v1883_v19 = vmul.f32 %v3781_v26, %v1709_v30  ;;  %v2050_v44 = vsel %vm2001_vm0, %v1953_v63, 0.0  ;;  %v1719_v26 = vpop.permute.xlu0 %1718 }
 0x3b4   :  { %1768 = vrot.lane.b32.xlu1 %v3763_v5, %s4199_s20  ;;  %v3783_v5 = vpop.eup %3782 }
 0x3b5   :  { %v1469_v37 = vadd.f32 1.0, %v3783_v5  ;;  %v1715_v5 = vpop.permute.xlu0 %1714 }
 0x3b8   :  { %1764 = vrot.lane.b32.xlu1 %v3767_v56, %s4199_s20  ;;  %v5201_v56 = vadd.f32 %v5123_v51, %v5015_v28 }
 0x3b9   :  { %1766 = vrot.lane.b32.xlu0 %v3765_v1, %s4199_s20  ;;  %v3337_v1 = vmul.f32 -1.442695, %v5193_v12 }
 0x3ba   :  { %v3343_v24 = vmul.f32 -1.442695, %v5201_v56 }
 0x3bb   :  { %3792 = vpow2.f32 %v3337_v1  ;;  %v5218_v1 = vpop.permute.xlu0 %1726 }
 0x3bc   :  { %3794 = vrcp.f32 %v1469_v37 }
 0x3bd   :  { %1762 = vrot.lane.b32.xlu0 %v3769_v3, %s4199_s20  ;;  %v2059_v3 = vsel %vm2001_vm0, %v1956_v0, 0.0  ;;  %3796 = vpow2.f32 %v3343_v24 }
 0x3c1   :  { %1774 = vrot.lane.b32.xlu0 %v3771_v4, %s4199_s20  ;;  %v1954_v4 = vmul.f32 %v4968_v48, %v1883_v19 }
 0x3c3   :  { %v2053_v43 = vsel %vm2001_vm0, %v1954_v4, 0.0 }
 0x3c5   :  { %1770 = vrot.lane.b32.xlu0 %v3773_v55, %s4199_s20  ;;  %v3785_v55 = vpop.eup %3784 }
 0x3c6   :  { %v1467_v10 = vadd.f32 1.0, %v3785_v55  ;;  %v3787_v28 = vpop.eup %3786  ;;  %v5221_v55 = vpop.permute.xlu0 %1722 }
 0x3c7   :  { %v3789_v33 = vpop.eup %3788  ;;  %v1473_v31 = vadd.f32 1.0, %v3787_v28  ;;  %v5232_v28 = vadd.f32 %v5123_v51, %v5019_v9 }
 0x3c8   :  { %3798 = vrcp.f32 %v1467_v10  ;;  %v3791_v61 = vpop.eup %3790  ;;  %v1472_v8 = vadd.f32 1.0, %v3789_v33 }
 0x3c9   :  { %3800 = vpow2.f32 %v3341_v15  ;;  %v1471_v7 = vadd.f32 1.0, %v3791_v61  ;;  %v3793_v49 = vpop.eup %3792  ;;  %v3344_v33 = vmul.f32 -1.442695, %v5232_v28 }
 0x3ca   :  { %3802 = vrcp.f32 %v1473_v31  ;;  %v3795_v59 = vpop.eup %3794  ;;  %v1470_v42 = vadd.f32 1.0, %v3793_v49  ;;  %v5224_v24 = vpop.permute.xlu0 %1734  ;;  %v5240_v31 = vadd.f32 %v5123_v51, %v5022_v46 }
 0x3cb   :  { %3804 = vrcp.f32 %v1472_v8  ;;  %v3797_v17 = vpop.eup %3796 }
 0x3cc   :  { %3806 = vrcp.f32 %v1471_v7  ;;  %v3342_v9 = vmul.f32 -1.442695, %v5240_v31 }
 0x3cd   :  { %3808 = vrcp.f32 %v1470_v42 }
 0x3ce   :  { %v5234_v15 = vpop.permute.xlu0 %1730 }
 0x3d2   :  { %v3799_v30 = vpop.eup %3798 }
 0x3d3   :  { %v3801_v63 = vpop.eup %3800 }
 0x3d4   :  { %v3803_v57 = vpop.eup %3802  ;;  %v1474_v60 = vadd.f32 1.0, %v3801_v63 }
 0x3d5   :  { %v3805_v19 = vpop.eup %3804 }
 0x3d6   :  { %v3807_v0 = vpop.eup %3806 }
 0x3dc   :  { %2057 = vadd.xlane.f32.xlu1 %v2056_v25  ;;  %v1476_v25 = vadd.f32 1.0, %v3797_v17  ;;  %v5259_v17 = vadd.f32 %v5123_v51, %v5026_v40 }
 0x3de   :  { %3810 = vrcp.f32 %v1476_v25 }
 0x3df   :  { %3812 = vrcp.f32 %v1474_v60 }
 0x3e0   :  { %2051 = vadd.xlane.f32.xlu1 %v2050_v44  ;;  %v3809_v44 = vpop.eup %3808  ;;  %3814 = vtanh.f32 %v4876_v36  ;;  %v5242_v36 = vpop.xlane.xlu0 %2009 }
 0x3e1   :  { %3816 = vtanh.f32 %v4880_v23 }
 0x3e2   :  { %3818 = vtanh.f32 %v4885_v6  ;;  %v5250_v6 = vadd.f32 %v5123_v51, %v5030_v11  ;;  %v5264_v11 = vadd.f32 %v5123_v51, %v5033_v18 }
 0x3e3   :  { %3820 = vtanh.f32 %v4889_v52 }
 0x3e4   :  { %2060 = vadd.xlane.f32.xlu0 %v2059_v3  ;;  %v1721_v3 = vpop.permute.xlu1 %1720  ;;  %3822 = vpow2.f32 %v3344_v33 }
 0x3e5   :  { %3824 = vpow2.f32 %v3342_v9 }
 0x3e8   :  { %2054 = vadd.xlane.f32.xlu0 %v2053_v43  ;;  %v3811_v37 = vpop.eup %3810  ;;  %v1717_v10 = vpop.permute.xlu1 %1716 }
 0x3e9   :  { %v3813_v4 = vpop.eup %3812 }
 0x3ea   :  { %v3815_v61 = vpop.eup %3814 }
 0x3eb   :  { %v1888_v8 = vmul.f32 %v3815_v61, %v1719_v26  ;;  %v3817_v7 = vpop.eup %3816  ;;  %v3347_v26 = vmul.f32 -1.442695, %v5259_v17 }
 0x3ec   :  { %v5228_v43 = vpop.permute.xlu1 %1728  ;;  %v1886_v46 = vmul.f32 %v3817_v7, %v1715_v5  ;;  %v3819_v52 = vpop.eup %3818 }
 0x3ed   :  { %v1959_v42 = vmul.f32 %v4968_v48, %v1888_v8  ;;  %v1889_v25 = vmul.f32 %v3819_v52, %v1721_v3  ;;  %v3821_v40 = vpop.eup %3820 }
 0x3ee   :  { %v1887_v5 = vmul.f32 %v3821_v40, %v1717_v10 }
 0x3ef   :  { %v2068_v63 = vsel %vm2001_vm0, %v1959_v42, 0.0 }
 0x3f0   :  { %v5244_v23 = vpop.permute.xlu1 %1724  ;;  %v1958_v61 = vmul.f32 %v4968_v48, %v1887_v5 }
 0x3f1   :  { %1776 = vrot.lane.b32.xlu1 %v3795_v59, %s4199_s20  ;;  %v5254_v59 = vpop.xlane.xlu0 %2003 }
 0x3f2   :  { %6629 = vst [vmem:[#allocation95_spill] sm:$0xff] %v5254_v59 }
 0x3f4   :  { %v5252_v49 = vpop.permute.xlu1 %1736 }
 0x3f5   :  { %1772 = vrot.lane.b32.xlu1 %v3799_v30, %s4199_s20  ;;  %v3348_v30 = vmul.f32 -1.442695, %v5250_v6  ;;  %v5276_v18 = vpop.xlane.xlu0 %2012 }
 0x3f6   :  { %6630 = vst [vmem:[#allocation96_spill] sm:$0xff] %v5276_v18 }
 0x3f7   :  { %3826 = vpow2.f32 %v3348_v30 }
 0x3f8   :  { %v5269_v60 = vpop.permute.xlu1 %1732  ;;  %3828 = vpow2.f32 %v3347_v26 }
 0x3f9   :  { %1784 = vrot.lane.b32.xlu1 %v3803_v57, %s4199_s20  ;;  %v1957_v57 = vmul.f32 %v4968_v48, %v1886_v46  ;;  %v5285_v9 = vpop.permute.xlu0 %1742  ;;  %v2065_v46 = vsel %vm2001_vm0, %v1958_v61, 0.0 }
 0x3fb   :  { %v2062_v3 = vsel %vm2001_vm0, %v1957_v57, 0.0 }
 0x3fd   :  { %1780 = vrot.lane.b32.xlu1 %v3807_v0, %s4199_s20  ;;  %v3346_v0 = vmul.f32 -1.442695, %v5264_v11  ;;  %v5290_v52 = vpop.permute.xlu0 %1738 }
 0x3fe   :  { %1782 = vrot.lane.b32.xlu0 %v3805_v19, %s4199_s20  ;;  %v5273_v19 = vadd.f32 %v5123_v51, %v5028_v38 }
 0x3ff   :  { %3830 = vpow2.f32 %v3346_v0 }
 0x400   :  { %v3345_v33 = vmul.f32 -1.442695, %v5273_v19 }
 0x401   :  { %v5294_v40 = vpop.xlane.xlu0 %2024 }
 0x402   :  { %1778 = vrot.lane.b32.xlu0 %v3809_v44, %s4199_s20  ;;  %v1960_v44 = vmul.f32 %v4968_v48, %v1889_v25  ;;  %3832 = vpow2.f32 %v3345_v33 }
 0x404   :  { %v2071_v51 = vsel %vm2001_vm0, %v1960_v44, 0.0 }
 0x405   :  { %v5299_v33 = vpop.xlane.xlu0 %2018 }
 0x406   :  { %1790 = vrot.lane.b32.xlu0 %v3811_v37, %s4199_s20  ;;  %v3823_v37 = vpop.eup %3822  ;;  %6632 = vst [vmem:[#allocation98_spill] sm:$0xff] %v5299_v33 }
 0x407   :  { %v1477_v38 = vadd.f32 1.0, %v3823_v37  ;;  %v3825_v8 = vpop.eup %3824 }
 0x408   :  { %v1475_v10 = vadd.f32 1.0, %v3825_v8  ;;  %v3827_v42 = vpop.eup %3826 }
 0x409   :  { %3834 = vrcp.f32 %v1477_v38  ;;  %v3829_v30 = vpop.eup %3828  ;;  %v1481_v25 = vadd.f32 1.0, %v3827_v42  ;;  %v5304_v8 = vpop.permute.xlu0 %1750 }
 0x40a   :  { %1786 = vrot.lane.b32.xlu0 %v3813_v4, %s4199_s20  ;;  %v5280_v4 = vpop.xlane.xlu1 %2006  ;;  %3836 = vrcp.f32 %v1475_v10  ;;  %v1480_v26 = vadd.f32 1.0, %v3829_v30 }
 0x40b   :  { %6631 = vst [vmem:[#allocation97_spill] sm:$0xff] %v5280_v4  ;;  %3838 = vrcp.f32 %v1481_v25  ;;  %v6645_v4 = vld [vmem:[#allocation90_spill] sm:$0xff] }
 0x40c   :  { %3840 = vrcp.f32 %v1480_v26 }
 0x40d   :  { %v5311_v30 = vpop.permute.xlu0 %1746 }
 0x40e   :  { %v5287_v7 = vpop.permute.xlu1 %1744 }
 0x411   :  { %v5316_v26 = vpop.xlane.xlu0 %2036 }
 0x412   :  { %v5292_v57 = vpop.permute.xlu1 %1740  ;;  %6634 = vst [vmem:[#allocation100_spill] sm:$0xff] %v5316_v26 }
 0x416   :  { %v5296_v37 = vpop.xlane.xlu1 %2021 }
 0x421   :  { %2069 = vadd.xlane.f32.xlu1 %v2068_v63  ;;  %v3831_v63 = vpop.eup %3830 }
 0x422   :  { %v1479_v0 = vadd.f32 1.0, %v3831_v63  ;;  %v3833_v5 = vpop.eup %3832 }
 0x423   :  { %v3835_v44 = vpop.eup %3834 }
 0x424   :  { %3842 = vrcp.f32 %v1479_v0  ;;  %v3837_v38 = vpop.eup %3836 }
 0x425   :  { %2063 = vadd.xlane.f32.xlu1 %v2062_v3  ;;  %v1478_v3 = vadd.f32 1.0, %v3833_v5  ;;  %v3839_v61 = vpop.eup %3838  ;;  %v5320_v5 = vpop.xlane.xlu0 %2030 }
 0x426   :  { %v3841_v10 = vpop.eup %3840  ;;  %6636 = vst [vmem:[#allocation102_spill] sm:$0xff] %v5320_v5 }
 0x427   :  { %3844 = vrcp.f32 %v1478_v3 }
 0x428   :  { %3846 = vtanh.f32 %v4906_v45 }
 0x429   :  { %2072 = vadd.xlane.f32.xlu0 %v2071_v51  ;;  %v5302_v51 = vpop.xlane.xlu1 %2015  ;;  %3848 = vtanh.f32 %v4896_v13  ;;  %v5326_v3 = vpop.permute.xlu0 %1758 }
 0x42a   :  { %6633 = vst [vmem:[#allocation99_spill] sm:$0xff] %v5302_v51 }
 0x42d   :  { %2066 = vadd.xlane.f32.xlu0 %v2065_v46  ;;  %v5307_v42 = vpop.permute.xlu1 %1752  ;;  %v5334_v26 = vpop.permute.xlu0 %1754 }
 0x42e   :  { %v3843_v46 = vpop.eup %3842 }
 0x431   :  { %v3845_v25 = vpop.eup %3844  ;;  %v5314_v63 = vpop.permute.xlu1 %1748 }
 0x432   :  { %v3847_v5 = vpop.eup %3846 }
 0x433   :  { %v3849_v45 = vpop.eup %3848 }
 0x434   :  { %v1892_v13 = vmul.f32 %v3849_v45, %v5218_v1 }
 0x435   :  { %v5318_v0 = vpop.xlane.xlu1 %2033 }
 0x436   :  { %1792 = vrot.lane.b32.xlu1 %v3835_v44, %s4199_s20  ;;  %6635 = vst [vmem:[#allocation101_spill] sm:$0xff] %v5318_v0  ;;  %v6642_v0 = vld [vmem:[#allocation89_spill] sm:$0xff]  ;;  %v1963_v1 = vmul.f32 %v4968_v48, %v1892_v13 }
 0x439   :  { %v5323_v44 = vpop.xlane.xlu1 %2027 }
 0x43a   :  { %1788 = vrot.lane.b32.xlu1 %v3837_v38, %s4199_s20  ;;  %6637 = vst [vmem:[#allocation103_spill] sm:$0xff] %v5323_v44  ;;  %v6638_v38 = vld [vmem:[#allocation85_spill] sm:$0xff]  ;;  %v1893_v44 = vmul.f32 %v3847_v5, %v5228_v43 }
 0x43b   :  { %3850 = vtanh.f32 %v6638_v38  ;;  %v6643_v38 = vld [vmem:[#allocation87_spill] sm:$0xff] }
 0x43c   :  { %v1964_v18 = vmul.f32 %v4968_v48, %v1893_v44  ;;  %v6648_v44 = vld [vmem:[#allocation92_spill] sm:$0xff] }
 0x43e   :  { %1800 = vrot.lane.b32.xlu1 %v3839_v61, %s4199_s20  ;;  %v6639_v61 = vld [vmem:[#allocation84_spill] sm:$0xff] }
 0x43f   :  { %3852 = vtanh.f32 %v6639_v61  ;;  %v5342_v61 = vpop.xlane.xlu0 %2048 }
 0x440   :  { %6644 = vst [vmem:[#allocation85_spill] sm:$0xff] %v5342_v61 }
 0x442   :  { %1796 = vrot.lane.b32.xlu1 %v3843_v46, %s4199_s20  ;;  %v6640_v46 = vld [vmem:[#allocation88_spill] sm:$0xff] }
 0x443   :  { %1798 = vrot.lane.b32.xlu0 %v3841_v10, %s4199_s20  ;;  %v5330_v10 = vpop.permute.xlu1 %1760  ;;  %3854 = vtanh.f32 %v6640_v46  ;;  %v5353_v59 = vpop.xlane.xlu0 %2042 }
 0x444   :  { %6647 = vst [vmem:[#allocation84_spill] sm:$0xff] %v5353_v59  ;;  %v6650_v59 = vld [vmem:[#allocation94_spill] sm:$0xff] }
 0x445   :  { %v3851_v51 = vpop.eup %3850 }
 0x447   :  { %1794 = vrot.lane.b32.xlu0 %v3845_v25, %s4199_s20  ;;  %v6641_v25 = vld [vmem:[#allocation86_spill] sm:$0xff]  ;;  %v5339_v33 = vpop.permute.xlu1 %1756 }
 0x448   :  { %3856 = vtanh.f32 %v6641_v25  ;;  %v1891_v25 = vmul.f32 %v3851_v51, %v5244_v23  ;;  %v2083_v23 = vsel %vm2001_vm0, %v1964_v18, 0.0 }
 0x449   :  { %3858 = vtanh.f32 %v6642_v0  ;;  %v3853_v46 = vpop.eup %3852  ;;  %v6646_v0 = vld [vmem:[#allocation91_spill] sm:$0xff] }
 0x44a   :  { %3860 = vtanh.f32 %v6643_v38  ;;  %v1890_v43 = vmul.f32 %v3853_v46, %v5221_v55  ;;  %v1962_v51 = vmul.f32 %v4968_v48, %v1891_v25  ;;  %v6649_v46 = vld [vmem:[#allocation93_spill] sm:$0xff] }
 0x44b   :  { %3862 = vtanh.f32 %v6645_v4  ;;  %v5348_v5 = vpop.xlane.xlu1 %2045  ;;  %v2080_v4 = vsel %vm2001_vm0, %v1963_v1, 0.0 }
 0x44c   :  { %3864 = vtanh.f32 %v6646_v0  ;;  %v1961_v13 = vmul.f32 %v4968_v48, %v1890_v43  ;;  %v2077_v25 = vsel %vm2001_vm0, %v1962_v51, 0.0  ;;  %v5373_v43 = vld [vmem:[%s6387_s5] ss:$0 sm:$0xff]  ;;  %s4208_s5 = smov [#allocation13]  }
 0x44d   :  { %v3855_v45 = vpop.eup %3854  ;;  %3866 = vtanh.f32 %v6648_v44  ;;  %s3232_s13 = sshll.u32 %s4208_s5, 4  ;;  %s3233_s13 = int_to_ptr.vmem [resolvable:$true] %s3232_s13 }
 0x44e   :  { %v1897_v61 = vmul.f32 %v3855_v45, %v5252_v49  ;;  %3868 = vtanh.f32 %v6649_v46  ;;  %v2074_v1 = vsel %vm2001_vm0, %v1961_v13, 0.0  ;;  %s4124_s14 = scalar_lea.vmem %s3233_s13, 16  ;;  %s4128_s15 = scalar_lea.vmem %s3233_s13, 32 }
 0x44f   :  { %v5362_v49 = vpop.xlane.xlu1 %2039  ;;  %3870 = vtanh.f32 %v6650_v59  ;;  %p4125_p10 = scmp.ne.s32.totalorder %s3233_s13, %s4124_s14  ;;  %p4129_p11 = scmp.lt.s32.totalorder %s3233_s13, %s3233_s13 }
 0x450   :  { %v1968_v44 = vmul.f32 %v4968_v48, %v1897_v61  ;;  %3872 = vtanh.f32 %v5045_v29  ;;  %p4130_p12 = scmp.lt.s32.totalorder %s4128_s15, %s4124_s14 }
 0x451   :  { %3874 = vtanh.f32 %v5050_v62 }
 0x452   :  { %v3857_v38 = vpop.eup %3856  ;;  %3876 = vtanh.f32 %v5055_v39  ;;  %p4131_p13 = por %p4130_p12, %p4129_p11 }
 0x453   :  { %v1896_v55 = vmul.f32 %v3857_v38, %v5224_v24  ;;  %v3859_v0 = vpop.eup %3858  ;;  %3878 = vtanh.f32 %v5077_v35 }
 0x454   :  { %v3861_v45 = vpop.eup %3860  ;;  %v1895_v18 = vmul.f32 %v3859_v0, %v5269_v60  ;;  %v5377_v60 = vpop.permute.xlu0 %1766  ;;  %3880 = vtanh.f32 %v5081_v22  ;;  %p4132_p0 = pnand %p4131_p13, %p4125_p10 }
 0x455   :  { %v1894_v24 = vmul.f32 %v3861_v45, %v5234_v15  ;;  %v1967_v38 = vmul.f32 %v5373_v43, %v1896_v55  ;;  %v3863_v48 = vpop.eup %3862  ;;  %v2095_v15 = vsel %vm2001_vm0, %v1968_v44, 0.0  ;;  %3882 = vtanh.f32 %v5086_v27 }
 0x456   :  { %v3865_v61 = vpop.eup %3864  ;;  %v1901_v59 = vmul.f32 %v3863_v48, %v5287_v7  ;;  %3884 = vtanh.f32 %v5091_v54 }
 0x457   :  { %v1900_v51 = vmul.f32 %v3865_v61, %v5285_v9  ;;  %v2092_v55 = vsel %vm2001_vm0, %v1967_v38, 0.0  ;;  %v1965_v29 = vmul.f32 %v5373_v43, %v1894_v24  ;;  %v3867_v13 = vpop.eup %3866  ;;  %3886 = vtanh.f32 %v5113_v2 }
 0x458   :  { %v3869_v7 = vpop.eup %3868  ;;  %v1899_v46 = vmul.f32 %v3867_v13, %v5292_v57  ;;  %v5390_v0 = vpop.permute.xlu0 %1762  ;;  %v1972_v9 = vmul.f32 %v5373_v43, %v1901_v59  ;;  %3888 = vtanh.f32 %v5117_v58 }
 0x459   :  { %v1898_v45 = vmul.f32 %v3869_v7, %v5290_v52  ;;  %v1971_v39 = vmul.f32 %v5373_v43, %v1900_v51  ;;  %3890 = vtanh.f32 %v5127_v34 }
 0x45a   :  { %v1970_v35 = vmul.f32 %v5373_v43, %v1899_v46  ;;  %3892 = vtanh.f32 %v5132_v16 }
 0x45b   :  { %v2104_v38 = vsel %vm2001_vm0, %v1971_v39, 0.0  ;;  %v1969_v22 = vmul.f32 %v5373_v43, %v1898_v45  ;;  %3894 = vtanh.f32 %v5164_v14 }
 0x45c   :  { %v5409_v48 = vpop.permute.xlu0 %1774  ;;  %v2101_v27 = vsel %vm2001_vm0, %v1970_v35, 0.0  ;;  %3896 = vtanh.f32 %v5140_v20 }
 0x45d   :  { %v2098_v51 = vsel %vm2001_vm0, %v1969_v22, 0.0  ;;  %3898 = vtanh.f32 %v5170_v50 }
 0x45e   :  { %3900 = vtanh.f32 %v5149_v32 }
 0x460   :  { %v5422_v13 = vpop.permute.xlu0 %1770 }
 0x466   :  { %2084 = vadd.xlane.f32.xlu0 %v2083_v23  ;;  %2081 = vadd.xlane.f32.xlu1 %v2080_v4  ;;  %v1966_v23 = vmul.f32 %v5373_v43, %v1895_v18  ;;  %v5384_v4 = vpop.permute.xlu1 %1768  ;;  %v2086_v18 = vsel %vm2001_vm0, %v1965_v29, 0.0 }
 0x468   :  { %v2089_v62 = vsel %vm2001_vm0, %v1966_v23, 0.0 }
 0x46a   :  { %2078 = vadd.xlane.f32.xlu0 %v2077_v25  ;;  %2075 = vadd.xlane.f32.xlu1 %v2074_v1  ;;  %v3871_v25 = vpop.eup %3870  ;;  %v5399_v57 = vpop.permute.xlu1 %1764  ;;  %v2107_v1 = vsel %vm2001_vm0, %v1972_v9, 0.0  ;;  %3902 = vtanh.f32 %v5176_v47 }
 0x46b   :  { %v3873_v44 = vpop.eup %3872  ;;  %v1905_v24 = vmul.f32 %v3871_v25, %v5307_v42  ;;  %3904 = vtanh.f32 %v5181_v21 }
 0x46c   :  { %v1904_v52 = vmul.f32 %v3873_v44, %v5304_v8  ;;  %v3875_v61 = vpop.eup %3874  ;;  %3906 = vtanh.f32 %v5186_v53 }
 0x46d   :  { %v3877_v59 = vpop.eup %3876  ;;  %v1976_v8 = vmul.f32 %v5373_v43, %v1905_v24  ;;  %3908 = vtanh.f32 %v5193_v12 }
 0x46e   :  { %2096 = vadd.xlane.f32.xlu0 %v2095_v15  ;;  %2093 = vadd.xlane.f32.xlu1 %v2092_v55  ;;  %v5411_v42 = vpop.xlane.xlu1 %2057  ;;  %v1903_v15 = vmul.f32 %v3875_v61, %v5314_v63  ;;  %v1902_v23 = vmul.f32 %v3877_v59, %v5311_v30  ;;  %v1975_v54 = vmul.f32 %v5373_v43, %v1904_v52  ;;  %v3879_v55 = vpop.eup %3878  ;;  %3910 = vtanh.f32 %v5201_v56 }
 0x46f   :  { %v3881_v29 = vpop.eup %3880  ;;  %v1909_v63 = vmul.f32 %v3879_v55, %v5330_v10  ;;  %v2119_v7 = vsel %vm2001_vm0, %v1976_v8, 0.0  ;;  %3912 = vtanh.f32 %v5208_v41 }
 0x470   :  { %v1974_v2 = vmul.f32 %v5373_v43, %v1903_v15  ;;  %v1908_v30 = vmul.f32 %v3881_v29, %v5326_v3  ;;  %v1973_v58 = vmul.f32 %v5373_v43, %v1902_v23  ;;  %v3883_v10 = vpop.eup %3882  ;;  %3914 = vtanh.f32 %v5232_v28 }
 0x471   :  { %v3885_v9 = vpop.eup %3884  ;;  %v1907_v45 = vmul.f32 %v3883_v10, %v5339_v33  ;;  %v1980_v3 = vmul.f32 %v5373_v43, %v1909_v63  ;;  %3916 = vtanh.f32 %v5240_v31 }
 0x472   :  { %2090 = vadd.xlane.f32.xlu0 %v2089_v62  ;;  %2087 = vadd.xlane.f32.xlu1 %v2086_v18  ;;  %v5428_v46 = vpop.xlane.xlu1 %2051  ;;  %v2116_v62 = vsel %vm2001_vm0, %v1975_v54, 0.0  ;;  %v5434_v18 = vpop.xlane.xlu0 %2060  ;;  %v2113_v34 = vsel %vm2001_vm0, %v1974_v2, 0.0  ;;  %v1906_v39 = vmul.f32 %v3885_v9, %v5334_v26  ;;  %v2110_v25 = vsel %vm2001_vm0, %v1973_v58, 0.0 }
 0x473   :  { %v1979_v16 = vmul.f32 %v5373_v43, %v1908_v30  ;;  %v3887_v44 = vpop.eup %3886  ;;  %v2131_v35 = vsel %vm2001_vm0, %v1980_v3, 0.0  ;;  %v1978_v52 = vmul.f32 %v5373_v43, %v1907_v45  ;;  %3918 = vtanh.f32 %v5259_v17 }
 0x474   :  { %v3889_v24 = vpop.eup %3888  ;;  %3920 = vtanh.f32 %v5273_v19 }
 0x475   :  { %v1912_v14 = vmul.f32 %v3889_v24, %v5377_v60  ;;  %v2128_v26 = vsel %vm2001_vm0, %v1979_v16, 0.0  ;;  %v3891_v22 = vpop.eup %3890  ;;  %v2125_v59 = vsel %vm2001_vm0, %v1978_v52, 0.0  ;;  %3922 = vtanh.f32 %v5250_v6 }
 0x476   :  { %2108 = vadd.xlane.f32.xlu0 %v2107_v1  ;;  %2105 = vadd.xlane.f32.xlu1 %v2104_v38  ;;  %v1777_v33 = vpop.permute.xlu1 %1776  ;;  %v1913_v1 = vmul.f32 %v3887_v44, %v5384_v4  ;;  %v1977_v38 = vmul.f32 %v5373_v43, %v1906_v39  ;;  %v5451_v20 = vpop.xlane.xlu0 %2054  ;;  %v1911_v61 = vmul.f32 %v3891_v22, %v5399_v57 }
 0x477   :  { %v3893_v4 = vpop.eup %3892  ;;  %v1983_v32 = vmul.f32 %v5373_v43, %v1912_v14  ;;  %3924 = vtanh.f32 %v5264_v11 }
 0x478   :  { %v1984_v50 = vmul.f32 %v5373_v43, %v1913_v1  ;;  %v1910_v60 = vmul.f32 %v3893_v4, %v5390_v0  ;;  %v3895_v8 = vpop.eup %3894  ;;  %v1982_v55 = vmul.f32 %v5373_v43, %v1911_v61 }
 0x479   :  { %v3897_v23 = vpop.eup %3896  ;;  %v1917_v57 = vmul.f32 %v3895_v8, %v1777_v33  ;;  %v2140_v0 = vsel %vm2001_vm0, %v1983_v32, 0.0 }
 0x47a   :  { %2102 = vadd.xlane.f32.xlu0 %v2101_v27  ;;  %2099 = vadd.xlane.f32.xlu1 %v2098_v51  ;;  %v1773_v15 = vpop.permute.xlu1 %1772  ;;  %v2122_v27 = vsel %vm2001_vm0, %v1977_v38, 0.0  ;;  %v1783_v51 = vpop.permute.xlu0 %1782  ;;  %v2143_v54 = vsel %vm2001_vm0, %v1984_v50, 0.0  ;;  %v1916_v47 = vmul.f32 %v3897_v23, %v5409_v48  ;;  %v1981_v29 = vmul.f32 %v5373_v43, %v1910_v60 }
 0x47b   :  { %v3899_v21 = vpop.eup %3898  ;;  %v2137_v30 = vsel %vm2001_vm0, %v1982_v55, 0.0 }
 0x47c   :  { %v1915_v2 = vmul.f32 %v3899_v21, %v1773_v15  ;;  %v2134_v48 = vsel %vm2001_vm0, %v1981_v29, 0.0  ;;  %v1987_v58 = vmul.f32 %v5373_v43, %v1916_v47 }
 0x47e   :  { %2120 = vadd.xlane.f32.xlu0 %v2119_v7  ;;  %2117 = vadd.xlane.f32.xlu1 %v2116_v62  ;;  %v1785_v63 = vpop.permute.xlu1 %1784  ;;  %v3901_v7 = vpop.eup %3900  ;;  %v1988_v62 = vmul.f32 %v5373_v43, %v1917_v57  ;;  %v1986_v3 = vmul.f32 %v5373_v43, %v1915_v2 }
 0x47f   :  { %v1914_v53 = vmul.f32 %v3901_v7, %v5422_v13  ;;  %v1779_v10 = vpop.permute.xlu0 %1778  ;;  %v3903_v12 = vpop.eup %3902  ;;  %v2152_v13 = vsel %vm2001_vm0, %v1987_v58, 0.0 }
 0x480   :  { %v3905_v9 = vpop.eup %3904  ;;  %v1921_v45 = vmul.f32 %v3903_v12, %v1785_v63  ;;  %v2149_v1 = vsel %vm2001_vm0, %v1986_v3, 0.0 }
 0x481   :  { %v1920_v39 = vmul.f32 %v3905_v9, %v1783_v51  ;;  %v1985_v16 = vmul.f32 %v5373_v43, %v1914_v53  ;;  %v3907_v56 = vpop.eup %3906 }
 0x482   :  { %2114 = vadd.xlane.f32.xlu0 %v2113_v34  ;;  %2111 = vadd.xlane.f32.xlu1 %v2110_v25  ;;  %v2155_v34 = vsel %vm2001_vm0, %v1988_v62, 0.0  ;;  %v1781_v25 = vpop.permute.xlu1 %1780  ;;  %v3909_v44 = vpop.eup %3908 }
 0x483   :  { %v1919_v33 = vmul.f32 %v3907_v56, %v1781_v25  ;;  %v1791_v24 = vpop.permute.xlu0 %1790  ;;  %v1918_v52 = vmul.f32 %v3909_v44, %v1779_v10  ;;  %v2146_v14 = vsel %vm2001_vm0, %v1985_v16, 0.0  ;;  %v3911_v38 = vpop.eup %3910 }
 0x484   :  { %v1924_v4 = vmul.f32 %v3911_v38, %v1791_v24  ;;  %v3913_v60 = vpop.eup %3912 }
 0x485   :  { %v1990_v41 = vmul.f32 %v5373_v43, %v1919_v33 }
 0x486   :  { %2132 = vadd.xlane.f32.xlu0 %v2131_v35  ;;  %2129 = vadd.xlane.f32.xlu1 %v2128_v26  ;;  %v1992_v35 = vmul.f32 %v5373_v43, %v1921_v45  ;;  %v1991_v26 = vmul.f32 %v5373_v43, %v1920_v39  ;;  %v1995_v8 = vmul.f32 %v5373_v43, %v1924_v4 }
 0x487   :  { %v1787_v50 = vpop.permute.xlu0 %1786  ;;  %v2161_v15 = vsel %vm2001_vm0, %v1990_v41, 0.0 }
 0x488   :  { %v2167_v22 = vsel %vm2001_vm0, %v1992_v35, 0.0  ;;  %v2164_v61 = vsel %vm2001_vm0, %v1991_v26, 0.0  ;;  %v2176_v23 = vsel %vm2001_vm0, %v1995_v8, 0.0  ;;  %v4207_v35 = vmov 0.0  }
 0x489   :  { %88 = vst.msk [vmem:[#allocation3] sm:$0x1] %vm86_vm1, %v4207_v35  ;;  %89 = vst [vmem:[#allocation4] sm:$0x1] %v4207_v35 }
 0x48a   :  { %2126 = vadd.xlane.f32.xlu0 %v2125_v59  ;;  %2123 = vadd.xlane.f32.xlu1 %v2122_v27  ;;  %v1989_v59 = vmul.f32 %v5373_v43, %v1918_v52  ;;  %v1922_v27 = vmul.f32 %v3913_v60, %v1787_v50 }
 0x48c   :  { %v2158_v32 = vsel %vm2001_vm0, %v1989_v59, 0.0  ;;  %v1993_v57 = vmul.f32 %v5373_v43, %v1922_v27 }
 0x48e   :  { %2144 = vadd.xlane.f32.xlu0 %v2143_v54  ;;  %2141 = vadd.xlane.f32.xlu1 %v2140_v0  ;;  %v2170_v51 = vsel %vm2001_vm0, %v1993_v57, 0.0  ;;  %v3915_v0 = vpop.eup %3914 }
 0x48f   :  { %v3917_v31 = vpop.eup %3916 }
 0x490   :  { %v3919_v53 = vpop.eup %3918 }
 0x492   :  { %2138 = vadd.xlane.f32.xlu0 %v2137_v30  ;;  %2135 = vadd.xlane.f32.xlu1 %v2134_v48  ;;  %v3921_v48 = vpop.eup %3920 }
 0x493   :  { %v3923_v11 = vpop.eup %3922 }
 0x494   :  { %v3925_v10 = vpop.eup %3924 }
 0x496   :  { %2156 = vadd.xlane.f32.xlu0 %v2155_v34  ;;  %2153 = vadd.xlane.f32.xlu1 %v2152_v13 }
 0x49a   :  { %2150 = vadd.xlane.f32.xlu0 %v2149_v1  ;;  %2147 = vadd.xlane.f32.xlu1 %v2146_v14  ;;  %v4206_v1 = vmov -1e+30  }
 0x49b   :  { %87 = vst.msk [vmem:[#allocation2] sm:$0x1] %vm86_vm1, %v4206_v1 }
 0x49e   :  { %2168 = vadd.xlane.f32.xlu0 %v2167_v22  ;;  %2165 = vadd.xlane.f32.xlu1 %v2164_v61 }
 0x4a2   :  { %2162 = vadd.xlane.f32.xlu0 %v2161_v15  ;;  %2159 = vadd.xlane.f32.xlu1 %v2158_v32 }
 0x4a6   :  { %2177 = vadd.xlane.f32.xlu1 %v2176_v23 }
 0x4aa   :  { %2171 = vadd.xlane.f32.xlu1 %v2170_v51 }
 0x4ae   :  { %v5494_v54 = vpop.xlane.xlu1 %2069 }
 0x4b2   :  { %v5497_v55 = vpop.xlane.xlu1 %2063 }
 0x4b6   :  { %v5500_v47 = vpop.xlane.xlu0 %2072  ;;  %v1793_v29 = vpop.permute.xlu1 %1792 }
 0x4b7   :  { %v1925_v21 = vmul.f32 %v3915_v0, %v1793_v29 }
 0x4b9   :  { %v1996_v63 = vmul.f32 %v5373_v43, %v1925_v21 }
 0x4ba   :  { %v5505_v28 = vpop.xlane.xlu0 %2066  ;;  %v1789_v7 = vpop.permute.xlu1 %1788 }
 0x4bb   :  { %v1923_v2 = vmul.f32 %v3917_v31, %v1789_v7  ;;  %v2179_v17 = vsel %vm2001_vm0, %v1996_v63, 0.0  ;;  %v5565_v63 = vld [vmem:[#allocation5] ss:$0 sm:$0xff] }
 0x4bc   :  { %2180 = vadd.xlane.f32.xlu0 %v2179_v17  ;;  %v5569_v31 = vadd.f32 %v5565_v63, %v5296_v37  ;;  %v5573_v7 = vadd.f32 %v5565_v63, %v5294_v40  ;;  %v6653_v17 = vld [vmem:[#allocation95_spill] sm:$0xff] }
 0x4bd   :  { %v1994_v62 = vmul.f32 %v5373_v43, %v1923_v2  ;;  %v5577_v2 = vadd.f32 %v5565_v63, %v5242_v36  ;;  %v6656_v40 = vld [vmem:[#allocation99_spill] sm:$0xff]  ;;  %v6657_v36 = vld [vmem:[#allocation98_spill] sm:$0xff] }
 0x4be   :  { %v1799_v30 = vpop.permute.xlu0 %1798  ;;  %v1801_v19 = vpop.permute.xlu1 %1800  ;;  %6651 = vst [vmem:[#allocation88_spill] sm:$0xff] %v5569_v31  ;;  %6652 = vst [vmem:[#allocation86_spill] sm:$0xff] %v5573_v7 }
 0x4bf   :  { %v2173_v6 = vsel %vm2001_vm0, %v1994_v62, 0.0  ;;  %v1928_v12 = vmul.f32 %v3919_v53, %v1799_v30  ;;  %v1929_v34 = vmul.f32 %v3923_v11, %v1801_v19  ;;  %v5581_v30 = vadd.f32 %v5565_v63, %v6653_v17  ;;  %v6654_v62 = vld [vmem:[#allocation97_spill] sm:$0xff]  ;;  %v6655_v53 = vld [vmem:[#allocation96_spill] sm:$0xff] }
 0x4c0   :  { %2174 = vadd.xlane.f32.xlu0 %v2173_v6  ;;  %v5585_v19 = vadd.f32 %v5565_v63, %v6654_v62  ;;  %v5589_v37 = vadd.f32 %v5565_v63, %v6655_v53  ;;  %v5599_v11 = vadd.f32 %v5565_v63, %v6657_v36  ;;  %v5641_v36 = vadd.f32 %v5565_v63, %v5348_v5 }
 0x4c1   :  { %v1999_v16 = vmul.f32 %v5373_v43, %v1928_v12  ;;  %v2000_v44 = vmul.f32 %v5373_v43, %v1929_v34  ;;  %v6659_v12 = vld [vmem:[#allocation101_spill] sm:$0xff] }
 0x4c2   :  { %v1795_v58 = vpop.permute.xlu0 %1794  ;;  %v1797_v9 = vpop.permute.xlu1 %1796  ;;  %6658 = vst [vmem:[#allocation89_spill] sm:$0xff] %v5599_v11  ;;  %v2273_v62 = vsel %vm2266_vm2, %v5599_v11, -inf  ;;  %v5669_v11 = vadd.f32 %v5565_v63, %v5428_v46  ;;  %v5685_v46 = vadd.f32 %v5565_v63, %v5451_v20 }
 0x4c3   :  { %v1926_v45 = vmul.f32 %v3921_v48, %v1795_v58  ;;  %v1927_v3 = vmul.f32 %v3925_v10, %v1797_v9  ;;  %v2188_v33 = vsel %vm2001_vm0, %v1999_v16, 0.0  ;;  %v2191_v24 = vsel %vm2001_vm0, %v2000_v44, 0.0 }
 0x4c4   :  { %v5595_v48 = vadd.f32 %v5565_v63, %v6656_v40  ;;  %v2275_v58 = vsel %vm2266_vm2, %v5569_v31, -inf  ;;  %v2277_v10 = vsel %vm2266_vm2, %v5573_v7, -inf  ;;  %v5607_v9 = vadd.f32 %v5565_v63, %v6659_v12  ;;  %v6666_v12 = vld [vmem:[#allocation85_spill] sm:$0xff] }
 0x4c5   :  { %v1997_v39 = vmul.f32 %v5373_v43, %v1926_v45  ;;  %v1998_v25 = vmul.f32 %v5373_v43, %v1927_v3  ;;  %v6661_v45 = vld [vmem:[#allocation100_spill] sm:$0xff]  ;;  %v2267_v44 = vsel %vm2266_vm2, %v5581_v30, -inf  ;;  %v2295_v20 = vsel %vm2266_vm2, %v5669_v11, -inf }
 0x4c6   :  { %6660 = vst [vmem:[#allocation87_spill] sm:$0xff] %v5607_v9  ;;  %v5611_v34 = vadd.f32 %v5565_v63, %v6661_v45  ;;  %v2271_v17 = vsel %vm2266_vm2, %v5595_v48, -inf  ;;  %v2283_v53 = vsel %vm2266_vm2, %v5607_v9, -inf }
 0x4c7   :  { %v2182_v13 = vsel %vm2001_vm0, %v1997_v39, 0.0  ;;  %v2185_v56 = vsel %vm2001_vm0, %v1998_v25, 0.0  ;;  %v6663_v39 = vld [vmem:[#allocation103_spill] sm:$0xff] }
 0x4c8   :  { %2183 = vadd.xlane.f32.xlu1 %v2182_v13  ;;  %2186 = vadd.xlane.f32.xlu0 %v2185_v56  ;;  %6662 = vst [vmem:[#allocation90_spill] sm:$0xff] %v5611_v34  ;;  %v5617_v25 = vadd.f32 %v5565_v63, %v6663_v39  ;;  %v6665_v13 = vld [vmem:[#allocation102_spill] sm:$0xff]  ;;  %v2269_v56 = vsel %vm2266_vm2, %v5577_v2, -inf  ;;  %v2285_v40 = vsel %vm2266_vm2, %v5611_v34, -inf }
 0x4c9   :  { %v5621_v16 = vadd.f32 %v5565_v63, %v6665_v13  ;;  %v2276_v1 = vmax.f32 %v2269_v56, %v2275_v58  ;;  %v5645_v58 = vadd.f32 %v5565_v63, %v6666_v12  ;;  %v5655_v13 = vadd.f32 %v5565_v63, %v5362_v49  ;;  %v6667_v56 = vld [vmem:[#allocation84_spill] sm:$0xff] }
 0x4ca   :  { %6664 = vst [vmem:[#allocation91_spill] sm:$0xff] %v5617_v25  ;;  %v2279_v45 = vsel %vm2266_vm2, %v5617_v25, -inf  ;;  %v5659_v5 = vadd.f32 %v5565_v63, %v6667_v56  ;;  %v5663_v12 = vadd.f32 %v5565_v63, %v5411_v42  ;;  %v2291_v56 = vsel %vm2266_vm2, %v5641_v36, -inf }
 0x4cb   :  { %v2281_v39 = vsel %vm2266_vm2, %v5621_v16, -inf  ;;  %v2284_v25 = vmax.f32 %v2276_v1, %v2283_v53  ;;  %v2287_v42 = vsel %vm2266_vm2, %v5655_v13, -inf  ;;  %v5681_v1 = vadd.f32 %v5565_v63, %v5434_v18 }
 0x4cc   :  { %2189 = vadd.xlane.f32.xlu1 %v2188_v33  ;;  %2192 = vadd.xlane.f32.xlu0 %v2191_v24  ;;  %v2268_v33 = vsel %vm2266_vm2, %v5585_v19, -inf  ;;  %v2270_v24 = vsel %vm2266_vm2, %v5589_v37, -inf  ;;  %6668 = vst [vmem:[#allocation92_spill] sm:$0xff] %v5663_v12 }
 0x4cd   :  { %v2278_v35 = vmax.f32 %v2270_v24, %v2277_v10  ;;  %v2272_v24 = vmax.f32 %v2267_v44, %v2271_v17  ;;  %v2274_v9 = vmax.f32 %v2268_v33, %v2273_v62  ;;  %v2293_v44 = vsel %vm2266_vm2, %v5645_v58, -inf }
 0x4ce   :  { %v2289_v33 = vsel %vm2266_vm2, %v5659_v5, -inf  ;;  %v5695_v17 = vadd.f32 %v5565_v63, %v5497_v55  ;;  %v5699_v62 = vadd.f32 %v5565_v63, %v5500_v47  ;;  %v2292_v53 = vmax.f32 %v2284_v25, %v2291_v56 }
 0x4cf   :  { %v2286_v31 = vmax.f32 %v2278_v35, %v2285_v40  ;;  %v2280_v49 = vmax.f32 %v2272_v24, %v2279_v45  ;;  %v2282_v34 = vmax.f32 %v2274_v9, %v2281_v39  ;;  %v2299_v9 = vsel %vm2266_vm2, %v5663_v12, -inf }
 0x4d0   :  { %v5691_v35 = vadd.f32 %v5565_v63, %v5494_v54  ;;  %v5707_v40 = vadd.f32 %v5565_v63, %v5505_v28  ;;  %v2300_v55 = vmax.f32 %v2292_v53, %v2299_v9  ;;  %v2301_v47 = vsel %vm2266_vm2, %v5681_v1, -inf }
 0x4d1   :  { %v2294_v54 = vmax.f32 %v2286_v31, %v2293_v44  ;;  %v2288_v45 = vmax.f32 %v2280_v49, %v2287_v42  ;;  %v2290_v39 = vmax.f32 %v2282_v34, %v2289_v33  ;;  %v2297_v12 = vsel %vm2266_vm2, %v5685_v46, -inf }
 0x4d2   :  { %6669 = vst [vmem:[#allocation93_spill] sm:$0xff] %v5691_v35  ;;  %v2307_v28 = vsel %vm2266_vm2, %v5691_v35, -inf  ;;  %v2303_v31 = vsel %vm2266_vm2, %v5695_v17, -inf  ;;  %v2309_v34 = vsel %vm2266_vm2, %v5699_v62, -inf  ;;  %v2305_v49 = vsel %vm2266_vm2, %v5707_v40, -inf }
 0x4d3   :  { %v2296_v56 = vmax.f32 %v2288_v45, %v2295_v20  ;;  %v2302_v33 = vmax.f32 %v2294_v54, %v2301_v47  ;;  %v2298_v9 = vmax.f32 %v2290_v39, %v2297_v12  ;;  %v2308_v12 = vmax.f32 %v2300_v55, %v2307_v28 }
 0x4d5   :  { %v2310_v54 = vmax.f32 %v2302_v33, %v2309_v34  ;;  %v2306_v39 = vmax.f32 %v2298_v9, %v2305_v49 }
 0x4f3   :  { %v5521_v52 = vpop.xlane.xlu0 %2084  ;;  %v5523_v14 = vpop.xlane.xlu1 %2081 }
 0x4f4   :  { %v5717_v25 = vadd.f32 %v5565_v63, %v5521_v52  ;;  %v5729_v44 = vadd.f32 %v5565_v63, %v5523_v14 }
 0x4f6   :  { %6670 = vst [vmem:[#allocation94_spill] sm:$0xff] %v5717_v25 }
 0x4f7   :  { %v5525_v43 = vpop.xlane.xlu0 %2078  ;;  %v5527_v26 = vpop.xlane.xlu1 %2075 }
 0x4f8   :  { %v5733_v52 = vadd.f32 %v5565_v63, %v5527_v26  ;;  %v5737_v42 = vadd.f32 %v5565_v63, %v5525_v43  ;;  %v2317_v26 = vsel %vm2266_vm2, %v5717_v25, -inf }
 0x4fa   :  { %v2311_v35 = vsel %vm2266_vm2, %v5733_v52, -inf }
 0x4fb   :  { %v5529_v38 = vpop.xlane.xlu0 %2096  ;;  %v5531_v22 = vpop.xlane.xlu1 %2093 }
 0x4fc   :  { %v5741_v53 = vadd.f32 %v5565_v63, %v5531_v22  ;;  %v5745_v20 = vadd.f32 %v5565_v63, %v5529_v38  ;;  %v2304_v22 = vmax.f32 %v2296_v56, %v2303_v31  ;;  %v2315_v38 = vsel %vm2266_vm2, %v5729_v44, -inf }
 0x4fd   :  { %v2316_v33 = vmax.f32 %v2308_v12, %v2315_v38 }
 0x4fe   :  { %6671 = vst [vmem:[#allocation95_spill] sm:$0xff] %v5741_v53  ;;  %v2323_v55 = vsel %vm2266_vm2, %v5741_v53, -inf  ;;  %v2325_v56 = vsel %vm2266_vm2, %v5745_v20, -inf  ;;  %v2312_v9 = vmax.f32 %v2304_v22, %v2311_v35 }
 0x4ff   :  { %v5533_v41 = vpop.xlane.xlu0 %2090  ;;  %v5535_v4 = vpop.xlane.xlu1 %2087  ;;  %v2324_v12 = vmax.f32 %v2316_v33, %v2323_v55 }
 0x500   :  { %v5753_v45 = vadd.f32 %v5565_v63, %v5535_v4  ;;  %v5757_v43 = vadd.f32 %v5565_v63, %v5533_v41  ;;  %v2313_v4 = vsel %vm2266_vm2, %v5737_v42, -inf  ;;  %v2318_v41 = vmax.f32 %v2310_v54, %v2317_v26 }
 0x501   :  { %v2314_v26 = vmax.f32 %v2306_v39, %v2313_v4 }
 0x502   :  { %6672 = vst [vmem:[#allocation97_spill] sm:$0xff] %v5753_v45  ;;  %v2319_v31 = vsel %vm2266_vm2, %v5753_v45, -inf  ;;  %v2321_v34 = vsel %vm2266_vm2, %v5757_v43, -inf  ;;  %v2326_v53 = vmax.f32 %v2318_v41, %v2325_v56 }
 0x503   :  { %v5537_v61 = vpop.xlane.xlu1 %2105  ;;  %v5539_v59 = vpop.xlane.xlu0 %2108  ;;  %v2320_v35 = vmax.f32 %v2312_v9, %v2319_v31  ;;  %v2322_v22 = vmax.f32 %v2314_v26, %v2321_v34 }
 0x504   :  { %v5769_v25 = vadd.f32 %v5565_v63, %v5539_v59  ;;  %v5777_v28 = vadd.f32 %v5565_v63, %v5537_v61 }
 0x506   :  { %6673 = vst [vmem:[#allocation96_spill] sm:$0xff] %v5777_v28  ;;  %v2333_v45 = vsel %vm2266_vm2, %v5769_v25, -inf }
 0x507   :  { %v5541_v50 = vpop.xlane.xlu1 %2099  ;;  %v5543_v60 = vpop.xlane.xlu0 %2102  ;;  %v2334_v41 = vmax.f32 %v2326_v53, %v2333_v45 }
 0x508   :  { %v5785_v59 = vadd.f32 %v5565_v63, %v5541_v50  ;;  %v5789_v49 = vadd.f32 %v5565_v63, %v5543_v60 }
 0x50a   :  { %6674 = vst [vmem:[#allocation99_spill] sm:$0xff] %v5785_v59  ;;  %v2327_v38 = vsel %vm2266_vm2, %v5785_v59, -inf  ;;  %v2329_v4 = vsel %vm2266_vm2, %v5789_v49, -inf }
 0x50b   :  { %v5545_v15 = vpop.xlane.xlu1 %2117  ;;  %v5547_v27 = vpop.xlane.xlu0 %2120  ;;  %v2328_v45 = vmax.f32 %v2320_v35, %v2327_v38  ;;  %v2330_v33 = vmax.f32 %v2322_v22, %v2329_v4 }
 0x50c   :  { %v5793_v61 = vadd.f32 %v5565_v63, %v5547_v27  ;;  %v5799_v50 = vadd.f32 %v5565_v63, %v5545_v15  ;;  %v2331_v27 = vsel %vm2266_vm2, %v5777_v28, -inf }
 0x50e   :  { %6675 = vst [vmem:[#allocation98_spill] sm:$0xff] %v5793_v61  ;;  %6676 = vst [vmem:[#allocation101_spill] sm:$0xff] %v5799_v50  ;;  %v2341_v55 = vsel %vm2266_vm2, %v5793_v61, -inf }
 0x50f   :  { %v5549_v32 = vpop.xlane.xlu1 %2111  ;;  %v5551_v8 = vpop.xlane.xlu0 %2114  ;;  %v2342_v26 = vmax.f32 %v2334_v41, %v2341_v55 }
 0x510   :  { %v5803_v60 = vadd.f32 %v5565_v63, %v5551_v8  ;;  %v5813_v15 = vadd.f32 %v5565_v63, %v5549_v32  ;;  %v2339_v32 = vsel %vm2266_vm2, %v5799_v50, -inf }
 0x512   :  { %v2337_v34 = vsel %vm2266_vm2, %v5803_v60, -inf  ;;  %v2335_v50 = vsel %vm2266_vm2, %v5813_v15, -inf }
 0x513   :  { %v5553_v23 = vpop.xlane.xlu1 %2129  ;;  %v5555_v57 = vpop.xlane.xlu0 %2132  ;;  %v2338_v59 = vmax.f32 %v2330_v33, %v2337_v34  ;;  %v2336_v38 = vmax.f32 %v2328_v45, %v2335_v50 }
 0x514   :  { %v5817_v8 = vadd.f32 %v5565_v63, %v5555_v57  ;;  %v5823_v56 = vadd.f32 %v5565_v63, %v5553_v23  ;;  %v2332_v23 = vmax.f32 %v2324_v12, %v2331_v27 }
 0x516   :  { %v2349_v28 = vsel %vm2266_vm2, %v5817_v8, -inf  ;;  %v2340_v61 = vmax.f32 %v2332_v23, %v2339_v32 }
 0x517   :  { %v5557_v51 = vpop.xlane.xlu1 %2123  ;;  %v5559_v0 = vpop.xlane.xlu0 %2126  ;;  %v2350_v4 = vmax.f32 %v2342_v26, %v2349_v28 }
 0x518   :  { %v5827_v31 = vadd.f32 %v5565_v63, %v5559_v0  ;;  %v5835_v57 = vadd.f32 %v5565_v63, %v5557_v51 }
 0x51a   :  { %v2345_v12 = vsel %vm2266_vm2, %v5827_v31, -inf  ;;  %v2343_v35 = vsel %vm2266_vm2, %v5835_v57, -inf }
 0x51b   :  { %v5561_v29 = vpop.xlane.xlu1 %2141  ;;  %v5563_v21 = vpop.xlane.xlu0 %2144  ;;  %v2346_v23 = vmax.f32 %v2338_v59, %v2345_v12 }
 0x51c   :  { %v5839_v53 = vadd.f32 %v5565_v63, %v5563_v21  ;;  %v5847_v51 = vadd.f32 %v5565_v63, %v5561_v29  ;;  %v2347_v21 = vsel %vm2266_vm2, %v5823_v56, -inf }
 0x51d   :  { %v2348_v32 = vmax.f32 %v2340_v61, %v2347_v21 }
 0x51e   :  { %v2357_v22 = vsel %vm2266_vm2, %v5839_v53, -inf  ;;  %v2355_v34 = vsel %vm2266_vm2, %v5847_v51, -inf }
 0x51f   :  { %v5591_v6 = vpop.xlane.xlu1 %2135  ;;  %v5613_v3 = vpop.xlane.xlu0 %2138  ;;  %v2358_v50 = vmax.f32 %v2350_v4, %v2357_v22  ;;  %v2356_v59 = vmax.f32 %v2348_v32, %v2355_v34 }
 0x520   :  { %v5859_v27 = vadd.f32 %v5565_v63, %v5591_v6  ;;  %v5863_v29 = vadd.f32 %v5565_v63, %v5613_v3  ;;  %v2344_v3 = vmax.f32 %v2336_v38, %v2343_v35 }
 0x522   :  { %v2353_v61 = vsel %vm2266_vm2, %v5863_v29, -inf }
 0x523   :  { %v5647_v10 = vpop.xlane.xlu1 %2153  ;;  %v5665_v7 = vpop.xlane.xlu0 %2156  ;;  %v2354_v38 = vmax.f32 %v2346_v23, %v2353_v61 }
 0x524   :  { %v5867_v41 = vadd.f32 %v5565_v63, %v5647_v10  ;;  %v5881_v28 = vadd.f32 %v5565_v63, %v5665_v7 }
 0x526   :  { %6677 = vst [vmem:[#allocation100_spill] sm:$0xff] %v5867_v41  ;;  %v2363_v26 = vsel %vm2266_vm2, %v5867_v41, -inf  ;;  %v2365_v4 = vsel %vm2266_vm2, %v5881_v28, -inf }
 0x527   :  { %v5701_v18 = vpop.xlane.xlu1 %2147  ;;  %v5709_v24 = vpop.xlane.xlu0 %2150  ;;  %v2364_v32 = vmax.f32 %v2356_v59, %v2363_v26 }
 0x528   :  { %v5871_v55 = vadd.f32 %v5565_v63, %v5709_v24  ;;  %v5877_v6 = vadd.f32 %v5565_v63, %v5701_v18  ;;  %v2351_v24 = vsel %vm2266_vm2, %v5859_v27, -inf }
 0x529   :  { %v2352_v22 = vmax.f32 %v2344_v3, %v2351_v24 }
 0x52a   :  { %6678 = vst [vmem:[#allocation103_spill] sm:$0xff] %v5877_v6  ;;  %v2361_v7 = vsel %vm2266_vm2, %v5871_v55, -inf  ;;  %v2359_v12 = vsel %vm2266_vm2, %v5877_v6, -inf }
 0x52b   :  { %v5747_v14 = vpop.xlane.xlu1 %2165  ;;  %v5759_v47 = vpop.xlane.xlu0 %2168  ;;  %v2360_v41 = vmax.f32 %v2352_v22, %v2359_v12  ;;  %v2362_v3 = vmax.f32 %v2354_v38, %v2361_v7  ;;  %v2366_v7 = vmax.f32 %v2358_v50, %v2365_v4 }
 0x52c   :  { %v5899_v21 = vadd.f32 %v5565_v63, %v5747_v14 }
 0x52e   :  { %6681 = vst [vmem:[#allocation84_spill] sm:$0xff] %v5899_v21  ;;  %v2371_v23 = vsel %vm2266_vm2, %v5899_v21, -inf }
 0x52f   :  { %v2160_v54 = vpop.xlane.xlu1 %2159  ;;  %v2163_v39 = vpop.xlane.xlu0 %2162 }
 0x530   :  { %v5888_v33 = vadd.f32 %v5565_v63, %v2160_v54  ;;  %v5891_v18 = vadd.f32 %v5565_v63, %v2163_v39  ;;  %v5905_v54 = vadd.f32 %v5565_v63, %v5759_v47 }
 0x532   :  { %6679 = vst [vmem:[#allocation102_spill] sm:$0xff] %v5888_v33  ;;  %6680 = vst [vmem:[#allocation85_spill] sm:$0xff] %v5891_v18  ;;  %v2367_v34 = vsel %vm2266_vm2, %v5888_v33, -inf  ;;  %v2369_v47 = vsel %vm2266_vm2, %v5891_v18, -inf  ;;  %v2373_v61 = vsel %vm2266_vm2, %v5905_v54, -inf }
 0x533   :  { %v2178_v9 = vpop.xlane.xlu1 %2177  ;;  %6682 = vst [vmem:[#allocation104_spill] sm:$0xff] %v5905_v54  ;;  %v2368_v12 = vmax.f32 %v2360_v41, %v2367_v34  ;;  %v2370_v22 = vmax.f32 %v2362_v3, %v2369_v47  ;;  %v2374_v6 = vmax.f32 %v2366_v7, %v2373_v61 }
 0x534   :  { %v5916_v14 = vadd.f32 %v5565_v63, %v2178_v9 }
 0x536   :  { %6684 = vst [vmem:[#allocation106_spill] sm:$0xff] %v5916_v14  ;;  %v2379_v38 = vsel %vm2266_vm2, %v5916_v14, -inf }
 0x537   :  { %v2172_v10 = vpop.xlane.xlu1 %2171 }
 0x538   :  { %v5908_v39 = vadd.f32 %v5565_v63, %v2172_v10 }
 0x53a   :  { %6683 = vst [vmem:[#allocation105_spill] sm:$0xff] %v5908_v39  ;;  %v2375_v59 = vsel %vm2266_vm2, %v5908_v39, -inf }
 0x549   :  { %v2181_v0 = vpop.xlane.xlu0 %2180 }
 0x54a   :  { %v5923_v10 = vadd.f32 %v5565_v63, %v2181_v0 }
 0x54c   :  { %v2381_v21 = vsel %vm2266_vm2, %v5923_v10, -inf }
 0x54d   :  { %v2175_v45 = vpop.xlane.xlu0 %2174  ;;  %v2382_v34 = vmax.f32 %v2374_v6, %v2381_v21 }
 0x54e   :  { %v5911_v35 = vadd.f32 %v5565_v63, %v2175_v45 }
 0x550   :  { %v2377_v0 = vsel %vm2266_vm2, %v5911_v35, -inf }
 0x551   :  { %v2378_v18 = vmax.f32 %v2370_v22, %v2377_v0 }
 0x555   :  { %v2184_v45 = vpop.xlane.xlu1 %2183  ;;  %v2187_v24 = vpop.xlane.xlu0 %2186 }
 0x556   :  { %v5928_v9 = vadd.f32 %v5565_v63, %v2184_v45  ;;  %v5937_v26 = vadd.f32 %v5565_v63, %v2187_v24  ;;  %v2372_v45 = vmax.f32 %v2364_v32, %v2371_v23  ;;  %v2376_v24 = vmax.f32 %v2368_v12, %v2375_v59 }
 0x558   :  { %v2385_v33 = vsel %vm2266_vm2, %v5937_v26, -inf  ;;  %v2383_v39 = vsel %vm2266_vm2, %v5928_v9, -inf  ;;  %v2380_v4 = vmax.f32 %v2372_v45, %v2379_v38 }
 0x559   :  { %v2190_v54 = vpop.xlane.xlu1 %2189  ;;  %v2193_v50 = vpop.xlane.xlu0 %2192  ;;  %v2386_v47 = vmax.f32 %v2378_v18, %v2385_v33  ;;  %v2384_v3 = vmax.f32 %v2376_v24, %v2383_v39  ;;  %v2405_v33 = vlaneseq }
 0x55a   :  { %v5948_v41 = vadd.f32 %v5565_v63, %v2190_v54  ;;  %v5951_v32 = vadd.f32 %v5565_v63, %v2193_v50  ;;  %v2265_v50 = vld [vmem:[#allocation2] sm:$0x1] }
 0x55b   :  { %v2391_v0 = vmax.f32 %v2384_v3, %v2386_v47  ;;  %v5958_v39 = vshrl.u32 %v2405_v33, 7 }
 0x55c   :  { %v2387_v23 = vsel %vm2266_vm2, %v5948_v41, -inf  ;;  %v2389_v14 = vsel %vm2266_vm2, %v5951_v32, -inf }
 0x55d   :  { %v2388_v61 = vmax.f32 %v2380_v4, %v2387_v23  ;;  %v2390_v59 = vmax.f32 %v2382_v34, %v2389_v14  ;;  %v2407_v14 = vsub.s32 0, %v5958_v39 }
 0x55f   :  { %v2392_v7 = vmax.f32 %v2388_v61, %v2390_v59 }
 0x561   :  { %v2393_v12 = vmax.f32 %v2391_v0, %v2392_v7 }
 0x563   :  { %v2394_v54 = vrot.slane %v2393_v12, 4 }
 0x565   :  { %v2395_v22 = vmax.f32 %v2393_v12, %v2394_v54 }
 0x567   :  { %v2396_v38 = vrot.slane %v2395_v22, 2 }
 0x569   :  { %v2397_v45 = vmax.f32 %v2395_v22, %v2396_v38 }
 0x56b   :  { %v2398_v63 = vrot.slane %v2397_v45, 1 }
 0x56d   :  { %v2399_v6 = vmax.f32 %v2397_v45, %v2398_v63 }
 0x56f   :  { %v2400_v18 = vmax.f32 %v2265_v50, %v2399_v6  ;;  %v6685_v6 = vld [vmem:[#allocation90_spill] sm:$0xff] }
 0x571   :  { %v2401_v21 = vsub.f32 %v2265_v50, %v2400_v18  ;;  %3206 = vst.msk [vmem:[#allocation2] sm:$0x1] %vm86_vm1, %v2400_v18  ;;  %v5964_v34 = vrot.slane %v2400_v18, %v2407_v14 }
 0x573   :  { %v2402_v24 = vmul.f32 1.442695, %v2401_v21  ;;  %v2410_v3 = vsub.f32 %v5581_v30, %v5964_v34  ;;  %v2411_v23 = vsub.f32 %v5585_v19, %v5964_v34  ;;  %v2467_v61 = vsub.f32 %v5911_v35, %v5964_v34  ;;  %v6686_v21 = vld [vmem:[#allocation89_spill] sm:$0xff] }
 0x574   :  { %v2412_v59 = vsub.f32 %v5577_v2, %v5964_v34  ;;  %v2469_v0 = vsub.f32 %v5923_v10, %v5964_v34  ;;  %v2470_v7 = vsub.f32 %v5928_v9, %v5964_v34  ;;  %v2471_v30 = vsub.f32 %v5937_v26, %v5964_v34 }
 0x575   :  { %3926 = vpow2.f32 %v2402_v24  ;;  %v2472_v19 = vsub.f32 %v5948_v41, %v5964_v34  ;;  %v2473_v12 = vsub.f32 %v5951_v32, %v5964_v34  ;;  %v2474_v54 = vmul.f32 1.442695, %v2410_v3 }
 0x576   :  { %v2476_v22 = vmul.f32 1.442695, %v2411_v23  ;;  %v2413_v2 = vsub.f32 %v5589_v37, %v5964_v34  ;;  %v2419_v38 = vsub.f32 %v5621_v16, %v5964_v34  ;;  %v2478_v45 = vmul.f32 1.442695, %v2412_v59  ;;  %v6687_v37 = vld [vmem:[#allocation88_spill] sm:$0xff] }
 0x577   :  { %3928 = vpow2.f32 %v2474_v54  ;;  %v2414_v63 = vsub.f32 %v5595_v48, %v5964_v34  ;;  %v2421_v33 = vsub.f32 %v6685_v6, %v5964_v34  ;;  %v2415_v24 = vsub.f32 %v6686_v21, %v5964_v34  ;;  %v6688_v54 = vld [vmem:[#allocation86_spill] sm:$0xff] }
 0x578   :  { %v3210_v4 = vld [vmem:[#allocation2] sm:$0x1]  ;;  %3930 = vpow2.f32 %v2476_v22  ;;  %v2480_v50 = vmul.f32 1.442695, %v2413_v2  ;;  %v2492_v18 = vmul.f32 1.442695, %v2419_v38  ;;  %v2423_v16 = vsub.f32 %v5659_v5, %v5964_v34 }
 0x579   :  { %3211 = vst.msk [vmem:[#allocation12] sm:$0x1] %vm86_vm1, %v3210_v4  ;;  %3932 = vpow2.f32 %v2478_v45  ;;  %v2416_v4 = vsub.f32 %v6687_v37, %v5964_v34  ;;  %v2482_v3 = vmul.f32 1.442695, %v2414_v63  ;;  %v2496_v23 = vmul.f32 1.442695, %v2421_v33 }
 0x57a   :  { %3934 = vpow2.f32 %v2480_v50  ;;  %v2417_v22 = vsub.f32 %v6688_v54, %v5964_v34  ;;  %v2484_v2 = vmul.f32 1.442695, %v2415_v24  ;;  %v6689_v38 = vld [vmem:[#allocation91_spill] sm:$0xff]  ;;  %v2425_v63 = vsub.f32 %v5645_v58, %v5964_v34 }
 0x57b   :  { %3936 = vpow2.f32 %v2492_v18  ;;  %v2418_v45 = vsub.f32 %v6689_v38, %v5964_v34  ;;  %v2486_v6 = vmul.f32 1.442695, %v2416_v4  ;;  %v2500_v5 = vmul.f32 1.442695, %v2423_v16  ;;  %v6690_v18 = vld [vmem:[#allocation87_spill] sm:$0xff] }
 0x57c   :  { %3938 = vpow2.f32 %v2482_v3  ;;  %v2488_v33 = vmul.f32 1.442695, %v2417_v22  ;;  %v2420_v21 = vsub.f32 %v6690_v18, %v5964_v34  ;;  %v2427_v37 = vsub.f32 %v5685_v46, %v5964_v34 }
 0x57d   :  { %3940 = vpow2.f32 %v2496_v23  ;;  %v2490_v24 = vmul.f32 1.442695, %v2418_v45  ;;  %v2504_v4 = vmul.f32 1.442695, %v2425_v63  ;;  %v2422_v16 = vsub.f32 %v5655_v13, %v5964_v34 }
 0x57e   :  { %3942 = vpow2.f32 %v2484_v2  ;;  %v2494_v23 = vmul.f32 1.442695, %v2420_v21  ;;  %v2429_v46 = vsub.f32 %v5681_v1, %v5964_v34  ;;  %v2508_v2 = vmul.f32 1.442695, %v2427_v37 }
 0x57f   :  { %v5966_v47 = vpop.eup %3926  ;;  %3944 = vpow2.f32 %v2486_v6  ;;  %v2424_v13 = vsub.f32 %v5641_v36, %v5964_v34  ;;  %v2426_v36 = vsub.f32 %v5669_v11, %v5964_v34  ;;  %v6691_v11 = vld [vmem:[#allocation92_spill] sm:$0xff]  ;;  %v2592_v35 = vmul.f32 1.442695, %v2469_v0 }
 0x580   :  { %2743 = vperm.xlu1 %3516, %v5966_v47   ;;  %3946 = vpow2.f32 %v2500_v5  ;;  %v2512_v18 = vmul.f32 1.442695, %v2429_v46  ;;  %v2596_v10 = vmul.f32 1.442695, %v2471_v30  ;;  %v2600_v26 = vmul.f32 1.442695, %v2473_v12 }
 0x581   :  { %v3929_v48 = vpop.eup %3928  ;;  %3948 = vpow2.f32 %v2488_v33  ;;  %v2431_v33 = vsub.f32 %v5707_v40, %v5964_v34  ;;  %v2433_v40 = vsub.f32 %v5699_v62, %v5964_v34  ;;  %v2435_v62 = vsub.f32 %v5737_v42, %v5964_v34  ;;  %v6692_v42 = vld [vmem:[#allocation94_spill] sm:$0xff] }
 0x582   :  { %v3931_v59 = vpop.eup %3930  ;;  %2753 = vperm.xlu0 %3517, %v3929_v48   ;;  %v2604_v58 = vsel %vm2266_vm2, %v3929_v48, 0.0  ;;  %3950 = vpow2.f32 %v2490_v24 }
 0x583   :  { %v3933_v50 = vpop.eup %3932  ;;  %v2605_v22 = vsel %vm2266_vm2, %v3931_v59, 0.0  ;;  %3952 = vpow2.f32 %v2504_v4 }
 0x584   :  { %2758 = vperm.xlu1 %3516, %v3931_v59   ;;  %v3935_v3 = vpop.eup %3934  ;;  %v2606_v38 = vadd.f32 %v2605_v22, %v2604_v58  ;;  %v2607_v6 = vsel %vm2266_vm2, %v3933_v50, 0.0  ;;  %3954 = vpow2.f32 %v2494_v23  ;;  %v2498_v59 = vmul.f32 1.442695, %v2422_v16 }
 0x585   :  { %v6011_v54 = vpop.eup %3936  ;;  %v2609_v5 = vsel %vm2266_vm2, %v3935_v3, 0.0  ;;  %3956 = vpow2.f32 %v2508_v2  ;;  %v2516_v23 = vmul.f32 1.442695, %v2431_v33 }
 0x586   :  { %2798 = vperm.xlu0 %3517, %v6011_v54   ;;  %v3939_v45 = vpop.eup %3938  ;;  %v2608_v63 = vadd.f32 %v2607_v6, %v2606_v38  ;;  %3958 = vpow2.f32 %v2498_v59  ;;  %v2428_v6 = vsub.f32 %v6691_v11, %v5964_v34  ;;  %v2520_v59 = vmul.f32 1.442695, %v2433_v40 }
 0x587   :  { %v6021_v48 = vpop.eup %3940  ;;  %v2611_v24 = vsel %vm2266_vm2, %v3939_v45, 0.0  ;;  %3960 = vpow2.f32 %v2512_v18 }
 0x588   :  { %2763 = vperm.xlu1 %3516, %v3933_v50   ;;  %v3943_v1 = vpop.eup %3942  ;;  %v2610_v50 = vadd.f32 %v2609_v5, %v2608_v63  ;;  %v2506_v63 = vmul.f32 1.442695, %v2426_v36  ;;  %v2621_v36 = vsel %vm2266_vm2, %v6011_v54, 0.0  ;;  %v2625_v54 = vsel %vm2266_vm2, %v6021_v48, 0.0 }
 0x589   :  { %v3945_v21 = vpop.eup %3944  ;;  %v2613_v58 = vsel %vm2266_vm2, %v3943_v1, 0.0 }
 0x58a   :  { %2808 = vperm.xlu0 %3517, %v6021_v48   ;;  %v3947_v37 = vpop.eup %3946  ;;  %v2612_v4 = vadd.f32 %v2611_v24, %v2610_v50  ;;  %v2615_v2 = vsel %vm2266_vm2, %v3945_v21, 0.0  ;;  %v2430_v24 = vsub.f32 %v5695_v17, %v5964_v34  ;;  %v6693_v17 = vld [vmem:[#allocation93_spill] sm:$0xff] }
 0x58b   :  { %v3949_v16 = vpop.eup %3948  ;;  %v2629_v48 = vsel %vm2266_vm2, %v3947_v37, 0.0 }
 0x58c   :  { %2768 = vperm.xlu1 %3516, %v3935_v3   ;;  %v2502_v3 = vmul.f32 1.442695, %v2424_v13  ;;  %v2614_v22 = vadd.f32 %v2613_v58, %v2612_v4  ;;  %v3951_v46 = vpop.eup %3950  ;;  %v2617_v13 = vsel %vm2266_vm2, %v3949_v16, 0.0  ;;  %v2510_v4 = vmul.f32 1.442695, %v2428_v6 }
 0x58d   :  { %v3953_v38 = vpop.eup %3952  ;;  %v2619_v33 = vsel %vm2266_vm2, %v3951_v46, 0.0  ;;  %v2514_v11 = vmul.f32 1.442695, %v2430_v24 }
 0x58e   :  { %2818 = vperm.xlu0 %3517, %v3947_v37   ;;  %3962 = vpow2.f32 %v2502_v3  ;;  %v2524_v3 = vmul.f32 1.442695, %v2435_v62  ;;  %v2633_v37 = vsel %vm2266_vm2, %v3953_v38, 0.0 }
 0x58f   :  { %3964 = vpow2.f32 %v2516_v23 }
 0x590   :  { %2773 = vperm.xlu1 %3516, %v3939_v45   ;;  %v2616_v45 = vadd.f32 %v2615_v2, %v2614_v22  ;;  %3966 = vpow2.f32 %v2506_v63 }
 0x591   :  { %3968 = vpow2.f32 %v2520_v59 }
 0x592   :  { %2828 = vperm.xlu0 %3517, %v3953_v38   ;;  %v2618_v5 = vadd.f32 %v2617_v13, %v2616_v45  ;;  %v2432_v45 = vsub.f32 %v6693_v17, %v5964_v34  ;;  %3970 = vpow2.f32 %v2510_v4 }
 0x593   :  { %3972 = vpow2.f32 %v2524_v3 }
 0x594   :  { %2778 = vperm.xlu1 %3516, %v3943_v1   ;;  %v3955_v1 = vpop.eup %3954  ;;  %v2620_v50 = vadd.f32 %v2619_v33, %v2618_v5  ;;  %v2434_v33 = vsub.f32 %v5733_v52, %v5964_v34  ;;  %3974 = vpow2.f32 %v2514_v11  ;;  %v2436_v52 = vsub.f32 %v5729_v44, %v5964_v34  ;;  %v6694_v11 = vld [vmem:[#allocation97_spill] sm:$0xff] }
 0x595   :  { %v3957_v18 = vpop.eup %3956  ;;  %v2623_v23 = vsel %vm2266_vm2, %v3955_v1, 0.0  ;;  %v2438_v44 = vsub.f32 %v6694_v11, %v5964_v34 }
 0x596   :  { %2838 = vperm.xlu0 %3517, %v3957_v18   ;;  %v2622_v58 = vadd.f32 %v2621_v36, %v2620_v50  ;;  %v3959_v40 = vpop.eup %3958  ;;  %v2518_v50 = vmul.f32 1.442695, %v2432_v45  ;;  %v2522_v3 = vmul.f32 1.442695, %v2434_v33  ;;  %v2637_v38 = vsel %vm2266_vm2, %v3957_v18, 0.0  ;;  %v6695_v33 = vld [vmem:[#allocation95_spill] sm:$0xff] }
 0x597   :  { %v3961_v22 = vpop.eup %3960  ;;  %v2627_v62 = vsel %vm2266_vm2, %v3959_v40, 0.0 }
 0x598   :  { %2783 = vperm.xlu1 %3516, %v3945_v21   ;;  %v2437_v21 = vsub.f32 %v6692_v42, %v5964_v34  ;;  %v2624_v2 = vadd.f32 %v2623_v23, %v2622_v58  ;;  %v3963_v13 = vpop.eup %3962  ;;  %v2641_v18 = vsel %vm2266_vm2, %v3961_v22, 0.0 }
 0x599   :  { %v3965_v59 = vpop.eup %3964  ;;  %v2631_v36 = vsel %vm2266_vm2, %v3963_v13, 0.0 }
 0x59a   :  { %2848 = vperm.xlu0 %3517, %v3961_v22   ;;  %v2528_v6 = vmul.f32 1.442695, %v2437_v21  ;;  %v2626_v63 = vadd.f32 %v2625_v54, %v2624_v2  ;;  %v3967_v4 = vpop.eup %3966  ;;  %v2526_v54 = vmul.f32 1.442695, %v2436_v52  ;;  %v6696_v52 = vld [vmem:[#allocation99_spill] sm:$0xff]  ;;  %v2645_v22 = vsel %vm2266_vm2, %v3965_v59, 0.0 }
 0x59b   :  { %v3969_v42 = vpop.eup %3968  ;;  %v2635_v2 = vsel %vm2266_vm2, %v3967_v4, 0.0 }
 0x59c   :  { %2788 = vperm.xlu1 %3516, %v3949_v16   ;;  %v2439_v16 = vsub.f32 %v5757_v43, %v5964_v34  ;;  %v2628_v5 = vadd.f32 %v2627_v62, %v2626_v63  ;;  %v2441_v43 = vsub.f32 %v5745_v20, %v5964_v34  ;;  %3976 = vpow2.f32 %v2528_v6  ;;  %v3971_v23 = vpop.eup %3970 }
 0x59d   :  { %3978 = vpow2.f32 %v2518_v50  ;;  %v2443_v20 = vsub.f32 %v5789_v49, %v5964_v34  ;;  %v3973_v17 = vpop.eup %3972  ;;  %v2445_v49 = vsub.f32 %v5769_v25, %v5964_v34  ;;  %v2639_v63 = vsel %vm2266_vm2, %v3971_v23, 0.0 }
 0x59e   :  { %2858 = vperm.xlu0 %3517, %v3965_v59   ;;  %v2630_v24 = vadd.f32 %v2629_v48, %v2628_v5  ;;  %v3975_v6 = vpop.eup %3974  ;;  %v2440_v50 = vsub.f32 %v6695_v33, %v5964_v34  ;;  %v2530_v48 = vmul.f32 1.442695, %v2438_v44  ;;  %v2447_v25 = vsub.f32 %v5803_v60, %v5964_v34  ;;  %v6698_v44 = vld [vmem:[#allocation96_spill] sm:$0xff] }
 0x59f   :  { %v2649_v59 = vsel %vm2266_vm2, %v3969_v42, 0.0 }
 0x5a0   :  { %2793 = vperm.xlu1 %3516, %v3951_v46   ;;  %v2532_v46 = vmul.f32 1.442695, %v2439_v16  ;;  %v2632_v21 = vadd.f32 %v2631_v36, %v2630_v24  ;;  %v2643_v24 = vsel %vm2266_vm2, %v3975_v6, 0.0 }
 0x5a2   :  { %2868 = vperm.xlu0 %3517, %v3969_v42   ;;  %3980 = vpow2.f32 %v2532_v46  ;;  %v2634_v58 = vadd.f32 %v2633_v37, %v2632_v21  ;;  %v2534_v37 = vmul.f32 1.442695, %v2440_v50  ;;  %v2446_v50 = vsub.f32 %v5813_v15, %v5964_v34 }
 0x5a3   :  { %3982 = vpow2.f32 %v2522_v3  ;;  %v2442_v3 = vsub.f32 %v6696_v52, %v5964_v34  ;;  %v2653_v42 = vsel %vm2266_vm2, %v3973_v17, 0.0 }
 0x5a4   :  { %2803 = vperm.xlu1 %3516, %v3955_v1   ;;  %v2536_v1 = vmul.f32 1.442695, %v2441_v43  ;;  %v2636_v45 = vadd.f32 %v2635_v2, %v2634_v58  ;;  %v2546_v52 = vmul.f32 1.442695, %v2446_v50 }
 0x5a6   :  { %2878 = vperm.xlu0 %3517, %v3973_v17   ;;  %3984 = vpow2.f32 %v2536_v1  ;;  %v2638_v16 = vadd.f32 %v2637_v38, %v2636_v45  ;;  %v3977_v62 = vpop.eup %3976  ;;  %v2538_v38 = vmul.f32 1.442695, %v2442_v3 }
 0x5a7   :  { %3986 = vpow2.f32 %v2526_v54  ;;  %v3979_v46 = vpop.eup %3978  ;;  %v2444_v54 = vsub.f32 %v6698_v44, %v5964_v34  ;;  %v2657_v17 = vsel %vm2266_vm2, %v3977_v62, 0.0 }
 0x5a8   :  { %2813 = vperm.xlu1 %3516, %v3959_v40   ;;  %v2540_v40 = vmul.f32 1.442695, %v2443_v20  ;;  %v2640_v5 = vadd.f32 %v2639_v63, %v2638_v16  ;;  %v2548_v20 = vmul.f32 1.442695, %v2447_v25  ;;  %v2647_v2 = vsel %vm2266_vm2, %v3979_v46, 0.0 }
 0x5aa   :  { %2888 = vperm.xlu0 %3517, %v3977_v62   ;;  %3988 = vpow2.f32 %v2540_v40  ;;  %v2642_v43 = vadd.f32 %v2641_v18, %v2640_v5 }
 0x5ab   :  { %3990 = vpow2.f32 %v2530_v48  ;;  %v2542_v48 = vmul.f32 1.442695, %v2444_v54 }
 0x5ac   :  { %2823 = vperm.xlu1 %3516, %v3963_v13   ;;  %v2544_v13 = vmul.f32 1.442695, %v2445_v49  ;;  %v3981_v36 = vpop.eup %3980  ;;  %v2644_v21 = vadd.f32 %v2643_v24, %v2642_v43 }
 0x5ad   :  { %v3983_v58 = vpop.eup %3982  ;;  %v2661_v62 = vsel %vm2266_vm2, %v3981_v36, 0.0 }
 0x5ae   :  { %2898 = vperm.xlu0 %3517, %v3981_v36   ;;  %3992 = vpow2.f32 %v2544_v13  ;;  %v2646_v1 = vadd.f32 %v2645_v22, %v2644_v21  ;;  %v2651_v63 = vsel %vm2266_vm2, %v3983_v58, 0.0  ;;  %v6699_v21 = vld [vmem:[#allocation101_spill] sm:$0xff] }
 0x5af   :  { %3994 = vpow2.f32 %v2534_v37  ;;  %v2448_v15 = vsub.f32 %v6699_v21, %v5964_v34 }
 0x5b0   :  { %2833 = vperm.xlu1 %3516, %v3967_v4   ;;  %v6697_v4 = vld [vmem:[#allocation98_spill] sm:$0xff]  ;;  %v3985_v45 = vpop.eup %3984  ;;  %v2648_v11 = vadd.f32 %v2647_v2, %v2646_v1  ;;  %3996 = vpow2.f32 %v2548_v20  ;;  %v2450_v20 = vsub.f32 %v5835_v57, %v5964_v34  ;;  %v2452_v57 = vsub.f32 %v5823_v56, %v5964_v34 }
 0x5b1   :  { %v2449_v60 = vsub.f32 %v6697_v4, %v5964_v34  ;;  %v3987_v16 = vpop.eup %3986  ;;  %3998 = vpow2.f32 %v2538_v38  ;;  %v2550_v1 = vmul.f32 1.442695, %v2448_v15  ;;  %v2665_v36 = vsel %vm2266_vm2, %v3985_v45, 0.0 }
 0x5b2   :  { %2908 = vperm.xlu0 %3517, %v3985_v45   ;;  %v2650_v40 = vadd.f32 %v2649_v59, %v2648_v11  ;;  %v2655_v13 = vsel %vm2266_vm2, %v3987_v16, 0.0  ;;  %v2554_v59 = vmul.f32 1.442695, %v2450_v20  ;;  %v2454_v56 = vsub.f32 %v5859_v27, %v5964_v34 }
 0x5b3   :  { %v2552_v49 = vmul.f32 1.442695, %v2449_v60  ;;  %v2558_v50 = vmul.f32 1.442695, %v2452_v57  ;;  %v2456_v27 = vsub.f32 %v5847_v51, %v5964_v34 }
 0x5b4   :  { %2843 = vperm.xlu1 %3516, %v3971_v23   ;;  %v2451_v23 = vsub.f32 %v5827_v31, %v5964_v34  ;;  %v3989_v5 = vpop.eup %3988  ;;  %v2652_v33 = vadd.f32 %v2651_v63, %v2650_v40  ;;  %v2453_v31 = vsub.f32 %v5817_v8, %v5964_v34  ;;  %v2455_v8 = vsub.f32 %v5863_v29, %v5964_v34 }
 0x5b5   :  { %4000 = vpow2.f32 %v2552_v49  ;;  %v3991_v25 = vpop.eup %3990  ;;  %v2457_v29 = vsub.f32 %v5839_v53, %v5964_v34  ;;  %v2459_v53 = vsub.f32 %v5871_v55, %v5964_v34  ;;  %v2669_v45 = vsel %vm2266_vm2, %v3989_v5, 0.0 }
 0x5b6   :  { %2918 = vperm.xlu0 %3517, %v3989_v5   ;;  %v2654_v18 = vadd.f32 %v2653_v42, %v2652_v33  ;;  %4002 = vpow2.f32 %v2542_v48  ;;  %v2659_v22 = vsel %vm2266_vm2, %v3991_v25, 0.0  ;;  %v2461_v55 = vsub.f32 %v5881_v28, %v5964_v34 }
 0x5b7   :  { %v2572_v48 = vmul.f32 1.442695, %v2459_v53 }
 0x5b8   :  { %2853 = vperm.xlu1 %3516, %v3975_v6   ;;  %v2556_v6 = vmul.f32 1.442695, %v2451_v23  ;;  %v3993_v43 = vpop.eup %3992  ;;  %v2656_v24 = vadd.f32 %v2655_v13, %v2654_v18  ;;  %v2568_v23 = vmul.f32 1.442695, %v2457_v29  ;;  %v2562_v13 = vmul.f32 1.442695, %v2454_v56 }
 0x5b9   :  { %v3995_v37 = vpop.eup %3994  ;;  %v2673_v5 = vsel %vm2266_vm2, %v3993_v43, 0.0  ;;  %v2576_v21 = vmul.f32 1.442695, %v2461_v55 }
 0x5ba   :  { %2928 = vperm.xlu0 %3517, %v3993_v43   ;;  %4004 = vpow2.f32 %v2556_v6  ;;  %v2658_v3 = vadd.f32 %v2657_v17, %v2656_v24  ;;  %v3997_v4 = vpop.eup %3996  ;;  %v2663_v44 = vsel %vm2266_vm2, %v3995_v37, 0.0  ;;  %v6700_v24 = vld [vmem:[#allocation85_spill] sm:$0xff] }
 0x5bb   :  { %4006 = vpow2.f32 %v2546_v52  ;;  %v3999_v11 = vpop.eup %3998  ;;  %v2463_v28 = vsub.f32 %v6700_v24, %v5964_v34  ;;  %v2677_v43 = vsel %vm2266_vm2, %v3997_v4, 0.0 }
 0x5bc   :  { %2863 = vperm.xlu1 %3516, %v3979_v46   ;;  %v2560_v46 = vmul.f32 1.442695, %v2453_v31  ;;  %v2660_v60 = vadd.f32 %v2659_v22, %v2658_v3  ;;  %v6701_v3 = vld [vmem:[#allocation103_spill] sm:$0xff]  ;;  %v6702_v22 = vld [vmem:[#allocation104_spill] sm:$0xff] }
 0x5bd   :  { %v2458_v51 = vsub.f32 %v6701_v3, %v5964_v34  ;;  %v2580_v20 = vmul.f32 1.442695, %v2463_v28  ;;  %v6706_v28 = vld [vmem:[#allocation105_spill] sm:$0xff] }
 0x5be   :  { %2938 = vperm.xlu0 %3517, %v3997_v4   ;;  %4008 = vpow2.f32 %v2560_v46  ;;  %v2662_v2 = vadd.f32 %v2661_v62, %v2660_v60  ;;  %v2465_v60 = vsub.f32 %v6702_v22, %v5964_v34 }
 0x5bf   :  { %v4001_v54 = vpop.eup %4000  ;;  %4010 = vpow2.f32 %v2550_v1 }
 0x5c0   :  { %2873 = vperm.xlu1 %3516, %v3983_v58   ;;  %v2564_v58 = vmul.f32 1.442695, %v2455_v8  ;;  %v2664_v38 = vadd.f32 %v2663_v44, %v2662_v2  ;;  %v4003_v40 = vpop.eup %4002  ;;  %v2681_v4 = vsel %vm2266_vm2, %v4001_v54, 0.0  ;;  %v2584_v57 = vmul.f32 1.442695, %v2465_v60 }
 0x5c1   :  { %v2671_v6 = vsel %vm2266_vm2, %v4003_v40, 0.0 }
 0x5c2   :  { %2948 = vperm.xlu0 %3517, %v4001_v54   ;;  %4012 = vpow2.f32 %v2564_v58  ;;  %v2666_v49 = vadd.f32 %v2665_v36, %v2664_v38  ;;  %v2570_v38 = vmul.f32 1.442695, %v2458_v51  ;;  %v2588_v54 = vmul.f32 1.442695, %v2467_v61 }
 0x5c3   :  { %4014 = vpow2.f32 %v2554_v59 }
 0x5c4   :  { %2883 = vperm.xlu1 %3516, %v3987_v16   ;;  %v2667_v16 = vsel %vm2266_vm2, %v3999_v11, 0.0  ;;  %v4005_v63 = vpop.eup %4004  ;;  %4016 = vpow2.f32 %v2568_v23 }
 0x5c5   :  { %v2668_v33 = vadd.f32 %v2667_v16, %v2666_v49  ;;  %v4007_v31 = vpop.eup %4006  ;;  %4018 = vpow2.f32 %v2558_v50  ;;  %v2685_v56 = vsel %vm2266_vm2, %v4005_v63, 0.0 }
 0x5c6   :  { %2958 = vperm.xlu0 %3517, %v4005_v63   ;;  %4020 = vpow2.f32 %v2572_v48  ;;  %v2675_v17 = vsel %vm2266_vm2, %v4007_v31, 0.0 }
 0x5c7   :  { %v2670_v42 = vadd.f32 %v2669_v45, %v2668_v33  ;;  %4022 = vpow2.f32 %v2562_v13 }
 0x5c8   :  { %2893 = vperm.xlu1 %3516, %v3991_v25   ;;  %v4009_v18 = vpop.eup %4008  ;;  %4024 = vpow2.f32 %v2576_v21  ;;  %v2466_v21 = vsub.f32 %v6706_v28, %v5964_v34 }
 0x5c9   :  { %v2672_v25 = vadd.f32 %v2671_v6, %v2670_v42  ;;  %v4011_v52 = vpop.eup %4010  ;;  %v2689_v63 = vsel %vm2266_vm2, %v4009_v18, 0.0 }
 0x5ca   :  { %2968 = vperm.xlu0 %3517, %v4009_v18   ;;  %v2679_v29 = vsel %vm2266_vm2, %v4011_v52, 0.0  ;;  %v2586_v51 = vmul.f32 1.442695, %v2466_v21 }
 0x5cb   :  { %v2674_v15 = vadd.f32 %v2673_v5, %v2672_v25 }
 0x5cc   :  { %2903 = vperm.xlu1 %3516, %v3995_v37   ;;  %v4013_v8 = vpop.eup %4012  ;;  %v2566_v37 = vmul.f32 1.442695, %v2456_v27 }
 0x5cd   :  { %v2676_v46 = vadd.f32 %v2675_v17, %v2674_v15  ;;  %v4015_v62 = vpop.eup %4014  ;;  %v2693_v18 = vsel %vm2266_vm2, %v4013_v8, 0.0 }
 0x5ce   :  { %2978 = vperm.xlu0 %3517, %v4013_v8   ;;  %v4017_v58 = vpop.eup %4016  ;;  %4026 = vpow2.f32 %v2566_v37  ;;  %v2683_v53 = vsel %vm2266_vm2, %v4015_v62, 0.0  ;;  %v6707_v8 = vld [vmem:[#allocation106_spill] sm:$0xff] }
 0x5cf   :  { %v2678_v1 = vadd.f32 %v2677_v43, %v2676_v46  ;;  %4028 = vpow2.f32 %v2580_v20  ;;  %v4019_v36 = vpop.eup %4018  ;;  %v2697_v37 = vsel %vm2266_vm2, %v4017_v58, 0.0  ;;  %v2468_v43 = vsub.f32 %v6707_v8, %v5964_v34  ;;  %v6708_v8 = vld [vmem:[#allocation21_spill] sm:$0xff] }
 0x5d0   :  { %2913 = vperm.xlu1 %3516, %v3999_v11   ;;  %v6703_v11 = vld [vmem:[#allocation100_spill] sm:$0xff]  ;;  %v4021_v23 = vpop.eup %4020  ;;  %4030 = vpow2.f32 %v2570_v38  ;;  %v2687_v55 = vsel %vm2266_vm2, %v4019_v36, 0.0  ;;  %v2594_v38 = vmul.f32 1.442695, %v2470_v7 }
 0x5d1   :  { %v2680_v2 = vadd.f32 %v2679_v29, %v2678_v1  ;;  %v2460_v44 = vsub.f32 %v6703_v11, %v5964_v34  ;;  %4032 = vpow2.f32 %v2584_v57  ;;  %v4023_v45 = vpop.eup %4022  ;;  %v2590_v29 = vmul.f32 1.442695, %v2468_v43 }
 0x5d2   :  { %2988 = vperm.xlu0 %3517, %v4017_v58   ;;  %v4025_v48 = vpop.eup %4024  ;;  %v2691_v13 = vsel %vm2266_vm2, %v4023_v45, 0.0  ;;  %v6709_v43 = vmax.f32 %v6708_v8, 0.0 }
 0x5d3   :  { %v2682_v59 = vadd.f32 %v2681_v4, %v2680_v2  ;;  %v2574_v33 = vmul.f32 1.442695, %v2460_v44  ;;  %v2705_v12 = vsel %vm2266_vm2, %v4025_v48, 0.0 }
 0x5d4   :  { %2923 = vperm.xlu1 %3516, %v4003_v40   ;;  %v6704_v40 = vld [vmem:[#allocation102_spill] sm:$0xff] }
 0x5d5   :  { %v2684_v49 = vadd.f32 %v2683_v53, %v2682_v59  ;;  %v2462_v16 = vsub.f32 %v6704_v40, %v5964_v34  ;;  %4034 = vpow2.f32 %v2574_v33 }
 0x5d6   :  { %2998 = vperm.xlu0 %3517, %v4021_v23   ;;  %4036 = vpow2.f32 %v2588_v54 }
 0x5d7   :  { %v2686_v50 = vadd.f32 %v2685_v56, %v2684_v49  ;;  %v2578_v25 = vmul.f32 1.442695, %v2462_v16  ;;  %v2598_v49 = vmul.f32 1.442695, %v2472_v19 }
 0x5d8   :  { %2933 = vperm.xlu1 %3516, %v4007_v31   ;;  %v6705_v31 = vld [vmem:[#allocation84_spill] sm:$0xff]  ;;  %v4027_v27 = vpop.eup %4026 }
 0x5d9   :  { %v2688_v42 = vadd.f32 %v2687_v55, %v2686_v50  ;;  %v2464_v6 = vsub.f32 %v6705_v31, %v5964_v34  ;;  %v4029_v5 = vpop.eup %4028  ;;  %4038 = vpow2.f32 %v2578_v25  ;;  %v2695_v17 = vsel %vm2266_vm2, %v4027_v27, 0.0 }
 0x5da   :  { %3008 = vperm.xlu0 %3517, %v4025_v48   ;;  %4040 = vpow2.f32 %v2592_v35 }
 0x5db   :  { %v2690_v61 = vadd.f32 %v2689_v63, %v2688_v42  ;;  %v2582_v15 = vmul.f32 1.442695, %v2464_v6 }
 0x5dc   :  { %2943 = vperm.xlu1 %3516, %v4011_v52   ;;  %v4031_v52 = vpop.eup %4030 }
 0x5dd   :  { %v2692_v24 = vadd.f32 %v2691_v13, %v2690_v61  ;;  %v4033_v46 = vpop.eup %4032  ;;  %4042 = vpow2.f32 %v2582_v15  ;;  %v2699_v60 = vsel %vm2266_vm2, %v4031_v52, 0.0 }
 0x5de   :  { %3018 = vperm.xlu0 %3517, %v4029_v5   ;;  %4044 = vpow2.f32 %v2596_v10  ;;  %v2713_v56 = vsel %vm2266_vm2, %v4033_v46, 0.0 }
 0x5df   :  { %v2694_v0 = vadd.f32 %v2693_v18, %v2692_v24  ;;  %v4035_v22 = vpop.eup %4034  ;;  %4046 = vpow2.f32 %v2586_v51 }
 0x5e0   :  { %2953 = vperm.xlu1 %3516, %v4015_v62   ;;  %v4037_v20 = vpop.eup %4036  ;;  %v2701_v62 = vsel %vm2266_vm2, %v4021_v23, 0.0  ;;  %4048 = vpow2.f32 %v2600_v26  ;;  %v2703_v11 = vsel %vm2266_vm2, %v4035_v22, 0.0  ;;  %v2709_v23 = vsel %vm2266_vm2, %v4029_v5, 0.0 }
 0x5e1   :  { %v2696_v3 = vadd.f32 %v2695_v17, %v2694_v0  ;;  %4050 = vpow2.f32 %v2590_v29  ;;  %v2717_v48 = vsel %vm2266_vm2, %v4037_v20, 0.0 }
 0x5e2   :  { %3028 = vperm.xlu0 %3517, %v4033_v46   ;;  %4052 = vpow2.f32 %v2594_v38 }
 0x5e3   :  { %v2698_v30 = vadd.f32 %v2697_v37, %v2696_v3  ;;  %v4039_v2 = vpop.eup %4038  ;;  %4054 = vpow2.f32 %v2598_v49 }
 0x5e4   :  { %2963 = vperm.xlu1 %3516, %v4019_v36   ;;  %v4041_v44 = vpop.eup %4040  ;;  %v2707_v59 = vsel %vm2266_vm2, %v4039_v2, 0.0 }
 0x5e5   :  { %v2700_v1 = vadd.f32 %v2699_v60, %v2698_v30  ;;  %v2721_v6 = vsel %vm2266_vm2, %v4041_v44, 0.0  ;;  %v6710_v60 = vld [vmem:[#allocation20_spill] sm:$0xff] }
 0x5e6   :  { %3038 = vperm.xlu0 %3517, %v4037_v20   ;;  %v6711_v20 = vmax.f32 %v6710_v60, 0.0 }
 0x5e7   :  { %v2702_v58 = vadd.f32 %v2701_v62, %v2700_v1  ;;  %v4043_v57 = vpop.eup %4042  ;;  %v6712_v62 = vld [vmem:[#allocation22_spill] sm:$0xff] }
 0x5e8   :  { %2973 = vperm.xlu1 %3516, %v4023_v45   ;;  %v4045_v36 = vpop.eup %4044  ;;  %v2711_v9 = vsel %vm2266_vm2, %v4043_v57, 0.0  ;;  %v6713_v29 = vmax.f32 %v6712_v62, 0.0 }
 0x5e9   :  { %v2704_v32 = vadd.f32 %v2703_v11, %v2702_v58  ;;  %v4047_v16 = vpop.eup %4046  ;;  %v2725_v13 = vsel %vm2266_vm2, %v4045_v36, 0.0 }
 0x5ea   :  { %3048 = vperm.xlu0 %3517, %v4041_v44   ;;  %v4049_v7 = vpop.eup %4048  ;;  %v2715_v50 = vsel %vm2266_vm2, %v4047_v16, 0.0 }
 0x5eb   :  { %v2706_v4 = vadd.f32 %v2705_v12, %v2704_v32  ;;  %v4051_v45 = vpop.eup %4050  ;;  %v2729_v18 = vsel %vm2266_vm2, %v4049_v7, 0.0  ;;  %v6714_v12 = vld [vmem:[#allocation23_spill] sm:$0xff] }
 0x5ec   :  { %2983 = vperm.xlu1 %3516, %v4027_v27   ;;  %v2719_v19 = vsel %vm2266_vm2, %v4051_v45, 0.0  ;;  %v4053_v42 = vpop.eup %4052  ;;  %v6715_v38 = vmax.f32 %v6714_v12, 0.0 }
 0x5ed   :  { %v2708_v53 = vadd.f32 %v2707_v59, %v2706_v4  ;;  %v2723_v63 = vsel %vm2266_vm2, %v4053_v42, 0.0  ;;  %v4055_v35 = vpop.eup %4054 }
 0x5ee   :  { %3058 = vperm.xlu0 %3517, %v4045_v36   ;;  %v2727_v28 = vsel %vm2266_vm2, %v4055_v35, 0.0 }
 0x5ef   :  { %v2710_v40 = vadd.f32 %v2709_v23, %v2708_v53  ;;  %v6716_v53 = vld [vmem:[#allocation24_spill] sm:$0xff] }
 0x5f0   :  { %2993 = vperm.xlu1 %3516, %v4031_v52   ;;  %v6717_v23 = vmax.f32 %v6716_v53, 0.0 }
 0x5f1   :  { %v2712_v33 = vadd.f32 %v2711_v9, %v2710_v40 }
 0x5f2   :  { %3068 = vperm.xlu0 %3517, %v4049_v7  }
 0x5f3   :  { %v2714_v54 = vadd.f32 %v2713_v56, %v2712_v33  ;;  %v6718_v33 = vld [vmem:[#allocation25_spill] sm:$0xff] }
 0x5f4   :  { %3003 = vperm.xlu1 %3516, %v4035_v22   ;;  %v2602_v22 = vld [vmem:[#allocation3] sm:$0x1]  ;;  %v6719_v56 = vmax.f32 %v6718_v33, 0.0 }
 0x5f5   :  { %v2716_v55 = vadd.f32 %v2715_v50, %v2714_v54 }
 0x5f7   :  { %v2718_v41 = vadd.f32 %v2717_v48, %v2716_v55 }
 0x5f8   :  { %3013 = vperm.xlu1 %3516, %v4039_v2  }
 0x5f9   :  { %v2720_v31 = vadd.f32 %v2719_v19, %v2718_v41 }
 0x5fb   :  { %v2722_v25 = vadd.f32 %v2721_v6, %v2720_v31 }
 0x5fc   :  { %3023 = vperm.xlu1 %3516, %v4043_v57   ;;  %v2603_v57 = vmul.f32 %v5966_v47, %v2602_v22 }
 0x5fd   :  { %v2724_v61 = vadd.f32 %v2723_v63, %v2722_v25 }
 0x5ff   :  { %v6181_v34 = vpop.permute.xlu1 %2743  ;;  %v2726_v5 = vadd.f32 %v2725_v13, %v2724_v61 }
 0x600   :  { %3033 = vperm.xlu1 %3516, %v4047_v16  }
 0x601   :  { %v2754_v24 = vpop.permute.xlu0 %2753  ;;  %v2728_v21 = vadd.f32 %v2727_v28, %v2726_v5  ;;  %v6726_v28 = vld [vmem:[#allocation29_spill] sm:$0xff] }
 0x602   :  { %v3071_v1 = vmul.f32 %v2754_v24, %v6711_v20 }
 0x603   :  { %v2759_v27 = vpop.permute.xlu1 %2758  ;;  %v2730_v10 = vadd.f32 %v2729_v18, %v2728_v21  ;;  %v6727_v21 = vmax.f32 %v6726_v28, 0.0 }
 0x604   :  { %3043 = vperm.xlu1 %3516, %v4051_v45   ;;  %v3072_v26 = vmul.f32 %v2759_v27, %v6709_v43  ;;  %v6720_v45 = vld [vmem:[#allocation26_spill] sm:$0xff]  ;;  %v6724_v27 = vld [vmem:[#allocation28_spill] sm:$0xff] }
 0x605   :  { %v2731_v0 = vrot.slane %v2730_v10, 4  ;;  %v2799_v52 = vpop.permute.xlu0 %2798  ;;  %v6721_v55 = vmax.f32 %v6720_v45, 0.0  ;;  %v6725_v13 = vmax.f32 %v6724_v27, 0.0 }
 0x606   :  { %v3135_v32 = vadd.f32 %v3072_v26, %v3071_v1 }
 0x607   :  { %v2764_v15 = vpop.permute.xlu1 %2763  ;;  %v2732_v46 = vadd.f32 %v2731_v0, %v2730_v10 }
 0x608   :  { %3053 = vperm.xlu1 %3516, %v4053_v42   ;;  %v3073_v58 = vmul.f32 %v2764_v15, %v6713_v29  ;;  %v6722_v42 = vld [vmem:[#allocation27_spill] sm:$0xff]  ;;  %v3080_v15 = vmul.f32 %v2799_v52, %v6727_v21 }
 0x609   :  { %v2733_v3 = vrot.slane %v2732_v46, 2  ;;  %v6189_v51 = vpop.permute.xlu0 %2808  ;;  %v6723_v31 = vmax.f32 %v6722_v42, 0.0 }
 0x60a   :  { %v3136_v36 = vadd.f32 %v3135_v32, %v3073_v58 }
 0x60b   :  { %v2769_v17 = vpop.permute.xlu1 %2768  ;;  %v2734_v30 = vadd.f32 %v2733_v3, %v2732_v46 }
 0x60c   :  { %3063 = vperm.xlu1 %3516, %v4055_v35   ;;  %v3074_v4 = vmul.f32 %v2769_v17, %v6715_v38 }
 0x60d   :  { %v2735_v2 = vrot.slane %v2734_v30, 1  ;;  %v6197_v11 = vpop.permute.xlu0 %2818 }
 0x60e   :  { %v3137_v7 = vadd.f32 %v3136_v36, %v3074_v4 }
 0x60f   :  { %v2774_v37 = vpop.permute.xlu1 %2773  ;;  %v2736_v59 = vadd.f32 %v2735_v2, %v2734_v30 }
 0x610   :  { %v3075_v49 = vmul.f32 %v2774_v37, %v6717_v23 }
 0x611   :  { %v2737_v40 = vadd.f32 %v2736_v59, %v2603_v57  ;;  %v6204_v16 = vpop.permute.xlu0 %2828 }
 0x612   :  { %v3138_v50 = vadd.f32 %v3137_v7, %v3075_v49 }
 0x613   :  { %v2779_v44 = vpop.permute.xlu1 %2778  ;;  %2739 = vst.msk [vmem:[#allocation3] sm:$0x1] %vm86_vm1, %v2737_v40 }
 0x614   :  { %v3076_v54 = vmul.f32 %v2779_v44, %v6719_v56 }
 0x615   :  { %v6211_v47 = vpop.permute.xlu0 %2838 }
 0x616   :  { %v3139_v19 = vadd.f32 %v3138_v50, %v3076_v54 }
 0x617   :  { %v2784_v9 = vpop.permute.xlu1 %2783 }
 0x618   :  { %v3077_v48 = vmul.f32 %v2784_v9, %v6721_v55 }
 0x619   :  { %v6215_v63 = vpop.permute.xlu0 %2848 }
 0x61a   :  { %v3140_v25 = vadd.f32 %v3139_v19, %v3077_v48  ;;  %v3212_v24 = vld [vmem:[#allocation3] sm:$0x1] }
 0x61b   :  { %v2789_v41 = vpop.permute.xlu1 %2788  ;;  %3213 = vst.msk [vmem:[#allocation13] sm:$0x1] %vm86_vm1, %v3212_v24 }
 0x61c   :  { %v3078_v6 = vmul.f32 %v2789_v41, %v6723_v31 }
 0x61d   :  { %v2859_v10 = vpop.permute.xlu0 %2858 }
 0x61e   :  { %v3141_v61 = vadd.f32 %v3140_v25, %v3078_v6 }
 0x61f   :  { %v2794_v35 = vpop.permute.xlu1 %2793 }
 0x620   :  { %v3079_v5 = vmul.f32 %v2794_v35, %v6725_v13 }
 0x622   :  { %v3142_v18 = vadd.f32 %v3141_v61, %v3079_v5 }
 0x623   :  { %v2804_v0 = vpop.permute.xlu1 %2803 }
 0x624   :  { %4135 = shalt.err (!%p4132_p0)
}
 0x625   :  { %s4136_s18 = scalar_lea.hbm %s6390_s8, 16 }
 0x626   :  { %p4137_p1 = scmp.ne.s32.totalorder %s6390_s8, %s4136_s18  ;;  %p4140_p2 = scmp.lt.u32.totalorder %s4136_s18, %s6390_s8 }
 0x628   :  { %p4142_p3 = pnand %p4140_p2, %p4137_p1 }
 0x62a   :  { %4145 = shalt.err (!%p4142_p3)
}
 0x62b   :  { %3235 = dma.vmem_to_hbm [thread:$0]  %s3233_s13, 16, %s6390_s8, [#allocation14]   ;;  %v3143_v52 = vadd.f32 %v3142_v18, %v3080_v15  ;;  %v6728_v17 = vld [vmem:[#allocation30_spill] sm:$0xff] }
 0x62c   :  { %v6729_v46 = vmax.f32 %v6728_v17, 0.0  ;;  %s4146_s27 = scalar_lea.vmem %s6222_s12, 16  ;;  %s4150_s0 = scalar_lea.vmem %s6222_s12, 32 }
 0x62d   :  { %p4147_p4 = scmp.ne.s32.totalorder %s6222_s12, %s4146_s27  ;;  %p4151_p5 = scmp.lt.s32.totalorder %s6222_s12, %s6222_s12 }
 0x62e   :  { %v3081_v3 = vmul.f32 %v2804_v0, %v6729_v46  ;;  %p4152_p6 = scmp.lt.s32.totalorder %s4150_s0, %s4146_s27 }
 0x630   :  { %p4153_p7 = por %p4152_p6, %p4151_p5 }
 0x632   :  { %p4154_p8 = pnand %p4153_p7, %p4147_p4 }
 0x634   :  { %4157 = shalt.err (!%p4154_p8)
}
 0x635   :  { %s4158_s21 = scalar_lea.hbm %s6389_s7, 16 }
 0x636   :  { %p4159_p9 = scmp.ne.s32.totalorder %s6389_s7, %s4158_s21  ;;  %p4162_p10 = scmp.lt.u32.totalorder %s4158_s21, %s6389_s7 }
 0x638   :  { %p4164_p11 = pnand %p4162_p10, %p4159_p9 }
 0x63a   :  { %4167 = shalt.err (!%p4164_p11)
}
 0x63b   :  { %3225 = dma.vmem_to_hbm [thread:$0]  %s6222_s12, 16, %s6389_s7, [#allocation8]   ;;  %v6730_v37 = vld [vmem:[#allocation31_spill] sm:$0xff]  ;;  %v3144_v26 = vadd.f32 %v3143_v52, %v3081_v3  ;;  %v2869_v30 = vpop.permute.xlu0 %2868  ;;  %v2814_v22 = vpop.permute.xlu1 %2813  ;;  %v6732_v20 = vld [vmem:[#allocation32_spill] sm:$0xff]  ;;  %v6734_v29 = vld [vmem:[#allocation33_spill] sm:$0xff] }
 0x63c   :  { %v6731_v8 = vmax.f32 %v6730_v37, 0.0  ;;  %v6733_v1 = vmax.f32 %v6732_v20, 0.0  ;;  %v6735_v58 = vmax.f32 %v6734_v29, 0.0  ;;  %v6736_v4 = vld [vmem:[#allocation34_spill] sm:$0xff]  ;;  %v6738_v36 = vld [vmem:[#allocation35_spill] sm:$0xff]  ;;  %v6740_v7 = vld [vmem:[#allocation36_spill] sm:$0xff] }
 0x63d   :  { %v6737_v57 = vmax.f32 %v6736_v4, 0.0  ;;  %v6741_v33 = vmax.f32 %v6740_v7, 0.0  ;;  %v6742_v54 = vld [vmem:[#allocation37_spill] sm:$0xff]  ;;  %v6744_v19 = vld [vmem:[#allocation38_spill] sm:$0xff]  ;;  %v6746_v6 = vld [vmem:[#allocation39_spill] sm:$0xff]  ;;  %s4210_s7 = smov [#allocation15]  }
 0x63e   :  { %v3082_v43 = vmul.f32 %v6189_v51, %v6731_v8  ;;  %v3083_v62 = vmul.f32 %v2814_v22, %v6733_v1  ;;  %v3084_v2 = vmul.f32 %v6197_v11, %v6735_v58  ;;  %v6739_v51 = vmax.f32 %v6738_v36, 0.0  ;;  %v6748_v5 = vld [vmem:[#allocation40_spill] sm:$0xff]  ;;  %v6750_v21 = vld [vmem:[#allocation41_spill] sm:$0xff]  ;;  %v6752_v46 = vld [vmem:[#allocation42_spill] sm:$0xff]  ;;  %s3242_s11 = sshll.u32 %s4210_s7, 4  ;;  %s3243_s11 = int_to_ptr.vmem [resolvable:$true] %s3242_s11 }
 0x63f   :  { %v2879_v32 = vpop.permute.xlu0 %2878  ;;  %v2824_v12 = vpop.permute.xlu1 %2823  ;;  %v6743_v11 = vmax.f32 %v6742_v54, 0.0  ;;  %v6745_v42 = vmax.f32 %v6744_v19, 0.0  ;;  %v6749_v24 = vmax.f32 %v6748_v5, 0.0  ;;  %v6753_v3 = vmax.f32 %v6752_v46, 0.0  ;;  %v6754_v8 = vld [vmem:[#allocation43_spill] sm:$0xff]  ;;  %v6756_v1 = vld [vmem:[#allocation44_spill] sm:$0xff]  ;;  %p4173_p13 = scmp.lt.s32.totalorder %s3243_s11, %s3243_s11 }
 0x640   :  { %v3145_v60 = vadd.f32 %v3144_v26, %v3082_v43  ;;  %v3085_v59 = vmul.f32 %v2824_v12, %v6737_v57  ;;  %v3086_v53 = vmul.f32 %v6204_v16, %v6739_v51  ;;  %v6747_v16 = vmax.f32 %v6746_v6, 0.0  ;;  %v6758_v58 = vld [vmem:[#allocation45_spill] sm:$0xff]  ;;  %v6760_v57 = vld [vmem:[#allocation46_spill] sm:$0xff]  ;;  %v6762_v51 = vld [vmem:[#allocation47_spill] sm:$0xff]  ;;  %s4168_s4 = scalar_lea.vmem %s3243_s11, 16  ;;  %s4172_s20 = scalar_lea.vmem %s3243_s11, 32 }
 0x641   :  { %v3088_v50 = vmul.f32 %v6211_v47, %v6743_v11  ;;  %v6751_v47 = vmax.f32 %v6750_v21, 0.0  ;;  %v6755_v43 = vmax.f32 %v6754_v8, 0.0  ;;  %v6766_v11 = vld [vmem:[#allocation49_spill] sm:$0xff]  ;;  %v6776_v46 = vld [vmem:[#allocation54_spill] sm:$0xff]  ;;  %p4169_p12 = scmp.ne.s32.totalorder %s3243_s11, %s4168_s4  ;;  %p4174_p0 = scmp.lt.s32.totalorder %s4172_s20, %s4168_s4 }
 0x642   :  { %v3146_v44 = vadd.f32 %v3145_v60, %v3083_v62  ;;  %v3090_v25 = vmul.f32 %v6215_v63, %v6747_v16  ;;  %v6757_v62 = vmax.f32 %v6756_v1, 0.0  ;;  %v6770_v16 = vld [vmem:[#allocation51_spill] sm:$0xff]  ;;  %v6780_v1 = vld [vmem:[#allocation56_spill] sm:$0xff] }
 0x643   :  { %v2889_v49 = vpop.permute.xlu0 %2888  ;;  %v2834_v40 = vpop.permute.xlu1 %2833  ;;  %v3092_v15 = vmul.f32 %v2859_v10, %v6751_v47  ;;  %v3094_v63 = vmul.f32 %v2869_v30, %v6755_v43  ;;  %v6774_v47 = vld [vmem:[#allocation53_spill] sm:$0xff]  ;;  %v6778_v43 = vld [vmem:[#allocation55_spill] sm:$0xff]  ;;  %p4175_p1 = por %p4174_p0, %p4173_p13 }
 0x644   :  { %v3147_v38 = vadd.f32 %v3146_v44, %v3084_v2  ;;  %v3087_v56 = vmul.f32 %v2834_v40, %v6741_v33  ;;  %v6759_v2 = vmax.f32 %v6758_v58, 0.0  ;;  %v6764_v33 = vld [vmem:[#allocation48_spill] sm:$0xff]  ;;  %v6782_v58 = vld [vmem:[#allocation57_spill] sm:$0xff] }
 0x645   :  { %p4176_p2 = pnand %p4175_p1, %p4169_p12 }
 0x646   :  { %v3148_v23 = vadd.f32 %v3147_v38, %v3085_v59  ;;  %v3096_v10 = vmul.f32 %v2879_v32, %v6759_v2  ;;  %v6761_v59 = vmax.f32 %v6760_v57, 0.0  ;;  %v6783_v2 = vmax.f32 %v6782_v58, 0.0  ;;  %v6784_v57 = vld [vmem:[#allocation58_spill] sm:$0xff] }
 0x647   :  { %v2899_v55 = vpop.permute.xlu0 %2898  ;;  %v2844_v48 = vpop.permute.xlu1 %2843 }
 0x648   :  { %v3149_v9 = vadd.f32 %v3148_v23, %v3086_v53  ;;  %v3089_v31 = vmul.f32 %v2844_v48, %v6745_v42  ;;  %v6763_v53 = vmax.f32 %v6762_v51, 0.0  ;;  %v6768_v42 = vld [vmem:[#allocation50_spill] sm:$0xff]  ;;  %v6786_v51 = vld [vmem:[#allocation59_spill] sm:$0xff] }
 0x64a   :  { %v3150_v45 = vadd.f32 %v3149_v9, %v3087_v56  ;;  %v3098_v30 = vmul.f32 %v2889_v49, %v6763_v53  ;;  %v6765_v56 = vmax.f32 %v6764_v33, 0.0  ;;  %v6787_v53 = vmax.f32 %v6786_v51, 0.0 }
 0x64b   :  { %v2909_v61 = vpop.permute.xlu0 %2908  ;;  %v2854_v27 = vpop.permute.xlu1 %2853 }
 0x64c   :  { %v3151_v41 = vadd.f32 %v3150_v45, %v3088_v50  ;;  %v3091_v28 = vmul.f32 %v2854_v27, %v6749_v24  ;;  %v6767_v50 = vmax.f32 %v6766_v11, 0.0  ;;  %v6772_v24 = vld [vmem:[#allocation52_spill] sm:$0xff]  ;;  %v6790_v11 = vld [vmem:[#allocation61_spill] sm:$0xff] }
 0x64e   :  { %v3152_v35 = vadd.f32 %v3151_v41, %v3089_v31  ;;  %v3100_v32 = vmul.f32 %v2899_v55, %v6767_v50  ;;  %v6769_v31 = vmax.f32 %v6768_v42, 0.0  ;;  %v6791_v50 = vmax.f32 %v6790_v11, 0.0 }
 0x64f   :  { %v2919_v0 = vpop.permute.xlu0 %2918  ;;  %v2864_v52 = vpop.permute.xlu1 %2863 }
 0x650   :  { %v3153_v13 = vadd.f32 %v3152_v35, %v3090_v25  ;;  %v3093_v37 = vmul.f32 %v2864_v52, %v6753_v3  ;;  %v6771_v25 = vmax.f32 %v6770_v16, 0.0  ;;  %v6777_v3 = vmax.f32 %v6776_v46, 0.0 }
 0x652   :  { %v3154_v18 = vadd.f32 %v3153_v13, %v3091_v28  ;;  %v3102_v49 = vmul.f32 %v2909_v61, %v6771_v25  ;;  %v6773_v28 = vmax.f32 %v6772_v24, 0.0 }
 0x653   :  { %v2929_v22 = vpop.permute.xlu0 %2928  ;;  %v2874_v60 = vpop.permute.xlu1 %2873 }
 0x654   :  { %v3155_v17 = vadd.f32 %v3154_v18, %v3092_v15  ;;  %v3095_v29 = vmul.f32 %v2874_v60, %v6757_v62  ;;  %v6775_v15 = vmax.f32 %v6774_v47, 0.0  ;;  %v6781_v62 = vmax.f32 %v6780_v1, 0.0 }
 0x656   :  { %v3156_v26 = vadd.f32 %v3155_v17, %v3093_v37  ;;  %v3104_v55 = vmul.f32 %v2919_v0, %v6775_v15 }
 0x657   :  { %v2939_v12 = vpop.permute.xlu0 %2938  ;;  %v2884_v38 = vpop.permute.xlu1 %2883 }
 0x658   :  { %v3157_v20 = vadd.f32 %v3156_v26, %v3094_v63  ;;  %v3097_v36 = vmul.f32 %v2884_v38, %v6761_v59  ;;  %v6779_v63 = vmax.f32 %v6778_v43, 0.0  ;;  %v6785_v59 = vmax.f32 %v6784_v57, 0.0 }
 0x65a   :  { %v3158_v44 = vadd.f32 %v3157_v20, %v3095_v29  ;;  %v3106_v61 = vmul.f32 %v2929_v22, %v6779_v63 }
 0x65b   :  { %v2949_v40 = vpop.permute.xlu0 %2948  ;;  %v2894_v9 = vpop.permute.xlu1 %2893 }
 0x65c   :  { %v3159_v4 = vadd.f32 %v3158_v44, %v3096_v10  ;;  %v3099_v54 = vmul.f32 %v2894_v9, %v6765_v56  ;;  %v3108_v10 = vmul.f32 %v2939_v12, %v6783_v2 }
 0x65e   :  { %v3160_v23 = vadd.f32 %v3159_v4, %v3097_v36 }
 0x65f   :  { %v2959_v48 = vpop.permute.xlu0 %2958  ;;  %v2904_v41 = vpop.permute.xlu1 %2903 }
 0x660   :  { %v3161_v7 = vadd.f32 %v3160_v23, %v3098_v30  ;;  %v3101_v6 = vmul.f32 %v2904_v41, %v6769_v31  ;;  %v3110_v30 = vmul.f32 %v2949_v40, %v6787_v53  ;;  %v3112_v12 = vmul.f32 %v2959_v48, %v6791_v50 }
 0x662   :  { %v3162_v45 = vadd.f32 %v3161_v7, %v3099_v54  ;;  %v6788_v7 = vld [vmem:[#allocation60_spill] sm:$0xff] }
 0x663   :  { %v2969_v27 = vpop.permute.xlu0 %2968  ;;  %v2914_v13 = vpop.permute.xlu1 %2913  ;;  %v6789_v33 = vmax.f32 %v6788_v7, 0.0 }
 0x664   :  { %v3163_v19 = vadd.f32 %v3162_v45, %v3100_v32  ;;  %v3103_v21 = vmul.f32 %v2914_v13, %v6773_v28 }
 0x666   :  { %v3164_v35 = vadd.f32 %v3163_v19, %v3101_v6  ;;  %v6792_v19 = vld [vmem:[#allocation62_spill] sm:$0xff]  ;;  %v6794_v6 = vld [vmem:[#allocation63_spill] sm:$0xff] }
 0x667   :  { %v2924_v52 = vpop.permute.xlu1 %2923  ;;  %v2979_v8 = vpop.permute.xlu0 %2978  ;;  %v6793_v42 = vmax.f32 %v6792_v19, 0.0  ;;  %v6795_v16 = vmax.f32 %v6794_v6, 0.0  ;;  %v6818_v19 = vld [vmem:[#allocation75_spill] sm:$0xff] }
 0x668   :  { %v3165_v5 = vadd.f32 %v3164_v35, %v3102_v49  ;;  %v3105_v37 = vmul.f32 %v2924_v52, %v6777_v3  ;;  %v6800_v52 = vld [vmem:[#allocation68_spill] sm:$0xff] }
 0x669   :  { %v3114_v25 = vmul.f32 %v2969_v27, %v6795_v16 }
 0x66a   :  { %v3166_v18 = vadd.f32 %v3165_v5, %v3103_v21  ;;  %v6796_v5 = vld [vmem:[#allocation64_spill] sm:$0xff]  ;;  %v6798_v21 = vld [vmem:[#allocation65_spill] sm:$0xff] }
 0x66b   :  { %v2934_v60 = vpop.permute.xlu1 %2933  ;;  %v2989_v44 = vpop.permute.xlu0 %2988  ;;  %v6797_v24 = vmax.f32 %v6796_v5, 0.0  ;;  %v6799_v47 = vmax.f32 %v6798_v21, 0.0  ;;  %v6822_v5 = vld [vmem:[#allocation77_spill] sm:$0xff] }
 0x66c   :  { %v3167_v17 = vadd.f32 %v3166_v18, %v3104_v55  ;;  %v3107_v29 = vmul.f32 %v2934_v60, %v6781_v62  ;;  %v6804_v60 = vld [vmem:[#allocation66_spill] sm:$0xff]  ;;  %v6806_v62 = vld [vmem:[#allocation67_spill] sm:$0xff] }
 0x66d   :  { %v3116_v15 = vmul.f32 %v2979_v8, %v6799_v47 }
 0x66e   :  { %v3168_v26 = vadd.f32 %v3167_v17, %v3105_v37  ;;  %v6801_v17 = vmax.f32 %v6800_v52, 0.0  ;;  %v6802_v37 = vld [vmem:[#allocation69_spill] sm:$0xff] }
 0x66f   :  { %v2944_v38 = vpop.permute.xlu1 %2943  ;;  %v2999_v54 = vpop.permute.xlu0 %2998  ;;  %v6803_v43 = vmax.f32 %v6802_v37, 0.0 }
 0x670   :  { %v3169_v20 = vadd.f32 %v3168_v26, %v3106_v61  ;;  %v3109_v36 = vmul.f32 %v2944_v38, %v6785_v59  ;;  %v6808_v38 = vld [vmem:[#allocation70_spill] sm:$0xff]  ;;  %v6810_v59 = vld [vmem:[#allocation71_spill] sm:$0xff] }
 0x671   :  { %v3118_v27 = vmul.f32 %v2989_v44, %v6803_v43 }
 0x672   :  { %v3170_v0 = vadd.f32 %v3169_v20, %v3107_v29  ;;  %v6805_v20 = vmax.f32 %v6804_v60, 0.0  ;;  %v6807_v29 = vmax.f32 %v6806_v62, 0.0  ;;  %v6830_v60 = vld [vmem:[#allocation81_spill] sm:$0xff] }
 0x673   :  { %v2954_v23 = vpop.permute.xlu1 %2953  ;;  %v3009_v49 = vpop.permute.xlu0 %3008 }
 0x674   :  { %v3171_v4 = vadd.f32 %v3170_v0, %v3108_v10  ;;  %v3111_v56 = vmul.f32 %v2954_v23, %v6789_v33  ;;  %v3120_v58 = vmul.f32 %v2999_v54, %v6807_v29  ;;  %v6814_v33 = vld [vmem:[#allocation73_spill] sm:$0xff] }
 0x676   :  { %v3172_v22 = vadd.f32 %v3171_v4, %v3109_v36  ;;  %v6809_v4 = vmax.f32 %v6808_v38, 0.0  ;;  %v6811_v36 = vmax.f32 %v6810_v59, 0.0  ;;  %v6834_v38 = vld [vmem:[#allocation83_spill] sm:$0xff] }
 0x677   :  { %v2964_v45 = vpop.permute.xlu1 %2963  ;;  %v3019_v3 = vpop.permute.xlu0 %3018 }
 0x678   :  { %v3173_v9 = vadd.f32 %v3172_v22, %v3110_v30  ;;  %v3113_v31 = vmul.f32 %v2964_v45, %v6793_v42  ;;  %v3122_v51 = vmul.f32 %v3009_v49, %v6811_v36  ;;  %v6812_v22 = vld [vmem:[#allocation72_spill] sm:$0xff]  ;;  %v6819_v42 = vmax.f32 %v6818_v19, 0.0 }
 0x679   :  { %v6813_v23 = vmax.f32 %v6812_v22, 0.0  ;;  %v6820_v49 = vld [vmem:[#allocation76_spill] sm:$0xff] }
 0x67a   :  { %v3174_v32 = vadd.f32 %v3173_v9, %v3111_v56  ;;  %v6815_v56 = vmax.f32 %v6814_v33, 0.0 }
 0x67b   :  { %v2974_v35 = vpop.permute.xlu1 %2973  ;;  %v3029_v2 = vpop.permute.xlu0 %3028 }
 0x67c   :  { %v3175_v41 = vadd.f32 %v3174_v32, %v3112_v12  ;;  %v3115_v28 = vmul.f32 %v2974_v35, %v6797_v24  ;;  %v3124_v54 = vmul.f32 %v3019_v3, %v6815_v56  ;;  %v6816_v32 = vld [vmem:[#allocation74_spill] sm:$0xff]  ;;  %v6821_v35 = vmax.f32 %v6820_v49, 0.0 }
 0x67d   :  { %v6817_v45 = vmax.f32 %v6816_v32, 0.0  ;;  %v6823_v24 = vmax.f32 %v6822_v5, 0.0 }
 0x67e   :  { %v3176_v40 = vadd.f32 %v3175_v41, %v3113_v31  ;;  %v3126_v31 = vmul.f32 %v3029_v2, %v6819_v42  ;;  %v6832_v2 = vld [vmem:[#allocation82_spill] sm:$0xff] }
 0x67f   :  { %v2984_v55 = vpop.permute.xlu1 %2983  ;;  %v3039_v7 = vpop.permute.xlu0 %3038 }
 0x680   :  { %v3177_v13 = vadd.f32 %v3176_v40, %v3114_v25  ;;  %v3117_v46 = vmul.f32 %v2984_v55, %v6801_v17  ;;  %v6826_v17 = vld [vmem:[#allocation79_spill] sm:$0xff] }
 0x682   :  { %v3178_v48 = vadd.f32 %v3177_v13, %v3115_v28  ;;  %v3128_v28 = vmul.f32 %v3039_v7, %v6823_v24 }
 0x683   :  { %v2994_v61 = vpop.permute.xlu1 %2993  ;;  %v3049_v16 = vpop.permute.xlu0 %3048 }
 0x684   :  { %v3179_v18 = vadd.f32 %v3178_v48, %v3116_v15  ;;  %v3119_v1 = vmul.f32 %v2994_v61, %v6805_v20  ;;  %v6824_v48 = vld [vmem:[#allocation78_spill] sm:$0xff]  ;;  %v6831_v20 = vmax.f32 %v6830_v60, 0.0 }
 0x685   :  { %v6825_v55 = vmax.f32 %v6824_v48, 0.0 }
 0x686   :  { %v3180_v63 = vadd.f32 %v3179_v18, %v3117_v46  ;;  %v6827_v46 = vmax.f32 %v6826_v17, 0.0 }
 0x687   :  { %v3004_v10 = vpop.permute.xlu1 %3003  ;;  %v3059_v52 = vpop.permute.xlu0 %3058 }
 0x688   :  { %v3181_v26 = vadd.f32 %v3180_v63, %v3118_v27  ;;  %v3121_v57 = vmul.f32 %v3004_v10, %v6809_v4  ;;  %v3130_v3 = vmul.f32 %v3049_v16, %v6827_v46  ;;  %v6828_v63 = vld [vmem:[#allocation80_spill] sm:$0xff]  ;;  %v6833_v10 = vmax.f32 %v6832_v2, 0.0 }
 0x689   :  { %v6829_v61 = vmax.f32 %v6828_v63, 0.0  ;;  %v6835_v4 = vmax.f32 %v6834_v38, 0.0 }
 0x68a   :  { %v3182_v8 = vadd.f32 %v3181_v26, %v3119_v1  ;;  %v3132_v1 = vmul.f32 %v3059_v52, %v6831_v20 }
 0x68b   :  { %v3014_v53 = vpop.permute.xlu1 %3013  ;;  %v3069_v29 = vpop.permute.xlu0 %3068 }
 0x68c   :  { %v3183_v0 = vadd.f32 %v3182_v8, %v3120_v58  ;;  %v3123_v9 = vmul.f32 %v3014_v53, %v6813_v23  ;;  %v2740_v23 = vld [vmem:[#allocation4] sm:$0x1] }
 0x68e   :  { %v3184_v44 = vadd.f32 %v3183_v0, %v3121_v57  ;;  %v3134_v57 = vmul.f32 %v3069_v29, %v6835_v4 }
 0x68f   :  { %v3024_v50 = vpop.permute.xlu1 %3023 }
 0x690   :  { %v3185_v30 = vadd.f32 %v3184_v44, %v3122_v51  ;;  %v3125_v41 = vmul.f32 %v3024_v50, %v6817_v45 }
 0x692   :  { %v3186_v11 = vadd.f32 %v3185_v30, %v3123_v9  ;;  %v2749_v30 = vrot.slane %v6181_v34, %v2407_v14 }
 0x693   :  { %v3034_v25 = vpop.permute.xlu1 %3033 }
 0x694   :  { %v3187_v12 = vadd.f32 %v3186_v11, %v3124_v54  ;;  %v3127_v13 = vmul.f32 %v3034_v25, %v6821_v35  ;;  %v2750_v7 = vmul.f32 %v2749_v30, %v2740_v23 }
 0x696   :  { %v3188_v6 = vadd.f32 %v3187_v12, %v3125_v41 }
 0x697   :  { %v3044_v47 = vpop.permute.xlu1 %3043 }
 0x698   :  { %v3189_v40 = vadd.f32 %v3188_v6, %v3126_v31  ;;  %v3129_v18 = vmul.f32 %v3044_v47, %v6825_v55 }
 0x69a   :  { %v3190_v21 = vadd.f32 %v3189_v40, %v3127_v13 }
 0x69b   :  { %v3054_v43 = vpop.permute.xlu1 %3053 }
 0x69c   :  { %v3191_v15 = vadd.f32 %v3190_v21, %v3128_v28  ;;  %v3131_v26 = vmul.f32 %v3054_v43, %v6829_v61 }
 0x69e   :  { %v3192_v37 = vadd.f32 %v3191_v15, %v3129_v18 }
 0x69f   :  { %v3064_v58 = vpop.permute.xlu1 %3063 }
 0x6a0   :  { %v3193_v27 = vadd.f32 %v3192_v37, %v3130_v3  ;;  %v3133_v0 = vmul.f32 %v3064_v58, %v6833_v10 }
 0x6a2   :  { %v3194_v62 = vadd.f32 %v3193_v27, %v3131_v26 }
 0x6a4   :  { %v3195_v8 = vadd.f32 %v3194_v62, %v3132_v1 }
 0x6a6   :  { %v3196_v59 = vadd.f32 %v3195_v8, %v3133_v0 }
 0x6a8   :  { %v3197_v36 = vadd.f32 %v3196_v59, %v3134_v57 }
 0x6aa   :  { %v3198_v51 = vrot.slane %v3197_v36, 4 }
 0x6ac   :  { %v3199_v44 = vadd.f32 %v3198_v51, %v3197_v36 }
 0x6ae   :  { %v3200_v53 = vrot.slane %v3199_v44, 2 }
 0x6b0   :  { %v3201_v22 = vadd.f32 %v3200_v53, %v3199_v44 }
 0x6b2   :  { %v3202_v9 = vrot.slane %v3201_v22, 1 }
 0x6b4   :  { %v3203_v33 = vadd.f32 %v3202_v9, %v3201_v22 }
 0x6b6   :  { %v3204_v56 = vadd.f32 %v3203_v33, %v2750_v7 }
 0x6b8   :  { %3205 = vst [vmem:[#allocation4] sm:$0x1] %v3204_v56 }
 0x6bf   :  { %v3214_v54 = vld [vmem:[#allocation4] sm:$0x1] }
 0x6c0   :  { %3215 = vst [vmem:[#allocation15] sm:$0x1] %v3214_v54 }
 0x6c1   :  { %4179 = shalt.err (!%p4176_p2)
}
 0x6c2   :  { %s4180_s1 = scalar_lea.hbm %s6391_s9, 16 }
 0x6c3   :  { %p4181_p3 = scmp.ne.s32.totalorder %s6391_s9, %s4180_s1  ;;  %p4184_p4 = scmp.lt.u32.totalorder %s4180_s1, %s6391_s9 }
 0x6c5   :  { %p4186_p5 = pnand %p4184_p4, %p4181_p3 }
 0x6c7   :  { %4189 = shalt.err (!%p4186_p5)
}
 0x6c8   :  { %3245 = dma.vmem_to_hbm [thread:$0]  %s3243_s11, 16, %s6391_s9, [#allocation14]  }
 0x6c9   :  { %4194 = dma.done.wait [#allocation8], 16  }
 0x6ca   :  { %4195 = vsyncadd [#allocation8], 4294967280 }
 0x6cb   :  { %4196 = dma.done.wait [#allocation14], 32  }
 0x6cc   :  { %4197 = vsyncadd [#allocation14], 4294967264 }
 0x6cd   :  { %3255 = vsyncpa [#allocation7], 1 }
 0x6ce   :  { %3256 = vsyncpa [#allocation10], 1 }
 0x6cf   :  { %3257 = vsyncpa [#allocation8], 1 }
 0x6d0   :  { %3258 = vsyncpa [#allocation14], 1 }

// kernel: tpu_custom_call.1
= control target key start
LH: loop header
LB: loop body
LE: loop exit
PB: predicated region body
PF: predicated region fallthrough
CT: control target
= control target key end

     0   :  { %s6382_s0 = inlined_call_operand.hbm [shape: f32[512,256], index: 0, kind: input, shape index: {}]   ;;  %s6383_s1 = inlined_call_operand.hbm [shape: bf16[256,128], index: 1, kind: input, shape index: {}]   ;;  %s6384_s2 = inlined_call_operand.vmem [shape: f32[1,128], index: 2, kind: input, shape index: {}]   ;;  %s6385_s3 = inlined_call_operand.hbm [shape: bf16[128,128], index: 3, kind: input, shape index: {}]   ;;  %s6386_s4 = inlined_call_operand.vmem [shape: f32[1,128], index: 4, kind: input, shape index: {}]   ;;  %s6387_s5 = inlined_call_operand.vmem [shape: f32[1,64], index: 5, kind: input, shape index: {}]   ;;  %s6388_s6 = inlined_call_operand.<no memory space> [shape: f32[1,1], index: 6, kind: input, shape index: {}]   ;;  %s6389_s7 = inlined_call_operand.hbm [shape: f32[1,1,1], index: 7, kind: output, shape index: {0}]   ;;  %s6390_s8 = inlined_call_operand.hbm [shape: f32[1,1,1], index: 8, kind: output, shape index: {1}]   ;;  %s6391_s9 = inlined_call_operand.hbm [shape: f32[1,1,128], index: 9, kind: output, shape index: {2}]  }
   0x1   :  { %v15_v0 = vstv %s6388_s6 }
   0x2   :  { %16 = vst [vmem:[#allocation5] sm:$0x1] %v15_v0 }
   0x3   :  { %17 = vsyncpa [#allocation7], 0 }
   0x4   :  { %18 = vsyncpa [#allocation10], 0 }
   0x5   :  { %19 = vsyncpa [#allocation8], 0 }
   0x6   :  { %20 = vsyncpa [#allocation14], 0  ;;  %s4198_s11 = smov [#allocation9]   ;;  %s4058_s15 = scalar_lea.hbm %s6383_s1, 2048 }
   0x7   :  { %s43_s12 = sshll.u32 %s4198_s11, 4  ;;  %p4059_p0 = scmp.ne.s32.totalorder %s6383_s1, %s4058_s15  ;;  %s44_s12 = int_to_ptr.vmem [resolvable:$true] %s43_s12 }
   0x8   :  { %p4062_p1 = scmp.lt.u32.totalorder %s4058_s15, %s6383_s1 }
   0xa   :  { %p4064_p2 = pnand %p4062_p1, %p4059_p0 }
   0xc   :  { %4067 = shalt.err (!%p4064_p2)
}
   0xd   :  { %s4068_s6 = scalar_lea.vmem %s44_s12, 2048  ;;  %p4073_p4 = scmp.lt.s32.totalorder %s44_s12, %s44_s12 }
   0xe   :  { %p4069_p3 = scmp.ne.s32.totalorder %s44_s12, %s4068_s6  ;;  %p4074_p5 = scmp.lt.s32.totalorder %s4068_s6, %s4068_s6 }
  0x10   :  { %p4075_p6 = por %p4074_p5, %p4073_p4 }
  0x12   :  { %p4076_p7 = pnand %p4075_p6, %p4069_p3 }
  0x14   :  { %4079 = shalt.err (!%p4076_p7)
}
  0x15   :  { %s4199_s20 = smov 64   ;;  %s4200_s21 = smov 4  }
  0x16   :  { %49 = dma.hbm_to_vmem [thread:$0]  %s6383_s1, 2048, %s44_s12, [#allocation10], %s4199_s20, %s4199_s20, %s4200_s21  }
  0x17   :  { %s4201_s24 = smov [#allocation6]   ;;  %s4080_s28 = scalar_lea.hbm %s6382_s0, 16384 }
  0x18   :  { %s31_s25 = sshll.u32 %s4201_s24, 4  ;;  %p4081_p8 = scmp.ne.s32.totalorder %s6382_s0, %s4080_s28  ;;  %s32_s25 = int_to_ptr.vmem [resolvable:$true] %s31_s25 }
  0x19   :  { %p4084_p9 = scmp.lt.u32.totalorder %s4080_s28, %s6382_s0 }
  0x1b   :  { %p4086_p10 = pnand %p4084_p9, %p4081_p8 }
  0x1d   :  { %4089 = shalt.err (!%p4086_p10)
}
  0x1e   :  { %s4090_s13 = scalar_lea.vmem %s32_s25, 16384  ;;  %p4095_p12 = scmp.lt.s32.totalorder %s32_s25, %s32_s25 }
  0x1f   :  { %p4091_p11 = scmp.ne.s32.totalorder %s32_s25, %s4090_s13  ;;  %p4096_p13 = scmp.lt.s32.totalorder %s4090_s13, %s4090_s13 }
  0x21   :  { %p4097_p0 = por %p4096_p13, %p4095_p12 }
  0x23   :  { %p4098_p1 = pnand %p4097_p0, %p4091_p11 }
  0x25   :  { %4101 = shalt.err (!%p4098_p1)
}
  0x26   :  { %s4202_s1 = smov 256   ;;  %s4203_s12 = smov 16  }
  0x27   :  { %37 = dma.hbm_to_vmem [thread:$0]  %s6382_s0, 16384, %s32_s25, [#allocation7], %s4202_s1, %s4202_s1, %s4203_s12  }
  0x28   :  { %s4204_s16 = smov [#allocation11]   ;;  %s4102_s6 = scalar_lea.hbm %s6385_s3, 1024 }
  0x29   :  { %s57_s17 = sshll.u32 %s4204_s16, 4  ;;  %p4103_p2 = scmp.ne.s32.totalorder %s6385_s3, %s4102_s6  ;;  %s58_s17 = int_to_ptr.vmem [resolvable:$true] %s57_s17 }
  0x2a   :  { %p4106_p3 = scmp.lt.u32.totalorder %s4102_s6, %s6385_s3 }
  0x2c   :  { %p4108_p4 = pnand %p4106_p3, %p4103_p2 }
  0x2e   :  { %4111 = shalt.err (!%p4108_p4)
}
  0x2f   :  { %s4112_s27 = scalar_lea.vmem %s58_s17, 1024  ;;  %p4117_p6 = scmp.lt.s32.totalorder %s58_s17, %s58_s17 }
  0x30   :  { %p4113_p5 = scmp.ne.s32.totalorder %s58_s17, %s4112_s27  ;;  %p4118_p7 = scmp.lt.s32.totalorder %s4112_s27, %s4112_s27 }
  0x32   :  { %p4119_p8 = por %p4118_p7, %p4117_p6 }
  0x34   :  { %p4120_p9 = pnand %p4119_p8, %p4113_p5 }
  0x36   :  { %4123 = shalt.err (!%p4120_p9)
}
  0x37   :  { %63 = dma.hbm_to_vmem [thread:$0]  %s6385_s3, 1024, %s58_s17, [#allocation10], %s4199_s20, %s4199_s20, %s4200_s21  }
  0x38   :  { %4190 = dma.done.wait [#allocation7], 16384  }
  0x39   :  { %4191 = vsyncadd [#allocation7], 4294950912 }
  0x3a   :  { %4192 = dma.done.wait [#allocation10], 3072  }
  0x3b   :  { %4193 = vsyncadd [#allocation10], 4294964224  ;;  %v4205_v1 = vmov 0   ;;  %v3518_v2 = vld [vmem:[#allocation9] sm:$0xff]   ;;  %v3519_v3 = vld [vmem:[#allocation9 + $0x8] sm:$0xff]   ;;  %vm2001_vm0 = vcmask 523264  }
  0x3c   :  { %417 = vmatprep.subr.bf16.mxu0 %v4205_v1  ;;  %3471 = vmatprep.subr.bf16.mxu1 %v4205_v1  ;;  %v3520_v4 = vld [vmem:[#allocation9 + $0x10] sm:$0xff]   ;;  %v3521_v5 = vld [vmem:[#allocation9 + $0x18] sm:$0xff]   ;;  %v3522_v6 = vld [vmem:[#allocation9 + $0x20] sm:$0xff]   ;;  %vm86_vm1 = vcmask 0   ;;  %vm2266_vm2 = vcmask 7168   ;;  %s4209_s1 = smov [#allocation12]  }
  0x3d   :  { %3516 = vset.pattern.permute.xlu1 %v4205_v1  ;;  %3517 = vset.pattern.permute.xlu0 %v4205_v1  ;;  %v91_v7 = vld [vmem:[#allocation6 + $0x8] sm:$0xff]  ;;  %v93_v8 = vld [vmem:[#allocation6 + $0x18] sm:$0xff]  ;;  %v3524_v11 = vld [vmem:[#allocation9 + $0x30] sm:$0xff]   ;;  %s3222_s12 = sshll.u32 %s4209_s1, 4  ;;  %s6222_s12 = int_to_ptr.vmem [resolvable:$true] %s3222_s12 }
  0x3e   :  { %418 = vmatpush1.bf16.msra.mxu0 %v3518_v2  ;;  %3487 = vmatpush1.bf16.msra.mxu1 %v3518_v2  ;;  %v219_v9 = vpack.c.bf16 %v93_v8, %v91_v7  ;;  %v3523_v10 = vld [vmem:[#allocation9 + $0x28] sm:$0xff]   ;;  %v3525_v12 = vld [vmem:[#allocation9 + $0x38] sm:$0xff]   ;;  %v3526_v13 = vld [vmem:[#allocation9 + $0x40] sm:$0xff]  }
  0x3f   :  { %419 = vmatprep.subr.bf16.mxu0 %v4205_v1  ;;  %3472 = vmatprep.subr.bf16.mxu1 %v4205_v1  ;;  %v3527_v14 = vld [vmem:[#allocation9 + $0x48] sm:$0xff]   ;;  %v3528_v15 = vld [vmem:[#allocation9 + $0x50] sm:$0xff]   ;;  %v3529_v16 = vld [vmem:[#allocation9 + $0x58] sm:$0xff]  }
  0x40   :  { %449 = vmatprep.mubr.bf16.mxu0 %v219_v9  ;;  %v3530_v17 = vld [vmem:[#allocation9 + $0x60] sm:$0xff]   ;;  %v3531_v18 = vld [vmem:[#allocation9 + $0x68] sm:$0xff]   ;;  %v3532_v19 = vld [vmem:[#allocation9 + $0x70] sm:$0xff]  }
  0x41   :  { %v3533_v20 = vld [vmem:[#allocation9 + $0x78] sm:$0xff]   ;;  %v90_v21 = vld [vmem:[#allocation6] sm:$0xff]  ;;  %v92_v22 = vld [vmem:[#allocation6 + $0x10] sm:$0xff] }
  0x42   :  { %420 = vmatpush1.bf16.msra.mxu0 %v3519_v3  ;;  %3488 = vmatpush1.bf16.msra.mxu1 %v3519_v3  ;;  %v95_v23 = vld [vmem:[#allocation6 + $0x28] sm:$0xff]  ;;  %v97_v24 = vld [vmem:[#allocation6 + $0x38] sm:$0xff]  ;;  %v218_v25 = vpack.c.bf16 %v92_v22, %v90_v21  ;;  %v94_v27 = vld [vmem:[#allocation6 + $0x20] sm:$0xff] }
  0x43   :  { %421 = vmatprep.subr.bf16.mxu0 %v4205_v1  ;;  %3473 = vmatprep.subr.bf16.mxu1 %v4205_v1  ;;  %v221_v26 = vpack.c.bf16 %v97_v24, %v95_v23  ;;  %v96_v28 = vld [vmem:[#allocation6 + $0x30] sm:$0xff]  ;;  %v99_v29 = vld [vmem:[#allocation6 + $0x48] sm:$0xff]  ;;  %v101_v30 = vld [vmem:[#allocation6 + $0x58] sm:$0xff] }
  0x44   :  { %v220_v31 = vpack.c.bf16 %v96_v28, %v94_v27  ;;  %v223_v32 = vpack.c.bf16 %v101_v30, %v99_v29  ;;  %v98_v33 = vld [vmem:[#allocation6 + $0x40] sm:$0xff]  ;;  %v100_v34 = vld [vmem:[#allocation6 + $0x50] sm:$0xff]  ;;  %v103_v35 = vld [vmem:[#allocation6 + $0x68] sm:$0xff] }
  0x45   :  { %v105_v36 = vld [vmem:[#allocation6 + $0x78] sm:$0xff]  ;;  %v222_v37 = vpack.c.bf16 %v100_v34, %v98_v33  ;;  %v102_v39 = vld [vmem:[#allocation6 + $0x60] sm:$0xff]  ;;  %v104_v40 = vld [vmem:[#allocation6 + $0x70] sm:$0xff] }
  0x46   :  { %422 = vmatpush1.bf16.msra.mxu0 %v3520_v4  ;;  %3489 = vmatpush1.bf16.msra.mxu1 %v3520_v4  ;;  %v225_v38 = vpack.c.bf16 %v105_v36, %v103_v35  ;;  %v107_v41 = vld [vmem:[#allocation6 + $0x88] sm:$0xff]  ;;  %v109_v42 = vld [vmem:[#allocation6 + $0x98] sm:$0xff]  ;;  %v224_v43 = vpack.c.bf16 %v104_v40, %v102_v39  ;;  %v106_v45 = vld [vmem:[#allocation6 + $0x80] sm:$0xff] }
  0x47   :  { %423 = vmatprep.subr.bf16.mxu0 %v4205_v1  ;;  %3474 = vmatprep.subr.bf16.mxu1 %v4205_v1  ;;  %v227_v44 = vpack.c.bf16 %v109_v42, %v107_v41  ;;  %v108_v46 = vld [vmem:[#allocation6 + $0x90] sm:$0xff]  ;;  %v111_v47 = vld [vmem:[#allocation6 + $0xa8] sm:$0xff]  ;;  %v113_v48 = vld [vmem:[#allocation6 + $0xb8] sm:$0xff] }
  0x48   :  { %v226_v49 = vpack.c.bf16 %v108_v46, %v106_v45  ;;  %v229_v50 = vpack.c.bf16 %v113_v48, %v111_v47  ;;  %v187_v51 = vld [vmem:[#allocation6 + $0x308] sm:$0xff]  ;;  %v189_v52 = vld [vmem:[#allocation6 + $0x318] sm:$0xff]  ;;  %v186_v54 = vld [vmem:[#allocation6 + $0x300] sm:$0xff] }
  0x49   :  { %v267_v53 = vpack.c.bf16 %v189_v52, %v187_v51  ;;  %v188_v55 = vld [vmem:[#allocation6 + $0x310] sm:$0xff]  ;;  %v110_v56 = vld [vmem:[#allocation6 + $0xa0] sm:$0xff]  ;;  %v115_v59 = vld [vmem:[#allocation6 + $0xc8] sm:$0xff] }
  0x4a   :  { %424 = vmatpush1.bf16.msra.mxu0 %v3521_v5  ;;  %3490 = vmatpush1.bf16.msra.mxu1 %v3521_v5  ;;  %v112_v57 = vld [vmem:[#allocation6 + $0xb0] sm:$0xff]  ;;  %v266_v58 = vpack.c.bf16 %v188_v55, %v186_v54  ;;  %v117_v60 = vld [vmem:[#allocation6 + $0xd8] sm:$0xff]  ;;  %v191_v63 = vld [vmem:[#allocation6 + $0x328] sm:$0xff] }
  0x4b   :  { %425 = vmatprep.subr.bf16.mxu0 %v4205_v1  ;;  %3475 = vmatprep.subr.bf16.mxu1 %v4205_v1  ;;  %v228_v61 = vpack.c.bf16 %v112_v57, %v110_v56  ;;  %v231_v62 = vpack.c.bf16 %v117_v60, %v115_v59  ;;  %v193_v0 = vld [vmem:[#allocation6 + $0x338] sm:$0xff]  ;;  %v190_v2 = vld [vmem:[#allocation6 + $0x320] sm:$0xff]  ;;  %v192_v3 = vld [vmem:[#allocation6 + $0x330] sm:$0xff] }
  0x4c   :  { %641 = vmatprep.mubr.bf16.mxu1 %v267_v53  ;;  %v114_v4 = vld [vmem:[#allocation6 + $0xc0] sm:$0xff]  ;;  %v116_v5 = vld [vmem:[#allocation6 + $0xd0] sm:$0xff]  ;;  %v119_v7 = vld [vmem:[#allocation6 + $0xe8] sm:$0xff] }
  0x4d   :  { %v121_v8 = vld [vmem:[#allocation6 + $0xf8] sm:$0xff]  ;;  %v230_v9 = vpack.c.bf16 %v116_v5, %v114_v4  ;;  %v122_v23 = vld [vmem:[#allocation6 + $0x100] sm:$0xff]  ;;  %v199_v24 = vld [vmem:[#allocation6 + $0x368] sm:$0xff] }
  0x4e   :  { %426 = vmatpush1.bf16.msra.mxu0 %v3522_v6  ;;  %3491 = vmatpush1.bf16.msra.mxu1 %v3522_v6  ;;  %v268_v6 = vpack.c.bf16 %v192_v3, %v190_v2  ;;  %v198_v27 = vld [vmem:[#allocation6 + $0x360] sm:$0xff]  ;;  %v200_v28 = vld [vmem:[#allocation6 + $0x370] sm:$0xff]  ;;  %v205_v33 = vld [vmem:[#allocation6 + $0x398] sm:$0xff] }
  0x4f   :  { %427 = vmatprep.subr.bf16.mxu0 %v4205_v1  ;;  %3476 = vmatprep.subr.bf16.mxu1 %v4205_v1  ;;  %v3534_v29 = vld [vmem:[#allocation11] sm:$0xff]   ;;  %v124_v30 = vld [vmem:[#allocation6 + $0x110] sm:$0xff]  ;;  %v127_v34 = vld [vmem:[#allocation6 + $0x128] sm:$0xff] }
  0x50   :  { %v129_v35 = vld [vmem:[#allocation6 + $0x138] sm:$0xff]  ;;  %v202_v39 = vld [vmem:[#allocation6 + $0x380] sm:$0xff]  ;;  %v204_v40 = vld [vmem:[#allocation6 + $0x390] sm:$0xff] }
  0x51   :  { %v237_v41 = vpack.c.bf16 %v129_v35, %v127_v34  ;;  %v207_v42 = vld [vmem:[#allocation6 + $0x3a8] sm:$0xff]  ;;  %v274_v45 = vpack.c.bf16 %v204_v40, %v202_v39  ;;  %v126_v47 = vld [vmem:[#allocation6 + $0x120] sm:$0xff]  ;;  %v128_v48 = vld [vmem:[#allocation6 + $0x130] sm:$0xff] }
  0x52   :  { %428 = vmatpush1.bf16.msra.mxu0 %v3523_v10  ;;  %3492 = vmatpush1.bf16.msra.mxu1 %v3523_v10  ;;  %v233_v10 = vpack.c.bf16 %v121_v8, %v119_v7  ;;  %v133_v51 = vld [vmem:[#allocation6 + $0x158] sm:$0xff]  ;;  %v236_v52 = vpack.c.bf16 %v128_v48, %v126_v47  ;;  %v206_v53 = vld [vmem:[#allocation6 + $0x3a0] sm:$0xff]  ;;  %v208_v54 = vld [vmem:[#allocation6 + $0x3b0] sm:$0xff] }
  0x53   :  { %429 = vmatprep.subr.bf16.mxu0 %v4205_v1  ;;  %3477 = vmatprep.subr.bf16.mxu1 %v4205_v1  ;;  %v211_v56 = vld [vmem:[#allocation6 + $0x3c8] sm:$0xff]  ;;  %v213_v57 = vld [vmem:[#allocation6 + $0x3d8] sm:$0xff]  ;;  %v130_v60 = vld [vmem:[#allocation6 + $0x140] sm:$0xff] }
  0x54   :  { %v279_v59 = vpack.c.bf16 %v213_v57, %v211_v56  ;;  %v210_v2 = vld [vmem:[#allocation6 + $0x3c0] sm:$0xff]  ;;  %v212_v3 = vld [vmem:[#allocation6 + $0x3d0] sm:$0xff]  ;;  %v139_v7 = vld [vmem:[#allocation6 + $0x188] sm:$0xff] }
  0x55   :  { %v134_v4 = vld [vmem:[#allocation6 + $0x160] sm:$0xff]  ;;  %v136_v5 = vld [vmem:[#allocation6 + $0x170] sm:$0xff]  ;;  %v141_v8 = vld [vmem:[#allocation6 + $0x198] sm:$0xff] }
  0x56   :  { %430 = vmatpush1.bf16.msra.mxu0 %v3524_v11  ;;  %3493 = vmatpush1.bf16.msra.mxu1 %v3524_v11  ;;  %v195_v11 = vld [vmem:[#allocation6 + $0x348] sm:$0xff]  ;;  %v148_v34 = vld [vmem:[#allocation6 + $0x1d0] sm:$0xff]  ;;  %v150_v39 = vld [vmem:[#allocation6 + $0x1e0] sm:$0xff] }
  0x57   :  { %431 = vmatprep.subr.bf16.mxu0 %v4205_v1  ;;  %3478 = vmatprep.subr.bf16.mxu1 %v4205_v1  ;;  %v151_v35 = vld [vmem:[#allocation6 + $0x1e8] sm:$0xff]  ;;  %v152_v40 = vld [vmem:[#allocation6 + $0x1f0] sm:$0xff]  ;;  %v161_v48 = vld [vmem:[#allocation6 + $0x238] sm:$0xff] }
  0x58   :  { %v159_v47 = vld [vmem:[#allocation6 + $0x228] sm:$0xff]  ;;  %v162_v57 = vld [vmem:[#allocation6 + $0x240] sm:$0xff] }
  0x5a   :  { %432 = vmatpush1.bf16.msra.mxu0 %v3525_v12  ;;  %3494 = vmatpush1.bf16.msra.mxu1 %v3525_v12  ;;  %v197_v12 = vld [vmem:[#allocation6 + $0x358] sm:$0xff] }
  0x5b   :  { %433 = vmatprep.subr.bf16.mxu0 %v4205_v1  ;;  %3479 = vmatprep.subr.bf16.mxu1 %v4205_v1 }
  0x5e   :  { %434 = vmatpush1.bf16.msra.mxu0 %v3526_v13  ;;  %3495 = vmatpush1.bf16.msra.mxu1 %v3526_v13  ;;  %v271_v13 = vpack.c.bf16 %v197_v12, %v195_v11  ;;  %v243_v11 = vpack.c.bf16 %v141_v8, %v139_v7  ;;  %v3539_v12 = vld [vmem:[#allocation11 + $0x28] sm:$0xff]   ;;  %v177_v8 = vld [vmem:[#allocation6 + $0x2b8] sm:$0xff] }
  0x5f   :  { %435 = vmatprep.subr.bf16.mxu0 %v4205_v1  ;;  %3480 = vmatprep.subr.bf16.mxu1 %v4205_v1  ;;  %v175_v7 = vld [vmem:[#allocation6 + $0x2a8] sm:$0xff] }
  0x62   :  { %436 = vmatpush1.bf16.msra.mxu0 %v3527_v14  ;;  %3496 = vmatpush1.bf16.msra.mxu1 %v3527_v14  ;;  %v194_v14 = vld [vmem:[#allocation6 + $0x340] sm:$0xff] }
  0x63   :  { %437 = vmatprep.subr.bf16.mxu0 %v4205_v1  ;;  %3481 = vmatprep.subr.bf16.mxu1 %v4205_v1 }
  0x66   :  { %438 = vmatpush1.bf16.msra.mxu0 %v3528_v15  ;;  %3497 = vmatpush1.bf16.msra.mxu1 %v3528_v15  ;;  %v196_v15 = vld [vmem:[#allocation6 + $0x350] sm:$0xff] }
  0x67   :  { %439 = vmatprep.subr.bf16.mxu0 %v4205_v1  ;;  %3482 = vmatprep.subr.bf16.mxu1 %v4205_v1 }
  0x6a   :  { %440 = vmatpush1.bf16.msra.mxu0 %v3529_v16  ;;  %3498 = vmatpush1.bf16.msra.mxu1 %v3529_v16  ;;  %v118_v16 = vld [vmem:[#allocation6 + $0xe0] sm:$0xff] }
  0x6b   :  { %441 = vmatprep.subr.bf16.mxu0 %v4205_v1  ;;  %3483 = vmatprep.subr.bf16.mxu1 %v4205_v1 }
  0x6e   :  { %442 = vmatpush1.bf16.msra.mxu0 %v3530_v17  ;;  %3499 = vmatpush1.bf16.msra.mxu1 %v3530_v17  ;;  %v120_v17 = vld [vmem:[#allocation6 + $0xf0] sm:$0xff] }
  0x6f   :  { %443 = vmatprep.subr.bf16.mxu0 %v4205_v1  ;;  %3484 = vmatprep.subr.bf16.mxu1 %v4205_v1  ;;  %v232_v21 = vpack.c.bf16 %v120_v17, %v118_v16  ;;  %v214_v16 = vld [vmem:[#allocation6 + $0x3e0] sm:$0xff]  ;;  %v216_v17 = vld [vmem:[#allocation6 + $0x3f0] sm:$0xff] }
  0x72   :  { %444 = vmatpush1.bf16.msra.mxu0 %v3531_v18  ;;  %3500 = vmatpush1.bf16.msra.mxu1 %v3531_v18  ;;  %v270_v18 = vpack.c.bf16 %v196_v15, %v194_v14  ;;  %v217_v14 = vld [vmem:[#allocation6 + $0x3f8] sm:$0xff] }
  0x73   :  { %445 = vmatprep.subr.bf16.mxu0 %v4205_v1  ;;  %3485 = vmatprep.subr.bf16.mxu1 %v4205_v1 }
  0x76   :  { %446 = vmatpush1.bf16.msra.mxu0 %v3532_v19  ;;  %3501 = vmatpush1.bf16.msra.mxu1 %v3532_v19  ;;  %v123_v19 = vld [vmem:[#allocation6 + $0x108] sm:$0xff] }
  0x77   :  { %447 = vmatprep.subr.bf16.mxu0 %v4205_v1  ;;  %3486 = vmatprep.subr.bf16.mxu1 %v4205_v1  ;;  %v269_v1 = vpack.c.bf16 %v193_v0, %v191_v63  ;;  %v137_v63 = vld [vmem:[#allocation6 + $0x178] sm:$0xff] }
  0x7a   :  { %448 = vmatpush1.bf16.msra.mxu0 %v3533_v20  ;;  %3502 = vmatpush1.bf16.msra.mxu1 %v3533_v20  ;;  %v125_v20 = vld [vmem:[#allocation6 + $0x118] sm:$0xff] }
  0x7b   :  { %v235_v22 = vpack.c.bf16 %v125_v20, %v123_v19  ;;  %3391 = vmatprep.subr.bf16.mxu1 %v3534_v29  ;;  %v140_v19 = vld [vmem:[#allocation6 + $0x190] sm:$0xff]  ;;  %v280_v20 = vpack.c.bf16 %v216_v17, %v214_v16  ;;  %v178_v17 = vld [vmem:[#allocation6 + $0x2c0] sm:$0xff] }
  0x7d   :  { %450 = vmatmul.mubr.bf16.vlgmr.msra.gmra.mrb[0].mxu0 %v218_v25  ;;  %642 = vmatmul.mubr.bf16.vlgmr.msra.gmra.mrb[0].mxu1 %v266_v58  ;;  %v201_v25 = vld [vmem:[#allocation6 + $0x378] sm:$0xff]  ;;  %v276_v58 = vpack.c.bf16 %v208_v54, %v206_v53  ;;  %v163_v53 = vld [vmem:[#allocation6 + $0x248] sm:$0xff] }
  0x7e   :  { %457 = vmatprep.mubr.bf16.mxu0 %v221_v26  ;;  %649 = vmatprep.mubr.bf16.mxu1 %v269_v1  ;;  %v273_v26 = vpack.c.bf16 %v201_v25, %v199_v24  ;;  %v165_v54 = vld [vmem:[#allocation6 + $0x258] sm:$0xff] }
  0x7f   :  { %3392 = vmatpush3.bf16.msra.mxu1 %v3534_v29  ;;  %v147_v29 = vld [vmem:[#allocation6 + $0x1c8] sm:$0xff]  ;;  %v255_v56 = vpack.c.bf16 %v165_v54, %v163_v53 }
  0x85   :  { %458 = vmatmul.mubr.bf16.gmra.mrb[4].mxu0 %v220_v31  ;;  %650 = vmatmul.mubr.bf16.gmra.mrb[4].mxu1 %v268_v6  ;;  %v272_v31 = vpack.c.bf16 %v200_v28, %v198_v27  ;;  %v278_v6 = vpack.c.bf16 %v212_v3, %v210_v2  ;;  %v142_v27 = vld [vmem:[#allocation6 + $0x1a0] sm:$0xff]  ;;  %v144_v28 = vld [vmem:[#allocation6 + $0x1b0] sm:$0xff]  ;;  %v173_v2 = vld [vmem:[#allocation6 + $0x298] sm:$0xff] }
  0x86   :  { %465 = vmatprep.mubr.bf16.mxu0 %v223_v32  ;;  %657 = vmatprep.mubr.bf16.mxu1 %v271_v13  ;;  %v203_v32 = vld [vmem:[#allocation6 + $0x388] sm:$0xff] }
  0x87   :  { %v275_v36 = vpack.c.bf16 %v205_v33, %v203_v32  ;;  %v215_v13 = vld [vmem:[#allocation6 + $0x3e8] sm:$0xff]  ;;  %v146_v33 = vld [vmem:[#allocation6 + $0x1c0] sm:$0xff] }
  0x88   :  { %v281_v15 = vpack.c.bf16 %v217_v14, %v215_v13  ;;  %v179_v13 = vld [vmem:[#allocation6 + $0x2c8] sm:$0xff]  ;;  %v181_v14 = vld [vmem:[#allocation6 + $0x2d8] sm:$0xff] }
  0x89   :  { %v263_v16 = vpack.c.bf16 %v181_v14, %v179_v13 }
  0x8d   :  { %466 = vmatmul.mubr.bf16.gmra.mrb[8].mxu0 %v222_v37  ;;  %658 = vmatmul.mubr.bf16.gmra.mrb[8].mxu1 %v270_v18  ;;  %v3535_v37 = vld [vmem:[#allocation11 + $0x8] sm:$0xff]   ;;  %v138_v18 = vld [vmem:[#allocation6 + $0x180] sm:$0xff] }
  0x8e   :  { %473 = vmatprep.mubr.bf16.mxu0 %v225_v38  ;;  %665 = vmatprep.mubr.bf16.mxu1 %v273_v26  ;;  %v234_v38 = vpack.c.bf16 %v124_v30, %v122_v23  ;;  %v3540_v23 = vld [vmem:[#allocation11 + $0x30] sm:$0xff]   ;;  %v242_v24 = vpack.c.bf16 %v140_v19, %v138_v18  ;;  %v3541_v26 = vld [vmem:[#allocation11 + $0x38] sm:$0xff]   ;;  %v183_v19 = vld [vmem:[#allocation6 + $0x2e8] sm:$0xff] }
  0x8f   :  { %3393 = vmatprep.subr.bf16.mxu1 %v3535_v37  ;;  %v149_v30 = vld [vmem:[#allocation6 + $0x1d8] sm:$0xff]  ;;  %v180_v18 = vld [vmem:[#allocation6 + $0x2d0] sm:$0xff] }
  0x90   :  { %3394 = vmatpush3.bf16.msra.mxu1 %v3535_v37  ;;  %v247_v32 = vpack.c.bf16 %v149_v30, %v147_v29  ;;  %v246_v37 = vpack.c.bf16 %v148_v34, %v146_v33 }
  0x95   :  { %474 = vmatmul.mubr.bf16.gmra.mrb[12].mxu0 %v224_v43  ;;  %666 = vmatmul.mubr.bf16.gmra.mrb[12].mxu1 %v272_v31  ;;  %v209_v43 = vld [vmem:[#allocation6 + $0x3b8] sm:$0xff]  ;;  %v244_v31 = vpack.c.bf16 %v144_v28, %v142_v27 }
  0x96   :  { %481 = vmatprep.mubr.bf16.mxu0 %v227_v44  ;;  %673 = vmatprep.mubr.bf16.mxu1 %v275_v36  ;;  %v3536_v44 = vld [vmem:[#allocation11 + $0x10] sm:$0xff]   ;;  %v277_v46 = vpack.c.bf16 %v209_v43, %v207_v42  ;;  %v153_v36 = vld [vmem:[#allocation6 + $0x1f8] sm:$0xff]  ;;  %v248_v43 = vpack.c.bf16 %v152_v40, %v150_v39 }
  0x97   :  { %3395 = vmatprep.subr.bf16.mxu1 %v3536_v44  ;;  %v157_v42 = vld [vmem:[#allocation6 + $0x218] sm:$0xff] }
  0x98   :  { %3396 = vmatpush3.bf16.msra.mxu1 %v3536_v44 }
  0x9d   :  { %482 = vmatmul.mubr.bf16.gmra.mrb[16].mxu0 %v226_v49  ;;  %v3537_v49 = vld [vmem:[#allocation11 + $0x18] sm:$0xff]   ;;  %674 = vmatmul.mubr.bf16.gmra.mrb[16].mxu1 %v274_v45  ;;  %v154_v45 = vld [vmem:[#allocation6 + $0x200] sm:$0xff] }
  0x9e   :  { %489 = vmatprep.mubr.bf16.mxu0 %v229_v50  ;;  %v131_v50 = vld [vmem:[#allocation6 + $0x148] sm:$0xff]  ;;  %681 = vmatprep.mubr.bf16.mxu1 %v277_v46  ;;  %v156_v46 = vld [vmem:[#allocation6 + $0x210] sm:$0xff] }
  0x9f   :  { %v239_v55 = vpack.c.bf16 %v133_v51, %v131_v50  ;;  %3397 = vmatprep.subr.bf16.mxu1 %v3537_v49  ;;  %v253_v50 = vpack.c.bf16 %v161_v48, %v159_v47  ;;  %v158_v51 = vld [vmem:[#allocation6 + $0x220] sm:$0xff] }
  0xa0   :  { %3398 = vmatpush3.bf16.msra.mxu1 %v3537_v49  ;;  %v250_v49 = vpack.c.bf16 %v156_v46, %v154_v45 }
  0xa5   :  { %490 = vmatmul.mubr.bf16.gmra.mrb[20].mxu0 %v228_v61  ;;  %v132_v61 = vld [vmem:[#allocation6 + $0x150] sm:$0xff]  ;;  %682 = vmatmul.mubr.bf16.gmra.mrb[20].mxu1 %v276_v58 }
  0xa6   :  { %497 = vmatprep.mubr.bf16.mxu0 %v231_v62  ;;  %v135_v62 = vld [vmem:[#allocation6 + $0x168] sm:$0xff]  ;;  %v238_v0 = vpack.c.bf16 %v132_v61, %v130_v60  ;;  %689 = vmatprep.mubr.bf16.mxu1 %v279_v59  ;;  %v164_v58 = vld [vmem:[#allocation6 + $0x250] sm:$0xff]  ;;  %v169_v60 = vld [vmem:[#allocation6 + $0x278] sm:$0xff] }
  0xa7   :  { %v241_v1 = vpack.c.bf16 %v137_v63, %v135_v62  ;;  %v167_v59 = vld [vmem:[#allocation6 + $0x268] sm:$0xff]  ;;  %v254_v61 = vpack.c.bf16 %v164_v58, %v162_v57  ;;  %v166_v63 = vld [vmem:[#allocation6 + $0x260] sm:$0xff] }
  0xa8   :  { %v257_v62 = vpack.c.bf16 %v169_v60, %v167_v59 }
  0xad   :  { %498 = vmatmul.mubr.bf16.gmra.mrb[24].mxu0 %v230_v9  ;;  %v3538_v9 = vld [vmem:[#allocation11 + $0x20] sm:$0xff]   ;;  %690 = vmatmul.mubr.bf16.gmra.mrb[24].mxu1 %v278_v6  ;;  %v172_v6 = vld [vmem:[#allocation6 + $0x290] sm:$0xff] }
  0xae   :  { %505 = vmatprep.mubr.bf16.mxu0 %v233_v10  ;;  %v240_v10 = vpack.c.bf16 %v136_v5, %v134_v4  ;;  %3399 = vmatprep.subr.bf16.mxu1 %v3538_v9  ;;  %v170_v5 = vld [vmem:[#allocation6 + $0x280] sm:$0xff] }
  0xaf   :  { %3400 = vmatpush3.bf16.msra.mxu1 %v3538_v9  ;;  %697 = vmatprep.mubr.bf16.mxu1 %v281_v15  ;;  %v258_v9 = vpack.c.bf16 %v172_v6, %v170_v5 }
  0xb0   :  { %3401 = vmatprep.subr.bf16.mxu1 %v3539_v12 }
  0xb3   :  { %3402 = vmatpush3.bf16.msra.mxu1 %v3539_v12  ;;  %v176_v12 = vld [vmem:[#allocation6 + $0x2b0] sm:$0xff] }
  0xb4   :  { %3403 = vmatprep.subr.bf16.mxu1 %v3540_v23 }
  0xb5   :  { %506 = vmatmul.mubr.bf16.gmra.mrb[28].mxu0 %v232_v21  ;;  %v143_v21 = vld [vmem:[#allocation6 + $0x1a8] sm:$0xff]  ;;  %698 = vmatmul.mubr.bf16.gmra.mrb[28].mxu1 %v280_v20  ;;  %v185_v20 = vld [vmem:[#allocation6 + $0x2f8] sm:$0xff] }
  0xb6   :  { %513 = vmatprep.mubr.bf16.mxu0 %v235_v22  ;;  %v145_v22 = vld [vmem:[#allocation6 + $0x1b8] sm:$0xff] }
  0xb7   :  { %v245_v25 = vpack.c.bf16 %v145_v22, %v143_v21  ;;  %3404 = vmatpush3.bf16.msra.mxu1 %v3540_v23  ;;  %v262_v21 = vpack.c.bf16 %v180_v18, %v178_v17  ;;  %v265_v22 = vpack.c.bf16 %v185_v20, %v183_v19  ;;  %v182_v23 = vld [vmem:[#allocation6 + $0x2e0] sm:$0xff] }
  0xb8   :  { %3405 = vmatprep.subr.bf16.mxu1 %v3541_v26 }
  0xbb   :  { %3406 = vmatpush3.bf16.msra.mxu1 %v3541_v26  ;;  %v4343_v26 = vld [vmem:[%s6384_s2] ss:$0 sm:$0xff] }
  0xbd   :  { %514 = vmatmul.mubr.bf16.gmra.mrb[32].mxu0 %v234_v38  ;;  %v249_v38 = vpack.c.bf16 %v153_v36, %v151_v35 }
  0xbe   :  { %521 = vmatprep.mubr.bf16.mxu0 %v237_v41  ;;  %v155_v41 = vld [vmem:[#allocation6 + $0x208] sm:$0xff] }
  0xbf   :  { %v251_v44 = vpack.c.bf16 %v157_v42, %v155_v41 }
  0xc5   :  { %522 = vmatmul.mubr.bf16.gmra.mrb[36].mxu0 %v236_v52  ;;  %v160_v52 = vld [vmem:[#allocation6 + $0x230] sm:$0xff] }
  0xc6   :  { %529 = vmatprep.mubr.bf16.mxu0 %v239_v55  ;;  %v252_v55 = vpack.c.bf16 %v160_v52, %v158_v51 }
  0xcd   :  { %530 = vmatmul.mubr.bf16.gmra.mrb[40].mxu0 %v238_v0  ;;  %v168_v0 = vld [vmem:[#allocation6 + $0x270] sm:$0xff] }
  0xce   :  { %537 = vmatprep.mubr.bf16.mxu0 %v241_v1  ;;  %v171_v1 = vld [vmem:[#allocation6 + $0x288] sm:$0xff]  ;;  %v256_v3 = vpack.c.bf16 %v168_v0, %v166_v63 }
  0xcf   :  { %v259_v4 = vpack.c.bf16 %v173_v2, %v171_v1 }
  0xd5   :  { %538 = vmatmul.mubr.bf16.gmra.mrb[44].mxu0 %v240_v10  ;;  %v261_v10 = vpack.c.bf16 %v177_v8, %v175_v7 }
  0xd6   :  { %545 = vmatprep.mubr.bf16.mxu0 %v243_v11  ;;  %v174_v11 = vld [vmem:[#allocation6 + $0x2a0] sm:$0xff] }
  0xd7   :  { %v260_v15 = vpack.c.bf16 %v176_v12, %v174_v11 }
  0xdd   :  { %546 = vmatmul.mubr.bf16.gmra.mrb[48].mxu0 %v242_v24  ;;  %v184_v24 = vld [vmem:[#allocation6 + $0x2f0] sm:$0xff] }
  0xde   :  { %553 = vmatprep.mubr.bf16.mxu0 %v245_v25  ;;  %v264_v25 = vpack.c.bf16 %v184_v24, %v182_v23 }
  0xe5   :  { %554 = vmatmul.mubr.bf16.gmra.mrb[52].mxu0 %v244_v31 }
  0xe6   :  { %561 = vmatprep.mubr.bf16.mxu0 %v247_v32 }
  0xed   :  { %562 = vmatmul.mubr.bf16.gmra.mrb[56].mxu0 %v246_v37 }
  0xee   :  { %569 = vmatprep.mubr.bf16.mxu0 %v249_v38 }
  0xf5   :  { %570 = vmatmul.mubr.bf16.gmra.mrb[60].mxu0 %v248_v43 }
  0xf6   :  { %577 = vmatprep.mubr.bf16.mxu0 %v251_v44 }
  0xfd   :  { %578 = vmatmul.mubr.bf16.gmra.mrb[64].mxu0 %v250_v49 }
  0xfe   :  { %585 = vmatprep.mubr.bf16.mxu0 %v253_v50 }
 0x105   :  { %586 = vmatmul.mubr.bf16.gmra.mrb[68].mxu0 %v252_v55 }
 0x106   :  { %593 = vmatprep.mubr.bf16.mxu0 %v255_v56 }
 0x10d   :  { %594 = vmatmul.mubr.bf16.gmra.mrb[72].mxu0 %v254_v61 }
 0x10e   :  { %601 = vmatprep.mubr.bf16.mxu0 %v257_v62 }
 0x115   :  { %602 = vmatmul.mubr.bf16.gmra.mrb[76].mxu0 %v256_v3 }
 0x116   :  { %609 = vmatprep.mubr.bf16.mxu0 %v259_v4 }
 0x11d   :  { %610 = vmatmul.mubr.bf16.gmra.mrb[80].mxu0 %v258_v9 }
 0x11e   :  { %617 = vmatprep.mubr.bf16.mxu0 %v261_v10 }
 0x125   :  { %618 = vmatmul.mubr.bf16.gmra.mrb[84].mxu0 %v260_v15 }
 0x126   :  { %625 = vmatprep.mubr.bf16.mxu0 %v263_v16 }
 0x12d   :  { %626 = vmatmul.mubr.bf16.gmra.mrb[88].mxu0 %v262_v21 }
 0x12e   :  { %633 = vmatprep.mubr.bf16.mxu0 %v265_v22 }
 0x135   :  { %634 = vmatmul.mubr.bf16.gmra.mrb[92].mxu0 %v264_v25 }
 0x150   :  { %v451_v27 = vpop.f32.mrb[0].mxu0 }
 0x151   :  { %v4346_v28 = vadd.f32 %v4343_v26, %v451_v27  ;;  %v453_v29 = vpop.f32.mrb[1].mxu0 }
 0x152   :  { %v454_v30 = vpop.f32.mrb[2].mxu0 }
 0x153   :  { %6554 = vst [vmem:[#allocation20_spill] sm:$0xff] %v4346_v28  ;;  %v4349_v31 = vadd.f32 %v4343_v26, %v454_v30  ;;  %v456_v32 = vpop.f32.mrb[3].mxu0  ;;  %v6424_v33 = vmax.f32 %v4346_v28, 0.0 }
 0x155   :  { %6555 = vst [vmem:[#allocation21_spill] sm:$0xff] %v4349_v31  ;;  %v6425_v34 = vmax.f32 %v4349_v31, 0.0 }
 0x157   :  { %v770_v35 = vpack.c.bf16 %v6425_v34, %v6424_v33 }
 0x158   :  { %v459_v36 = vpop.f32.mrb[4].mxu0 }
 0x159   :  { %v4358_v37 = vadd.f32 %v4343_v26, %v459_v36  ;;  %v461_v38 = vpop.f32.mrb[5].mxu0  ;;  %3407 = vmatprep.mubr.bf16.mxu1 %v770_v35 }
 0x15a   :  { %v462_v39 = vpop.f32.mrb[6].mxu0  ;;  %v4435_v38 = vpop.f32.mrb[0].mxu1 }
 0x15b   :  { %6556 = vst [vmem:[#allocation22_spill] sm:$0xff] %v4358_v37  ;;  %v4361_v40 = vadd.f32 %v4343_v26, %v462_v39  ;;  %v464_v41 = vpop.f32.mrb[7].mxu0  ;;  %v6421_v42 = vmax.f32 %v4358_v37, 0.0 }
 0x15d   :  { %6557 = vst [vmem:[#allocation23_spill] sm:$0xff] %v4361_v40  ;;  %v6420_v43 = vmax.f32 %v4361_v40, 0.0 }
 0x15f   :  { %v771_v44 = vpack.c.bf16 %v6420_v43, %v6421_v42 }
 0x160   :  { %v467_v45 = vpop.f32.mrb[8].mxu0 }
 0x161   :  { %v4370_v46 = vadd.f32 %v4343_v26, %v467_v45  ;;  %v469_v47 = vpop.f32.mrb[9].mxu0  ;;  %3408 = vmatmul.mubr.bf16.vlgmr.msra.gmra.mrb[32].mxu1 %v771_v44  ;;  %v645_v44 = vpop.f32.mrb[1].mxu1 }
 0x162   :  { %v470_v48 = vpop.f32.mrb[10].mxu0  ;;  %v4439_v45 = vpop.f32.mrb[2].mxu1 }
 0x163   :  { %6558 = vst [vmem:[#allocation24_spill] sm:$0xff] %v4370_v46  ;;  %v4373_v49 = vadd.f32 %v4343_v26, %v470_v48  ;;  %v472_v50 = vpop.f32.mrb[11].mxu0  ;;  %v6417_v51 = vmax.f32 %v4370_v46, 0.0  ;;  %v648_v48 = vpop.f32.mrb[3].mxu1 }
 0x165   :  { %6559 = vst [vmem:[#allocation25_spill] sm:$0xff] %v4373_v49  ;;  %v6416_v52 = vmax.f32 %v4373_v49, 0.0 }
 0x167   :  { %v772_v53 = vpack.c.bf16 %v6416_v52, %v6417_v51 }
 0x168   :  { %v475_v54 = vpop.f32.mrb[12].mxu0 }
 0x169   :  { %v4382_v55 = vadd.f32 %v4343_v26, %v475_v54  ;;  %v477_v56 = vpop.f32.mrb[13].mxu0  ;;  %3411 = vmatprep.mubr.bf16.mxu1 %v772_v53  ;;  %v4445_v53 = vpop.f32.mrb[4].mxu1 }
 0x16a   :  { %v478_v57 = vpop.f32.mrb[14].mxu0 }
 0x16b   :  { %6560 = vst [vmem:[#allocation26_spill] sm:$0xff] %v4382_v55  ;;  %v4385_v58 = vadd.f32 %v4343_v26, %v478_v57  ;;  %v480_v59 = vpop.f32.mrb[15].mxu0  ;;  %v6413_v60 = vmax.f32 %v4382_v55, 0.0  ;;  %v653_v57 = vpop.f32.mrb[5].mxu1 }
 0x16d   :  { %6561 = vst [vmem:[#allocation27_spill] sm:$0xff] %v4385_v58  ;;  %v6412_v61 = vmax.f32 %v4385_v58, 0.0 }
 0x16f   :  { %v773_v62 = vpack.c.bf16 %v6412_v61, %v6413_v60 }
 0x170   :  { %v483_v63 = vpop.f32.mrb[16].mxu0 }
 0x171   :  { %v4394_v0 = vadd.f32 %v4343_v26, %v483_v63  ;;  %v485_v1 = vpop.f32.mrb[17].mxu0  ;;  %3412 = vmatmul.mubr.bf16.gmra.mrb[36].mxu1 %v773_v62  ;;  %v4450_v62 = vpop.f32.mrb[6].mxu1 }
 0x172   :  { %v486_v2 = vpop.f32.mrb[18].mxu0 }
 0x173   :  { %6562 = vst [vmem:[#allocation28_spill] sm:$0xff] %v4394_v0  ;;  %v4397_v3 = vadd.f32 %v4343_v26, %v486_v2  ;;  %v488_v4 = vpop.f32.mrb[19].mxu0  ;;  %v6409_v5 = vmax.f32 %v4394_v0, 0.0  ;;  %v656_v2 = vpop.f32.mrb[7].mxu1 }
 0x175   :  { %6563 = vst [vmem:[#allocation29_spill] sm:$0xff] %v4397_v3  ;;  %v6408_v6 = vmax.f32 %v4397_v3, 0.0 }
 0x177   :  { %v774_v7 = vpack.c.bf16 %v6408_v6, %v6409_v5 }
 0x178   :  { %v491_v8 = vpop.f32.mrb[20].mxu0 }
 0x179   :  { %v4406_v9 = vadd.f32 %v4343_v26, %v491_v8  ;;  %v493_v10 = vpop.f32.mrb[21].mxu0  ;;  %3415 = vmatprep.mubr.bf16.mxu1 %v774_v7 }
 0x17a   :  { %v494_v11 = vpop.f32.mrb[22].mxu0 }
 0x17b   :  { %6564 = vst [vmem:[#allocation30_spill] sm:$0xff] %v4406_v9  ;;  %v4409_v12 = vadd.f32 %v4343_v26, %v494_v11  ;;  %v496_v13 = vpop.f32.mrb[23].mxu0  ;;  %v6405_v14 = vmax.f32 %v4406_v9, 0.0 }
 0x17d   :  { %6565 = vst [vmem:[#allocation31_spill] sm:$0xff] %v4409_v12  ;;  %v6402_v15 = vmax.f32 %v4409_v12, 0.0 }
 0x17f   :  { %v775_v16 = vpack.c.bf16 %v6402_v15, %v6405_v14 }
 0x180   :  { %v499_v17 = vpop.f32.mrb[24].mxu0 }
 0x181   :  { %v4418_v18 = vadd.f32 %v4343_v26, %v499_v17  ;;  %v501_v19 = vpop.f32.mrb[25].mxu0  ;;  %3416 = vmatmul.mubr.bf16.gmra.mrb[40].mxu1 %v775_v16  ;;  %v4464_v16 = vpop.f32.mrb[8].mxu1 }
 0x182   :  { %v502_v20 = vpop.f32.mrb[26].mxu0  ;;  %v661_v19 = vpop.f32.mrb[9].mxu1 }
 0x183   :  { %6566 = vst [vmem:[#allocation32_spill] sm:$0xff] %v4418_v18  ;;  %v4421_v21 = vadd.f32 %v4343_v26, %v502_v20  ;;  %v504_v22 = vpop.f32.mrb[27].mxu0  ;;  %v6401_v23 = vmax.f32 %v4418_v18, 0.0 }
 0x185   :  { %6567 = vst [vmem:[#allocation33_spill] sm:$0xff] %v4421_v21  ;;  %v6400_v24 = vmax.f32 %v4421_v21, 0.0 }
 0x187   :  { %v776_v25 = vpack.c.bf16 %v6400_v24, %v6401_v23 }
 0x188   :  { %v507_v27 = vpop.f32.mrb[28].mxu0 }
 0x189   :  { %v4430_v29 = vadd.f32 %v4343_v26, %v507_v27  ;;  %v509_v30 = vpop.f32.mrb[29].mxu0  ;;  %3419 = vmatprep.mubr.bf16.mxu1 %v776_v25  ;;  %v4469_v25 = vpop.f32.mrb[10].mxu1 }
 0x18a   :  { %v510_v32 = vpop.f32.mrb[30].mxu0  ;;  %v664_v27 = vpop.f32.mrb[11].mxu1 }
 0x18b   :  { %6568 = vst [vmem:[#allocation34_spill] sm:$0xff] %v4430_v29  ;;  %v4433_v35 = vadd.f32 %v4343_v26, %v510_v32  ;;  %v512_v36 = vpop.f32.mrb[31].mxu0  ;;  %v6399_v39 = vmax.f32 %v4430_v29, 0.0 }
 0x18c   :  { %v4473_v36 = vpop.f32.mrb[12].mxu1 }
 0x18d   :  { %6569 = vst [vmem:[#allocation35_spill] sm:$0xff] %v4433_v35  ;;  %v6398_v41 = vmax.f32 %v4433_v35, 0.0  ;;  %v669_v44 = vpop.f32.mrb[13].mxu1 }
 0x18e   :  { %v4479_v48 = vpop.f32.mrb[14].mxu1 }
 0x18f   :  { %v777_v47 = vpack.c.bf16 %v6398_v41, %v6399_v39 }
 0x190   :  { %v515_v50 = vpop.f32.mrb[32].mxu0 }
 0x191   :  { %v4448_v54 = vadd.f32 %v4343_v26, %v515_v50  ;;  %v517_v56 = vpop.f32.mrb[33].mxu0  ;;  %3420 = vmatmul.mubr.bf16.gmra.mrb[44].mxu1 %v777_v47 }
 0x192   :  { %v518_v59 = vpop.f32.mrb[34].mxu0  ;;  %v672_v56 = vpop.f32.mrb[15].mxu1 }
 0x193   :  { %6570 = vst [vmem:[#allocation36_spill] sm:$0xff] %v4448_v54  ;;  %v4453_v63 = vadd.f32 %v4343_v26, %v518_v59  ;;  %v520_v1 = vpop.f32.mrb[35].mxu0  ;;  %v6395_v4 = vmax.f32 %v4448_v54, 0.0 }
 0x194   :  { %v4484_v1 = vpop.f32.mrb[16].mxu1 }
 0x195   :  { %6571 = vst [vmem:[#allocation37_spill] sm:$0xff] %v4453_v63  ;;  %v6394_v7 = vmax.f32 %v4453_v63, 0.0 }
 0x197   :  { %v778_v8 = vpack.c.bf16 %v6394_v7, %v6395_v4 }
 0x198   :  { %v523_v10 = vpop.f32.mrb[36].mxu0 }
 0x199   :  { %v4462_v11 = vadd.f32 %v4343_v26, %v523_v10  ;;  %v525_v13 = vpop.f32.mrb[37].mxu0  ;;  %3423 = vmatprep.mubr.bf16.mxu1 %v778_v8  ;;  %v677_v8 = vpop.f32.mrb[17].mxu1 }
 0x19a   :  { %v526_v17 = vpop.f32.mrb[38].mxu0 }
 0x19b   :  { %6572 = vst [vmem:[#allocation38_spill] sm:$0xff] %v4462_v11  ;;  %v4467_v20 = vadd.f32 %v4343_v26, %v526_v17  ;;  %v528_v22 = vpop.f32.mrb[39].mxu0  ;;  %v6393_v30 = vmax.f32 %v4462_v11, 0.0  ;;  %v4489_v17 = vpop.f32.mrb[18].mxu1 }
 0x19c   :  { %v680_v19 = vpop.f32.mrb[19].mxu1 }
 0x19d   :  { %6573 = vst [vmem:[#allocation39_spill] sm:$0xff] %v4467_v20  ;;  %v6392_v32 = vmax.f32 %v4467_v20, 0.0  ;;  %v4493_v44 = vpop.f32.mrb[20].mxu1 }
 0x19f   :  { %v779_v47 = vpack.c.bf16 %v6392_v32, %v6393_v30 }
 0x1a0   :  { %v531_v50 = vpop.f32.mrb[40].mxu0 }
 0x1a1   :  { %v4482_v57 = vadd.f32 %v4343_v26, %v531_v50  ;;  %v533_v59 = vpop.f32.mrb[41].mxu0  ;;  %3424 = vmatmul.mubr.bf16.gmra.mrb[48].mxu1 %v779_v47  ;;  %v685_v50 = vpop.f32.mrb[21].mxu1 }
 0x1a2   :  { %v534_v2 = vpop.f32.mrb[42].mxu0  ;;  %v4499_v56 = vpop.f32.mrb[22].mxu1 }
 0x1a3   :  { %6574 = vst [vmem:[#allocation40_spill] sm:$0xff] %v4482_v57  ;;  %v4487_v10 = vadd.f32 %v4343_v26, %v534_v2  ;;  %v536_v13 = vpop.f32.mrb[43].mxu0  ;;  %v6397_v22 = vmax.f32 %v4482_v57, 0.0  ;;  %v688_v2 = vpop.f32.mrb[23].mxu1 }
 0x1a4   :  { %v4504_v19 = vpop.f32.mrb[24].mxu1 }
 0x1a5   :  { %6575 = vst [vmem:[#allocation41_spill] sm:$0xff] %v4487_v10  ;;  %v6396_v27 = vmax.f32 %v4487_v10, 0.0  ;;  %v693_v30 = vpop.f32.mrb[25].mxu1 }
 0x1a6   :  { %v4509_v4 = vpop.f32.mrb[26].mxu1 }
 0x1a7   :  { %v780_v47 = vpack.c.bf16 %v6396_v27, %v6397_v22  ;;  %v696_v27 = vpop.f32.mrb[27].mxu1 }
 0x1a8   :  { %v539_v59 = vpop.f32.mrb[44].mxu0  ;;  %v4513_v41 = vpop.f32.mrb[28].mxu1 }
 0x1a9   :  { %v4502_v8 = vadd.f32 %v4343_v26, %v539_v59  ;;  %v541_v13 = vpop.f32.mrb[45].mxu0  ;;  %3427 = vmatprep.mubr.bf16.mxu1 %v780_v47  ;;  %v701_v59 = vpop.f32.mrb[29].mxu1 }
 0x1aa   :  { %v542_v32 = vpop.f32.mrb[46].mxu0  ;;  %v4519_v30 = vpop.f32.mrb[30].mxu1 }
 0x1ab   :  { %6576 = vst [vmem:[#allocation42_spill] sm:$0xff] %v4502_v8  ;;  %v4507_v50 = vadd.f32 %v4343_v26, %v542_v32  ;;  %v544_v7 = vpop.f32.mrb[47].mxu0  ;;  %v6404_v22 = vmax.f32 %v4502_v8, 0.0  ;;  %v704_v13 = vpop.f32.mrb[31].mxu1 }
 0x1ad   :  { %6577 = vst [vmem:[#allocation43_spill] sm:$0xff] %v4507_v50  ;;  %v6403_v2 = vmax.f32 %v4507_v50, 0.0 }
 0x1af   :  { %v781_v47 = vpack.c.bf16 %v6403_v2, %v6404_v22 }
 0x1b0   :  { %v547_v32 = vpop.f32.mrb[48].mxu0 }
 0x1b1   :  { %v4522_v7 = vadd.f32 %v4343_v26, %v547_v32  ;;  %v549_v27 = vpop.f32.mrb[49].mxu0  ;;  %3428 = vmatmul.mubr.bf16.gmra.mrb[52].mxu1 %v781_v47 }
 0x1b2   :  { %v550_v39 = vpop.f32.mrb[50].mxu0 }
 0x1b3   :  { %6578 = vst [vmem:[#allocation44_spill] sm:$0xff] %v4522_v7  ;;  %v4525_v24 = vadd.f32 %v4343_v26, %v550_v39  ;;  %v552_v23 = vpop.f32.mrb[51].mxu0  ;;  %v6407_v59 = vmax.f32 %v4522_v7, 0.0 }
 0x1b5   :  { %6579 = vst [vmem:[#allocation45_spill] sm:$0xff] %v4525_v24  ;;  %v6406_v15 = vmax.f32 %v4525_v24, 0.0 }
 0x1b7   :  { %v782_v2 = vpack.c.bf16 %v6406_v15, %v6407_v59 }
 0x1b8   :  { %v555_v13 = vpop.f32.mrb[52].mxu0 }
 0x1b9   :  { %v4534_v32 = vadd.f32 %v4343_v26, %v555_v13  ;;  %v557_v27 = vpop.f32.mrb[53].mxu0  ;;  %3431 = vmatprep.mubr.bf16.mxu1 %v782_v2 }
 0x1ba   :  { %v558_v47 = vpop.f32.mrb[54].mxu0 }
 0x1bb   :  { %6580 = vst [vmem:[#allocation46_spill] sm:$0xff] %v4534_v32  ;;  %v4537_v39 = vadd.f32 %v4343_v26, %v558_v47  ;;  %v560_v23 = vpop.f32.mrb[55].mxu0  ;;  %v6411_v22 = vmax.f32 %v4534_v32, 0.0 }
 0x1bd   :  { %6581 = vst [vmem:[#allocation47_spill] sm:$0xff] %v4537_v39  ;;  %v6410_v14 = vmax.f32 %v4537_v39, 0.0 }
 0x1bf   :  { %v783_v15 = vpack.c.bf16 %v6410_v14, %v6411_v22 }
 0x1c0   :  { %v563_v59 = vpop.f32.mrb[56].mxu0 }
 0x1c1   :  { %v4546_v13 = vadd.f32 %v4343_v26, %v563_v59  ;;  %v565_v27 = vpop.f32.mrb[57].mxu0  ;;  %3432 = vmatmul.mubr.bf16.gmra.mrb[56].mxu1 %v783_v15 }
 0x1c2   :  { %v566_v2 = vpop.f32.mrb[58].mxu0 }
 0x1c3   :  { %6582 = vst [vmem:[#allocation48_spill] sm:$0xff] %v4546_v13  ;;  %v4549_v47 = vadd.f32 %v4343_v26, %v566_v2  ;;  %v568_v23 = vpop.f32.mrb[59].mxu0  ;;  %v6415_v6 = vmax.f32 %v4546_v13, 0.0 }
 0x1c5   :  { %6583 = vst [vmem:[#allocation49_spill] sm:$0xff] %v4549_v47  ;;  %v6414_v5 = vmax.f32 %v4549_v47, 0.0 }
 0x1c7   :  { %v784_v14 = vpack.c.bf16 %v6414_v5, %v6415_v6 }
 0x1c8   :  { %v571_v22 = vpop.f32.mrb[60].mxu0 }
 0x1c9   :  { %v4558_v59 = vadd.f32 %v4343_v26, %v571_v22  ;;  %v573_v27 = vpop.f32.mrb[61].mxu0  ;;  %3435 = vmatprep.mubr.bf16.mxu1 %v784_v14 }
 0x1ca   :  { %v574_v15 = vpop.f32.mrb[62].mxu0 }
 0x1cb   :  { %6584 = vst [vmem:[#allocation50_spill] sm:$0xff] %v4558_v59  ;;  %v4561_v2 = vadd.f32 %v4343_v26, %v574_v15  ;;  %v576_v23 = vpop.f32.mrb[63].mxu0  ;;  %v6419_v61 = vmax.f32 %v4558_v59, 0.0 }
 0x1cd   :  { %6585 = vst [vmem:[#allocation51_spill] sm:$0xff] %v4561_v2  ;;  %v6418_v60 = vmax.f32 %v4561_v2, 0.0 }
 0x1cf   :  { %v785_v5 = vpack.c.bf16 %v6418_v60, %v6419_v61 }
 0x1d0   :  { %v579_v6 = vpop.f32.mrb[64].mxu0 }
 0x1d1   :  { %3436 = vmatmul.mubr.bf16.gmra.mrb[60].mxu1 %v785_v5  ;;  %v4570_v22 = vadd.f32 %v4343_v26, %v579_v6  ;;  %v581_v14 = vpop.f32.mrb[65].mxu0 }
 0x1d2   :  { %v582_v27 = vpop.f32.mrb[66].mxu0 }
 0x1d3   :  { %6586 = vst [vmem:[#allocation52_spill] sm:$0xff] %v4570_v22  ;;  %v6423_v15 = vmax.f32 %v4570_v22, 0.0  ;;  %v4574_v23 = vadd.f32 %v4343_v26, %v582_v27  ;;  %v584_v52 = vpop.f32.mrb[67].mxu0 }
 0x1d5   :  { %6587 = vst [vmem:[#allocation53_spill] sm:$0xff] %v4574_v23  ;;  %v6422_v51 = vmax.f32 %v4574_v23, 0.0 }
 0x1d7   :  { %v786_v60 = vpack.c.bf16 %v6422_v51, %v6423_v15 }
 0x1d8   :  { %v587_v61 = vpop.f32.mrb[68].mxu0 }
 0x1d9   :  { %v4582_v5 = vadd.f32 %v4343_v26, %v587_v61  ;;  %v589_v6 = vpop.f32.mrb[69].mxu0  ;;  %3439 = vmatprep.mubr.bf16.mxu1 %v786_v60 }
 0x1da   :  { %v590_v14 = vpop.f32.mrb[70].mxu0 }
 0x1db   :  { %6588 = vst [vmem:[#allocation54_spill] sm:$0xff] %v4582_v5  ;;  %v6427_v43 = vmax.f32 %v4582_v5, 0.0  ;;  %v4586_v27 = vadd.f32 %v4343_v26, %v590_v14  ;;  %v592_v52 = vpop.f32.mrb[71].mxu0 }
 0x1dd   :  { %6589 = vst [vmem:[#allocation55_spill] sm:$0xff] %v4586_v27  ;;  %v6426_v42 = vmax.f32 %v4586_v27, 0.0 }
 0x1df   :  { %v787_v51 = vpack.c.bf16 %v6426_v42, %v6427_v43 }
 0x1e0   :  { %v595_v15 = vpop.f32.mrb[72].mxu0 }
 0x1e1   :  { %v4594_v61 = vadd.f32 %v4343_v26, %v595_v15  ;;  %v597_v6 = vpop.f32.mrb[73].mxu0  ;;  %3440 = vmatmul.mubr.bf16.gmra.mrb[64].mxu1 %v787_v51 }
 0x1e2   :  { %v598_v60 = vpop.f32.mrb[74].mxu0 }
 0x1e3   :  { %6590 = vst [vmem:[#allocation56_spill] sm:$0xff] %v4594_v61  ;;  %v6431_v33 = vmax.f32 %v4594_v61, 0.0  ;;  %v4598_v14 = vadd.f32 %v4343_v26, %v598_v60  ;;  %v600_v52 = vpop.f32.mrb[75].mxu0 }
 0x1e5   :  { %6591 = vst [vmem:[#allocation57_spill] sm:$0xff] %v4598_v14  ;;  %v6430_v34 = vmax.f32 %v4598_v14, 0.0 }
 0x1e7   :  { %v788_v42 = vpack.c.bf16 %v6430_v34, %v6431_v33 }
 0x1e8   :  { %v603_v43 = vpop.f32.mrb[76].mxu0 }
 0x1e9   :  { %v4606_v15 = vadd.f32 %v4343_v26, %v603_v43  ;;  %v605_v6 = vpop.f32.mrb[77].mxu0  ;;  %3443 = vmatprep.mubr.bf16.mxu1 %v788_v42 }
 0x1ea   :  { %v606_v51 = vpop.f32.mrb[78].mxu0 }
 0x1eb   :  { %6592 = vst [vmem:[#allocation58_spill] sm:$0xff] %v4606_v15  ;;  %v6435_v27 = vmax.f32 %v4606_v15, 0.0  ;;  %v4610_v60 = vadd.f32 %v4343_v26, %v606_v51  ;;  %v608_v52 = vpop.f32.mrb[79].mxu0 }
 0x1ed   :  { %6593 = vst [vmem:[#allocation59_spill] sm:$0xff] %v4610_v60  ;;  %v6434_v5 = vmax.f32 %v4610_v60, 0.0 }
 0x1ef   :  { %v789_v34 = vpack.c.bf16 %v6434_v5, %v6435_v27 }
 0x1f0   :  { %v611_v33 = vpop.f32.mrb[80].mxu0 }
 0x1f1   :  { %v4618_v43 = vadd.f32 %v4343_v26, %v611_v33  ;;  %v613_v6 = vpop.f32.mrb[81].mxu0  ;;  %3444 = vmatmul.mubr.bf16.gmra.mrb[68].mxu1 %v789_v34 }
 0x1f2   :  { %v614_v42 = vpop.f32.mrb[82].mxu0 }
 0x1f3   :  { %6594 = vst [vmem:[#allocation60_spill] sm:$0xff] %v4618_v43  ;;  %v6439_v14 = vmax.f32 %v4618_v43, 0.0  ;;  %v4622_v51 = vadd.f32 %v4343_v26, %v614_v42  ;;  %v616_v52 = vpop.f32.mrb[83].mxu0 }
 0x1f5   :  { %6595 = vst [vmem:[#allocation61_spill] sm:$0xff] %v4622_v51  ;;  %v6438_v61 = vmax.f32 %v4622_v51, 0.0 }
 0x1f7   :  { %v790_v5 = vpack.c.bf16 %v6438_v61, %v6439_v14 }
 0x1f8   :  { %v619_v27 = vpop.f32.mrb[84].mxu0 }
 0x1f9   :  { %v4630_v33 = vadd.f32 %v4343_v26, %v619_v27  ;;  %v621_v6 = vpop.f32.mrb[85].mxu0  ;;  %3447 = vmatprep.mubr.bf16.mxu1 %v790_v5 }
 0x1fa   :  { %v622_v34 = vpop.f32.mrb[86].mxu0 }
 0x1fb   :  { %6596 = vst [vmem:[#allocation62_spill] sm:$0xff] %v4630_v33  ;;  %v6444_v60 = vmax.f32 %v4630_v33, 0.0  ;;  %v4634_v42 = vadd.f32 %v4343_v26, %v622_v34  ;;  %v624_v52 = vpop.f32.mrb[87].mxu0  ;;  %v4651_v33 = vadd.f32 %v4343_v26, %v4435_v38 }
 0x1fd   :  { %6597 = vst [vmem:[#allocation63_spill] sm:$0xff] %v4634_v42  ;;  %v6443_v15 = vmax.f32 %v4634_v42, 0.0  ;;  %6600 = vst [vmem:[#allocation66_spill] sm:$0xff] %v4651_v33 }
 0x1ff   :  { %v791_v61 = vpack.c.bf16 %v6443_v15, %v6444_v60  ;;  %v4655_v15 = vadd.f32 %v4343_v26, %v4439_v45  ;;  %v6450_v60 = vmax.f32 %v4651_v33, 0.0 }
 0x200   :  { %v627_v14 = vpop.f32.mrb[88].mxu0 }
 0x201   :  { %v4642_v27 = vadd.f32 %v4343_v26, %v627_v14  ;;  %v629_v6 = vpop.f32.mrb[89].mxu0  ;;  %3448 = vmatmul.mubr.bf16.gmra.mrb[72].mxu1 %v791_v61  ;;  %6601 = vst [vmem:[#allocation67_spill] sm:$0xff] %v4655_v15  ;;  %v6449_v38 = vmax.f32 %v4655_v15, 0.0 }
 0x202   :  { %v630_v5 = vpop.f32.mrb[90].mxu0 }
 0x203   :  { %6598 = vst [vmem:[#allocation64_spill] sm:$0xff] %v4642_v27  ;;  %v6467_v51 = vmax.f32 %v4642_v27, 0.0  ;;  %v4646_v34 = vadd.f32 %v4343_v26, %v630_v5  ;;  %v632_v52 = vpop.f32.mrb[91].mxu0 }
 0x205   :  { %6599 = vst [vmem:[#allocation65_spill] sm:$0xff] %v4646_v34  ;;  %v6448_v43 = vmax.f32 %v4646_v34, 0.0 }
 0x207   :  { %v792_v61 = vpack.c.bf16 %v6448_v43, %v6467_v51  ;;  %v4673_v43 = vadd.f32 %v4343_v26, %v4445_v53 }
 0x208   :  { %v635_v14 = vpop.f32.mrb[92].mxu0 }
 0x209   :  { %v4662_v6 = vadd.f32 %v4343_v26, %v635_v14  ;;  %v637_v5 = vpop.f32.mrb[93].mxu0  ;;  %3451 = vmatprep.mubr.bf16.mxu1 %v792_v61  ;;  %6604 = vst [vmem:[#allocation70_spill] sm:$0xff] %v4673_v43  ;;  %v4677_v61 = vadd.f32 %v4343_v26, %v4450_v62  ;;  %v794_v14 = vpack.c.bf16 %v6449_v38, %v6450_v60  ;;  %v6453_v62 = vmax.f32 %v4673_v43, 0.0 }
 0x20a   :  { %v638_v52 = vpop.f32.mrb[94].mxu0  ;;  %v4685_v5 = vadd.f32 %v4343_v26, %v4464_v16  ;;  %v4705_v60 = vadd.f32 %v4343_v26, %v4473_v36 }
 0x20b   :  { %6602 = vst [vmem:[#allocation68_spill] sm:$0xff] %v4662_v6  ;;  %v6454_v42 = vmax.f32 %v4662_v6, 0.0  ;;  %v4668_v45 = vadd.f32 %v4343_v26, %v638_v52  ;;  %v640_v27 = vpop.f32.mrb[95].mxu0  ;;  %6605 = vst [vmem:[#allocation71_spill] sm:$0xff] %v4677_v61  ;;  %v6452_v52 = vmax.f32 %v4677_v61, 0.0 }
 0x20c   :  { %6606 = vst [vmem:[#allocation72_spill] sm:$0xff] %v4685_v5  ;;  %v4689_v27 = vadd.f32 %v4343_v26, %v4469_v25  ;;  %v6458_v38 = vmax.f32 %v4685_v5, 0.0  ;;  %6608 = vst [vmem:[#allocation74_spill] sm:$0xff] %v4705_v60  ;;  %v6457_v36 = vmax.f32 %v4705_v60, 0.0 }
 0x20d   :  { %6603 = vst [vmem:[#allocation69_spill] sm:$0xff] %v4668_v45  ;;  %v6451_v34 = vmax.f32 %v4668_v45, 0.0  ;;  %v795_v25 = vpack.c.bf16 %v6452_v52, %v6453_v62  ;;  %v4721_v52 = vadd.f32 %v4343_v26, %v4489_v17  ;;  %v4737_v17 = vadd.f32 %v4343_v26, %v4499_v56 }
 0x20e   :  { %6607 = vst [vmem:[#allocation73_spill] sm:$0xff] %v4689_v27  ;;  %v6455_v16 = vmax.f32 %v4689_v27, 0.0 }
 0x20f   :  { %v793_v53 = vpack.c.bf16 %v6451_v34, %v6454_v42  ;;  %v4709_v34 = vadd.f32 %v4343_v26, %v4479_v48  ;;  %6611 = vst [vmem:[#allocation77_spill] sm:$0xff] %v4721_v52  ;;  %v6459_v42 = vmax.f32 %v4721_v52, 0.0  ;;  %6613 = vst [vmem:[#allocation79_spill] sm:$0xff] %v4737_v17 }
 0x211   :  { %3452 = vmatmul.mubr.bf16.gmra.mrb[76].mxu1 %v793_v53  ;;  %6609 = vst [vmem:[#allocation75_spill] sm:$0xff] %v4709_v34  ;;  %v4717_v53 = vadd.f32 %v4343_v26, %v4484_v1  ;;  %v6456_v62 = vmax.f32 %v4709_v34, 0.0 }
 0x212   :  { %3455 = vmatprep.mubr.bf16.mxu1 %v794_v14  ;;  %v796_v14 = vpack.c.bf16 %v6455_v16, %v6458_v38  ;;  %v4733_v16 = vadd.f32 %v4343_v26, %v4493_v44 }
 0x213   :  { %6610 = vst [vmem:[#allocation76_spill] sm:$0xff] %v4717_v53  ;;  %v6460_v48 = vmax.f32 %v4717_v53, 0.0  ;;  %v797_v1 = vpack.c.bf16 %v6456_v62, %v6457_v36  ;;  %v4749_v62 = vadd.f32 %v4343_v26, %v4509_v4  ;;  %v6463_v36 = vmax.f32 %v4737_v17, 0.0 }
 0x214   :  { %6612 = vst [vmem:[#allocation78_spill] sm:$0xff] %v4733_v16  ;;  %v6464_v44 = vmax.f32 %v4733_v16, 0.0  ;;  %v4765_v4 = vadd.f32 %v4343_v26, %v4519_v30 }
 0x215   :  { %6615 = vst [vmem:[#allocation81_spill] sm:$0xff] %v4749_v62  ;;  %v6461_v38 = vmax.f32 %v4749_v62, 0.0 }
 0x216   :  { %6617 = vst [vmem:[#allocation83_spill] sm:$0xff] %v4765_v4 }
 0x219   :  { %3456 = vmatmul.mubr.bf16.gmra.mrb[80].mxu1 %v795_v25  ;;  %v798_v25 = vpack.c.bf16 %v6459_v42, %v6460_v48  ;;  %v4761_v42 = vadd.f32 %v4343_v26, %v4513_v41  ;;  %v6465_v48 = vmax.f32 %v4765_v4, 0.0 }
 0x21a   :  { %3459 = vmatprep.mubr.bf16.mxu1 %v796_v14  ;;  %v4745_v14 = vadd.f32 %v4343_v26, %v4504_v19  ;;  %v799_v19 = vpack.c.bf16 %v6463_v36, %v6464_v44  ;;  %v4780_v26 = vld [vmem:[%s6386_s4] ss:$0 sm:$0xff] }
 0x21b   :  { %6616 = vst [vmem:[#allocation82_spill] sm:$0xff] %v4761_v42 }
 0x21c   :  { %6614 = vst [vmem:[#allocation80_spill] sm:$0xff] %v4745_v14  ;;  %v6462_v56 = vmax.f32 %v4745_v14, 0.0 }
 0x221   :  { %3460 = vmatmul.mubr.bf16.gmra.mrb[84].mxu1 %v797_v1  ;;  %v800_v1 = vpack.c.bf16 %v6461_v38, %v6462_v56 }
 0x222   :  { %3463 = vmatprep.mubr.bf16.mxu1 %v798_v25  ;;  %v6466_v25 = vmax.f32 %v4761_v42, 0.0 }
 0x224   :  { %v801_v41 = vpack.c.bf16 %v6465_v48, %v6466_v25 }
 0x229   :  { %3464 = vmatmul.mubr.bf16.gmra.mrb[88].mxu1 %v799_v19 }
 0x22a   :  { %3467 = vmatprep.mubr.bf16.mxu1 %v800_v1 }
 0x231   :  { %3468 = vmatmul.mubr.bf16.gmra.mrb[92].mxu1 %v801_v41 }
 0x234   :  { %v3409_v30 = vpop.f32.mrb[32].mxu1 }
 0x235   :  { %v4783_v38 = vadd.f32 %v3409_v30, %v4780_v26  ;;  %v907_v56 = vpop.f32.mrb[33].mxu1 }
 0x236   :  { %v3410_v36 = vpop.f32.mrb[34].mxu1  ;;  %v4790_v48 = vadd.f32 %v4780_v26, %v907_v56 }
 0x237   :  { %v3287_v19 = vmul.f32 -1.442695, %v4783_v38  ;;  %v4787_v1 = vadd.f32 %v3410_v36, %v4780_v26  ;;  %v910_v44 = vpop.f32.mrb[35].mxu1 }
 0x238   :  { %v3285_v25 = vmul.f32 -1.442695, %v4790_v48  ;;  %v4795_v30 = vadd.f32 %v4780_v26, %v910_v44 }
 0x239   :  { %3542 = vpow2.f32 %v3287_v19  ;;  %v3288_v41 = vmul.f32 -1.442695, %v4787_v1 }
 0x23a   :  { %v3286_v51 = vmul.f32 -1.442695, %v4795_v30 }
 0x23b   :  { %3544 = vpow2.f32 %v3288_v41 }
 0x23c   :  { %3546 = vpow2.f32 %v3285_v25 }
 0x23d   :  { %3548 = vpow2.f32 %v3286_v51 }
 0x243   :  { %v3543_v4 = vpop.eup %3542 }
 0x244   :  { %v3413_v36 = vpop.f32.mrb[36].mxu1  ;;  %v1420_v42 = vadd.f32 1.0, %v3543_v4 }
 0x245   :  { %v4799_v62 = vadd.f32 %v3413_v36, %v4780_v26  ;;  %v923_v56 = vpop.f32.mrb[37].mxu1  ;;  %v3545_v19 = vpop.eup %3544 }
 0x246   :  { %v4802_v14 = vadd.f32 %v4780_v26, %v923_v56  ;;  %v3414_v17 = vpop.f32.mrb[38].mxu1  ;;  %3550 = vrcp.f32 %v1420_v42  ;;  %v1421_v41 = vadd.f32 1.0, %v3545_v19  ;;  %v3547_v36 = vpop.eup %3546 }
 0x247   :  { %v3291_v44 = vmul.f32 -1.442695, %v4799_v62  ;;  %v4806_v25 = vadd.f32 %v3414_v17, %v4780_v26  ;;  %v926_v16 = vpop.f32.mrb[39].mxu1  ;;  %v1418_v19 = vadd.f32 1.0, %v3547_v36  ;;  %v3549_v52 = vpop.eup %3548 }
 0x248   :  { %v3289_v51 = vmul.f32 -1.442695, %v4802_v14  ;;  %v4810_v4 = vadd.f32 %v4780_v26, %v926_v16  ;;  %3552 = vrcp.f32 %v1421_v41  ;;  %v1419_v17 = vadd.f32 1.0, %v3549_v52 }
 0x249   :  { %3554 = vpow2.f32 %v3291_v44  ;;  %v3292_v56 = vmul.f32 -1.442695, %v4806_v25 }
 0x24a   :  { %3556 = vpow2.f32 %v3289_v51  ;;  %v3290_v42 = vmul.f32 -1.442695, %v4810_v4 }
 0x24b   :  { %3558 = vpow2.f32 %v3292_v56 }
 0x24c   :  { %3560 = vpow2.f32 %v3290_v42 }
 0x24d   :  { %3562 = vrcp.f32 %v1418_v19 }
 0x24e   :  { %3564 = vrcp.f32 %v1419_v17 }
 0x250   :  { %v3551_v53 = vpop.eup %3550 }
 0x251   :  { %1678 = vrot.lane.b32.xlu1 %v3551_v53, %s4199_s20 }
 0x252   :  { %v3553_v34 = vpop.eup %3552 }
 0x253   :  { %v3555_v16 = vpop.eup %3554 }
 0x254   :  { %v3417_v60 = vpop.f32.mrb[40].mxu1  ;;  %v1424_v41 = vadd.f32 1.0, %v3555_v16  ;;  %v3557_v36 = vpop.eup %3556 }
 0x255   :  { %v4816_v44 = vadd.f32 %v3417_v60, %v4780_v26  ;;  %1680 = vrot.lane.b32.xlu1 %v3553_v34, %s4199_s20  ;;  %v939_v51 = vpop.f32.mrb[41].mxu1  ;;  %v3559_v19 = vpop.eup %3558  ;;  %v1422_v17 = vadd.f32 1.0, %v3557_v36 }
 0x256   :  { %v4820_v56 = vadd.f32 %v4780_v26, %v939_v51  ;;  %v3418_v42 = vpop.f32.mrb[42].mxu1  ;;  %3566 = vrcp.f32 %v1424_v41  ;;  %v1425_v16 = vadd.f32 1.0, %v3559_v19  ;;  %v3561_v60 = vpop.eup %3560 }
 0x257   :  { %v3295_v52 = vmul.f32 -1.442695, %v4816_v44  ;;  %v942_v53 = vpop.f32.mrb[43].mxu1  ;;  %v4824_v27 = vadd.f32 %v3418_v42, %v4780_v26  ;;  %v3563_v51 = vpop.eup %3562  ;;  %v1423_v61 = vadd.f32 1.0, %v3561_v60 }
 0x258   :  { %v3293_v34 = vmul.f32 -1.442695, %v4820_v56  ;;  %v4828_v5 = vadd.f32 %v4780_v26, %v942_v53  ;;  %1674 = vrot.lane.b32.xlu0 %v3563_v51, %s4199_s20  ;;  %v3565_v36 = vpop.eup %3564 }
 0x259   :  { %3568 = vpow2.f32 %v3295_v52  ;;  %v3296_v41 = vmul.f32 -1.442695, %v4824_v27 }
 0x25a   :  { %3570 = vrcp.f32 %v1425_v16  ;;  %v3294_v42 = vmul.f32 -1.442695, %v4828_v5 }
 0x25b   :  { %3572 = vrcp.f32 %v1422_v17 }
 0x25c   :  { %3574 = vpow2.f32 %v3293_v34  ;;  %1676 = vrot.lane.b32.xlu0 %v3565_v36, %s4199_s20 }
 0x25d   :  { %3576 = vrcp.f32 %v1423_v61 }
 0x25e   :  { %3578 = vpow2.f32 %v3296_v41 }
 0x25f   :  { %3580 = vpow2.f32 %v3294_v42 }
 0x260   :  { %v3567_v52 = vpop.eup %3566 }
 0x261   :  { %1686 = vrot.lane.b32.xlu0 %v3567_v52, %s4199_s20 }
 0x263   :  { %v3569_v53 = vpop.eup %3568 }
 0x264   :  { %v3421_v19 = vpop.f32.mrb[44].mxu1  ;;  %v3571_v16 = vpop.eup %3570  ;;  %v1428_v60 = vadd.f32 1.0, %v3569_v53 }
 0x265   :  { %v4836_v51 = vadd.f32 %v3421_v19, %v4780_v26  ;;  %v955_v17 = vpop.f32.mrb[45].mxu1  ;;  %1688 = vrot.lane.b32.xlu1 %v3571_v16, %s4199_s20  ;;  %v3573_v41 = vpop.eup %3572 }
 0x266   :  { %v4840_v34 = vadd.f32 %v4780_v26, %v955_v17  ;;  %v3422_v61 = vpop.f32.mrb[46].mxu1  ;;  %3582 = vrcp.f32 %v1428_v60  ;;  %v3575_v43 = vpop.eup %3574  ;;  %1682 = vrot.lane.b32.xlu0 %v3573_v41, %s4199_s20 }
 0x267   :  { %v3299_v42 = vmul.f32 -1.442695, %v4836_v51  ;;  %v958_v36 = vpop.f32.mrb[47].mxu1  ;;  %v4846_v53 = vadd.f32 %v3422_v61, %v4780_v26  ;;  %v3577_v19 = vpop.eup %3576  ;;  %v1426_v15 = vadd.f32 1.0, %v3575_v43 }
 0x268   :  { %v3297_v52 = vmul.f32 -1.442695, %v4840_v34  ;;  %v3579_v16 = vpop.eup %3578  ;;  %v4849_v17 = vadd.f32 %v4780_v26, %v958_v36 }
 0x269   :  { %3584 = vpow2.f32 %v3299_v42  ;;  %1684 = vrot.lane.b32.xlu1 %v3577_v19, %s4199_s20  ;;  %v1429_v60 = vadd.f32 1.0, %v3579_v16  ;;  %v3581_v33 = vpop.eup %3580  ;;  %v3300_v45 = vmul.f32 -1.442695, %v4846_v53 }
 0x26a   :  { %3586 = vrcp.f32 %v1426_v15  ;;  %v1427_v41 = vadd.f32 1.0, %v3581_v33  ;;  %v3298_v61 = vmul.f32 -1.442695, %v4849_v17 }
 0x26b   :  { %3588 = vpow2.f32 %v3297_v52 }
 0x26c   :  { %3590 = vrcp.f32 %v1429_v60 }
 0x26d   :  { %3592 = vpow2.f32 %v3300_v45 }
 0x26e   :  { %3594 = vrcp.f32 %v1427_v41 }
 0x26f   :  { %3596 = vpow2.f32 %v3298_v61 }
 0x270   :  { %v3583_v6 = vpop.eup %3582 }
 0x271   :  { %1694 = vrot.lane.b32.xlu0 %v3583_v6, %s4199_s20 }
 0x273   :  { %v3585_v43 = vpop.eup %3584 }
 0x274   :  { %v1432_v42 = vadd.f32 1.0, %v3585_v43  ;;  %v3425_v36 = vpop.f32.mrb[48].mxu1  ;;  %v3587_v19 = vpop.eup %3586 }
 0x275   :  { %v4856_v15 = vadd.f32 %v3425_v36, %v4780_v26  ;;  %v971_v52 = vpop.f32.mrb[49].mxu1  ;;  %v3589_v16 = vpop.eup %3588  ;;  %1690 = vrot.lane.b32.xlu0 %v3587_v19, %s4199_s20 }
 0x276   :  { %3598 = vrcp.f32 %v1432_v42  ;;  %v4859_v33 = vadd.f32 %v4780_v26, %v971_v52  ;;  %v3426_v45 = vpop.f32.mrb[50].mxu1  ;;  %v3591_v60 = vpop.eup %3590  ;;  %v1430_v41 = vadd.f32 1.0, %v3589_v16 }
 0x277   :  { %v3303_v6 = vmul.f32 -1.442695, %v4856_v15  ;;  %v4864_v61 = vadd.f32 %v3426_v45, %v4780_v26  ;;  %v974_v43 = vpop.f32.mrb[51].mxu1  ;;  %1696 = vrot.lane.b32.xlu1 %v3591_v60, %s4199_s20  ;;  %v3593_v52 = vpop.eup %3592 }
 0x278   :  { %v3301_v36 = vmul.f32 -1.442695, %v4859_v33  ;;  %3600 = vrcp.f32 %v1430_v41  ;;  %v4869_v42 = vadd.f32 %v4780_v26, %v974_v43  ;;  %v3595_v23 = vpop.eup %3594  ;;  %v1433_v16 = vadd.f32 1.0, %v3593_v52 }
 0x279   :  { %3602 = vpow2.f32 %v3303_v6  ;;  %v3304_v19 = vmul.f32 -1.442695, %v4864_v61  ;;  %v3597_v22 = vpop.eup %3596 }
 0x27a   :  { %3604 = vpow2.f32 %v3301_v36  ;;  %v1431_v45 = vadd.f32 1.0, %v3597_v22  ;;  %v3302_v60 = vmul.f32 -1.442695, %v4869_v42 }
 0x27b   :  { %1692 = vrot.lane.b32.xlu1 %v3595_v23, %s4199_s20  ;;  %3606 = vrcp.f32 %v1433_v16 }
 0x27c   :  { %3608 = vpow2.f32 %v3304_v19 }
 0x27d   :  { %3610 = vrcp.f32 %v1431_v45 }
 0x27e   :  { %3612 = vpow2.f32 %v3302_v60 }
 0x280   :  { %v3599_v2 = vpop.eup %3598 }
 0x281   :  { %1702 = vrot.lane.b32.xlu0 %v3599_v2, %s4199_s20 }
 0x282   :  { %v3601_v41 = vpop.eup %3600 }
 0x283   :  { %v3603_v6 = vpop.eup %3602 }
 0x284   :  { %v3429_v43 = vpop.f32.mrb[52].mxu1  ;;  %v3605_v59 = vpop.eup %3604  ;;  %v1436_v47 = vadd.f32 1.0, %v3603_v6 }
 0x285   :  { %v4876_v36 = vadd.f32 %v3429_v43, %v4780_v26  ;;  %v987_v52 = vpop.f32.mrb[53].mxu1  ;;  %1698 = vrot.lane.b32.xlu0 %v3601_v41, %s4199_s20  ;;  %v1434_v22 = vadd.f32 1.0, %v3605_v59  ;;  %v3607_v16 = vpop.eup %3606 }
 0x286   :  { %v4880_v23 = vadd.f32 %v4780_v26, %v987_v52  ;;  %v3430_v19 = vpop.f32.mrb[54].mxu1  ;;  %3614 = vrcp.f32 %v1436_v47  ;;  %v3609_v60 = vpop.eup %3608  ;;  %1704 = vrot.lane.b32.xlu1 %v3607_v16, %s4199_s20 }
 0x287   :  { %v3307_v2 = vmul.f32 -1.442695, %v4876_v36  ;;  %v990_v45 = vpop.f32.mrb[55].mxu1  ;;  %v4885_v6 = vadd.f32 %v3430_v19, %v4780_v26  ;;  %3616 = vrcp.f32 %v1434_v22  ;;  %v1437_v43 = vadd.f32 1.0, %v3609_v60  ;;  %v3611_v59 = vpop.eup %3610 }
 0x288   :  { %v3305_v41 = vmul.f32 -1.442695, %v4880_v23  ;;  %v4889_v52 = vadd.f32 %v4780_v26, %v990_v45  ;;  %v3613_v13 = vpop.eup %3612 }
 0x289   :  { %3618 = vpow2.f32 %v3307_v2  ;;  %v1435_v47 = vadd.f32 1.0, %v3613_v13  ;;  %v3308_v39 = vmul.f32 -1.442695, %v4885_v6 }
 0x28a   :  { %3620 = vrcp.f32 %v1437_v43  ;;  %1700 = vrot.lane.b32.xlu1 %v3611_v59, %s4199_s20  ;;  %v3306_v19 = vmul.f32 -1.442695, %v4889_v52 }
 0x28b   :  { %3622 = vpow2.f32 %v3305_v41 }
 0x28c   :  { %3624 = vrcp.f32 %v1435_v47 }
 0x28d   :  { %3626 = vpow2.f32 %v3308_v39 }
 0x28e   :  { %3628 = vpow2.f32 %v3306_v19 }
 0x290   :  { %v3615_v22 = vpop.eup %3614 }
 0x291   :  { %1710 = vrot.lane.b32.xlu0 %v3615_v22, %s4199_s20  ;;  %v3617_v16 = vpop.eup %3616 }
 0x293   :  { %v3619_v2 = vpop.eup %3618 }
 0x294   :  { %v3433_v45 = vpop.f32.mrb[56].mxu1  ;;  %v3621_v60 = vpop.eup %3620  ;;  %v1440_v32 = vadd.f32 1.0, %v3619_v2 }
 0x295   :  { %v4896_v13 = vadd.f32 %v3433_v45, %v4780_v26  ;;  %v1003_v43 = vpop.f32.mrb[57].mxu1  ;;  %1712 = vrot.lane.b32.xlu1 %v3621_v60, %s4199_s20  ;;  %1706 = vrot.lane.b32.xlu0 %v3617_v16, %s4199_s20  ;;  %v3623_v59 = vpop.eup %3622 }
 0x296   :  { %v4900_v41 = vadd.f32 %v4780_v26, %v1003_v43  ;;  %v3434_v39 = vpop.f32.mrb[58].mxu1  ;;  %3630 = vrcp.f32 %v1440_v32  ;;  %v1438_v22 = vadd.f32 1.0, %v3623_v59  ;;  %v3625_v24 = vpop.eup %3624 }
 0x297   :  { %v3311_v47 = vmul.f32 -1.442695, %v4896_v13  ;;  %v1006_v19 = vpop.f32.mrb[59].mxu1  ;;  %v4906_v45 = vadd.f32 %v3434_v39, %v4780_v26  ;;  %v3627_v60 = vpop.eup %3626 }
 0x298   :  { %6618 = vst [vmem:[#allocation84_spill] sm:$0xff] %v4900_v41  ;;  %v3309_v2 = vmul.f32 -1.442695, %v4900_v41  ;;  %v4909_v43 = vadd.f32 %v4780_v26, %v1006_v19  ;;  %v1441_v16 = vadd.f32 1.0, %v3627_v60  ;;  %v3629_v32 = vpop.eup %3628 }
 0x299   :  { %3632 = vpow2.f32 %v3311_v47  ;;  %1708 = vrot.lane.b32.xlu1 %v3625_v24, %s4199_s20  ;;  %v3312_v7 = vmul.f32 -1.442695, %v4906_v45  ;;  %v1439_v59 = vadd.f32 1.0, %v3629_v32 }
 0x29a   :  { %6619 = vst [vmem:[#allocation85_spill] sm:$0xff] %v4909_v43  ;;  %3634 = vrcp.f32 %v1438_v22  ;;  %v3310_v50 = vmul.f32 -1.442695, %v4909_v43 }
 0x29b   :  { %3636 = vpow2.f32 %v3309_v2 }
 0x29c   :  { %3638 = vrcp.f32 %v1441_v16 }
 0x29d   :  { %3640 = vpow2.f32 %v3312_v7 }
 0x29e   :  { %3642 = vrcp.f32 %v1439_v59 }
 0x29f   :  { %3644 = vpow2.f32 %v3310_v50 }
 0x2a0   :  { %v3631_v39 = vpop.eup %3630 }
 0x2a1   :  { %1718 = vrot.lane.b32.xlu0 %v3631_v39, %s4199_s20 }
 0x2a3   :  { %v3633_v47 = vpop.eup %3632 }
 0x2a4   :  { %v1444_v19 = vadd.f32 1.0, %v3633_v47  ;;  %v3437_v8 = vpop.f32.mrb[60].mxu1  ;;  %v3635_v24 = vpop.eup %3634 }
 0x2a5   :  { %v4916_v22 = vadd.f32 %v3437_v8, %v4780_v26  ;;  %v1019_v2 = vpop.f32.mrb[61].mxu1  ;;  %v3637_v60 = vpop.eup %3636  ;;  %1714 = vrot.lane.b32.xlu0 %v3635_v24, %s4199_s20 }
 0x2a6   :  { %3646 = vrcp.f32 %v1444_v19  ;;  %v4919_v16 = vadd.f32 %v4780_v26, %v1019_v2  ;;  %v3438_v7 = vpop.f32.mrb[62].mxu1  ;;  %v3639_v32 = vpop.eup %3638  ;;  %v1442_v50 = vadd.f32 1.0, %v3637_v60 }
 0x2a7   :  { %6620 = vst [vmem:[#allocation86_spill] sm:$0xff] %v4916_v22  ;;  %v3315_v59 = vmul.f32 -1.442695, %v4916_v22  ;;  %v4924_v39 = vadd.f32 %v3438_v7, %v4780_v26  ;;  %v1022_v47 = vpop.f32.mrb[63].mxu1  ;;  %1720 = vrot.lane.b32.xlu1 %v3639_v32, %s4199_s20  ;;  %v3641_v2 = vpop.eup %3640 }
 0x2a8   :  { %6621 = vst [vmem:[#allocation87_spill] sm:$0xff] %v4919_v16  ;;  %v3313_v8 = vmul.f32 -1.442695, %v4919_v16  ;;  %3648 = vrcp.f32 %v1442_v50  ;;  %v4929_v19 = vadd.f32 %v4780_v26, %v1022_v47  ;;  %v3643_v10 = vpop.eup %3642  ;;  %v1445_v60 = vadd.f32 1.0, %v3641_v2 }
 0x2a9   :  { %6622 = vst [vmem:[#allocation88_spill] sm:$0xff] %v4924_v39  ;;  %3650 = vpow2.f32 %v3315_v59  ;;  %v3316_v24 = vmul.f32 -1.442695, %v4924_v39  ;;  %v3645_v57 = vpop.eup %3644 }
 0x2aa   :  { %6623 = vst [vmem:[#allocation89_spill] sm:$0xff] %v4929_v19  ;;  %3652 = vpow2.f32 %v3313_v8  ;;  %v1443_v7 = vadd.f32 1.0, %v3645_v57  ;;  %v3314_v32 = vmul.f32 -1.442695, %v4929_v19 }
 0x2ab   :  { %1716 = vrot.lane.b32.xlu1 %v3643_v10, %s4199_s20  ;;  %3654 = vrcp.f32 %v1445_v60 }
 0x2ac   :  { %3656 = vpow2.f32 %v3316_v24 }
 0x2ad   :  { %3658 = vrcp.f32 %v1443_v7 }
 0x2ae   :  { %3660 = vpow2.f32 %v3314_v32 }
 0x2b0   :  { %v3647_v20 = vpop.eup %3646 }
 0x2b1   :  { %1726 = vrot.lane.b32.xlu0 %v3647_v20, %s4199_s20 }
 0x2b2   :  { %v3649_v50 = vpop.eup %3648 }
 0x2b3   :  { %v3651_v59 = vpop.eup %3650 }
 0x2b4   :  { %v3441_v47 = vpop.f32.mrb[64].mxu1  ;;  %v3653_v11 = vpop.eup %3652  ;;  %v1448_v63 = vadd.f32 1.0, %v3651_v59 }
 0x2b5   :  { %1722 = vrot.lane.b32.xlu0 %v3649_v50, %s4199_s20  ;;  %v1035_v8 = vpop.f32.mrb[65].mxu1  ;;  %v1446_v2 = vadd.f32 1.0, %v3653_v11  ;;  %v3655_v60 = vpop.eup %3654  ;;  %v4971_v29 = vadd.f32 %v3441_v47, %v4780_v26 }
 0x2b6   :  { %v3442_v10 = vpop.f32.mrb[66].mxu1  ;;  %3662 = vrcp.f32 %v1448_v63  ;;  %v3657_v54 = vpop.eup %3656  ;;  %1728 = vrot.lane.b32.xlu1 %v3655_v60, %s4199_s20  ;;  %v4980_v3 = vadd.f32 %v4780_v26, %v1035_v8 }
 0x2b7   :  { %v1038_v57 = vpop.f32.mrb[67].mxu1  ;;  %v1449_v24 = vadd.f32 1.0, %v3657_v54  ;;  %v3659_v7 = vpop.eup %3658  ;;  %3664 = vrcp.f32 %v1446_v2  ;;  %6625 = vst [vmem:[#allocation91_spill] sm:$0xff] %v4971_v29 }
 0x2b8   :  { %v3661_v20 = vpop.eup %3660  ;;  %v4975_v18 = vadd.f32 %v4780_v26, %v1038_v57  ;;  %6627 = vst [vmem:[#allocation93_spill] sm:$0xff] %v4980_v3  ;;  %v3317_v8 = vmul.f32 -1.442695, %v4980_v3 }
 0x2b9   :  { %3666 = vrcp.f32 %v1449_v24  ;;  %v1447_v32 = vadd.f32 1.0, %v3661_v20 }
 0x2ba   :  { %1724 = vrot.lane.b32.xlu1 %v3659_v7, %s4199_s20  ;;  %6626 = vst [vmem:[#allocation92_spill] sm:$0xff] %v4975_v18  ;;  %v3318_v47 = vmul.f32 -1.442695, %v4975_v18 }
 0x2bb   :  { %3668 = vrcp.f32 %v1447_v32 }
 0x2bc   :  { %3670 = vtanh.f32 %v4783_v38 }
 0x2bd   :  { %3672 = vtanh.f32 %v4790_v48  ;;  %v4968_v48 = vld [vmem:[%s6387_s5] ss:$0 sm:$0xff] }
 0x2be   :  { %3674 = vtanh.f32 %v4787_v1 }
 0x2bf   :  { %3676 = vtanh.f32 %v4795_v30 }
 0x2c0   :  { %v3663_v59 = vpop.eup %3662 }
 0x2c1   :  { %1734 = vrot.lane.b32.xlu0 %v3663_v59, %s4199_s20  ;;  %v3665_v11 = vpop.eup %3664 }
 0x2c3   :  { %v3667_v63 = vpop.eup %3666  ;;  %v1679_v59 = vpop.permute.xlu1 %1678 }
 0x2c4   :  { %v4939_v50 = vpop.f32.mrb[68].mxu1  ;;  %1736 = vrot.lane.b32.xlu1 %v3667_v63, %s4199_s20  ;;  %v4963_v63 = vadd.f32 %v3442_v10, %v4780_v26 }
 0x2c5   :  { %v4941_v35 = vpop.f32.mrb[69].mxu1  ;;  %1730 = vrot.lane.b32.xlu0 %v3665_v11, %s4199_s20  ;;  %v3669_v60 = vpop.eup %3668 }
 0x2c6   :  { %v4945_v54 = vpop.f32.mrb[70].mxu1  ;;  %v3671_v11 = vpop.eup %3670  ;;  %6624 = vst [vmem:[#allocation90_spill] sm:$0xff] %v4963_v63  ;;  %v3320_v1 = vmul.f32 -1.442695, %v4963_v63  ;;  %v5055_v39 = vadd.f32 %v4780_v26, %v4941_v35 }
 0x2c7   :  { %v4947_v2 = vpop.f32.mrb[71].mxu1  ;;  %v1868_v38 = vmul.f32 %v3671_v11, %v1679_v59  ;;  %v3673_v21 = vpop.eup %3672  ;;  %v3319_v11 = vmul.f32 -1.442695, %v4971_v29  ;;  %v5045_v29 = vadd.f32 %v4939_v50, %v4780_v26 }
 0x2c8   :  { %1732 = vrot.lane.b32.xlu1 %v3669_v60, %s4199_s20  ;;  %v1681_v12 = vpop.permute.xlu1 %1680  ;;  %v3675_v9 = vpop.eup %3674  ;;  %3678 = vpow2.f32 %v3320_v1 }
 0x2c9   :  { %v1939_v10 = vmul.f32 %v4968_v48, %v1868_v38  ;;  %v3677_v0 = vpop.eup %3676  ;;  %v1869_v58 = vmul.f32 %v3675_v9, %v1681_v12  ;;  %3680 = vpow2.f32 %v3319_v11 }
 0x2ca   :  { %v1675_v60 = vpop.permute.xlu0 %1674  ;;  %3682 = vpow2.f32 %v3318_v47 }
 0x2cb   :  { %v1866_v30 = vmul.f32 %v3673_v21, %v1675_v60  ;;  %v2008_v57 = vsel %vm2001_vm0, %v1939_v10, 0.0  ;;  %v1940_v12 = vmul.f32 %v4968_v48, %v1869_v58  ;;  %3684 = vpow2.f32 %v3317_v8 }
 0x2cd   :  { %v1937_v21 = vmul.f32 %v4968_v48, %v1866_v30 }
 0x2ce   :  { %v1677_v59 = vpop.permute.xlu0 %1676 }
 0x2cf   :  { %v1867_v38 = vmul.f32 %v3677_v0, %v1677_v59  ;;  %v2002_v9 = vsel %vm2001_vm0, %v1937_v21, 0.0  ;;  %v2011_v0 = vsel %vm2001_vm0, %v1940_v12, 0.0 }
 0x2d1   :  { %v1938_v30 = vmul.f32 %v4968_v48, %v1867_v38 }
 0x2d2   :  { %v3679_v59 = vpop.eup %3678 }
 0x2d3   :  { %v2005_v11 = vsel %vm2001_vm0, %v1938_v30, 0.0  ;;  %v3681_v58 = vpop.eup %3680 }
 0x2d4   :  { %v4951_v24 = vpop.f32.mrb[72].mxu1  ;;  %v3683_v46 = vpop.eup %3682  ;;  %v1452_v38 = vadd.f32 1.0, %v3681_v58 }
 0x2d5   :  { %v4954_v7 = vpop.f32.mrb[73].mxu1  ;;  %v1451_v8 = vadd.f32 1.0, %v3683_v46  ;;  %v3685_v40 = vpop.eup %3684 }
 0x2d6   :  { %v4956_v20 = vpop.f32.mrb[74].mxu1 }
 0x2d7   :  { %v4958_v32 = vpop.f32.mrb[75].mxu1 }
 0x2e4   :  { %v4985_v60 = vpop.f32.mrb[76].mxu1  ;;  %2009 = vadd.xlane.f32.xlu0 %v2008_v57 }
 0x2e5   :  { %v4987_v55 = vpop.f32.mrb[77].mxu1 }
 0x2e6   :  { %v4989_v49 = vpop.f32.mrb[78].mxu1 }
 0x2e7   :  { %v4992_v1 = vpop.f32.mrb[79].mxu1 }
 0x2e8   :  { %2003 = vadd.xlane.f32.xlu0 %v2002_v9  ;;  %v1453_v9 = vadd.f32 1.0, %v3679_v59 }
 0x2ea   :  { %3686 = vrcp.f32 %v1453_v9 }
 0x2eb   :  { %3688 = vrcp.f32 %v1452_v38 }
 0x2ec   :  { %v4998_v10 = vpop.f32.mrb[80].mxu1  ;;  %2012 = vadd.xlane.f32.xlu0 %v2011_v0  ;;  %2006 = vadd.xlane.f32.xlu1 %v2005_v11  ;;  %v1450_v11 = vadd.f32 1.0, %v3685_v40  ;;  %3690 = vrcp.f32 %v1451_v8 }
 0x2ed   :  { %v5001_v57 = vpop.f32.mrb[81].mxu1 }
 0x2ee   :  { %v5003_v47 = vpop.f32.mrb[82].mxu1  ;;  %3692 = vrcp.f32 %v1450_v11 }
 0x2ef   :  { %v5005_v21 = vpop.f32.mrb[83].mxu1  ;;  %3694 = vtanh.f32 %v4806_v25 }
 0x2f0   :  { %3696 = vtanh.f32 %v4799_v62  ;;  %v5050_v62 = vadd.f32 %v4780_v26, %v4947_v2 }
 0x2f1   :  { %3698 = vtanh.f32 %v4810_v4 }
 0x2f2   :  { %3700 = vtanh.f32 %v4802_v14  ;;  %v3322_v50 = vmul.f32 -1.442695, %v5050_v62 }
 0x2f4   :  { %v5007_v12 = vpop.f32.mrb[84].mxu1  ;;  %v3687_v58 = vpop.eup %3686 }
 0x2f5   :  { %v5009_v37 = vpop.f32.mrb[85].mxu1  ;;  %v3689_v31 = vpop.eup %3688 }
 0x2f6   :  { %v5011_v30 = vpop.f32.mrb[86].mxu1  ;;  %v3691_v3 = vpop.eup %3690 }
 0x2f7   :  { %v5013_v0 = vpop.f32.mrb[87].mxu1 }
 0x2f8   :  { %v3693_v8 = vpop.eup %3692 }
 0x2fc   :  { %v5015_v28 = vpop.f32.mrb[88].mxu1 }
 0x2fd   :  { %v5017_v59 = vpop.f32.mrb[89].mxu1  ;;  %1744 = vrot.lane.b32.xlu1 %v3687_v58, %s4199_s20  ;;  %v1687_v58 = vpop.permute.xlu0 %1686 }
 0x2fe   :  { %v5019_v9 = vpop.f32.mrb[90].mxu1 }
 0x2ff   :  { %v5022_v46 = vpop.f32.mrb[91].mxu1 }
 0x301   :  { %1740 = vrot.lane.b32.xlu1 %v3691_v3, %s4199_s20  ;;  %v5041_v3 = vadd.f32 %v4945_v54, %v4780_v26  ;;  %v1683_v19 = vpop.permute.xlu0 %1682  ;;  %v3323_v54 = vmul.f32 -1.442695, %v5045_v29 }
 0x302   :  { %1742 = vrot.lane.b32.xlu0 %v3689_v31, %s4199_s20  ;;  %v1689_v31 = vpop.permute.xlu1 %1688 }
 0x303   :  { %6628 = vst [vmem:[#allocation94_spill] sm:$0xff] %v5041_v3  ;;  %v3324_v63 = vmul.f32 -1.442695, %v5041_v3 }
 0x304   :  { %v5026_v40 = vpop.f32.mrb[92].mxu1 }
 0x305   :  { %v5028_v38 = vpop.f32.mrb[93].mxu1  ;;  %3702 = vpow2.f32 %v3324_v63 }
 0x306   :  { %v5030_v11 = vpop.f32.mrb[94].mxu1  ;;  %1738 = vrot.lane.b32.xlu0 %v3693_v8, %s4199_s20  ;;  %v3695_v8 = vpop.eup %3694  ;;  %3704 = vpow2.f32 %v3323_v54 }
 0x307   :  { %v5033_v18 = vpop.f32.mrb[95].mxu1  ;;  %v3697_v25 = vpop.eup %3696  ;;  %v1873_v4 = vmul.f32 %v3695_v8, %v1689_v31  ;;  %3706 = vpow2.f32 %v3322_v50 }
 0x308   :  { %v1872_v14 = vmul.f32 %v3697_v25, %v1687_v58  ;;  %v1685_v16 = vpop.permute.xlu1 %1684  ;;  %v3699_v22 = vpop.eup %3698  ;;  %v3321_v58 = vmul.f32 -1.442695, %v5055_v39 }
 0x309   :  { %v3701_v3 = vpop.eup %3700  ;;  %v1871_v41 = vmul.f32 %v3699_v22, %v1685_v16  ;;  %v1944_v2 = vmul.f32 %v4968_v48, %v1873_v4 }
 0x30a   :  { %v1870_v43 = vmul.f32 %v3701_v3, %v1683_v19  ;;  %v1943_v31 = vmul.f32 %v4968_v48, %v1872_v14  ;;  %3708 = vpow2.f32 %v3321_v58 }
 0x30b   :  { %v2023_v8 = vsel %vm2001_vm0, %v1944_v2, 0.0  ;;  %v1942_v25 = vmul.f32 %v4968_v48, %v1871_v41 }
 0x30c   :  { %v2020_v35 = vsel %vm2001_vm0, %v1943_v31, 0.0  ;;  %v1941_v63 = vmul.f32 %v4968_v48, %v1870_v43 }
 0x30d   :  { %v2017_v22 = vsel %vm2001_vm0, %v1942_v25, 0.0  ;;  %v1697_v25 = vpop.permute.xlu1 %1696 }
 0x30e   :  { %v2014_v19 = vsel %vm2001_vm0, %v1941_v63, 0.0  ;;  %v1695_v63 = vpop.permute.xlu0 %1694 }
 0x30f   :  { %v3703_v16 = vpop.eup %3702 }
 0x310   :  { %v3705_v3 = vpop.eup %3704  ;;  %v1457_v4 = vadd.f32 1.0, %v3703_v16 }
 0x311   :  { %v3707_v14 = vpop.eup %3706  ;;  %v1456_v54 = vadd.f32 1.0, %v3705_v3  ;;  %v1693_v3 = vpop.permute.xlu1 %1692 }
 0x312   :  { %3710 = vrcp.f32 %v1457_v4  ;;  %v1455_v41 = vadd.f32 1.0, %v3707_v14 }
 0x313   :  { %3712 = vrcp.f32 %v1456_v54  ;;  %v5091_v54 = vadd.f32 %v4780_v26, %v4954_v7 }
 0x314   :  { %v3709_v50 = vpop.eup %3708  ;;  %3714 = vrcp.f32 %v1455_v41 }
 0x315   :  { %v1454_v2 = vadd.f32 1.0, %v3709_v50 }
 0x317   :  { %3716 = vrcp.f32 %v1454_v2 }
 0x318   :  { %3718 = vtanh.f32 %v4824_v27  ;;  %v5086_v27 = vadd.f32 %v4780_v26, %v4958_v32 }
 0x319   :  { %3720 = vtanh.f32 %v4816_v44 }
 0x31a   :  { %3722 = vtanh.f32 %v4828_v5 }
 0x31b   :  { %3724 = vtanh.f32 %v4820_v56 }
 0x31c   :  { %v3711_v43 = vpop.eup %3710 }
 0x31d   :  { %v3713_v31 = vpop.eup %3712 }
 0x31e   :  { %v3715_v58 = vpop.eup %3714 }
 0x325   :  { %2024 = vadd.xlane.f32.xlu0 %v2023_v8  ;;  %2021 = vadd.xlane.f32.xlu1 %v2020_v35  ;;  %v3717_v8 = vpop.eup %3716  ;;  %v5077_v35 = vadd.f32 %v4956_v20, %v4780_v26  ;;  %v1691_v20 = vpop.permute.xlu0 %1690 }
 0x326   :  { %v3719_v16 = vpop.eup %3718 }
 0x327   :  { %v3721_v5 = vpop.eup %3720  ;;  %v1877_v44 = vmul.f32 %v3719_v16, %v1697_v25 }
 0x328   :  { %v1876_v56 = vmul.f32 %v3721_v5, %v1695_v63  ;;  %v3723_v14 = vpop.eup %3722 }
 0x329   :  { %2018 = vadd.xlane.f32.xlu0 %v2017_v22  ;;  %2015 = vadd.xlane.f32.xlu1 %v2014_v19  ;;  %v5081_v22 = vadd.f32 %v4951_v24, %v4780_v26  ;;  %v3328_v19 = vmul.f32 -1.442695, %v5077_v35  ;;  %v3326_v24 = vmul.f32 -1.442695, %v5086_v27  ;;  %v3725_v41 = vpop.eup %3724  ;;  %v1875_v50 = vmul.f32 %v3723_v14, %v1693_v3 }
 0x32a   :  { %v1948_v32 = vmul.f32 %v4968_v48, %v1877_v44  ;;  %v1874_v2 = vmul.f32 %v3725_v41, %v1691_v20 }
 0x32b   :  { %v3327_v4 = vmul.f32 -1.442695, %v5081_v22  ;;  %3726 = vpow2.f32 %v3328_v19 }
 0x32c   :  { %v1945_v25 = vmul.f32 %v4968_v48, %v1874_v2  ;;  %v5113_v2 = vadd.f32 %v4989_v49, %v4780_v26 }
 0x32d   :  { %3728 = vpow2.f32 %v3327_v4 }
 0x32e   :  { %3730 = vpow2.f32 %v3326_v24  ;;  %v2026_v19 = vsel %vm2001_vm0, %v1945_v25, 0.0 }
 0x335   :  { %v3727_v16 = vpop.eup %3726 }
 0x336   :  { %v1461_v44 = vadd.f32 1.0, %v3727_v16 }
 0x337   :  { %v3729_v5 = vpop.eup %3728 }
 0x338   :  { %v1460_v3 = vadd.f32 1.0, %v3729_v5 }
 0x33a   :  { %1752 = vrot.lane.b32.xlu1 %v3711_v43, %s4199_s20  ;;  %v1947_v43 = vmul.f32 %v4968_v48, %v1876_v56  ;;  %v3731_v56 = vpop.eup %3730 }
 0x33b   :  { %v1459_v4 = vadd.f32 1.0, %v3731_v56 }
 0x33c   :  { %v2032_v7 = vsel %vm2001_vm0, %v1947_v43, 0.0  ;;  %v1705_v43 = vpop.permute.xlu1 %1704 }
 0x33e   :  { %1748 = vrot.lane.b32.xlu1 %v3715_v58, %s4199_s20  ;;  %v2035_v58 = vsel %vm2001_vm0, %v1948_v32, 0.0 }
 0x33f   :  { %1750 = vrot.lane.b32.xlu0 %v3713_v31, %s4199_s20  ;;  %v3325_v31 = vmul.f32 -1.442695, %v5091_v54 }
 0x340   :  { %v1701_v25 = vpop.permute.xlu1 %1700 }
 0x341   :  { %3732 = vpow2.f32 %v3325_v31  ;;  %v1703_v31 = vpop.permute.xlu0 %1702 }
 0x342   :  { %3734 = vrcp.f32 %v1461_v44 }
 0x343   :  { %1746 = vrot.lane.b32.xlu0 %v3717_v8, %s4199_s20  ;;  %v1946_v8 = vmul.f32 %v4968_v48, %v1875_v50  ;;  %3736 = vrcp.f32 %v1460_v3 }
 0x344   :  { %3738 = vrcp.f32 %v1459_v4 }
 0x345   :  { %v2029_v63 = vsel %vm2001_vm0, %v1946_v8, 0.0 }
 0x34b   :  { %v3733_v20 = vpop.eup %3732 }
 0x34c   :  { %v1458_v14 = vadd.f32 1.0, %v3733_v20  ;;  %v3735_v24 = vpop.eup %3734 }
 0x34d   :  { %v3737_v41 = vpop.eup %3736 }
 0x34e   :  { %3740 = vrcp.f32 %v1458_v14  ;;  %v3739_v50 = vpop.eup %3738 }
 0x34f   :  { %3742 = vtanh.f32 %v4846_v53 }
 0x350   :  { %3744 = vtanh.f32 %v4836_v51  ;;  %v5123_v51 = vld [vmem:[%s6386_s4] ss:$0 sm:$0xff] }
 0x351   :  { %3746 = vtanh.f32 %v4849_v17  ;;  %v5132_v16 = vadd.f32 %v5123_v51, %v4987_v55  ;;  %v5140_v20 = vadd.f32 %v5123_v51, %v4998_v10 }
 0x352   :  { %3748 = vtanh.f32 %v4840_v34  ;;  %v5127_v34 = vadd.f32 %v5123_v51, %v4992_v1 }
 0x353   :  { %v3329_v4 = vmul.f32 -1.442695, %v5132_v16 }
 0x358   :  { %v3741_v32 = vpop.eup %3740 }
 0x359   :  { %v3743_v8 = vpop.eup %3742 }
 0x35a   :  { %v3745_v49 = vpop.eup %3744  ;;  %v1881_v53 = vmul.f32 %v3743_v8, %v1705_v43 }
 0x35b   :  { %v1880_v17 = vmul.f32 %v3745_v49, %v1703_v31 }
 0x35c   :  { %v1952_v1 = vmul.f32 %v4968_v48, %v1881_v53 }
 0x35d   :  { %v1951_v3 = vmul.f32 %v4968_v48, %v1880_v17 }
 0x35e   :  { %v2047_v55 = vsel %vm2001_vm0, %v1952_v1, 0.0 }
 0x362   :  { %2036 = vadd.xlane.f32.xlu0 %v2035_v58  ;;  %2033 = vadd.xlane.f32.xlu1 %v2032_v7  ;;  %v5117_v58 = vadd.f32 %v4985_v60, %v4780_v26  ;;  %v3332_v7 = vmul.f32 -1.442695, %v5113_v2  ;;  %v1699_v26 = vpop.permute.xlu0 %1698  ;;  %v3747_v60 = vpop.eup %3746 }
 0x363   :  { %v3749_v5 = vpop.eup %3748  ;;  %v1879_v44 = vmul.f32 %v3747_v60, %v1701_v25 }
 0x364   :  { %3750 = vpow2.f32 %v3332_v7  ;;  %v1878_v56 = vmul.f32 %v3749_v5, %v1699_v26 }
 0x365   :  { %v1950_v14 = vmul.f32 %v4968_v48, %v1879_v44 }
 0x366   :  { %2030 = vadd.xlane.f32.xlu0 %v2029_v63  ;;  %2027 = vadd.xlane.f32.xlu1 %v2026_v19  ;;  %v3331_v63 = vmul.f32 -1.442695, %v5117_v58  ;;  %v3330_v19 = vmul.f32 -1.442695, %v5127_v34 }
 0x367   :  { %v2041_v10 = vsel %vm2001_vm0, %v1950_v14, 0.0  ;;  %v5164_v14 = vadd.f32 %v5123_v51, %v5003_v47  ;;  %v5176_v47 = vadd.f32 %v5123_v51, %v5011_v30 }
 0x368   :  { %3752 = vpow2.f32 %v3331_v63 }
 0x369   :  { %3754 = vpow2.f32 %v3330_v19 }
 0x36a   :  { %3756 = vpow2.f32 %v3329_v4 }
 0x36e   :  { %v3751_v43 = vpop.eup %3750 }
 0x36f   :  { %v1465_v49 = vadd.f32 1.0, %v3751_v43 }
 0x372   :  { %v3753_v7 = vpop.eup %3752 }
 0x373   :  { %v3755_v53 = vpop.eup %3754  ;;  %v1464_v17 = vadd.f32 1.0, %v3753_v7 }
 0x374   :  { %v1463_v25 = vadd.f32 1.0, %v3755_v53  ;;  %v3757_v63 = vpop.eup %3756  ;;  %v5186_v53 = vadd.f32 %v5123_v51, %v5013_v0 }
 0x377   :  { %1760 = vrot.lane.b32.xlu1 %v3735_v24, %s4199_s20  ;;  %v2044_v24 = vsel %vm2001_vm0, %v1951_v3, 0.0 }
 0x37b   :  { %1756 = vrot.lane.b32.xlu1 %v3739_v50, %s4199_s20  ;;  %v3335_v50 = vmul.f32 -1.442695, %v5140_v20 }
 0x37c   :  { %1758 = vrot.lane.b32.xlu0 %v3737_v41, %s4199_s20  ;;  %v1949_v41 = vmul.f32 %v4968_v48, %v1878_v56 }
 0x37d   :  { %3758 = vpow2.f32 %v3335_v50  ;;  %v5170_v50 = vadd.f32 %v5123_v51, %v5005_v21  ;;  %v5181_v21 = vadd.f32 %v5123_v51, %v5007_v12  ;;  %v5193_v12 = vadd.f32 %v5123_v51, %v5009_v37 }
 0x37e   :  { %v2038_v31 = vsel %vm2001_vm0, %v1949_v41, 0.0  ;;  %v3336_v41 = vmul.f32 -1.442695, %v5164_v14 }
 0x380   :  { %1754 = vrot.lane.b32.xlu0 %v3741_v32, %s4199_s20  ;;  %v5149_v32 = vadd.f32 %v5123_v51, %v5001_v57  ;;  %v1462_v57 = vadd.f32 1.0, %v3757_v63 }
 0x382   :  { %v3333_v8 = vmul.f32 -1.442695, %v5149_v32 }
 0x384   :  { %3760 = vpow2.f32 %v3333_v8 }
 0x385   :  { %3762 = vrcp.f32 %v1465_v49 }
 0x386   :  { %3764 = vrcp.f32 %v1464_v17 }
 0x387   :  { %3766 = vrcp.f32 %v1463_v25  ;;  %v3759_v26 = vpop.eup %3758 }
 0x388   :  { %3768 = vrcp.f32 %v1462_v57  ;;  %v1468_v60 = vadd.f32 1.0, %v3759_v26  ;;  %v3339_v57 = vmul.f32 -1.442695, %v5181_v21 }
 0x38a   :  { %3770 = vrcp.f32 %v1468_v60  ;;  %v3338_v60 = vmul.f32 -1.442695, %v5186_v53 }
 0x38e   :  { %v3761_v19 = vpop.eup %3760 }
 0x38f   :  { %v3763_v5 = vpop.eup %3762  ;;  %v1466_v44 = vadd.f32 1.0, %v3761_v19 }
 0x390   :  { %v3765_v1 = vpop.eup %3764 }
 0x391   :  { %v3767_v56 = vpop.eup %3766  ;;  %3772 = vrcp.f32 %v1466_v44 }
 0x392   :  { %v3769_v3 = vpop.eup %3768  ;;  %3774 = vtanh.f32 %v4856_v15 }
 0x393   :  { %3776 = vtanh.f32 %v4859_v33  ;;  %v3334_v33 = vmul.f32 -1.442695, %v5170_v50 }
 0x394   :  { %v3771_v4 = vpop.eup %3770  ;;  %3778 = vtanh.f32 %v4864_v61 }
 0x395   :  { %3780 = vtanh.f32 %v4869_v42  ;;  %v3340_v42 = vmul.f32 -1.442695, %v5176_v47 }
 0x396   :  { %3782 = vpow2.f32 %v3336_v41  ;;  %v5208_v41 = vadd.f32 %v5123_v51, %v5017_v59 }
 0x397   :  { %3784 = vpow2.f32 %v3334_v33 }
 0x398   :  { %3786 = vpow2.f32 %v3340_v42 }
 0x399   :  { %3788 = vpow2.f32 %v3339_v57 }
 0x39a   :  { %3790 = vpow2.f32 %v3338_v60 }
 0x39f   :  { %2048 = vadd.xlane.f32.xlu0 %v2047_v55  ;;  %2045 = vadd.xlane.f32.xlu1 %v2044_v24  ;;  %v3773_v55 = vpop.eup %3772  ;;  %v1711_v24 = vpop.permute.xlu0 %1710 }
 0x3a3   :  { %2042 = vadd.xlane.f32.xlu0 %v2041_v10  ;;  %2039 = vadd.xlane.f32.xlu1 %v2038_v31  ;;  %v3775_v10 = vpop.eup %3774  ;;  %v1707_v15 = vpop.permute.xlu0 %1706 }
 0x3a4   :  { %v1884_v43 = vmul.f32 %v3775_v10, %v1711_v24  ;;  %v1713_v31 = vpop.permute.xlu1 %1712  ;;  %v3777_v61 = vpop.eup %3776 }
 0x3a5   :  { %v1882_v8 = vmul.f32 %v3777_v61, %v1707_v15  ;;  %v3779_v49 = vpop.eup %3778  ;;  %v3341_v15 = vmul.f32 -1.442695, %v5208_v41 }
 0x3a6   :  { %v1955_v7 = vmul.f32 %v4968_v48, %v1884_v43  ;;  %v1885_v17 = vmul.f32 %v3779_v49, %v1713_v31  ;;  %v3781_v26 = vpop.eup %3780 }
 0x3a7   :  { %v1953_v63 = vmul.f32 %v4968_v48, %v1882_v8 }
 0x3a8   :  { %v1709_v30 = vpop.permute.xlu1 %1708  ;;  %v2056_v25 = vsel %vm2001_vm0, %v1955_v7, 0.0  ;;  %v1956_v0 = vmul.f32 %v4968_v48, %v1885_v17 }
 0x3a9   :  { %v1883_v19 = vmul.f32 %v3781_v26, %v1709_v30  ;;  %v2050_v44 = vsel %vm2001_vm0, %v1953_v63, 0.0  ;;  %v1719_v26 = vpop.permute.xlu0 %1718 }
 0x3b4   :  { %1768 = vrot.lane.b32.xlu1 %v3763_v5, %s4199_s20  ;;  %v3783_v5 = vpop.eup %3782 }
 0x3b5   :  { %v1469_v37 = vadd.f32 1.0, %v3783_v5  ;;  %v1715_v5 = vpop.permute.xlu0 %1714 }
 0x3b8   :  { %1764 = vrot.lane.b32.xlu1 %v3767_v56, %s4199_s20  ;;  %v5201_v56 = vadd.f32 %v5123_v51, %v5015_v28 }
 0x3b9   :  { %1766 = vrot.lane.b32.xlu0 %v3765_v1, %s4199_s20  ;;  %v3337_v1 = vmul.f32 -1.442695, %v5193_v12 }
 0x3ba   :  { %v3343_v24 = vmul.f32 -1.442695, %v5201_v56 }
 0x3bb   :  { %3792 = vpow2.f32 %v3337_v1  ;;  %v5218_v1 = vpop.permute.xlu0 %1726 }
 0x3bc   :  { %3794 = vrcp.f32 %v1469_v37 }
 0x3bd   :  { %1762 = vrot.lane.b32.xlu0 %v3769_v3, %s4199_s20  ;;  %v2059_v3 = vsel %vm2001_vm0, %v1956_v0, 0.0  ;;  %3796 = vpow2.f32 %v3343_v24 }
 0x3c1   :  { %1774 = vrot.lane.b32.xlu0 %v3771_v4, %s4199_s20  ;;  %v1954_v4 = vmul.f32 %v4968_v48, %v1883_v19 }
 0x3c3   :  { %v2053_v43 = vsel %vm2001_vm0, %v1954_v4, 0.0 }
 0x3c5   :  { %1770 = vrot.lane.b32.xlu0 %v3773_v55, %s4199_s20  ;;  %v3785_v55 = vpop.eup %3784 }
 0x3c6   :  { %v1467_v10 = vadd.f32 1.0, %v3785_v55  ;;  %v3787_v28 = vpop.eup %3786  ;;  %v5221_v55 = vpop.permute.xlu0 %1722 }
 0x3c7   :  { %v3789_v33 = vpop.eup %3788  ;;  %v1473_v31 = vadd.f32 1.0, %v3787_v28  ;;  %v5232_v28 = vadd.f32 %v5123_v51, %v5019_v9 }
 0x3c8   :  { %3798 = vrcp.f32 %v1467_v10  ;;  %v3791_v61 = vpop.eup %3790  ;;  %v1472_v8 = vadd.f32 1.0, %v3789_v33 }
 0x3c9   :  { %3800 = vpow2.f32 %v3341_v15  ;;  %v1471_v7 = vadd.f32 1.0, %v3791_v61  ;;  %v3793_v49 = vpop.eup %3792  ;;  %v3344_v33 = vmul.f32 -1.442695, %v5232_v28 }
 0x3ca   :  { %3802 = vrcp.f32 %v1473_v31  ;;  %v3795_v59 = vpop.eup %3794  ;;  %v1470_v42 = vadd.f32 1.0, %v3793_v49  ;;  %v5224_v24 = vpop.permute.xlu0 %1734  ;;  %v5240_v31 = vadd.f32 %v5123_v51, %v5022_v46 }
 0x3cb   :  { %3804 = vrcp.f32 %v1472_v8  ;;  %v3797_v17 = vpop.eup %3796 }
 0x3cc   :  { %3806 = vrcp.f32 %v1471_v7  ;;  %v3342_v9 = vmul.f32 -1.442695, %v5240_v31 }
 0x3cd   :  { %3808 = vrcp.f32 %v1470_v42 }
 0x3ce   :  { %v5234_v15 = vpop.permute.xlu0 %1730 }
 0x3d2   :  { %v3799_v30 = vpop.eup %3798 }
 0x3d3   :  { %v3801_v63 = vpop.eup %3800 }
 0x3d4   :  { %v3803_v57 = vpop.eup %3802  ;;  %v1474_v60 = vadd.f32 1.0, %v3801_v63 }
 0x3d5   :  { %v3805_v19 = vpop.eup %3804 }
 0x3d6   :  { %v3807_v0 = vpop.eup %3806 }
 0x3dc   :  { %2057 = vadd.xlane.f32.xlu1 %v2056_v25  ;;  %v1476_v25 = vadd.f32 1.0, %v3797_v17  ;;  %v5259_v17 = vadd.f32 %v5123_v51, %v5026_v40 }
 0x3de   :  { %3810 = vrcp.f32 %v1476_v25 }
 0x3df   :  { %3812 = vrcp.f32 %v1474_v60 }
 0x3e0   :  { %2051 = vadd.xlane.f32.xlu1 %v2050_v44  ;;  %v3809_v44 = vpop.eup %3808  ;;  %3814 = vtanh.f32 %v4876_v36  ;;  %v5242_v36 = vpop.xlane.xlu0 %2009 }
 0x3e1   :  { %3816 = vtanh.f32 %v4880_v23 }
 0x3e2   :  { %3818 = vtanh.f32 %v4885_v6  ;;  %v5250_v6 = vadd.f32 %v5123_v51, %v5030_v11  ;;  %v5264_v11 = vadd.f32 %v5123_v51, %v5033_v18 }
 0x3e3   :  { %3820 = vtanh.f32 %v4889_v52 }
 0x3e4   :  { %2060 = vadd.xlane.f32.xlu0 %v2059_v3  ;;  %v1721_v3 = vpop.permute.xlu1 %1720  ;;  %3822 = vpow2.f32 %v3344_v33 }
 0x3e5   :  { %3824 = vpow2.f32 %v3342_v9 }
 0x3e8   :  { %2054 = vadd.xlane.f32.xlu0 %v2053_v43  ;;  %v3811_v37 = vpop.eup %3810  ;;  %v1717_v10 = vpop.permute.xlu1 %1716 }
 0x3e9   :  { %v3813_v4 = vpop.eup %3812 }
 0x3ea   :  { %v3815_v61 = vpop.eup %3814 }
 0x3eb   :  { %v1888_v8 = vmul.f32 %v3815_v61, %v1719_v26  ;;  %v3817_v7 = vpop.eup %3816  ;;  %v3347_v26 = vmul.f32 -1.442695, %v5259_v17 }
 0x3ec   :  { %v5228_v43 = vpop.permute.xlu1 %1728  ;;  %v1886_v46 = vmul.f32 %v3817_v7, %v1715_v5  ;;  %v3819_v52 = vpop.eup %3818 }
 0x3ed   :  { %v1959_v42 = vmul.f32 %v4968_v48, %v1888_v8  ;;  %v1889_v25 = vmul.f32 %v3819_v52, %v1721_v3  ;;  %v3821_v40 = vpop.eup %3820 }
 0x3ee   :  { %v1887_v5 = vmul.f32 %v3821_v40, %v1717_v10 }
 0x3ef   :  { %v2068_v63 = vsel %vm2001_vm0, %v1959_v42, 0.0 }
 0x3f0   :  { %v5244_v23 = vpop.permute.xlu1 %1724  ;;  %v1958_v61 = vmul.f32 %v4968_v48, %v1887_v5 }
 0x3f1   :  { %1776 = vrot.lane.b32.xlu1 %v3795_v59, %s4199_s20  ;;  %v5254_v59 = vpop.xlane.xlu0 %2003 }
 0x3f2   :  { %6629 = vst [vmem:[#allocation95_spill] sm:$0xff] %v5254_v59 }
 0x3f4   :  { %v5252_v49 = vpop.permute.xlu1 %1736 }
 0x3f5   :  { %1772 = vrot.lane.b32.xlu1 %v3799_v30, %s4199_s20  ;;  %v3348_v30 = vmul.f32 -1.442695, %v5250_v6  ;;  %v5276_v18 = vpop.xlane.xlu0 %2012 }
 0x3f6   :  { %6630 = vst [vmem:[#allocation96_spill] sm:$0xff] %v5276_v18 }
 0x3f7   :  { %3826 = vpow2.f32 %v3348_v30 }
 0x3f8   :  { %v5269_v60 = vpop.permute.xlu1 %1732  ;;  %3828 = vpow2.f32 %v3347_v26 }
 0x3f9   :  { %1784 = vrot.lane.b32.xlu1 %v3803_v57, %s4199_s20  ;;  %v1957_v57 = vmul.f32 %v4968_v48, %v1886_v46  ;;  %v5285_v9 = vpop.permute.xlu0 %1742  ;;  %v2065_v46 = vsel %vm2001_vm0, %v1958_v61, 0.0 }
 0x3fb   :  { %v2062_v3 = vsel %vm2001_vm0, %v1957_v57, 0.0 }
 0x3fd   :  { %1780 = vrot.lane.b32.xlu1 %v3807_v0, %s4199_s20  ;;  %v3346_v0 = vmul.f32 -1.442695, %v5264_v11  ;;  %v5290_v52 = vpop.permute.xlu0 %1738 }
 0x3fe   :  { %1782 = vrot.lane.b32.xlu0 %v3805_v19, %s4199_s20  ;;  %v5273_v19 = vadd.f32 %v5123_v51, %v5028_v38 }
 0x3ff   :  { %3830 = vpow2.f32 %v3346_v0 }
 0x400   :  { %v3345_v33 = vmul.f32 -1.442695, %v5273_v19 }
 0x401   :  { %v5294_v40 = vpop.xlane.xlu0 %2024 }
 0x402   :  { %1778 = vrot.lane.b32.xlu0 %v3809_v44, %s4199_s20  ;;  %v1960_v44 = vmul.f32 %v4968_v48, %v1889_v25  ;;  %3832 = vpow2.f32 %v3345_v33 }
 0x404   :  { %v2071_v51 = vsel %vm2001_vm0, %v1960_v44, 0.0 }
 0x405   :  { %v5299_v33 = vpop.xlane.xlu0 %2018 }
 0x406   :  { %1790 = vrot.lane.b32.xlu0 %v3811_v37, %s4199_s20  ;;  %v3823_v37 = vpop.eup %3822  ;;  %6632 = vst [vmem:[#allocation98_spill] sm:$0xff] %v5299_v33 }
 0x407   :  { %v1477_v38 = vadd.f32 1.0, %v3823_v37  ;;  %v3825_v8 = vpop.eup %3824 }
 0x408   :  { %v1475_v10 = vadd.f32 1.0, %v3825_v8  ;;  %v3827_v42 = vpop.eup %3826 }
 0x409   :  { %3834 = vrcp.f32 %v1477_v38  ;;  %v3829_v30 = vpop.eup %3828  ;;  %v1481_v25 = vadd.f32 1.0, %v3827_v42  ;;  %v5304_v8 = vpop.permute.xlu0 %1750 }
 0x40a   :  { %1786 = vrot.lane.b32.xlu0 %v3813_v4, %s4199_s20  ;;  %v5280_v4 = vpop.xlane.xlu1 %2006  ;;  %3836 = vrcp.f32 %v1475_v10  ;;  %v1480_v26 = vadd.f32 1.0, %v3829_v30 }
 0x40b   :  { %6631 = vst [vmem:[#allocation97_spill] sm:$0xff] %v5280_v4  ;;  %3838 = vrcp.f32 %v1481_v25  ;;  %v6645_v4 = vld [vmem:[#allocation90_spill] sm:$0xff] }
 0x40c   :  { %3840 = vrcp.f32 %v1480_v26 }
 0x40d   :  { %v5311_v30 = vpop.permute.xlu0 %1746 }
 0x40e   :  { %v5287_v7 = vpop.permute.xlu1 %1744 }
 0x411   :  { %v5316_v26 = vpop.xlane.xlu0 %2036 }
 0x412   :  { %v5292_v57 = vpop.permute.xlu1 %1740  ;;  %6634 = vst [vmem:[#allocation100_spill] sm:$0xff] %v5316_v26 }
 0x416   :  { %v5296_v37 = vpop.xlane.xlu1 %2021 }
 0x421   :  { %2069 = vadd.xlane.f32.xlu1 %v2068_v63  ;;  %v3831_v63 = vpop.eup %3830 }
 0x422   :  { %v1479_v0 = vadd.f32 1.0, %v3831_v63  ;;  %v3833_v5 = vpop.eup %3832 }
 0x423   :  { %v3835_v44 = vpop.eup %3834 }
 0x424   :  { %3842 = vrcp.f32 %v1479_v0  ;;  %v3837_v38 = vpop.eup %3836 }
 0x425   :  { %2063 = vadd.xlane.f32.xlu1 %v2062_v3  ;;  %v1478_v3 = vadd.f32 1.0, %v3833_v5  ;;  %v3839_v61 = vpop.eup %3838  ;;  %v5320_v5 = vpop.xlane.xlu0 %2030 }
 0x426   :  { %v3841_v10 = vpop.eup %3840  ;;  %6636 = vst [vmem:[#allocation102_spill] sm:$0xff] %v5320_v5 }
 0x427   :  { %3844 = vrcp.f32 %v1478_v3 }
 0x428   :  { %3846 = vtanh.f32 %v4906_v45 }
 0x429   :  { %2072 = vadd.xlane.f32.xlu0 %v2071_v51  ;;  %v5302_v51 = vpop.xlane.xlu1 %2015  ;;  %3848 = vtanh.f32 %v4896_v13  ;;  %v5326_v3 = vpop.permute.xlu0 %1758 }
 0x42a   :  { %6633 = vst [vmem:[#allocation99_spill] sm:$0xff] %v5302_v51 }
 0x42d   :  { %2066 = vadd.xlane.f32.xlu0 %v2065_v46  ;;  %v5307_v42 = vpop.permute.xlu1 %1752  ;;  %v5334_v26 = vpop.permute.xlu0 %1754 }
 0x42e   :  { %v3843_v46 = vpop.eup %3842 }
 0x431   :  { %v3845_v25 = vpop.eup %3844  ;;  %v5314_v63 = vpop.permute.xlu1 %1748 }
 0x432   :  { %v3847_v5 = vpop.eup %3846 }
 0x433   :  { %v3849_v45 = vpop.eup %3848 }
 0x434   :  { %v1892_v13 = vmul.f32 %v3849_v45, %v5218_v1 }
 0x435   :  { %v5318_v0 = vpop.xlane.xlu1 %2033 }
 0x436   :  { %1792 = vrot.lane.b32.xlu1 %v3835_v44, %s4199_s20  ;;  %6635 = vst [vmem:[#allocation101_spill] sm:$0xff] %v5318_v0  ;;  %v6642_v0 = vld [vmem:[#allocation89_spill] sm:$0xff]  ;;  %v1963_v1 = vmul.f32 %v4968_v48, %v1892_v13 }
 0x439   :  { %v5323_v44 = vpop.xlane.xlu1 %2027 }
 0x43a   :  { %1788 = vrot.lane.b32.xlu1 %v3837_v38, %s4199_s20  ;;  %6637 = vst [vmem:[#allocation103_spill] sm:$0xff] %v5323_v44  ;;  %v6638_v38 = vld [vmem:[#allocation85_spill] sm:$0xff]  ;;  %v1893_v44 = vmul.f32 %v3847_v5, %v5228_v43 }
 0x43b   :  { %3850 = vtanh.f32 %v6638_v38  ;;  %v6643_v38 = vld [vmem:[#allocation87_spill] sm:$0xff] }
 0x43c   :  { %v1964_v18 = vmul.f32 %v4968_v48, %v1893_v44  ;;  %v6648_v44 = vld [vmem:[#allocation92_spill] sm:$0xff] }
 0x43e   :  { %1800 = vrot.lane.b32.xlu1 %v3839_v61, %s4199_s20  ;;  %v6639_v61 = vld [vmem:[#allocation84_spill] sm:$0xff] }
 0x43f   :  { %3852 = vtanh.f32 %v6639_v61  ;;  %v5342_v61 = vpop.xlane.xlu0 %2048 }
 0x440   :  { %6644 = vst [vmem:[#allocation85_spill] sm:$0xff] %v5342_v61 }
 0x442   :  { %1796 = vrot.lane.b32.xlu1 %v3843_v46, %s4199_s20  ;;  %v6640_v46 = vld [vmem:[#allocation88_spill] sm:$0xff] }
 0x443   :  { %1798 = vrot.lane.b32.xlu0 %v3841_v10, %s4199_s20  ;;  %v5330_v10 = vpop.permute.xlu1 %1760  ;;  %3854 = vtanh.f32 %v6640_v46  ;;  %v5353_v59 = vpop.xlane.xlu0 %2042 }
 0x444   :  { %6647 = vst [vmem:[#allocation84_spill] sm:$0xff] %v5353_v59  ;;  %v6650_v59 = vld [vmem:[#allocation94_spill] sm:$0xff] }
 0x445   :  { %v3851_v51 = vpop.eup %3850 }
 0x447   :  { %1794 = vrot.lane.b32.xlu0 %v3845_v25, %s4199_s20  ;;  %v6641_v25 = vld [vmem:[#allocation86_spill] sm:$0xff]  ;;  %v5339_v33 = vpop.permute.xlu1 %1756 }
 0x448   :  { %3856 = vtanh.f32 %v6641_v25  ;;  %v1891_v25 = vmul.f32 %v3851_v51, %v5244_v23  ;;  %v2083_v23 = vsel %vm2001_vm0, %v1964_v18, 0.0 }
 0x449   :  { %3858 = vtanh.f32 %v6642_v0  ;;  %v3853_v46 = vpop.eup %3852  ;;  %v6646_v0 = vld [vmem:[#allocation91_spill] sm:$0xff] }
 0x44a   :  { %3860 = vtanh.f32 %v6643_v38  ;;  %v1890_v43 = vmul.f32 %v3853_v46, %v5221_v55  ;;  %v1962_v51 = vmul.f32 %v4968_v48, %v1891_v25  ;;  %v6649_v46 = vld [vmem:[#allocation93_spill] sm:$0xff] }
 0x44b   :  { %3862 = vtanh.f32 %v6645_v4  ;;  %v5348_v5 = vpop.xlane.xlu1 %2045  ;;  %v2080_v4 = vsel %vm2001_vm0, %v1963_v1, 0.0 }
 0x44c   :  { %3864 = vtanh.f32 %v6646_v0  ;;  %v1961_v13 = vmul.f32 %v4968_v48, %v1890_v43  ;;  %v2077_v25 = vsel %vm2001_vm0, %v1962_v51, 0.0  ;;  %v5373_v43 = vld [vmem:[%s6387_s5] ss:$0 sm:$0xff]  ;;  %s4208_s5 = smov [#allocation13]  }
 0x44d   :  { %v3855_v45 = vpop.eup %3854  ;;  %3866 = vtanh.f32 %v6648_v44  ;;  %s3232_s13 = sshll.u32 %s4208_s5, 4  ;;  %s3233_s13 = int_to_ptr.vmem [resolvable:$true] %s3232_s13 }
 0x44e   :  { %v1897_v61 = vmul.f32 %v3855_v45, %v5252_v49  ;;  %3868 = vtanh.f32 %v6649_v46  ;;  %v2074_v1 = vsel %vm2001_vm0, %v1961_v13, 0.0  ;;  %s4124_s14 = scalar_lea.vmem %s3233_s13, 16  ;;  %s4128_s15 = scalar_lea.vmem %s3233_s13, 32 }
 0x44f   :  { %v5362_v49 = vpop.xlane.xlu1 %2039  ;;  %3870 = vtanh.f32 %v6650_v59  ;;  %p4125_p10 = scmp.ne.s32.totalorder %s3233_s13, %s4124_s14  ;;  %p4129_p11 = scmp.lt.s32.totalorder %s3233_s13, %s3233_s13 }
 0x450   :  { %v1968_v44 = vmul.f32 %v4968_v48, %v1897_v61  ;;  %3872 = vtanh.f32 %v5045_v29  ;;  %p4130_p12 = scmp.lt.s32.totalorder %s4128_s15, %s4124_s14 }
 0x451   :  { %3874 = vtanh.f32 %v5050_v62 }
 0x452   :  { %v3857_v38 = vpop.eup %3856  ;;  %3876 = vtanh.f32 %v5055_v39  ;;  %p4131_p13 = por %p4130_p12, %p4129_p11 }
 0x453   :  { %v1896_v55 = vmul.f32 %v3857_v38, %v5224_v24  ;;  %v3859_v0 = vpop.eup %3858  ;;  %3878 = vtanh.f32 %v5077_v35 }
 0x454   :  { %v3861_v45 = vpop.eup %3860  ;;  %v1895_v18 = vmul.f32 %v3859_v0, %v5269_v60  ;;  %v5377_v60 = vpop.permute.xlu0 %1766  ;;  %3880 = vtanh.f32 %v5081_v22  ;;  %p4132_p0 = pnand %p4131_p13, %p4125_p10 }
 0x455   :  { %v1894_v24 = vmul.f32 %v3861_v45, %v5234_v15  ;;  %v1967_v38 = vmul.f32 %v5373_v43, %v1896_v55  ;;  %v3863_v48 = vpop.eup %3862  ;;  %v2095_v15 = vsel %vm2001_vm0, %v1968_v44, 0.0  ;;  %3882 = vtanh.f32 %v5086_v27 }
 0x456   :  { %v3865_v61 = vpop.eup %3864  ;;  %v1901_v59 = vmul.f32 %v3863_v48, %v5287_v7  ;;  %3884 = vtanh.f32 %v5091_v54 }
 0x457   :  { %v1900_v51 = vmul.f32 %v3865_v61, %v5285_v9  ;;  %v2092_v55 = vsel %vm2001_vm0, %v1967_v38, 0.0  ;;  %v1965_v29 = vmul.f32 %v5373_v43, %v1894_v24  ;;  %v3867_v13 = vpop.eup %3866  ;;  %3886 = vtanh.f32 %v5113_v2 }
 0x458   :  { %v3869_v7 = vpop.eup %3868  ;;  %v1899_v46 = vmul.f32 %v3867_v13, %v5292_v57  ;;  %v5390_v0 = vpop.permute.xlu0 %1762  ;;  %v1972_v9 = vmul.f32 %v5373_v43, %v1901_v59  ;;  %3888 = vtanh.f32 %v5117_v58 }
 0x459   :  { %v1898_v45 = vmul.f32 %v3869_v7, %v5290_v52  ;;  %v1971_v39 = vmul.f32 %v5373_v43, %v1900_v51  ;;  %3890 = vtanh.f32 %v5127_v34 }
 0x45a   :  { %v1970_v35 = vmul.f32 %v5373_v43, %v1899_v46  ;;  %3892 = vtanh.f32 %v5132_v16 }
 0x45b   :  { %v2104_v38 = vsel %vm2001_vm0, %v1971_v39, 0.0  ;;  %v1969_v22 = vmul.f32 %v5373_v43, %v1898_v45  ;;  %3894 = vtanh.f32 %v5164_v14 }
 0x45c   :  { %v5409_v48 = vpop.permute.xlu0 %1774  ;;  %v2101_v27 = vsel %vm2001_vm0, %v1970_v35, 0.0  ;;  %3896 = vtanh.f32 %v5140_v20 }
 0x45d   :  { %v2098_v51 = vsel %vm2001_vm0, %v1969_v22, 0.0  ;;  %3898 = vtanh.f32 %v5170_v50 }
 0x45e   :  { %3900 = vtanh.f32 %v5149_v32 }
 0x460   :  { %v5422_v13 = vpop.permute.xlu0 %1770 }
 0x466   :  { %2084 = vadd.xlane.f32.xlu0 %v2083_v23  ;;  %2081 = vadd.xlane.f32.xlu1 %v2080_v4  ;;  %v1966_v23 = vmul.f32 %v5373_v43, %v1895_v18  ;;  %v5384_v4 = vpop.permute.xlu1 %1768  ;;  %v2086_v18 = vsel %vm2001_vm0, %v1965_v29, 0.0 }
 0x468   :  { %v2089_v62 = vsel %vm2001_vm0, %v1966_v23, 0.0 }
 0x46a   :  { %2078 = vadd.xlane.f32.xlu0 %v2077_v25  ;;  %2075 = vadd.xlane.f32.xlu1 %v2074_v1  ;;  %v3871_v25 = vpop.eup %3870  ;;  %v5399_v57 = vpop.permute.xlu1 %1764  ;;  %v2107_v1 = vsel %vm2001_vm0, %v1972_v9, 0.0  ;;  %3902 = vtanh.f32 %v5176_v47 }
 0x46b   :  { %v3873_v44 = vpop.eup %3872  ;;  %v1905_v24 = vmul.f32 %v3871_v25, %v5307_v42  ;;  %3904 = vtanh.f32 %v5181_v21 }
 0x46c   :  { %v1904_v52 = vmul.f32 %v3873_v44, %v5304_v8  ;;  %v3875_v61 = vpop.eup %3874  ;;  %3906 = vtanh.f32 %v5186_v53 }
 0x46d   :  { %v3877_v59 = vpop.eup %3876  ;;  %v1976_v8 = vmul.f32 %v5373_v43, %v1905_v24  ;;  %3908 = vtanh.f32 %v5193_v12 }
 0x46e   :  { %2096 = vadd.xlane.f32.xlu0 %v2095_v15  ;;  %2093 = vadd.xlane.f32.xlu1 %v2092_v55  ;;  %v5411_v42 = vpop.xlane.xlu1 %2057  ;;  %v1903_v15 = vmul.f32 %v3875_v61, %v5314_v63  ;;  %v1902_v23 = vmul.f32 %v3877_v59, %v5311_v30  ;;  %v1975_v54 = vmul.f32 %v5373_v43, %v1904_v52  ;;  %v3879_v55 = vpop.eup %3878  ;;  %3910 = vtanh.f32 %v5201_v56 }
 0x46f   :  { %v3881_v29 = vpop.eup %3880  ;;  %v1909_v63 = vmul.f32 %v3879_v55, %v5330_v10  ;;  %v2119_v7 = vsel %vm2001_vm0, %v1976_v8, 0.0  ;;  %3912 = vtanh.f32 %v5208_v41 }
 0x470   :  { %v1974_v2 = vmul.f32 %v5373_v43, %v1903_v15  ;;  %v1908_v30 = vmul.f32 %v3881_v29, %v5326_v3  ;;  %v1973_v58 = vmul.f32 %v5373_v43, %v1902_v23  ;;  %v3883_v10 = vpop.eup %3882  ;;  %3914 = vtanh.f32 %v5232_v28 }
 0x471   :  { %v3885_v9 = vpop.eup %3884  ;;  %v1907_v45 = vmul.f32 %v3883_v10, %v5339_v33  ;;  %v1980_v3 = vmul.f32 %v5373_v43, %v1909_v63  ;;  %3916 = vtanh.f32 %v5240_v31 }
 0x472   :  { %2090 = vadd.xlane.f32.xlu0 %v2089_v62  ;;  %2087 = vadd.xlane.f32.xlu1 %v2086_v18  ;;  %v5428_v46 = vpop.xlane.xlu1 %2051  ;;  %v2116_v62 = vsel %vm2001_vm0, %v1975_v54, 0.0  ;;  %v5434_v18 = vpop.xlane.xlu0 %2060  ;;  %v2113_v34 = vsel %vm2001_vm0, %v1974_v2, 0.0  ;;  %v1906_v39 = vmul.f32 %v3885_v9, %v5334_v26  ;;  %v2110_v25 = vsel %vm2001_vm0, %v1973_v58, 0.0 }
 0x473   :  { %v1979_v16 = vmul.f32 %v5373_v43, %v1908_v30  ;;  %v3887_v44 = vpop.eup %3886  ;;  %v2131_v35 = vsel %vm2001_vm0, %v1980_v3, 0.0  ;;  %v1978_v52 = vmul.f32 %v5373_v43, %v1907_v45  ;;  %3918 = vtanh.f32 %v5259_v17 }
 0x474   :  { %v3889_v24 = vpop.eup %3888  ;;  %3920 = vtanh.f32 %v5273_v19 }
 0x475   :  { %v1912_v14 = vmul.f32 %v3889_v24, %v5377_v60  ;;  %v2128_v26 = vsel %vm2001_vm0, %v1979_v16, 0.0  ;;  %v3891_v22 = vpop.eup %3890  ;;  %v2125_v59 = vsel %vm2001_vm0, %v1978_v52, 0.0  ;;  %3922 = vtanh.f32 %v5250_v6 }
 0x476   :  { %2108 = vadd.xlane.f32.xlu0 %v2107_v1  ;;  %2105 = vadd.xlane.f32.xlu1 %v2104_v38  ;;  %v1777_v33 = vpop.permute.xlu1 %1776  ;;  %v1913_v1 = vmul.f32 %v3887_v44, %v5384_v4  ;;  %v1977_v38 = vmul.f32 %v5373_v43, %v1906_v39  ;;  %v5451_v20 = vpop.xlane.xlu0 %2054  ;;  %v1911_v61 = vmul.f32 %v3891_v22, %v5399_v57 }
 0x477   :  { %v3893_v4 = vpop.eup %3892  ;;  %v1983_v32 = vmul.f32 %v5373_v43, %v1912_v14  ;;  %3924 = vtanh.f32 %v5264_v11 }
 0x478   :  { %v1984_v50 = vmul.f32 %v5373_v43, %v1913_v1  ;;  %v1910_v60 = vmul.f32 %v3893_v4, %v5390_v0  ;;  %v3895_v8 = vpop.eup %3894  ;;  %v1982_v55 = vmul.f32 %v5373_v43, %v1911_v61 }
 0x479   :  { %v3897_v23 = vpop.eup %3896  ;;  %v1917_v57 = vmul.f32 %v3895_v8, %v1777_v33  ;;  %v2140_v0 = vsel %vm2001_vm0, %v1983_v32, 0.0 }
 0x47a   :  { %2102 = vadd.xlane.f32.xlu0 %v2101_v27  ;;  %2099 = vadd.xlane.f32.xlu1 %v2098_v51  ;;  %v1773_v15 = vpop.permute.xlu1 %1772  ;;  %v2122_v27 = vsel %vm2001_vm0, %v1977_v38, 0.0  ;;  %v1783_v51 = vpop.permute.xlu0 %1782  ;;  %v2143_v54 = vsel %vm2001_vm0, %v1984_v50, 0.0  ;;  %v1916_v47 = vmul.f32 %v3897_v23, %v5409_v48  ;;  %v1981_v29 = vmul.f32 %v5373_v43, %v1910_v60 }
 0x47b   :  { %v3899_v21 = vpop.eup %3898  ;;  %v2137_v30 = vsel %vm2001_vm0, %v1982_v55, 0.0 }
 0x47c   :  { %v1915_v2 = vmul.f32 %v3899_v21, %v1773_v15  ;;  %v2134_v48 = vsel %vm2001_vm0, %v1981_v29, 0.0  ;;  %v1987_v58 = vmul.f32 %v5373_v43, %v1916_v47 }
 0x47e   :  { %2120 = vadd.xlane.f32.xlu0 %v2119_v7  ;;  %2117 = vadd.xlane.f32.xlu1 %v2116_v62  ;;  %v1785_v63 = vpop.permute.xlu1 %1784  ;;  %v3901_v7 = vpop.eup %3900  ;;  %v1988_v62 = vmul.f32 %v5373_v43, %v1917_v57  ;;  %v1986_v3 = vmul.f32 %v5373_v43, %v1915_v2 }
 0x47f   :  { %v1914_v53 = vmul.f32 %v3901_v7, %v5422_v13  ;;  %v1779_v10 = vpop.permute.xlu0 %1778  ;;  %v3903_v12 = vpop.eup %3902  ;;  %v2152_v13 = vsel %vm2001_vm0, %v1987_v58, 0.0 }
 0x480   :  { %v3905_v9 = vpop.eup %3904  ;;  %v1921_v45 = vmul.f32 %v3903_v12, %v1785_v63  ;;  %v2149_v1 = vsel %vm2001_vm0, %v1986_v3, 0.0 }
 0x481   :  { %v1920_v39 = vmul.f32 %v3905_v9, %v1783_v51  ;;  %v1985_v16 = vmul.f32 %v5373_v43, %v1914_v53  ;;  %v3907_v56 = vpop.eup %3906 }
 0x482   :  { %2114 = vadd.xlane.f32.xlu0 %v2113_v34  ;;  %2111 = vadd.xlane.f32.xlu1 %v2110_v25  ;;  %v2155_v34 = vsel %vm2001_vm0, %v1988_v62, 0.0  ;;  %v1781_v25 = vpop.permute.xlu1 %1780  ;;  %v3909_v44 = vpop.eup %3908 }
 0x483   :  { %v1919_v33 = vmul.f32 %v3907_v56, %v1781_v25  ;;  %v1791_v24 = vpop.permute.xlu0 %1790  ;;  %v1918_v52 = vmul.f32 %v3909_v44, %v1779_v10  ;;  %v2146_v14 = vsel %vm2001_vm0, %v1985_v16, 0.0  ;;  %v3911_v38 = vpop.eup %3910 }
 0x484   :  { %v1924_v4 = vmul.f32 %v3911_v38, %v1791_v24  ;;  %v3913_v60 = vpop.eup %3912 }
 0x485   :  { %v1990_v41 = vmul.f32 %v5373_v43, %v1919_v33 }
 0x486   :  { %2132 = vadd.xlane.f32.xlu0 %v2131_v35  ;;  %2129 = vadd.xlane.f32.xlu1 %v2128_v26  ;;  %v1992_v35 = vmul.f32 %v5373_v43, %v1921_v45  ;;  %v1991_v26 = vmul.f32 %v5373_v43, %v1920_v39  ;;  %v1995_v8 = vmul.f32 %v5373_v43, %v1924_v4 }
 0x487   :  { %v1787_v50 = vpop.permute.xlu0 %1786  ;;  %v2161_v15 = vsel %vm2001_vm0, %v1990_v41, 0.0 }
 0x488   :  { %v2167_v22 = vsel %vm2001_vm0, %v1992_v35, 0.0  ;;  %v2164_v61 = vsel %vm2001_vm0, %v1991_v26, 0.0  ;;  %v2176_v23 = vsel %vm2001_vm0, %v1995_v8, 0.0  ;;  %v4207_v35 = vmov 0.0  }
 0x489   :  { %88 = vst.msk [vmem:[#allocation3] sm:$0x1] %vm86_vm1, %v4207_v35  ;;  %89 = vst [vmem:[#allocation4] sm:$0x1] %v4207_v35 }
 0x48a   :  { %2126 = vadd.xlane.f32.xlu0 %v2125_v59  ;;  %2123 = vadd.xlane.f32.xlu1 %v2122_v27  ;;  %v1989_v59 = vmul.f32 %v5373_v43, %v1918_v52  ;;  %v1922_v27 = vmul.f32 %v3913_v60, %v1787_v50 }
 0x48c   :  { %v2158_v32 = vsel %vm2001_vm0, %v1989_v59, 0.0  ;;  %v1993_v57 = vmul.f32 %v5373_v43, %v1922_v27 }
 0x48e   :  { %2144 = vadd.xlane.f32.xlu0 %v2143_v54  ;;  %2141 = vadd.xlane.f32.xlu1 %v2140_v0  ;;  %v2170_v51 = vsel %vm2001_vm0, %v1993_v57, 0.0  ;;  %v3915_v0 = vpop.eup %3914 }
 0x48f   :  { %v3917_v31 = vpop.eup %3916 }
 0x490   :  { %v3919_v53 = vpop.eup %3918 }
 0x492   :  { %2138 = vadd.xlane.f32.xlu0 %v2137_v30  ;;  %2135 = vadd.xlane.f32.xlu1 %v2134_v48  ;;  %v3921_v48 = vpop.eup %3920 }
 0x493   :  { %v3923_v11 = vpop.eup %3922 }
 0x494   :  { %v3925_v10 = vpop.eup %3924 }
 0x496   :  { %2156 = vadd.xlane.f32.xlu0 %v2155_v34  ;;  %2153 = vadd.xlane.f32.xlu1 %v2152_v13 }
 0x49a   :  { %2150 = vadd.xlane.f32.xlu0 %v2149_v1  ;;  %2147 = vadd.xlane.f32.xlu1 %v2146_v14  ;;  %v4206_v1 = vmov -1e+30  }
 0x49b   :  { %87 = vst.msk [vmem:[#allocation2] sm:$0x1] %vm86_vm1, %v4206_v1 }
 0x49e   :  { %2168 = vadd.xlane.f32.xlu0 %v2167_v22  ;;  %2165 = vadd.xlane.f32.xlu1 %v2164_v61 }
 0x4a2   :  { %2162 = vadd.xlane.f32.xlu0 %v2161_v15  ;;  %2159 = vadd.xlane.f32.xlu1 %v2158_v32 }
 0x4a6   :  { %2177 = vadd.xlane.f32.xlu1 %v2176_v23 }
 0x4aa   :  { %2171 = vadd.xlane.f32.xlu1 %v2170_v51 }
 0x4ae   :  { %v5494_v54 = vpop.xlane.xlu1 %2069 }
 0x4b2   :  { %v5497_v55 = vpop.xlane.xlu1 %2063 }
 0x4b6   :  { %v5500_v47 = vpop.xlane.xlu0 %2072  ;;  %v1793_v29 = vpop.permute.xlu1 %1792 }
 0x4b7   :  { %v1925_v21 = vmul.f32 %v3915_v0, %v1793_v29 }
 0x4b9   :  { %v1996_v63 = vmul.f32 %v5373_v43, %v1925_v21 }
 0x4ba   :  { %v5505_v28 = vpop.xlane.xlu0 %2066  ;;  %v1789_v7 = vpop.permute.xlu1 %1788 }
 0x4bb   :  { %v1923_v2 = vmul.f32 %v3917_v31, %v1789_v7  ;;  %v2179_v17 = vsel %vm2001_vm0, %v1996_v63, 0.0  ;;  %v5565_v63 = vld [vmem:[#allocation5] ss:$0 sm:$0xff] }
 0x4bc   :  { %2180 = vadd.xlane.f32.xlu0 %v2179_v17  ;;  %v5569_v31 = vadd.f32 %v5565_v63, %v5296_v37  ;;  %v5573_v7 = vadd.f32 %v5565_v63, %v5294_v40  ;;  %v6653_v17 = vld [vmem:[#allocation95_spill] sm:$0xff] }
 0x4bd   :  { %v1994_v62 = vmul.f32 %v5373_v43, %v1923_v2  ;;  %v5577_v2 = vadd.f32 %v5565_v63, %v5242_v36  ;;  %v6656_v40 = vld [vmem:[#allocation99_spill] sm:$0xff]  ;;  %v6657_v36 = vld [vmem:[#allocation98_spill] sm:$0xff] }
 0x4be   :  { %v1799_v30 = vpop.permute.xlu0 %1798  ;;  %v1801_v19 = vpop.permute.xlu1 %1800  ;;  %6651 = vst [vmem:[#allocation88_spill] sm:$0xff] %v5569_v31  ;;  %6652 = vst [vmem:[#allocation86_spill] sm:$0xff] %v5573_v7 }
 0x4bf   :  { %v2173_v6 = vsel %vm2001_vm0, %v1994_v62, 0.0  ;;  %v1928_v12 = vmul.f32 %v3919_v53, %v1799_v30  ;;  %v1929_v34 = vmul.f32 %v3923_v11, %v1801_v19  ;;  %v5581_v30 = vadd.f32 %v5565_v63, %v6653_v17  ;;  %v6654_v62 = vld [vmem:[#allocation97_spill] sm:$0xff]  ;;  %v6655_v53 = vld [vmem:[#allocation96_spill] sm:$0xff] }
 0x4c0   :  { %2174 = vadd.xlane.f32.xlu0 %v2173_v6  ;;  %v5585_v19 = vadd.f32 %v5565_v63, %v6654_v62  ;;  %v5589_v37 = vadd.f32 %v5565_v63, %v6655_v53  ;;  %v5599_v11 = vadd.f32 %v5565_v63, %v6657_v36  ;;  %v5641_v36 = vadd.f32 %v5565_v63, %v5348_v5 }
 0x4c1   :  { %v1999_v16 = vmul.f32 %v5373_v43, %v1928_v12  ;;  %v2000_v44 = vmul.f32 %v5373_v43, %v1929_v34  ;;  %v6659_v12 = vld [vmem:[#allocation101_spill] sm:$0xff] }
 0x4c2   :  { %v1795_v58 = vpop.permute.xlu0 %1794  ;;  %v1797_v9 = vpop.permute.xlu1 %1796  ;;  %6658 = vst [vmem:[#allocation89_spill] sm:$0xff] %v5599_v11  ;;  %v2273_v62 = vsel %vm2266_vm2, %v5599_v11, -inf  ;;  %v5669_v11 = vadd.f32 %v5565_v63, %v5428_v46  ;;  %v5685_v46 = vadd.f32 %v5565_v63, %v5451_v20 }
 0x4c3   :  { %v1926_v45 = vmul.f32 %v3921_v48, %v1795_v58  ;;  %v1927_v3 = vmul.f32 %v3925_v10, %v1797_v9  ;;  %v2188_v33 = vsel %vm2001_vm0, %v1999_v16, 0.0  ;;  %v2191_v24 = vsel %vm2001_vm0, %v2000_v44, 0.0 }
 0x4c4   :  { %v5595_v48 = vadd.f32 %v5565_v63, %v6656_v40  ;;  %v2275_v58 = vsel %vm2266_vm2, %v5569_v31, -inf  ;;  %v2277_v10 = vsel %vm2266_vm2, %v5573_v7, -inf  ;;  %v5607_v9 = vadd.f32 %v5565_v63, %v6659_v12  ;;  %v6666_v12 = vld [vmem:[#allocation85_spill] sm:$0xff] }
 0x4c5   :  { %v1997_v39 = vmul.f32 %v5373_v43, %v1926_v45  ;;  %v1998_v25 = vmul.f32 %v5373_v43, %v1927_v3  ;;  %v6661_v45 = vld [vmem:[#allocation100_spill] sm:$0xff]  ;;  %v2267_v44 = vsel %vm2266_vm2, %v5581_v30, -inf  ;;  %v2295_v20 = vsel %vm2266_vm2, %v5669_v11, -inf }
 0x4c6   :  { %6660 = vst [vmem:[#allocation87_spill] sm:$0xff] %v5607_v9  ;;  %v5611_v34 = vadd.f32 %v5565_v63, %v6661_v45  ;;  %v2271_v17 = vsel %vm2266_vm2, %v5595_v48, -inf  ;;  %v2283_v53 = vsel %vm2266_vm2, %v5607_v9, -inf }
 0x4c7   :  { %v2182_v13 = vsel %vm2001_vm0, %v1997_v39, 0.0  ;;  %v2185_v56 = vsel %vm2001_vm0, %v1998_v25, 0.0  ;;  %v6663_v39 = vld [vmem:[#allocation103_spill] sm:$0xff] }
 0x4c8   :  { %2183 = vadd.xlane.f32.xlu1 %v2182_v13  ;;  %2186 = vadd.xlane.f32.xlu0 %v2185_v56  ;;  %6662 = vst [vmem:[#allocation90_spill] sm:$0xff] %v5611_v34  ;;  %v5617_v25 = vadd.f32 %v5565_v63, %v6663_v39  ;;  %v6665_v13 = vld [vmem:[#allocation102_spill] sm:$0xff]  ;;  %v2269_v56 = vsel %vm2266_vm2, %v5577_v2, -inf  ;;  %v2285_v40 = vsel %vm2266_vm2, %v5611_v34, -inf }
 0x4c9   :  { %v5621_v16 = vadd.f32 %v5565_v63, %v6665_v13  ;;  %v2276_v1 = vmax.f32 %v2269_v56, %v2275_v58  ;;  %v5645_v58 = vadd.f32 %v5565_v63, %v6666_v12  ;;  %v5655_v13 = vadd.f32 %v5565_v63, %v5362_v49  ;;  %v6667_v56 = vld [vmem:[#allocation84_spill] sm:$0xff] }
 0x4ca   :  { %6664 = vst [vmem:[#allocation91_spill] sm:$0xff] %v5617_v25  ;;  %v2279_v45 = vsel %vm2266_vm2, %v5617_v25, -inf  ;;  %v5659_v5 = vadd.f32 %v5565_v63, %v6667_v56  ;;  %v5663_v12 = vadd.f32 %v5565_v63, %v5411_v42  ;;  %v2291_v56 = vsel %vm2266_vm2, %v5641_v36, -inf }
 0x4cb   :  { %v2281_v39 = vsel %vm2266_vm2, %v5621_v16, -inf  ;;  %v2284_v25 = vmax.f32 %v2276_v1, %v2283_v53  ;;  %v2287_v42 = vsel %vm2266_vm2, %v5655_v13, -inf  ;;  %v5681_v1 = vadd.f32 %v5565_v63, %v5434_v18 }
 0x4cc   :  { %2189 = vadd.xlane.f32.xlu1 %v2188_v33  ;;  %2192 = vadd.xlane.f32.xlu0 %v2191_v24  ;;  %v2268_v33 = vsel %vm2266_vm2, %v5585_v19, -inf  ;;  %v2270_v24 = vsel %vm2266_vm2, %v5589_v37, -inf  ;;  %6668 = vst [vmem:[#allocation92_spill] sm:$0xff] %v5663_v12 }
 0x4cd   :  { %v2278_v35 = vmax.f32 %v2270_v24, %v2277_v10  ;;  %v2272_v24 = vmax.f32 %v2267_v44, %v2271_v17  ;;  %v2274_v9 = vmax.f32 %v2268_v33, %v2273_v62  ;;  %v2293_v44 = vsel %vm2266_vm2, %v5645_v58, -inf }
 0x4ce   :  { %v2289_v33 = vsel %vm2266_vm2, %v5659_v5, -inf  ;;  %v5695_v17 = vadd.f32 %v5565_v63, %v5497_v55  ;;  %v5699_v62 = vadd.f32 %v5565_v63, %v5500_v47  ;;  %v2292_v53 = vmax.f32 %v2284_v25, %v2291_v56 }
 0x4cf   :  { %v2286_v31 = vmax.f32 %v2278_v35, %v2285_v40  ;;  %v2280_v49 = vmax.f32 %v2272_v24, %v2279_v45  ;;  %v2282_v34 = vmax.f32 %v2274_v9, %v2281_v39  ;;  %v2299_v9 = vsel %vm2266_vm2, %v5663_v12, -inf }
 0x4d0   :  { %v5691_v35 = vadd.f32 %v5565_v63, %v5494_v54  ;;  %v5707_v40 = vadd.f32 %v5565_v63, %v5505_v28  ;;  %v2300_v55 = vmax.f32 %v2292_v53, %v2299_v9  ;;  %v2301_v47 = vsel %vm2266_vm2, %v5681_v1, -inf }
 0x4d1   :  { %v2294_v54 = vmax.f32 %v2286_v31, %v2293_v44  ;;  %v2288_v45 = vmax.f32 %v2280_v49, %v2287_v42  ;;  %v2290_v39 = vmax.f32 %v2282_v34, %v2289_v33  ;;  %v2297_v12 = vsel %vm2266_vm2, %v5685_v46, -inf }
 0x4d2   :  { %6669 = vst [vmem:[#allocation93_spill] sm:$0xff] %v5691_v35  ;;  %v2307_v28 = vsel %vm2266_vm2, %v5691_v35, -inf  ;;  %v2303_v31 = vsel %vm2266_vm2, %v5695_v17, -inf  ;;  %v2309_v34 = vsel %vm2266_vm2, %v5699_v62, -inf  ;;  %v2305_v49 = vsel %vm2266_vm2, %v5707_v40, -inf }
 0x4d3   :  { %v2296_v56 = vmax.f32 %v2288_v45, %v2295_v20  ;;  %v2302_v33 = vmax.f32 %v2294_v54, %v2301_v47  ;;  %v2298_v9 = vmax.f32 %v2290_v39, %v2297_v12  ;;  %v2308_v12 = vmax.f32 %v2300_v55, %v2307_v28 }
 0x4d5   :  { %v2310_v54 = vmax.f32 %v2302_v33, %v2309_v34  ;;  %v2306_v39 = vmax.f32 %v2298_v9, %v2305_v49 }
 0x4f3   :  { %v5521_v52 = vpop.xlane.xlu0 %2084  ;;  %v5523_v14 = vpop.xlane.xlu1 %2081 }
 0x4f4   :  { %v5717_v25 = vadd.f32 %v5565_v63, %v5521_v52  ;;  %v5729_v44 = vadd.f32 %v5565_v63, %v5523_v14 }
 0x4f6   :  { %6670 = vst [vmem:[#allocation94_spill] sm:$0xff] %v5717_v25 }
 0x4f7   :  { %v5525_v43 = vpop.xlane.xlu0 %2078  ;;  %v5527_v26 = vpop.xlane.xlu1 %2075 }
 0x4f8   :  { %v5733_v52 = vadd.f32 %v5565_v63, %v5527_v26  ;;  %v5737_v42 = vadd.f32 %v5565_v63, %v5525_v43  ;;  %v2317_v26 = vsel %vm2266_vm2, %v5717_v25, -inf }
 0x4fa   :  { %v2311_v35 = vsel %vm2266_vm2, %v5733_v52, -inf }
 0x4fb   :  { %v5529_v38 = vpop.xlane.xlu0 %2096  ;;  %v5531_v22 = vpop.xlane.xlu1 %2093 }
 0x4fc   :  { %v5741_v53 = vadd.f32 %v5565_v63, %v5531_v22  ;;  %v5745_v20 = vadd.f32 %v5565_v63, %v5529_v38  ;;  %v2304_v22 = vmax.f32 %v2296_v56, %v2303_v31  ;;  %v2315_v38 = vsel %vm2266_vm2, %v5729_v44, -inf }
 0x4fd   :  { %v2316_v33 = vmax.f32 %v2308_v12, %v2315_v38 }
 0x4fe   :  { %6671 = vst [vmem:[#allocation95_spill] sm:$0xff] %v5741_v53  ;;  %v2323_v55 = vsel %vm2266_vm2, %v5741_v53, -inf  ;;  %v2325_v56 = vsel %vm2266_vm2, %v5745_v20, -inf  ;;  %v2312_v9 = vmax.f32 %v2304_v22, %v2311_v35 }
 0x4ff   :  { %v5533_v41 = vpop.xlane.xlu0 %2090  ;;  %v5535_v4 = vpop.xlane.xlu1 %2087  ;;  %v2324_v12 = vmax.f32 %v2316_v33, %v2323_v55 }
 0x500   :  { %v5753_v45 = vadd.f32 %v5565_v63, %v5535_v4  ;;  %v5757_v43 = vadd.f32 %v5565_v63, %v5533_v41  ;;  %v2313_v4 = vsel %vm2266_vm2, %v5737_v42, -inf  ;;  %v2318_v41 = vmax.f32 %v2310_v54, %v2317_v26 }
 0x501   :  { %v2314_v26 = vmax.f32 %v2306_v39, %v2313_v4 }
 0x502   :  { %6672 = vst [vmem:[#allocation97_spill] sm:$0xff] %v5753_v45  ;;  %v2319_v31 = vsel %vm2266_vm2, %v5753_v45, -inf  ;;  %v2321_v34 = vsel %vm2266_vm2, %v5757_v43, -inf  ;;  %v2326_v53 = vmax.f32 %v2318_v41, %v2325_v56 }
 0x503   :  { %v5537_v61 = vpop.xlane.xlu1 %2105  ;;  %v5539_v59 = vpop.xlane.xlu0 %2108  ;;  %v2320_v35 = vmax.f32 %v2312_v9, %v2319_v31  ;;  %v2322_v22 = vmax.f32 %v2314_v26, %v2321_v34 }
 0x504   :  { %v5769_v25 = vadd.f32 %v5565_v63, %v5539_v59  ;;  %v5777_v28 = vadd.f32 %v5565_v63, %v5537_v61 }
 0x506   :  { %6673 = vst [vmem:[#allocation96_spill] sm:$0xff] %v5777_v28  ;;  %v2333_v45 = vsel %vm2266_vm2, %v5769_v25, -inf }
 0x507   :  { %v5541_v50 = vpop.xlane.xlu1 %2099  ;;  %v5543_v60 = vpop.xlane.xlu0 %2102  ;;  %v2334_v41 = vmax.f32 %v2326_v53, %v2333_v45 }
 0x508   :  { %v5785_v59 = vadd.f32 %v5565_v63, %v5541_v50  ;;  %v5789_v49 = vadd.f32 %v5565_v63, %v5543_v60 }
 0x50a   :  { %6674 = vst [vmem:[#allocation99_spill] sm:$0xff] %v5785_v59  ;;  %v2327_v38 = vsel %vm2266_vm2, %v5785_v59, -inf  ;;  %v2329_v4 = vsel %vm2266_vm2, %v5789_v49, -inf }
 0x50b   :  { %v5545_v15 = vpop.xlane.xlu1 %2117  ;;  %v5547_v27 = vpop.xlane.xlu0 %2120  ;;  %v2328_v45 = vmax.f32 %v2320_v35, %v2327_v38  ;;  %v2330_v33 = vmax.f32 %v2322_v22, %v2329_v4 }
 0x50c   :  { %v5793_v61 = vadd.f32 %v5565_v63, %v5547_v27  ;;  %v5799_v50 = vadd.f32 %v5565_v63, %v5545_v15  ;;  %v2331_v27 = vsel %vm2266_vm2, %v5777_v28, -inf }
 0x50e   :  { %6675 = vst [vmem:[#allocation98_spill] sm:$0xff] %v5793_v61  ;;  %6676 = vst [vmem:[#allocation101_spill] sm:$0xff] %v5799_v50  ;;  %v2341_v55 = vsel %vm2266_vm2, %v5793_v61, -inf }
 0x50f   :  { %v5549_v32 = vpop.xlane.xlu1 %2111  ;;  %v5551_v8 = vpop.xlane.xlu0 %2114  ;;  %v2342_v26 = vmax.f32 %v2334_v41, %v2341_v55 }
 0x510   :  { %v5803_v60 = vadd.f32 %v5565_v63, %v5551_v8  ;;  %v5813_v15 = vadd.f32 %v5565_v63, %v5549_v32  ;;  %v2339_v32 = vsel %vm2266_vm2, %v5799_v50, -inf }
 0x512   :  { %v2337_v34 = vsel %vm2266_vm2, %v5803_v60, -inf  ;;  %v2335_v50 = vsel %vm2266_vm2, %v5813_v15, -inf }
 0x513   :  { %v5553_v23 = vpop.xlane.xlu1 %2129  ;;  %v5555_v57 = vpop.xlane.xlu0 %2132  ;;  %v2338_v59 = vmax.f32 %v2330_v33, %v2337_v34  ;;  %v2336_v38 = vmax.f32 %v2328_v45, %v2335_v50 }
 0x514   :  { %v5817_v8 = vadd.f32 %v5565_v63, %v5555_v57  ;;  %v5823_v56 = vadd.f32 %v5565_v63, %v5553_v23  ;;  %v2332_v23 = vmax.f32 %v2324_v12, %v2331_v27 }
 0x516   :  { %v2349_v28 = vsel %vm2266_vm2, %v5817_v8, -inf  ;;  %v2340_v61 = vmax.f32 %v2332_v23, %v2339_v32 }
 0x517   :  { %v5557_v51 = vpop.xlane.xlu1 %2123  ;;  %v5559_v0 = vpop.xlane.xlu0 %2126  ;;  %v2350_v4 = vmax.f32 %v2342_v26, %v2349_v28 }
 0x518   :  { %v5827_v31 = vadd.f32 %v5565_v63, %v5559_v0  ;;  %v5835_v57 = vadd.f32 %v5565_v63, %v5557_v51 }
 0x51a   :  { %v2345_v12 = vsel %vm2266_vm2, %v5827_v31, -inf  ;;  %v2343_v35 = vsel %vm2266_vm2, %v5835_v57, -inf }
 0x51b   :  { %v5561_v29 = vpop.xlane.xlu1 %2141  ;;  %v5563_v21 = vpop.xlane.xlu0 %2144  ;;  %v2346_v23 = vmax.f32 %v2338_v59, %v2345_v12 }
 0x51c   :  { %v5839_v53 = vadd.f32 %v5565_v63, %v5563_v21  ;;  %v5847_v51 = vadd.f32 %v5565_v63, %v5561_v29  ;;  %v2347_v21 = vsel %vm2266_vm2, %v5823_v56, -inf }
 0x51d   :  { %v2348_v32 = vmax.f32 %v2340_v61, %v2347_v21 }
 0x51e   :  { %v2357_v22 = vsel %vm2266_vm2, %v5839_v53, -inf  ;;  %v2355_v34 = vsel %vm2266_vm2, %v5847_v51, -inf }
 0x51f   :  { %v5591_v6 = vpop.xlane.xlu1 %2135  ;;  %v5613_v3 = vpop.xlane.xlu0 %2138  ;;  %v2358_v50 = vmax.f32 %v2350_v4, %v2357_v22  ;;  %v2356_v59 = vmax.f32 %v2348_v32, %v2355_v34 }
 0x520   :  { %v5859_v27 = vadd.f32 %v5565_v63, %v5591_v6  ;;  %v5863_v29 = vadd.f32 %v5565_v63, %v5613_v3  ;;  %v2344_v3 = vmax.f32 %v2336_v38, %v2343_v35 }
 0x522   :  { %v2353_v61 = vsel %vm2266_vm2, %v5863_v29, -inf }
 0x523   :  { %v5647_v10 = vpop.xlane.xlu1 %2153  ;;  %v5665_v7 = vpop.xlane.xlu0 %2156  ;;  %v2354_v38 = vmax.f32 %v2346_v23, %v2353_v61 }
 0x524   :  { %v5867_v41 = vadd.f32 %v5565_v63, %v5647_v10  ;;  %v5881_v28 = vadd.f32 %v5565_v63, %v5665_v7 }
 0x526   :  { %6677 = vst [vmem:[#allocation100_spill] sm:$0xff] %v5867_v41  ;;  %v2363_v26 = vsel %vm2266_vm2, %v5867_v41, -inf  ;;  %v2365_v4 = vsel %vm2266_vm2, %v5881_v28, -inf }
 0x527   :  { %v5701_v18 = vpop.xlane.xlu1 %2147  ;;  %v5709_v24 = vpop.xlane.xlu0 %2150  ;;  %v2364_v32 = vmax.f32 %v2356_v59, %v2363_v26 }
 0x528   :  { %v5871_v55 = vadd.f32 %v5565_v63, %v5709_v24  ;;  %v5877_v6 = vadd.f32 %v5565_v63, %v5701_v18  ;;  %v2351_v24 = vsel %vm2266_vm2, %v5859_v27, -inf }
 0x529   :  { %v2352_v22 = vmax.f32 %v2344_v3, %v2351_v24 }
 0x52a   :  { %6678 = vst [vmem:[#allocation103_spill] sm:$0xff] %v5877_v6  ;;  %v2361_v7 = vsel %vm2266_vm2, %v5871_v55, -inf  ;;  %v2359_v12 = vsel %vm2266_vm2, %v5877_v6, -inf }
 0x52b   :  { %v5747_v14 = vpop.xlane.xlu1 %2165  ;;  %v5759_v47 = vpop.xlane.xlu0 %2168  ;;  %v2360_v41 = vmax.f32 %v2352_v22, %v2359_v12  ;;  %v2362_v3 = vmax.f32 %v2354_v38, %v2361_v7  ;;  %v2366_v7 = vmax.f32 %v2358_v50, %v2365_v4 }
 0x52c   :  { %v5899_v21 = vadd.f32 %v5565_v63, %v5747_v14 }
 0x52e   :  { %6681 = vst [vmem:[#allocation84_spill] sm:$0xff] %v5899_v21  ;;  %v2371_v23 = vsel %vm2266_vm2, %v5899_v21, -inf }
 0x52f   :  { %v2160_v54 = vpop.xlane.xlu1 %2159  ;;  %v2163_v39 = vpop.xlane.xlu0 %2162 }
 0x530   :  { %v5888_v33 = vadd.f32 %v5565_v63, %v2160_v54  ;;  %v5891_v18 = vadd.f32 %v5565_v63, %v2163_v39  ;;  %v5905_v54 = vadd.f32 %v5565_v63, %v5759_v47 }
 0x532   :  { %6679 = vst [vmem:[#allocation102_spill] sm:$0xff] %v5888_v33  ;;  %6680 = vst [vmem:[#allocation85_spill] sm:$0xff] %v5891_v18  ;;  %v2367_v34 = vsel %vm2266_vm2, %v5888_v33, -inf  ;;  %v2369_v47 = vsel %vm2266_vm2, %v5891_v18, -inf  ;;  %v2373_v61 = vsel %vm2266_vm2, %v5905_v54, -inf }
 0x533   :  { %v2178_v9 = vpop.xlane.xlu1 %2177  ;;  %6682 = vst [vmem:[#allocation104_spill] sm:$0xff] %v5905_v54  ;;  %v2368_v12 = vmax.f32 %v2360_v41, %v2367_v34  ;;  %v2370_v22 = vmax.f32 %v2362_v3, %v2369_v47  ;;  %v2374_v6 = vmax.f32 %v2366_v7, %v2373_v61 }
 0x534   :  { %v5916_v14 = vadd.f32 %v5565_v63, %v2178_v9 }
 0x536   :  { %6684 = vst [vmem:[#allocation106_spill] sm:$0xff] %v5916_v14  ;;  %v2379_v38 = vsel %vm2266_vm2, %v5916_v14, -inf }
 0x537   :  { %v2172_v10 = vpop.xlane.xlu1 %2171 }
 0x538   :  { %v5908_v39 = vadd.f32 %v5565_v63, %v2172_v10 }
 0x53a   :  { %6683 = vst [vmem:[#allocation105_spill] sm:$0xff] %v5908_v39  ;;  %v2375_v59 = vsel %vm2266_vm2, %v5908_v39, -inf }
 0x549   :  { %v2181_v0 = vpop.xlane.xlu0 %2180 }
 0x54a   :  { %v5923_v10 = vadd.f32 %v5565_v63, %v2181_v0 }
 0x54c   :  { %v2381_v21 = vsel %vm2266_vm2, %v5923_v10, -inf }
 0x54d   :  { %v2175_v45 = vpop.xlane.xlu0 %2174  ;;  %v2382_v34 = vmax.f32 %v2374_v6, %v2381_v21 }
 0x54e   :  { %v5911_v35 = vadd.f32 %v5565_v63, %v2175_v45 }
 0x550   :  { %v2377_v0 = vsel %vm2266_vm2, %v5911_v35, -inf }
 0x551   :  { %v2378_v18 = vmax.f32 %v2370_v22, %v2377_v0 }
 0x555   :  { %v2184_v45 = vpop.xlane.xlu1 %2183  ;;  %v2187_v24 = vpop.xlane.xlu0 %2186 }
 0x556   :  { %v5928_v9 = vadd.f32 %v5565_v63, %v2184_v45  ;;  %v5937_v26 = vadd.f32 %v5565_v63, %v2187_v24  ;;  %v2372_v45 = vmax.f32 %v2364_v32, %v2371_v23  ;;  %v2376_v24 = vmax.f32 %v2368_v12, %v2375_v59 }
 0x558   :  { %v2385_v33 = vsel %vm2266_vm2, %v5937_v26, -inf  ;;  %v2383_v39 = vsel %vm2266_vm2, %v5928_v9, -inf  ;;  %v2380_v4 = vmax.f32 %v2372_v45, %v2379_v38 }
 0x559   :  { %v2190_v54 = vpop.xlane.xlu1 %2189  ;;  %v2193_v50 = vpop.xlane.xlu0 %2192  ;;  %v2386_v47 = vmax.f32 %v2378_v18, %v2385_v33  ;;  %v2384_v3 = vmax.f32 %v2376_v24, %v2383_v39  ;;  %v2405_v33 = vlaneseq }
 0x55a   :  { %v5948_v41 = vadd.f32 %v5565_v63, %v2190_v54  ;;  %v5951_v32 = vadd.f32 %v5565_v63, %v2193_v50  ;;  %v2265_v50 = vld [vmem:[#allocation2] sm:$0x1] }
 0x55b   :  { %v2391_v0 = vmax.f32 %v2384_v3, %v2386_v47  ;;  %v5958_v39 = vshrl.u32 %v2405_v33, 7 }
 0x55c   :  { %v2387_v23 = vsel %vm2266_vm2, %v5948_v41, -inf  ;;  %v2389_v14 = vsel %vm2266_vm2, %v5951_v32, -inf }
 0x55d   :  { %v2388_v61 = vmax.f32 %v2380_v4, %v2387_v23  ;;  %v2390_v59 = vmax.f32 %v2382_v34, %v2389_v14  ;;  %v2407_v14 = vsub.s32 0, %v5958_v39 }
 0x55f   :  { %v2392_v7 = vmax.f32 %v2388_v61, %v2390_v59 }
 0x561   :  { %v2393_v12 = vmax.f32 %v2391_v0, %v2392_v7 }
 0x563   :  { %v2394_v54 = vrot.slane %v2393_v12, 4 }
 0x565   :  { %v2395_v22 = vmax.f32 %v2393_v12, %v2394_v54 }
 0x567   :  { %v2396_v38 = vrot.slane %v2395_v22, 2 }
 0x569   :  { %v2397_v45 = vmax.f32 %v2395_v22, %v2396_v38 }
 0x56b   :  { %v2398_v63 = vrot.slane %v2397_v45, 1 }
 0x56d   :  { %v2399_v6 = vmax.f32 %v2397_v45, %v2398_v63 }
 0x56f   :  { %v2400_v18 = vmax.f32 %v2265_v50, %v2399_v6  ;;  %v6685_v6 = vld [vmem:[#allocation90_spill] sm:$0xff] }
 0x571   :  { %v2401_v21 = vsub.f32 %v2265_v50, %v2400_v18  ;;  %3206 = vst.msk [vmem:[#allocation2] sm:$0x1] %vm86_vm1, %v2400_v18  ;;  %v5964_v34 = vrot.slane %v2400_v18, %v2407_v14 }
 0x573   :  { %v2402_v24 = vmul.f32 1.442695, %v2401_v21  ;;  %v2410_v3 = vsub.f32 %v5581_v30, %v5964_v34  ;;  %v2411_v23 = vsub.f32 %v5585_v19, %v5964_v34  ;;  %v2467_v61 = vsub.f32 %v5911_v35, %v5964_v34  ;;  %v6686_v21 = vld [vmem:[#allocation89_spill] sm:$0xff] }
 0x574   :  { %v2412_v59 = vsub.f32 %v5577_v2, %v5964_v34  ;;  %v2469_v0 = vsub.f32 %v5923_v10, %v5964_v34  ;;  %v2470_v7 = vsub.f32 %v5928_v9, %v5964_v34  ;;  %v2471_v30 = vsub.f32 %v5937_v26, %v5964_v34 }
 0x575   :  { %3926 = vpow2.f32 %v2402_v24  ;;  %v2472_v19 = vsub.f32 %v5948_v41, %v5964_v34  ;;  %v2473_v12 = vsub.f32 %v5951_v32, %v5964_v34  ;;  %v2474_v54 = vmul.f32 1.442695, %v2410_v3 }
 0x576   :  { %v2476_v22 = vmul.f32 1.442695, %v2411_v23  ;;  %v2413_v2 = vsub.f32 %v5589_v37, %v5964_v34  ;;  %v2419_v38 = vsub.f32 %v5621_v16, %v5964_v34  ;;  %v2478_v45 = vmul.f32 1.442695, %v2412_v59  ;;  %v6687_v37 = vld [vmem:[#allocation88_spill] sm:$0xff] }
 0x577   :  { %3928 = vpow2.f32 %v2474_v54  ;;  %v2414_v63 = vsub.f32 %v5595_v48, %v5964_v34  ;;  %v2421_v33 = vsub.f32 %v6685_v6, %v5964_v34  ;;  %v2415_v24 = vsub.f32 %v6686_v21, %v5964_v34  ;;  %v6688_v54 = vld [vmem:[#allocation86_spill] sm:$0xff] }
 0x578   :  { %v3210_v4 = vld [vmem:[#allocation2] sm:$0x1]  ;;  %3930 = vpow2.f32 %v2476_v22  ;;  %v2480_v50 = vmul.f32 1.442695, %v2413_v2  ;;  %v2492_v18 = vmul.f32 1.442695, %v2419_v38  ;;  %v2423_v16 = vsub.f32 %v5659_v5, %v5964_v34 }
 0x579   :  { %3211 = vst.msk [vmem:[#allocation12] sm:$0x1] %vm86_vm1, %v3210_v4  ;;  %3932 = vpow2.f32 %v2478_v45  ;;  %v2416_v4 = vsub.f32 %v6687_v37, %v5964_v34  ;;  %v2482_v3 = vmul.f32 1.442695, %v2414_v63  ;;  %v2496_v23 = vmul.f32 1.442695, %v2421_v33 }
 0x57a   :  { %3934 = vpow2.f32 %v2480_v50  ;;  %v2417_v22 = vsub.f32 %v6688_v54, %v5964_v34  ;;  %v2484_v2 = vmul.f32 1.442695, %v2415_v24  ;;  %v6689_v38 = vld [vmem:[#allocation91_spill] sm:$0xff]  ;;  %v2425_v63 = vsub.f32 %v5645_v58, %v5964_v34 }
 0x57b   :  { %3936 = vpow2.f32 %v2492_v18  ;;  %v2418_v45 = vsub.f32 %v6689_v38, %v5964_v34  ;;  %v2486_v6 = vmul.f32 1.442695, %v2416_v4  ;;  %v2500_v5 = vmul.f32 1.442695, %v2423_v16  ;;  %v6690_v18 = vld [vmem:[#allocation87_spill] sm:$0xff] }
 0x57c   :  { %3938 = vpow2.f32 %v2482_v3  ;;  %v2488_v33 = vmul.f32 1.442695, %v2417_v22  ;;  %v2420_v21 = vsub.f32 %v6690_v18, %v5964_v34  ;;  %v2427_v37 = vsub.f32 %v5685_v46, %v5964_v34 }
 0x57d   :  { %3940 = vpow2.f32 %v2496_v23  ;;  %v2490_v24 = vmul.f32 1.442695, %v2418_v45  ;;  %v2504_v4 = vmul.f32 1.442695, %v2425_v63  ;;  %v2422_v16 = vsub.f32 %v5655_v13, %v5964_v34 }
 0x57e   :  { %3942 = vpow2.f32 %v2484_v2  ;;  %v2494_v23 = vmul.f32 1.442695, %v2420_v21  ;;  %v2429_v46 = vsub.f32 %v5681_v1, %v5964_v34  ;;  %v2508_v2 = vmul.f32 1.442695, %v2427_v37 }
 0x57f   :  { %v5966_v47 = vpop.eup %3926  ;;  %3944 = vpow2.f32 %v2486_v6  ;;  %v2424_v13 = vsub.f32 %v5641_v36, %v5964_v34  ;;  %v2426_v36 = vsub.f32 %v5669_v11, %v5964_v34  ;;  %v6691_v11 = vld [vmem:[#allocation92_spill] sm:$0xff]  ;;  %v2592_v35 = vmul.f32 1.442695, %v2469_v0 }
 0x580   :  { %2743 = vperm.xlu1 %3516, %v5966_v47   ;;  %3946 = vpow2.f32 %v2500_v5  ;;  %v2512_v18 = vmul.f32 1.442695, %v2429_v46  ;;  %v2596_v10 = vmul.f32 1.442695, %v2471_v30  ;;  %v2600_v26 = vmul.f32 1.442695, %v2473_v12 }
 0x581   :  { %v3929_v48 = vpop.eup %3928  ;;  %3948 = vpow2.f32 %v2488_v33  ;;  %v2431_v33 = vsub.f32 %v5707_v40, %v5964_v34  ;;  %v2433_v40 = vsub.f32 %v5699_v62, %v5964_v34  ;;  %v2435_v62 = vsub.f32 %v5737_v42, %v5964_v34  ;;  %v6692_v42 = vld [vmem:[#allocation94_spill] sm:$0xff] }
 0x582   :  { %v3931_v59 = vpop.eup %3930  ;;  %2753 = vperm.xlu0 %3517, %v3929_v48   ;;  %v2604_v58 = vsel %vm2266_vm2, %v3929_v48, 0.0  ;;  %3950 = vpow2.f32 %v2490_v24 }
 0x583   :  { %v3933_v50 = vpop.eup %3932  ;;  %v2605_v22 = vsel %vm2266_vm2, %v3931_v59, 0.0  ;;  %3952 = vpow2.f32 %v2504_v4 }
 0x584   :  { %2758 = vperm.xlu1 %3516, %v3931_v59   ;;  %v3935_v3 = vpop.eup %3934  ;;  %v2606_v38 = vadd.f32 %v2605_v22, %v2604_v58  ;;  %v2607_v6 = vsel %vm2266_vm2, %v3933_v50, 0.0  ;;  %3954 = vpow2.f32 %v2494_v23  ;;  %v2498_v59 = vmul.f32 1.442695, %v2422_v16 }
 0x585   :  { %v6011_v54 = vpop.eup %3936  ;;  %v2609_v5 = vsel %vm2266_vm2, %v3935_v3, 0.0  ;;  %3956 = vpow2.f32 %v2508_v2  ;;  %v2516_v23 = vmul.f32 1.442695, %v2431_v33 }
 0x586   :  { %2798 = vperm.xlu0 %3517, %v6011_v54   ;;  %v3939_v45 = vpop.eup %3938  ;;  %v2608_v63 = vadd.f32 %v2607_v6, %v2606_v38  ;;  %3958 = vpow2.f32 %v2498_v59  ;;  %v2428_v6 = vsub.f32 %v6691_v11, %v5964_v34  ;;  %v2520_v59 = vmul.f32 1.442695, %v2433_v40 }
 0x587   :  { %v6021_v48 = vpop.eup %3940  ;;  %v2611_v24 = vsel %vm2266_vm2, %v3939_v45, 0.0  ;;  %3960 = vpow2.f32 %v2512_v18 }
 0x588   :  { %2763 = vperm.xlu1 %3516, %v3933_v50   ;;  %v3943_v1 = vpop.eup %3942  ;;  %v2610_v50 = vadd.f32 %v2609_v5, %v2608_v63  ;;  %v2506_v63 = vmul.f32 1.442695, %v2426_v36  ;;  %v2621_v36 = vsel %vm2266_vm2, %v6011_v54, 0.0  ;;  %v2625_v54 = vsel %vm2266_vm2, %v6021_v48, 0.0 }
 0x589   :  { %v3945_v21 = vpop.eup %3944  ;;  %v2613_v58 = vsel %vm2266_vm2, %v3943_v1, 0.0 }
 0x58a   :  { %2808 = vperm.xlu0 %3517, %v6021_v48   ;;  %v3947_v37 = vpop.eup %3946  ;;  %v2612_v4 = vadd.f32 %v2611_v24, %v2610_v50  ;;  %v2615_v2 = vsel %vm2266_vm2, %v3945_v21, 0.0  ;;  %v2430_v24 = vsub.f32 %v5695_v17, %v5964_v34  ;;  %v6693_v17 = vld [vmem:[#allocation93_spill] sm:$0xff] }
 0x58b   :  { %v3949_v16 = vpop.eup %3948  ;;  %v2629_v48 = vsel %vm2266_vm2, %v3947_v37, 0.0 }
 0x58c   :  { %2768 = vperm.xlu1 %3516, %v3935_v3   ;;  %v2502_v3 = vmul.f32 1.442695, %v2424_v13  ;;  %v2614_v22 = vadd.f32 %v2613_v58, %v2612_v4  ;;  %v3951_v46 = vpop.eup %3950  ;;  %v2617_v13 = vsel %vm2266_vm2, %v3949_v16, 0.0  ;;  %v2510_v4 = vmul.f32 1.442695, %v2428_v6 }
 0x58d   :  { %v3953_v38 = vpop.eup %3952  ;;  %v2619_v33 = vsel %vm2266_vm2, %v3951_v46, 0.0  ;;  %v2514_v11 = vmul.f32 1.442695, %v2430_v24 }
 0x58e   :  { %2818 = vperm.xlu0 %3517, %v3947_v37   ;;  %3962 = vpow2.f32 %v2502_v3  ;;  %v2524_v3 = vmul.f32 1.442695, %v2435_v62  ;;  %v2633_v37 = vsel %vm2266_vm2, %v3953_v38, 0.0 }
 0x58f   :  { %3964 = vpow2.f32 %v2516_v23 }
 0x590   :  { %2773 = vperm.xlu1 %3516, %v3939_v45   ;;  %v2616_v45 = vadd.f32 %v2615_v2, %v2614_v22  ;;  %3966 = vpow2.f32 %v2506_v63 }
 0x591   :  { %3968 = vpow2.f32 %v2520_v59 }
 0x592   :  { %2828 = vperm.xlu0 %3517, %v3953_v38   ;;  %v2618_v5 = vadd.f32 %v2617_v13, %v2616_v45  ;;  %v2432_v45 = vsub.f32 %v6693_v17, %v5964_v34  ;;  %3970 = vpow2.f32 %v2510_v4 }
 0x593   :  { %3972 = vpow2.f32 %v2524_v3 }
 0x594   :  { %2778 = vperm.xlu1 %3516, %v3943_v1   ;;  %v3955_v1 = vpop.eup %3954  ;;  %v2620_v50 = vadd.f32 %v2619_v33, %v2618_v5  ;;  %v2434_v33 = vsub.f32 %v5733_v52, %v5964_v34  ;;  %3974 = vpow2.f32 %v2514_v11  ;;  %v2436_v52 = vsub.f32 %v5729_v44, %v5964_v34  ;;  %v6694_v11 = vld [vmem:[#allocation97_spill] sm:$0xff] }
 0x595   :  { %v3957_v18 = vpop.eup %3956  ;;  %v2623_v23 = vsel %vm2266_vm2, %v3955_v1, 0.0  ;;  %v2438_v44 = vsub.f32 %v6694_v11, %v5964_v34 }
 0x596   :  { %2838 = vperm.xlu0 %3517, %v3957_v18   ;;  %v2622_v58 = vadd.f32 %v2621_v36, %v2620_v50  ;;  %v3959_v40 = vpop.eup %3958  ;;  %v2518_v50 = vmul.f32 1.442695, %v2432_v45  ;;  %v2522_v3 = vmul.f32 1.442695, %v2434_v33  ;;  %v2637_v38 = vsel %vm2266_vm2, %v3957_v18, 0.0  ;;  %v6695_v33 = vld [vmem:[#allocation95_spill] sm:$0xff] }
 0x597   :  { %v3961_v22 = vpop.eup %3960  ;;  %v2627_v62 = vsel %vm2266_vm2, %v3959_v40, 0.0 }
 0x598   :  { %2783 = vperm.xlu1 %3516, %v3945_v21   ;;  %v2437_v21 = vsub.f32 %v6692_v42, %v5964_v34  ;;  %v2624_v2 = vadd.f32 %v2623_v23, %v2622_v58  ;;  %v3963_v13 = vpop.eup %3962  ;;  %v2641_v18 = vsel %vm2266_vm2, %v3961_v22, 0.0 }
 0x599   :  { %v3965_v59 = vpop.eup %3964  ;;  %v2631_v36 = vsel %vm2266_vm2, %v3963_v13, 0.0 }
 0x59a   :  { %2848 = vperm.xlu0 %3517, %v3961_v22   ;;  %v2528_v6 = vmul.f32 1.442695, %v2437_v21  ;;  %v2626_v63 = vadd.f32 %v2625_v54, %v2624_v2  ;;  %v3967_v4 = vpop.eup %3966  ;;  %v2526_v54 = vmul.f32 1.442695, %v2436_v52  ;;  %v6696_v52 = vld [vmem:[#allocation99_spill] sm:$0xff]  ;;  %v2645_v22 = vsel %vm2266_vm2, %v3965_v59, 0.0 }
 0x59b   :  { %v3969_v42 = vpop.eup %3968  ;;  %v2635_v2 = vsel %vm2266_vm2, %v3967_v4, 0.0 }
 0x59c   :  { %2788 = vperm.xlu1 %3516, %v3949_v16   ;;  %v2439_v16 = vsub.f32 %v5757_v43, %v5964_v34  ;;  %v2628_v5 = vadd.f32 %v2627_v62, %v2626_v63  ;;  %v2441_v43 = vsub.f32 %v5745_v20, %v5964_v34  ;;  %3976 = vpow2.f32 %v2528_v6  ;;  %v3971_v23 = vpop.eup %3970 }
 0x59d   :  { %3978 = vpow2.f32 %v2518_v50  ;;  %v2443_v20 = vsub.f32 %v5789_v49, %v5964_v34  ;;  %v3973_v17 = vpop.eup %3972  ;;  %v2445_v49 = vsub.f32 %v5769_v25, %v5964_v34  ;;  %v2639_v63 = vsel %vm2266_vm2, %v3971_v23, 0.0 }
 0x59e   :  { %2858 = vperm.xlu0 %3517, %v3965_v59   ;;  %v2630_v24 = vadd.f32 %v2629_v48, %v2628_v5  ;;  %v3975_v6 = vpop.eup %3974  ;;  %v2440_v50 = vsub.f32 %v6695_v33, %v5964_v34  ;;  %v2530_v48 = vmul.f32 1.442695, %v2438_v44  ;;  %v2447_v25 = vsub.f32 %v5803_v60, %v5964_v34  ;;  %v6698_v44 = vld [vmem:[#allocation96_spill] sm:$0xff] }
 0x59f   :  { %v2649_v59 = vsel %vm2266_vm2, %v3969_v42, 0.0 }
 0x5a0   :  { %2793 = vperm.xlu1 %3516, %v3951_v46   ;;  %v2532_v46 = vmul.f32 1.442695, %v2439_v16  ;;  %v2632_v21 = vadd.f32 %v2631_v36, %v2630_v24  ;;  %v2643_v24 = vsel %vm2266_vm2, %v3975_v6, 0.0 }
 0x5a2   :  { %2868 = vperm.xlu0 %3517, %v3969_v42   ;;  %3980 = vpow2.f32 %v2532_v46  ;;  %v2634_v58 = vadd.f32 %v2633_v37, %v2632_v21  ;;  %v2534_v37 = vmul.f32 1.442695, %v2440_v50  ;;  %v2446_v50 = vsub.f32 %v5813_v15, %v5964_v34 }
 0x5a3   :  { %3982 = vpow2.f32 %v2522_v3  ;;  %v2442_v3 = vsub.f32 %v6696_v52, %v5964_v34  ;;  %v2653_v42 = vsel %vm2266_vm2, %v3973_v17, 0.0 }
 0x5a4   :  { %2803 = vperm.xlu1 %3516, %v3955_v1   ;;  %v2536_v1 = vmul.f32 1.442695, %v2441_v43  ;;  %v2636_v45 = vadd.f32 %v2635_v2, %v2634_v58  ;;  %v2546_v52 = vmul.f32 1.442695, %v2446_v50 }
 0x5a6   :  { %2878 = vperm.xlu0 %3517, %v3973_v17   ;;  %3984 = vpow2.f32 %v2536_v1  ;;  %v2638_v16 = vadd.f32 %v2637_v38, %v2636_v45  ;;  %v3977_v62 = vpop.eup %3976  ;;  %v2538_v38 = vmul.f32 1.442695, %v2442_v3 }
 0x5a7   :  { %3986 = vpow2.f32 %v2526_v54  ;;  %v3979_v46 = vpop.eup %3978  ;;  %v2444_v54 = vsub.f32 %v6698_v44, %v5964_v34  ;;  %v2657_v17 = vsel %vm2266_vm2, %v3977_v62, 0.0 }
 0x5a8   :  { %2813 = vperm.xlu1 %3516, %v3959_v40   ;;  %v2540_v40 = vmul.f32 1.442695, %v2443_v20  ;;  %v2640_v5 = vadd.f32 %v2639_v63, %v2638_v16  ;;  %v2548_v20 = vmul.f32 1.442695, %v2447_v25  ;;  %v2647_v2 = vsel %vm2266_vm2, %v3979_v46, 0.0 }
 0x5aa   :  { %2888 = vperm.xlu0 %3517, %v3977_v62   ;;  %3988 = vpow2.f32 %v2540_v40  ;;  %v2642_v43 = vadd.f32 %v2641_v18, %v2640_v5 }
 0x5ab   :  { %3990 = vpow2.f32 %v2530_v48  ;;  %v2542_v48 = vmul.f32 1.442695, %v2444_v54 }
 0x5ac   :  { %2823 = vperm.xlu1 %3516, %v3963_v13   ;;  %v2544_v13 = vmul.f32 1.442695, %v2445_v49  ;;  %v3981_v36 = vpop.eup %3980  ;;  %v2644_v21 = vadd.f32 %v2643_v24, %v2642_v43 }
 0x5ad   :  { %v3983_v58 = vpop.eup %3982  ;;  %v2661_v62 = vsel %vm2266_vm2, %v3981_v36, 0.0 }
 0x5ae   :  { %2898 = vperm.xlu0 %3517, %v3981_v36   ;;  %3992 = vpow2.f32 %v2544_v13  ;;  %v2646_v1 = vadd.f32 %v2645_v22, %v2644_v21  ;;  %v2651_v63 = vsel %vm2266_vm2, %v3983_v58, 0.0  ;;  %v6699_v21 = vld [vmem:[#allocation101_spill] sm:$0xff] }
 0x5af   :  { %3994 = vpow2.f32 %v2534_v37  ;;  %v2448_v15 = vsub.f32 %v6699_v21, %v5964_v34 }
 0x5b0   :  { %2833 = vperm.xlu1 %3516, %v3967_v4   ;;  %v6697_v4 = vld [vmem:[#allocation98_spill] sm:$0xff]  ;;  %v3985_v45 = vpop.eup %3984  ;;  %v2648_v11 = vadd.f32 %v2647_v2, %v2646_v1  ;;  %3996 = vpow2.f32 %v2548_v20  ;;  %v2450_v20 = vsub.f32 %v5835_v57, %v5964_v34  ;;  %v2452_v57 = vsub.f32 %v5823_v56, %v5964_v34 }
 0x5b1   :  { %v2449_v60 = vsub.f32 %v6697_v4, %v5964_v34  ;;  %v3987_v16 = vpop.eup %3986  ;;  %3998 = vpow2.f32 %v2538_v38  ;;  %v2550_v1 = vmul.f32 1.442695, %v2448_v15  ;;  %v2665_v36 = vsel %vm2266_vm2, %v3985_v45, 0.0 }
 0x5b2   :  { %2908 = vperm.xlu0 %3517, %v3985_v45   ;;  %v2650_v40 = vadd.f32 %v2649_v59, %v2648_v11  ;;  %v2655_v13 = vsel %vm2266_vm2, %v3987_v16, 0.0  ;;  %v2554_v59 = vmul.f32 1.442695, %v2450_v20  ;;  %v2454_v56 = vsub.f32 %v5859_v27, %v5964_v34 }
 0x5b3   :  { %v2552_v49 = vmul.f32 1.442695, %v2449_v60  ;;  %v2558_v50 = vmul.f32 1.442695, %v2452_v57  ;;  %v2456_v27 = vsub.f32 %v5847_v51, %v5964_v34 }
 0x5b4   :  { %2843 = vperm.xlu1 %3516, %v3971_v23   ;;  %v2451_v23 = vsub.f32 %v5827_v31, %v5964_v34  ;;  %v3989_v5 = vpop.eup %3988  ;;  %v2652_v33 = vadd.f32 %v2651_v63, %v2650_v40  ;;  %v2453_v31 = vsub.f32 %v5817_v8, %v5964_v34  ;;  %v2455_v8 = vsub.f32 %v5863_v29, %v5964_v34 }
 0x5b5   :  { %4000 = vpow2.f32 %v2552_v49  ;;  %v3991_v25 = vpop.eup %3990  ;;  %v2457_v29 = vsub.f32 %v5839_v53, %v5964_v34  ;;  %v2459_v53 = vsub.f32 %v5871_v55, %v5964_v34  ;;  %v2669_v45 = vsel %vm2266_vm2, %v3989_v5, 0.0 }
 0x5b6   :  { %2918 = vperm.xlu0 %3517, %v3989_v5   ;;  %v2654_v18 = vadd.f32 %v2653_v42, %v2652_v33  ;;  %4002 = vpow2.f32 %v2542_v48  ;;  %v2659_v22 = vsel %vm2266_vm2, %v3991_v25, 0.0  ;;  %v2461_v55 = vsub.f32 %v5881_v28, %v5964_v34 }
 0x5b7   :  { %v2572_v48 = vmul.f32 1.442695, %v2459_v53 }
 0x5b8   :  { %2853 = vperm.xlu1 %3516, %v3975_v6   ;;  %v2556_v6 = vmul.f32 1.442695, %v2451_v23  ;;  %v3993_v43 = vpop.eup %3992  ;;  %v2656_v24 = vadd.f32 %v2655_v13, %v2654_v18  ;;  %v2568_v23 = vmul.f32 1.442695, %v2457_v29  ;;  %v2562_v13 = vmul.f32 1.442695, %v2454_v56 }
 0x5b9   :  { %v3995_v37 = vpop.eup %3994  ;;  %v2673_v5 = vsel %vm2266_vm2, %v3993_v43, 0.0  ;;  %v2576_v21 = vmul.f32 1.442695, %v2461_v55 }
 0x5ba   :  { %2928 = vperm.xlu0 %3517, %v3993_v43   ;;  %4004 = vpow2.f32 %v2556_v6  ;;  %v2658_v3 = vadd.f32 %v2657_v17, %v2656_v24  ;;  %v3997_v4 = vpop.eup %3996  ;;  %v2663_v44 = vsel %vm2266_vm2, %v3995_v37, 0.0  ;;  %v6700_v24 = vld [vmem:[#allocation85_spill] sm:$0xff] }
 0x5bb   :  { %4006 = vpow2.f32 %v2546_v52  ;;  %v3999_v11 = vpop.eup %3998  ;;  %v2463_v28 = vsub.f32 %v6700_v24, %v5964_v34  ;;  %v2677_v43 = vsel %vm2266_vm2, %v3997_v4, 0.0 }
 0x5bc   :  { %2863 = vperm.xlu1 %3516, %v3979_v46   ;;  %v2560_v46 = vmul.f32 1.442695, %v2453_v31  ;;  %v2660_v60 = vadd.f32 %v2659_v22, %v2658_v3  ;;  %v6701_v3 = vld [vmem:[#allocation103_spill] sm:$0xff]  ;;  %v6702_v22 = vld [vmem:[#allocation104_spill] sm:$0xff] }
 0x5bd   :  { %v2458_v51 = vsub.f32 %v6701_v3, %v5964_v34  ;;  %v2580_v20 = vmul.f32 1.442695, %v2463_v28  ;;  %v6706_v28 = vld [vmem:[#allocation105_spill] sm:$0xff] }
 0x5be   :  { %2938 = vperm.xlu0 %3517, %v3997_v4   ;;  %4008 = vpow2.f32 %v2560_v46  ;;  %v2662_v2 = vadd.f32 %v2661_v62, %v2660_v60  ;;  %v2465_v60 = vsub.f32 %v6702_v22, %v5964_v34 }
 0x5bf   :  { %v4001_v54 = vpop.eup %4000  ;;  %4010 = vpow2.f32 %v2550_v1 }
 0x5c0   :  { %2873 = vperm.xlu1 %3516, %v3983_v58   ;;  %v2564_v58 = vmul.f32 1.442695, %v2455_v8  ;;  %v2664_v38 = vadd.f32 %v2663_v44, %v2662_v2  ;;  %v4003_v40 = vpop.eup %4002  ;;  %v2681_v4 = vsel %vm2266_vm2, %v4001_v54, 0.0  ;;  %v2584_v57 = vmul.f32 1.442695, %v2465_v60 }
 0x5c1   :  { %v2671_v6 = vsel %vm2266_vm2, %v4003_v40, 0.0 }
 0x5c2   :  { %2948 = vperm.xlu0 %3517, %v4001_v54   ;;  %4012 = vpow2.f32 %v2564_v58  ;;  %v2666_v49 = vadd.f32 %v2665_v36, %v2664_v38  ;;  %v2570_v38 = vmul.f32 1.442695, %v2458_v51  ;;  %v2588_v54 = vmul.f32 1.442695, %v2467_v61 }
 0x5c3   :  { %4014 = vpow2.f32 %v2554_v59 }
 0x5c4   :  { %2883 = vperm.xlu1 %3516, %v3987_v16   ;;  %v2667_v16 = vsel %vm2266_vm2, %v3999_v11, 0.0  ;;  %v4005_v63 = vpop.eup %4004  ;;  %4016 = vpow2.f32 %v2568_v23 }
 0x5c5   :  { %v2668_v33 = vadd.f32 %v2667_v16, %v2666_v49  ;;  %v4007_v31 = vpop.eup %4006  ;;  %4018 = vpow2.f32 %v2558_v50  ;;  %v2685_v56 = vsel %vm2266_vm2, %v4005_v63, 0.0 }
 0x5c6   :  { %2958 = vperm.xlu0 %3517, %v4005_v63   ;;  %4020 = vpow2.f32 %v2572_v48  ;;  %v2675_v17 = vsel %vm2266_vm2, %v4007_v31, 0.0 }
 0x5c7   :  { %v2670_v42 = vadd.f32 %v2669_v45, %v2668_v33  ;;  %4022 = vpow2.f32 %v2562_v13 }
 0x5c8   :  { %2893 = vperm.xlu1 %3516, %v3991_v25   ;;  %v4009_v18 = vpop.eup %4008  ;;  %4024 = vpow2.f32 %v2576_v21  ;;  %v2466_v21 = vsub.f32 %v6706_v28, %v5964_v34 }
 0x5c9   :  { %v2672_v25 = vadd.f32 %v2671_v6, %v2670_v42  ;;  %v4011_v52 = vpop.eup %4010  ;;  %v2689_v63 = vsel %vm2266_vm2, %v4009_v18, 0.0 }
 0x5ca   :  { %2968 = vperm.xlu0 %3517, %v4009_v18   ;;  %v2679_v29 = vsel %vm2266_vm2, %v4011_v52, 0.0  ;;  %v2586_v51 = vmul.f32 1.442695, %v2466_v21 }
 0x5cb   :  { %v2674_v15 = vadd.f32 %v2673_v5, %v2672_v25 }
 0x5cc   :  { %2903 = vperm.xlu1 %3516, %v3995_v37   ;;  %v4013_v8 = vpop.eup %4012  ;;  %v2566_v37 = vmul.f32 1.442695, %v2456_v27 }
 0x5cd   :  { %v2676_v46 = vadd.f32 %v2675_v17, %v2674_v15  ;;  %v4015_v62 = vpop.eup %4014  ;;  %v2693_v18 = vsel %vm2266_vm2, %v4013_v8, 0.0 }
 0x5ce   :  { %2978 = vperm.xlu0 %3517, %v4013_v8   ;;  %v4017_v58 = vpop.eup %4016  ;;  %4026 = vpow2.f32 %v2566_v37  ;;  %v2683_v53 = vsel %vm2266_vm2, %v4015_v62, 0.0  ;;  %v6707_v8 = vld [vmem:[#allocation106_spill] sm:$0xff] }
 0x5cf   :  { %v2678_v1 = vadd.f32 %v2677_v43, %v2676_v46  ;;  %4028 = vpow2.f32 %v2580_v20  ;;  %v4019_v36 = vpop.eup %4018  ;;  %v2697_v37 = vsel %vm2266_vm2, %v4017_v58, 0.0  ;;  %v2468_v43 = vsub.f32 %v6707_v8, %v5964_v34  ;;  %v6708_v8 = vld [vmem:[#allocation21_spill] sm:$0xff] }
 0x5d0   :  { %2913 = vperm.xlu1 %3516, %v3999_v11   ;;  %v6703_v11 = vld [vmem:[#allocation100_spill] sm:$0xff]  ;;  %v4021_v23 = vpop.eup %4020  ;;  %4030 = vpow2.f32 %v2570_v38  ;;  %v2687_v55 = vsel %vm2266_vm2, %v4019_v36, 0.0  ;;  %v2594_v38 = vmul.f32 1.442695, %v2470_v7 }
 0x5d1   :  { %v2680_v2 = vadd.f32 %v2679_v29, %v2678_v1  ;;  %v2460_v44 = vsub.f32 %v6703_v11, %v5964_v34  ;;  %4032 = vpow2.f32 %v2584_v57  ;;  %v4023_v45 = vpop.eup %4022  ;;  %v2590_v29 = vmul.f32 1.442695, %v2468_v43 }
 0x5d2   :  { %2988 = vperm.xlu0 %3517, %v4017_v58   ;;  %v4025_v48 = vpop.eup %4024  ;;  %v2691_v13 = vsel %vm2266_vm2, %v4023_v45, 0.0  ;;  %v6709_v43 = vmax.f32 %v6708_v8, 0.0 }
 0x5d3   :  { %v2682_v59 = vadd.f32 %v2681_v4, %v2680_v2  ;;  %v2574_v33 = vmul.f32 1.442695, %v2460_v44  ;;  %v2705_v12 = vsel %vm2266_vm2, %v4025_v48, 0.0 }
 0x5d4   :  { %2923 = vperm.xlu1 %3516, %v4003_v40   ;;  %v6704_v40 = vld [vmem:[#allocation102_spill] sm:$0xff] }
 0x5d5   :  { %v2684_v49 = vadd.f32 %v2683_v53, %v2682_v59  ;;  %v2462_v16 = vsub.f32 %v6704_v40, %v5964_v34  ;;  %4034 = vpow2.f32 %v2574_v33 }
 0x5d6   :  { %2998 = vperm.xlu0 %3517, %v4021_v23   ;;  %4036 = vpow2.f32 %v2588_v54 }
 0x5d7   :  { %v2686_v50 = vadd.f32 %v2685_v56, %v2684_v49  ;;  %v2578_v25 = vmul.f32 1.442695, %v2462_v16  ;;  %v2598_v49 = vmul.f32 1.442695, %v2472_v19 }
 0x5d8   :  { %2933 = vperm.xlu1 %3516, %v4007_v31   ;;  %v6705_v31 = vld [vmem:[#allocation84_spill] sm:$0xff]  ;;  %v4027_v27 = vpop.eup %4026 }
 0x5d9   :  { %v2688_v42 = vadd.f32 %v2687_v55, %v2686_v50  ;;  %v2464_v6 = vsub.f32 %v6705_v31, %v5964_v34  ;;  %v4029_v5 = vpop.eup %4028  ;;  %4038 = vpow2.f32 %v2578_v25  ;;  %v2695_v17 = vsel %vm2266_vm2, %v4027_v27, 0.0 }
 0x5da   :  { %3008 = vperm.xlu0 %3517, %v4025_v48   ;;  %4040 = vpow2.f32 %v2592_v35 }
 0x5db   :  { %v2690_v61 = vadd.f32 %v2689_v63, %v2688_v42  ;;  %v2582_v15 = vmul.f32 1.442695, %v2464_v6 }
 0x5dc   :  { %2943 = vperm.xlu1 %3516, %v4011_v52   ;;  %v4031_v52 = vpop.eup %4030 }
 0x5dd   :  { %v2692_v24 = vadd.f32 %v2691_v13, %v2690_v61  ;;  %v4033_v46 = vpop.eup %4032  ;;  %4042 = vpow2.f32 %v2582_v15  ;;  %v2699_v60 = vsel %vm2266_vm2, %v4031_v52, 0.0 }
 0x5de   :  { %3018 = vperm.xlu0 %3517, %v4029_v5   ;;  %4044 = vpow2.f32 %v2596_v10  ;;  %v2713_v56 = vsel %vm2266_vm2, %v4033_v46, 0.0 }
 0x5df   :  { %v2694_v0 = vadd.f32 %v2693_v18, %v2692_v24  ;;  %v4035_v22 = vpop.eup %4034  ;;  %4046 = vpow2.f32 %v2586_v51 }
 0x5e0   :  { %2953 = vperm.xlu1 %3516, %v4015_v62   ;;  %v4037_v20 = vpop.eup %4036  ;;  %v2701_v62 = vsel %vm2266_vm2, %v4021_v23, 0.0  ;;  %4048 = vpow2.f32 %v2600_v26  ;;  %v2703_v11 = vsel %vm2266_vm2, %v4035_v22, 0.0  ;;  %v2709_v23 = vsel %vm2266_vm2, %v4029_v5, 0.0 }
 0x5e1   :  { %v2696_v3 = vadd.f32 %v2695_v17, %v2694_v0  ;;  %4050 = vpow2.f32 %v2590_v29  ;;  %v2717_v48 = vsel %vm2266_vm2, %v4037_v20, 0.0 }
 0x5e2   :  { %3028 = vperm.xlu0 %3517, %v4033_v46   ;;  %4052 = vpow2.f32 %v2594_v38 }
 0x5e3   :  { %v2698_v30 = vadd.f32 %v2697_v37, %v2696_v3  ;;  %v4039_v2 = vpop.eup %4038  ;;  %4054 = vpow2.f32 %v2598_v49 }
 0x5e4   :  { %2963 = vperm.xlu1 %3516, %v4019_v36   ;;  %v4041_v44 = vpop.eup %4040  ;;  %v2707_v59 = vsel %vm2266_vm2, %v4039_v2, 0.0 }
 0x5e5   :  { %v2700_v1 = vadd.f32 %v2699_v60, %v2698_v30  ;;  %v2721_v6 = vsel %vm2266_vm2, %v4041_v44, 0.0  ;;  %v6710_v60 = vld [vmem:[#allocation20_spill] sm:$0xff] }
 0x5e6   :  { %3038 = vperm.xlu0 %3517, %v4037_v20   ;;  %v6711_v20 = vmax.f32 %v6710_v60, 0.0 }
 0x5e7   :  { %v2702_v58 = vadd.f32 %v2701_v62, %v2700_v1  ;;  %v4043_v57 = vpop.eup %4042  ;;  %v6712_v62 = vld [vmem:[#allocation22_spill] sm:$0xff] }
 0x5e8   :  { %2973 = vperm.xlu1 %3516, %v4023_v45   ;;  %v4045_v36 = vpop.eup %4044  ;;  %v2711_v9 = vsel %vm2266_vm2, %v4043_v57, 0.0  ;;  %v6713_v29 = vmax.f32 %v6712_v62, 0.0 }
 0x5e9   :  { %v2704_v32 = vadd.f32 %v2703_v11, %v2702_v58  ;;  %v4047_v16 = vpop.eup %4046  ;;  %v2725_v13 = vsel %vm2266_vm2, %v4045_v36, 0.0 }
 0x5ea   :  { %3048 = vperm.xlu0 %3517, %v4041_v44   ;;  %v4049_v7 = vpop.eup %4048  ;;  %v2715_v50 = vsel %vm2266_vm2, %v4047_v16, 0.0 }
 0x5eb   :  { %v2706_v4 = vadd.f32 %v2705_v12, %v2704_v32  ;;  %v4051_v45 = vpop.eup %4050  ;;  %v2729_v18 = vsel %vm2266_vm2, %v4049_v7, 0.0  ;;  %v6714_v12 = vld [vmem:[#allocation23_spill] sm:$0xff] }
 0x5ec   :  { %2983 = vperm.xlu1 %3516, %v4027_v27   ;;  %v2719_v19 = vsel %vm2266_vm2, %v4051_v45, 0.0  ;;  %v4053_v42 = vpop.eup %4052  ;;  %v6715_v38 = vmax.f32 %v6714_v12, 0.0 }
 0x5ed   :  { %v2708_v53 = vadd.f32 %v2707_v59, %v2706_v4  ;;  %v2723_v63 = vsel %vm2266_vm2, %v4053_v42, 0.0  ;;  %v4055_v35 = vpop.eup %4054 }
 0x5ee   :  { %3058 = vperm.xlu0 %3517, %v4045_v36   ;;  %v2727_v28 = vsel %vm2266_vm2, %v4055_v35, 0.0 }
 0x5ef   :  { %v2710_v40 = vadd.f32 %v2709_v23, %v2708_v53  ;;  %v6716_v53 = vld [vmem:[#allocation24_spill] sm:$0xff] }
 0x5f0   :  { %2993 = vperm.xlu1 %3516, %v4031_v52   ;;  %v6717_v23 = vmax.f32 %v6716_v53, 0.0 }
 0x5f1   :  { %v2712_v33 = vadd.f32 %v2711_v9, %v2710_v40 }
 0x5f2   :  { %3068 = vperm.xlu0 %3517, %v4049_v7  }
 0x5f3   :  { %v2714_v54 = vadd.f32 %v2713_v56, %v2712_v33  ;;  %v6718_v33 = vld [vmem:[#allocation25_spill] sm:$0xff] }
 0x5f4   :  { %3003 = vperm.xlu1 %3516, %v4035_v22   ;;  %v2602_v22 = vld [vmem:[#allocation3] sm:$0x1]  ;;  %v6719_v56 = vmax.f32 %v6718_v33, 0.0 }
 0x5f5   :  { %v2716_v55 = vadd.f32 %v2715_v50, %v2714_v54 }
 0x5f7   :  { %v2718_v41 = vadd.f32 %v2717_v48, %v2716_v55 }
 0x5f8   :  { %3013 = vperm.xlu1 %3516, %v4039_v2  }
 0x5f9   :  { %v2720_v31 = vadd.f32 %v2719_v19, %v2718_v41 }
 0x5fb   :  { %v2722_v25 = vadd.f32 %v2721_v6, %v2720_v31 }
 0x5fc   :  { %3023 = vperm.xlu1 %3516, %v4043_v57   ;;  %v2603_v57 = vmul.f32 %v5966_v47, %v2602_v22 }
 0x5fd   :  { %v2724_v61 = vadd.f32 %v2723_v63, %v2722_v25 }
 0x5ff   :  { %v6181_v34 = vpop.permute.xlu1 %2743  ;;  %v2726_v5 = vadd.f32 %v2725_v13, %v2724_v61 }
 0x600   :  { %3033 = vperm.xlu1 %3516, %v4047_v16  }
 0x601   :  { %v2754_v24 = vpop.permute.xlu0 %2753  ;;  %v2728_v21 = vadd.f32 %v2727_v28, %v2726_v5  ;;  %v6726_v28 = vld [vmem:[#allocation29_spill] sm:$0xff] }
 0x602   :  { %v3071_v1 = vmul.f32 %v2754_v24, %v6711_v20 }
 0x603   :  { %v2759_v27 = vpop.permute.xlu1 %2758  ;;  %v2730_v10 = vadd.f32 %v2729_v18, %v2728_v21  ;;  %v6727_v21 = vmax.f32 %v6726_v28, 0.0 }
 0x604   :  { %3043 = vperm.xlu1 %3516, %v4051_v45   ;;  %v3072_v26 = vmul.f32 %v2759_v27, %v6709_v43  ;;  %v6720_v45 = vld [vmem:[#allocation26_spill] sm:$0xff]  ;;  %v6724_v27 = vld [vmem:[#allocation28_spill] sm:$0xff] }
 0x605   :  { %v2731_v0 = vrot.slane %v2730_v10, 4  ;;  %v2799_v52 = vpop.permute.xlu0 %2798  ;;  %v6721_v55 = vmax.f32 %v6720_v45, 0.0  ;;  %v6725_v13 = vmax.f32 %v6724_v27, 0.0 }
 0x606   :  { %v3135_v32 = vadd.f32 %v3072_v26, %v3071_v1 }
 0x607   :  { %v2764_v15 = vpop.permute.xlu1 %2763  ;;  %v2732_v46 = vadd.f32 %v2731_v0, %v2730_v10 }
 0x608   :  { %3053 = vperm.xlu1 %3516, %v4053_v42   ;;  %v3073_v58 = vmul.f32 %v2764_v15, %v6713_v29  ;;  %v6722_v42 = vld [vmem:[#allocation27_spill] sm:$0xff]  ;;  %v3080_v15 = vmul.f32 %v2799_v52, %v6727_v21 }
 0x609   :  { %v2733_v3 = vrot.slane %v2732_v46, 2  ;;  %v6189_v51 = vpop.permute.xlu0 %2808  ;;  %v6723_v31 = vmax.f32 %v6722_v42, 0.0 }
 0x60a   :  { %v3136_v36 = vadd.f32 %v3135_v32, %v3073_v58 }
 0x60b   :  { %v2769_v17 = vpop.permute.xlu1 %2768  ;;  %v2734_v30 = vadd.f32 %v2733_v3, %v2732_v46 }
 0x60c   :  { %3063 = vperm.xlu1 %3516, %v4055_v35   ;;  %v3074_v4 = vmul.f32 %v2769_v17, %v6715_v38 }
 0x60d   :  { %v2735_v2 = vrot.slane %v2734_v30, 1  ;;  %v6197_v11 = vpop.permute.xlu0 %2818 }
 0x60e   :  { %v3137_v7 = vadd.f32 %v3136_v36, %v3074_v4 }
 0x60f   :  { %v2774_v37 = vpop.permute.xlu1 %2773  ;;  %v2736_v59 = vadd.f32 %v2735_v2, %v2734_v30 }
 0x610   :  { %v3075_v49 = vmul.f32 %v2774_v37, %v6717_v23 }
 0x611   :  { %v2737_v40 = vadd.f32 %v2736_v59, %v2603_v57  ;;  %v6204_v16 = vpop.permute.xlu0 %2828 }
 0x612   :  { %v3138_v50 = vadd.f32 %v3137_v7, %v3075_v49 }
 0x613   :  { %v2779_v44 = vpop.permute.xlu1 %2778  ;;  %2739 = vst.msk [vmem:[#allocation3] sm:$0x1] %vm86_vm1, %v2737_v40 }
 0x614   :  { %v3076_v54 = vmul.f32 %v2779_v44, %v6719_v56 }
 0x615   :  { %v6211_v47 = vpop.permute.xlu0 %2838 }
 0x616   :  { %v3139_v19 = vadd.f32 %v3138_v50, %v3076_v54 }
 0x617   :  { %v2784_v9 = vpop.permute.xlu1 %2783 }
 0x618   :  { %v3077_v48 = vmul.f32 %v2784_v9, %v6721_v55 }
 0x619   :  { %v6215_v63 = vpop.permute.xlu0 %2848 }
 0x61a   :  { %v3140_v25 = vadd.f32 %v3139_v19, %v3077_v48  ;;  %v3212_v24 = vld [vmem:[#allocation3] sm:$0x1] }
 0x61b   :  { %v2789_v41 = vpop.permute.xlu1 %2788  ;;  %3213 = vst.msk [vmem:[#allocation13] sm:$0x1] %vm86_vm1, %v3212_v24 }
 0x61c   :  { %v3078_v6 = vmul.f32 %v2789_v41, %v6723_v31 }
 0x61d   :  { %v2859_v10 = vpop.permute.xlu0 %2858 }
 0x61e   :  { %v3141_v61 = vadd.f32 %v3140_v25, %v3078_v6 }
 0x61f   :  { %v2794_v35 = vpop.permute.xlu1 %2793 }
 0x620   :  { %v3079_v5 = vmul.f32 %v2794_v35, %v6725_v13 }
 0x622   :  { %v3142_v18 = vadd.f32 %v3141_v61, %v3079_v5 }
 0x623   :  { %v2804_v0 = vpop.permute.xlu1 %2803 }
 0x624   :  { %4135 = shalt.err (!%p4132_p0)
}
 0x625   :  { %s4136_s18 = scalar_lea.hbm %s6390_s8, 16 }
 0x626   :  { %p4137_p1 = scmp.ne.s32.totalorder %s6390_s8, %s4136_s18  ;;  %p4140_p2 = scmp.lt.u32.totalorder %s4136_s18, %s6390_s8 }
 0x628   :  { %p4142_p3 = pnand %p4140_p2, %p4137_p1 }
 0x62a   :  { %4145 = shalt.err (!%p4142_p3)
}
 0x62b   :  { %3235 = dma.vmem_to_hbm [thread:$0]  %s3233_s13, 16, %s6390_s8, [#allocation14]   ;;  %v3143_v52 = vadd.f32 %v3142_v18, %v3080_v15  ;;  %v6728_v17 = vld [vmem:[#allocation30_spill] sm:$0xff] }
 0x62c   :  { %v6729_v46 = vmax.f32 %v6728_v17, 0.0  ;;  %s4146_s27 = scalar_lea.vmem %s6222_s12, 16  ;;  %s4150_s0 = scalar_lea.vmem %s6222_s12, 32 }
 0x62d   :  { %p4147_p4 = scmp.ne.s32.totalorder %s6222_s12, %s4146_s27  ;;  %p4151_p5 = scmp.lt.s32.totalorder %s6222_s12, %s6222_s12 }
 0x62e   :  { %v3081_v3 = vmul.f32 %v2804_v0, %v6729_v46  ;;  %p4152_p6 = scmp.lt.s32.totalorder %s4150_s0, %s4146_s27 }
 0x630   :  { %p4153_p7 = por %p4152_p6, %p4151_p5 }
 0x632   :  { %p4154_p8 = pnand %p4153_p7, %p4147_p4 }
 0x634   :  { %4157 = shalt.err (!%p4154_p8)
}
 0x635   :  { %s4158_s21 = scalar_lea.hbm %s6389_s7, 16 }
 0x636   :  { %p4159_p9 = scmp.ne.s32.totalorder %s6389_s7, %s4158_s21  ;;  %p4162_p10 = scmp.lt.u32.totalorder %s4158_s21, %s6389_s7 }
 0x638   :  { %p4164_p11 = pnand %p4162_p10, %p4159_p9 }
 0x63a   :  { %4167 = shalt.err (!%p4164_p11)
}
 0x63b   :  { %3225 = dma.vmem_to_hbm [thread:$0]  %s6222_s12, 16, %s6389_s7, [#allocation8]   ;;  %v6730_v37 = vld [vmem:[#allocation31_spill] sm:$0xff]  ;;  %v3144_v26 = vadd.f32 %v3143_v52, %v3081_v3  ;;  %v2869_v30 = vpop.permute.xlu0 %2868  ;;  %v2814_v22 = vpop.permute.xlu1 %2813  ;;  %v6732_v20 = vld [vmem:[#allocation32_spill] sm:$0xff]  ;;  %v6734_v29 = vld [vmem:[#allocation33_spill] sm:$0xff] }
 0x63c   :  { %v6731_v8 = vmax.f32 %v6730_v37, 0.0  ;;  %v6733_v1 = vmax.f32 %v6732_v20, 0.0  ;;  %v6735_v58 = vmax.f32 %v6734_v29, 0.0  ;;  %v6736_v4 = vld [vmem:[#allocation34_spill] sm:$0xff]  ;;  %v6738_v36 = vld [vmem:[#allocation35_spill] sm:$0xff]  ;;  %v6740_v7 = vld [vmem:[#allocation36_spill] sm:$0xff] }
 0x63d   :  { %v6737_v57 = vmax.f32 %v6736_v4, 0.0  ;;  %v6741_v33 = vmax.f32 %v6740_v7, 0.0  ;;  %v6742_v54 = vld [vmem:[#allocation37_spill] sm:$0xff]  ;;  %v6744_v19 = vld [vmem:[#allocation38_spill] sm:$0xff]  ;;  %v6746_v6 = vld [vmem:[#allocation39_spill] sm:$0xff]  ;;  %s4210_s7 = smov [#allocation15]  }
 0x63e   :  { %v3082_v43 = vmul.f32 %v6189_v51, %v6731_v8  ;;  %v3083_v62 = vmul.f32 %v2814_v22, %v6733_v1  ;;  %v3084_v2 = vmul.f32 %v6197_v11, %v6735_v58  ;;  %v6739_v51 = vmax.f32 %v6738_v36, 0.0  ;;  %v6748_v5 = vld [vmem:[#allocation40_spill] sm:$0xff]  ;;  %v6750_v21 = vld [vmem:[#allocation41_spill] sm:$0xff]  ;;  %v6752_v46 = vld [vmem:[#allocation42_spill] sm:$0xff]  ;;  %s3242_s11 = sshll.u32 %s4210_s7, 4  ;;  %s3243_s11 = int_to_ptr.vmem [resolvable:$true] %s3242_s11 }
 0x63f   :  { %v2879_v32 = vpop.permute.xlu0 %2878  ;;  %v2824_v12 = vpop.permute.xlu1 %2823  ;;  %v6743_v11 = vmax.f32 %v6742_v54, 0.0  ;;  %v6745_v42 = vmax.f32 %v6744_v19, 0.0  ;;  %v6749_v24 = vmax.f32 %v6748_v5, 0.0  ;;  %v6753_v3 = vmax.f32 %v6752_v46, 0.0  ;;  %v6754_v8 = vld [vmem:[#allocation43_spill] sm:$0xff]  ;;  %v6756_v1 = vld [vmem:[#allocation44_spill] sm:$0xff]  ;;  %p4173_p13 = scmp.lt.s32.totalorder %s3243_s11, %s3243_s11 }
 0x640   :  { %v3145_v60 = vadd.f32 %v3144_v26, %v3082_v43  ;;  %v3085_v59 = vmul.f32 %v2824_v12, %v6737_v57  ;;  %v3086_v53 = vmul.f32 %v6204_v16, %v6739_v51  ;;  %v6747_v16 = vmax.f32 %v6746_v6, 0.0  ;;  %v6758_v58 = vld [vmem:[#allocation45_spill] sm:$0xff]  ;;  %v6760_v57 = vld [vmem:[#allocation46_spill] sm:$0xff]  ;;  %v6762_v51 = vld [vmem:[#allocation47_spill] sm:$0xff]  ;;  %s4168_s4 = scalar_lea.vmem %s3243_s11, 16  ;;  %s4172_s20 = scalar_lea.vmem %s3243_s11, 32 }
 0x641   :  { %v3088_v50 = vmul.f32 %v6211_v47, %v6743_v11  ;;  %v6751_v47 = vmax.f32 %v6750_v21, 0.0  ;;  %v6755_v43 = vmax.f32 %v6754_v8, 0.0  ;;  %v6766_v11 = vld [vmem:[#allocation49_spill] sm:$0xff]  ;;  %v6776_v46 = vld [vmem:[#allocation54_spill] sm:$0xff]  ;;  %p4169_p12 = scmp.ne.s32.totalorder %s3243_s11, %s4168_s4  ;;  %p4174_p0 = scmp.lt.s32.totalorder %s4172_s20, %s4168_s4 }
 0x642   :  { %v3146_v44 = vadd.f32 %v3145_v60, %v3083_v62  ;;  %v3090_v25 = vmul.f32 %v6215_v63, %v6747_v16  ;;  %v6757_v62 = vmax.f32 %v6756_v1, 0.0  ;;  %v6770_v16 = vld [vmem:[#allocation51_spill] sm:$0xff]  ;;  %v6780_v1 = vld [vmem:[#allocation56_spill] sm:$0xff] }
 0x643   :  { %v2889_v49 = vpop.permute.xlu0 %2888  ;;  %v2834_v40 = vpop.permute.xlu1 %2833  ;;  %v3092_v15 = vmul.f32 %v2859_v10, %v6751_v47  ;;  %v3094_v63 = vmul.f32 %v2869_v30, %v6755_v43  ;;  %v6774_v47 = vld [vmem:[#allocation53_spill] sm:$0xff]  ;;  %v6778_v43 = vld [vmem:[#allocation55_spill] sm:$0xff]  ;;  %p4175_p1 = por %p4174_p0, %p4173_p13 }
 0x644   :  { %v3147_v38 = vadd.f32 %v3146_v44, %v3084_v2  ;;  %v3087_v56 = vmul.f32 %v2834_v40, %v6741_v33  ;;  %v6759_v2 = vmax.f32 %v6758_v58, 0.0  ;;  %v6764_v33 = vld [vmem:[#allocation48_spill] sm:$0xff]  ;;  %v6782_v58 = vld [vmem:[#allocation57_spill] sm:$0xff] }
 0x645   :  { %p4176_p2 = pnand %p4175_p1, %p4169_p12 }
 0x646   :  { %v3148_v23 = vadd.f32 %v3147_v38, %v3085_v59  ;;  %v3096_v10 = vmul.f32 %v2879_v32, %v6759_v2  ;;  %v6761_v59 = vmax.f32 %v6760_v57, 0.0  ;;  %v6783_v2 = vmax.f32 %v6782_v58, 0.0  ;;  %v6784_v57 = vld [vmem:[#allocation58_spill] sm:$0xff] }
 0x647   :  { %v2899_v55 = vpop.permute.xlu0 %2898  ;;  %v2844_v48 = vpop.permute.xlu1 %2843 }
 0x648   :  { %v3149_v9 = vadd.f32 %v3148_v23, %v3086_v53  ;;  %v3089_v31 = vmul.f32 %v2844_v48, %v6745_v42  ;;  %v6763_v53 = vmax.f32 %v6762_v51, 0.0  ;;  %v6768_v42 = vld [vmem:[#allocation50_spill] sm:$0xff]  ;;  %v6786_v51 = vld [vmem:[#allocation59_spill] sm:$0xff] }
 0x64a   :  { %v3150_v45 = vadd.f32 %v3149_v9, %v3087_v56  ;;  %v3098_v30 = vmul.f32 %v2889_v49, %v6763_v53  ;;  %v6765_v56 = vmax.f32 %v6764_v33, 0.0  ;;  %v6787_v53 = vmax.f32 %v6786_v51, 0.0 }
 0x64b   :  { %v2909_v61 = vpop.permute.xlu0 %2908  ;;  %v2854_v27 = vpop.permute.xlu1 %2853 }
 0x64c   :  { %v3151_v41 = vadd.f32 %v3150_v45, %v3088_v50  ;;  %v3091_v28 = vmul.f32 %v2854_v27, %v6749_v24  ;;  %v6767_v50 = vmax.f32 %v6766_v11, 0.0  ;;  %v6772_v24 = vld [vmem:[#allocation52_spill] sm:$0xff]  ;;  %v6790_v11 = vld [vmem:[#allocation61_spill] sm:$0xff] }
 0x64e   :  { %v3152_v35 = vadd.f32 %v3151_v41, %v3089_v31  ;;  %v3100_v32 = vmul.f32 %v2899_v55, %v6767_v50  ;;  %v6769_v31 = vmax.f32 %v6768_v42, 0.0  ;;  %v6791_v50 = vmax.f32 %v6790_v11, 0.0 }
 0x64f   :  { %v2919_v0 = vpop.permute.xlu0 %2918  ;;  %v2864_v52 = vpop.permute.xlu1 %2863 }
 0x650   :  { %v3153_v13 = vadd.f32 %v3152_v35, %v3090_v25  ;;  %v3093_v37 = vmul.f32 %v2864_v52, %v6753_v3  ;;  %v6771_v25 = vmax.f32 %v6770_v16, 0.0  ;;  %v6777_v3 = vmax.f32 %v6776_v46, 0.0 }
 0x652   :  { %v3154_v18 = vadd.f32 %v3153_v13, %v3091_v28  ;;  %v3102_v49 = vmul.f32 %v2909_v61, %v6771_v25  ;;  %v6773_v28 = vmax.f32 %v6772_v24, 0.0 }
 0x653   :  { %v2929_v22 = vpop.permute.xlu0 %2928  ;;  %v2874_v60 = vpop.permute.xlu1 %2873 }
 0x654   :  { %v3155_v17 = vadd.f32 %v3154_v18, %v3092_v15  ;;  %v3095_v29 = vmul.f32 %v2874_v60, %v6757_v62  ;;  %v6775_v15 = vmax.f32 %v6774_v47, 0.0  ;;  %v6781_v62 = vmax.f32 %v6780_v1, 0.0 }
 0x656   :  { %v3156_v26 = vadd.f32 %v3155_v17, %v3093_v37  ;;  %v3104_v55 = vmul.f32 %v2919_v0, %v6775_v15 }
 0x657   :  { %v2939_v12 = vpop.permute.xlu0 %2938  ;;  %v2884_v38 = vpop.permute.xlu1 %2883 }
 0x658   :  { %v3157_v20 = vadd.f32 %v3156_v26, %v3094_v63  ;;  %v3097_v36 = vmul.f32 %v2884_v38, %v6761_v59  ;;  %v6779_v63 = vmax.f32 %v6778_v43, 0.0  ;;  %v6785_v59 = vmax.f32 %v6784_v57, 0.0 }
 0x65a   :  { %v3158_v44 = vadd.f32 %v3157_v20, %v3095_v29  ;;  %v3106_v61 = vmul.f32 %v2929_v22, %v6779_v63 }
 0x65b   :  { %v2949_v40 = vpop.permute.xlu0 %2948  ;;  %v2894_v9 = vpop.permute.xlu1 %2893 }
 0x65c   :  { %v3159_v4 = vadd.f32 %v3158_v44, %v3096_v10  ;;  %v3099_v54 = vmul.f32 %v2894_v9, %v6765_v56  ;;  %v3108_v10 = vmul.f32 %v2939_v12, %v6783_v2 }
 0x65e   :  { %v3160_v23 = vadd.f32 %v3159_v4, %v3097_v36 }
 0x65f   :  { %v2959_v48 = vpop.permute.xlu0 %2958  ;;  %v2904_v41 = vpop.permute.xlu1 %2903 }
 0x660   :  { %v3161_v7 = vadd.f32 %v3160_v23, %v3098_v30  ;;  %v3101_v6 = vmul.f32 %v2904_v41, %v6769_v31  ;;  %v3110_v30 = vmul.f32 %v2949_v40, %v6787_v53  ;;  %v3112_v12 = vmul.f32 %v2959_v48, %v6791_v50 }
 0x662   :  { %v3162_v45 = vadd.f32 %v3161_v7, %v3099_v54  ;;  %v6788_v7 = vld [vmem:[#allocation60_spill] sm:$0xff] }
 0x663   :  { %v2969_v27 = vpop.permute.xlu0 %2968  ;;  %v2914_v13 = vpop.permute.xlu1 %2913  ;;  %v6789_v33 = vmax.f32 %v6788_v7, 0.0 }
 0x664   :  { %v3163_v19 = vadd.f32 %v3162_v45, %v3100_v32  ;;  %v3103_v21 = vmul.f32 %v2914_v13, %v6773_v28 }
 0x666   :  { %v3164_v35 = vadd.f32 %v3163_v19, %v3101_v6  ;;  %v6792_v19 = vld [vmem:[#allocation62_spill] sm:$0xff]  ;;  %v6794_v6 = vld [vmem:[#allocation63_spill] sm:$0xff] }
 0x667   :  { %v2924_v52 = vpop.permute.xlu1 %2923  ;;  %v2979_v8 = vpop.permute.xlu0 %2978  ;;  %v6793_v42 = vmax.f32 %v6792_v19, 0.0  ;;  %v6795_v16 = vmax.f32 %v6794_v6, 0.0  ;;  %v6818_v19 = vld [vmem:[#allocation75_spill] sm:$0xff] }
 0x668   :  { %v3165_v5 = vadd.f32 %v3164_v35, %v3102_v49  ;;  %v3105_v37 = vmul.f32 %v2924_v52, %v6777_v3  ;;  %v6800_v52 = vld [vmem:[#allocation68_spill] sm:$0xff] }
 0x669   :  { %v3114_v25 = vmul.f32 %v2969_v27, %v6795_v16 }
 0x66a   :  { %v3166_v18 = vadd.f32 %v3165_v5, %v3103_v21  ;;  %v6796_v5 = vld [vmem:[#allocation64_spill] sm:$0xff]  ;;  %v6798_v21 = vld [vmem:[#allocation65_spill] sm:$0xff] }
 0x66b   :  { %v2934_v60 = vpop.permute.xlu1 %2933  ;;  %v2989_v44 = vpop.permute.xlu0 %2988  ;;  %v6797_v24 = vmax.f32 %v6796_v5, 0.0  ;;  %v6799_v47 = vmax.f32 %v6798_v21, 0.0  ;;  %v6822_v5 = vld [vmem:[#allocation77_spill] sm:$0xff] }
 0x66c   :  { %v3167_v17 = vadd.f32 %v3166_v18, %v3104_v55  ;;  %v3107_v29 = vmul.f32 %v2934_v60, %v6781_v62  ;;  %v6804_v60 = vld [vmem:[#allocation66_spill] sm:$0xff]  ;;  %v6806_v62 = vld [vmem:[#allocation67_spill] sm:$0xff] }
 0x66d   :  { %v3116_v15 = vmul.f32 %v2979_v8, %v6799_v47 }
 0x66e   :  { %v3168_v26 = vadd.f32 %v3167_v17, %v3105_v37  ;;  %v6801_v17 = vmax.f32 %v6800_v52, 0.0  ;;  %v6802_v37 = vld [vmem:[#allocation69_spill] sm:$0xff] }
 0x66f   :  { %v2944_v38 = vpop.permute.xlu1 %2943  ;;  %v2999_v54 = vpop.permute.xlu0 %2998  ;;  %v6803_v43 = vmax.f32 %v6802_v37, 0.0 }
 0x670   :  { %v3169_v20 = vadd.f32 %v3168_v26, %v3106_v61  ;;  %v3109_v36 = vmul.f32 %v2944_v38, %v6785_v59  ;;  %v6808_v38 = vld [vmem:[#allocation70_spill] sm:$0xff]  ;;  %v6810_v59 = vld [vmem:[#allocation71_spill] sm:$0xff] }
 0x671   :  { %v3118_v27 = vmul.f32 %v2989_v44, %v6803_v43 }
 0x672   :  { %v3170_v0 = vadd.f32 %v3169_v20, %v3107_v29  ;;  %v6805_v20 = vmax.f32 %v6804_v60, 0.0  ;;  %v6807_v29 = vmax.f32 %v6806_v62, 0.0  ;;  %v6830_v60 = vld [vmem:[#allocation81_spill] sm:$0xff] }
 0x673   :  { %v2954_v23 = vpop.permute.xlu1 %2953  ;;  %v3009_v49 = vpop.permute.xlu0 %3008 }
 0x674   :  { %v3171_v4 = vadd.f32 %v3170_v0, %v3108_v10  ;;  %v3111_v56 = vmul.f32 %v2954_v23, %v6789_v33  ;;  %v3120_v58 = vmul.f32 %v2999_v54, %v6807_v29  ;;  %v6814_v33 = vld [vmem:[#allocation73_spill] sm:$0xff] }
 0x676   :  { %v3172_v22 = vadd.f32 %v3171_v4, %v3109_v36  ;;  %v6809_v4 = vmax.f32 %v6808_v38, 0.0  ;;  %v6811_v36 = vmax.f32 %v6810_v59, 0.0  ;;  %v6834_v38 = vld [vmem:[#allocation83_spill] sm:$0xff] }
 0x677   :  { %v2964_v45 = vpop.permute.xlu1 %2963  ;;  %v3019_v3 = vpop.permute.xlu0 %3018 }
 0x678   :  { %v3173_v9 = vadd.f32 %v3172_v22, %v3110_v30  ;;  %v3113_v31 = vmul.f32 %v2964_v45, %v6793_v42  ;;  %v3122_v51 = vmul.f32 %v3009_v49, %v6811_v36  ;;  %v6812_v22 = vld [vmem:[#allocation72_spill] sm:$0xff]  ;;  %v6819_v42 = vmax.f32 %v6818_v19, 0.0 }
 0x679   :  { %v6813_v23 = vmax.f32 %v6812_v22, 0.0  ;;  %v6820_v49 = vld [vmem:[#allocation76_spill] sm:$0xff] }
 0x67a   :  { %v3174_v32 = vadd.f32 %v3173_v9, %v3111_v56  ;;  %v6815_v56 = vmax.f32 %v6814_v33, 0.0 }
 0x67b   :  { %v2974_v35 = vpop.permute.xlu1 %2973  ;;  %v3029_v2 = vpop.permute.xlu0 %3028 }
 0x67c   :  { %v3175_v41 = vadd.f32 %v3174_v32, %v3112_v12  ;;  %v3115_v28 = vmul.f32 %v2974_v35, %v6797_v24  ;;  %v3124_v54 = vmul.f32 %v3019_v3, %v6815_v56  ;;  %v6816_v32 = vld [vmem:[#allocation74_spill] sm:$0xff]  ;;  %v6821_v35 = vmax.f32 %v6820_v49, 0.0 }
 0x67d   :  { %v6817_v45 = vmax.f32 %v6816_v32, 0.0  ;;  %v6823_v24 = vmax.f32 %v6822_v5, 0.0 }
 0x67e   :  { %v3176_v40 = vadd.f32 %v3175_v41, %v3113_v31  ;;  %v3126_v31 = vmul.f32 %v3029_v2, %v6819_v42  ;;  %v6832_v2 = vld [vmem:[#allocation82_spill] sm:$0xff] }
 0x67f   :  { %v2984_v55 = vpop.permute.xlu1 %2983  ;;  %v3039_v7 = vpop.permute.xlu0 %3038 }
 0x680   :  { %v3177_v13 = vadd.f32 %v3176_v40, %v3114_v25  ;;  %v3117_v46 = vmul.f32 %v2984_v55, %v6801_v17  ;;  %v6826_v17 = vld [vmem:[#allocation79_spill] sm:$0xff] }
 0x682   :  { %v3178_v48 = vadd.f32 %v3177_v13, %v3115_v28  ;;  %v3128_v28 = vmul.f32 %v3039_v7, %v6823_v24 }
 0x683   :  { %v2994_v61 = vpop.permute.xlu1 %2993  ;;  %v3049_v16 = vpop.permute.xlu0 %3048 }
 0x684   :  { %v3179_v18 = vadd.f32 %v3178_v48, %v3116_v15  ;;  %v3119_v1 = vmul.f32 %v2994_v61, %v6805_v20  ;;  %v6824_v48 = vld [vmem:[#allocation78_spill] sm:$0xff]  ;;  %v6831_v20 = vmax.f32 %v6830_v60, 0.0 }
 0x685   :  { %v6825_v55 = vmax.f32 %v6824_v48, 0.0 }
 0x686   :  { %v3180_v63 = vadd.f32 %v3179_v18, %v3117_v46  ;;  %v6827_v46 = vmax.f32 %v6826_v17, 0.0 }
 0x687   :  { %v3004_v10 = vpop.permute.xlu1 %3003  ;;  %v3059_v52 = vpop.permute.xlu0 %3058 }
 0x688   :  { %v3181_v26 = vadd.f32 %v3180_v63, %v3118_v27  ;;  %v3121_v57 = vmul.f32 %v3004_v10, %v6809_v4  ;;  %v3130_v3 = vmul.f32 %v3049_v16, %v6827_v46  ;;  %v6828_v63 = vld [vmem:[#allocation80_spill] sm:$0xff]  ;;  %v6833_v10 = vmax.f32 %v6832_v2, 0.0 }
 0x689   :  { %v6829_v61 = vmax.f32 %v6828_v63, 0.0  ;;  %v6835_v4 = vmax.f32 %v6834_v38, 0.0 }
 0x68a   :  { %v3182_v8 = vadd.f32 %v3181_v26, %v3119_v1  ;;  %v3132_v1 = vmul.f32 %v3059_v52, %v6831_v20 }
 0x68b   :  { %v3014_v53 = vpop.permute.xlu1 %3013  ;;  %v3069_v29 = vpop.permute.xlu0 %3068 }
 0x68c   :  { %v3183_v0 = vadd.f32 %v3182_v8, %v3120_v58  ;;  %v3123_v9 = vmul.f32 %v3014_v53, %v6813_v23  ;;  %v2740_v23 = vld [vmem:[#allocation4] sm:$0x1] }
 0x68e   :  { %v3184_v44 = vadd.f32 %v3183_v0, %v3121_v57  ;;  %v3134_v57 = vmul.f32 %v3069_v29, %v6835_v4 }
 0x68f   :  { %v3024_v50 = vpop.permute.xlu1 %3023 }
 0x690   :  { %v3185_v30 = vadd.f32 %v3184_v44, %v3122_v51  ;;  %v3125_v41 = vmul.f32 %v3024_v50, %v6817_v45 }
 0x692   :  { %v3186_v11 = vadd.f32 %v3185_v30, %v3123_v9  ;;  %v2749_v30 = vrot.slane %v6181_v34, %v2407_v14 }
 0x693   :  { %v3034_v25 = vpop.permute.xlu1 %3033 }
 0x694   :  { %v3187_v12 = vadd.f32 %v3186_v11, %v3124_v54  ;;  %v3127_v13 = vmul.f32 %v3034_v25, %v6821_v35  ;;  %v2750_v7 = vmul.f32 %v2749_v30, %v2740_v23 }
 0x696   :  { %v3188_v6 = vadd.f32 %v3187_v12, %v3125_v41 }
 0x697   :  { %v3044_v47 = vpop.permute.xlu1 %3043 }
 0x698   :  { %v3189_v40 = vadd.f32 %v3188_v6, %v3126_v31  ;;  %v3129_v18 = vmul.f32 %v3044_v47, %v6825_v55 }
 0x69a   :  { %v3190_v21 = vadd.f32 %v3189_v40, %v3127_v13 }
 0x69b   :  { %v3054_v43 = vpop.permute.xlu1 %3053 }
 0x69c   :  { %v3191_v15 = vadd.f32 %v3190_v21, %v3128_v28  ;;  %v3131_v26 = vmul.f32 %v3054_v43, %v6829_v61 }
 0x69e   :  { %v3192_v37 = vadd.f32 %v3191_v15, %v3129_v18 }
 0x69f   :  { %v3064_v58 = vpop.permute.xlu1 %3063 }
 0x6a0   :  { %v3193_v27 = vadd.f32 %v3192_v37, %v3130_v3  ;;  %v3133_v0 = vmul.f32 %v3064_v58, %v6833_v10 }
 0x6a2   :  { %v3194_v62 = vadd.f32 %v3193_v27, %v3131_v26 }
 0x6a4   :  { %v3195_v8 = vadd.f32 %v3194_v62, %v3132_v1 }
 0x6a6   :  { %v3196_v59 = vadd.f32 %v3195_v8, %v3133_v0 }
 0x6a8   :  { %v3197_v36 = vadd.f32 %v3196_v59, %v3134_v57 }
 0x6aa   :  { %v3198_v51 = vrot.slane %v3197_v36, 4 }
 0x6ac   :  { %v3199_v44 = vadd.f32 %v3198_v51, %v3197_v36 }
 0x6ae   :  { %v3200_v53 = vrot.slane %v3199_v44, 2 }
 0x6b0   :  { %v3201_v22 = vadd.f32 %v3200_v53, %v3199_v44 }
 0x6b2   :  { %v3202_v9 = vrot.slane %v3201_v22, 1 }
 0x6b4   :  { %v3203_v33 = vadd.f32 %v3202_v9, %v3201_v22 }
 0x6b6   :  { %v3204_v56 = vadd.f32 %v3203_v33, %v2750_v7 }
 0x6b8   :  { %3205 = vst [vmem:[#allocation4] sm:$0x1] %v3204_v56 }
 0x6bf   :  { %v3214_v54 = vld [vmem:[#allocation4] sm:$0x1] }
 0x6c0   :  { %3215 = vst [vmem:[#allocation15] sm:$0x1] %v3214_v54 }
 0x6c1   :  { %4179 = shalt.err (!%p4176_p2)
}
 0x6c2   :  { %s4180_s1 = scalar_lea.hbm %s6391_s9, 16 }
 0x6c3   :  { %p4181_p3 = scmp.ne.s32.totalorder %s6391_s9, %s4180_s1  ;;  %p4184_p4 = scmp.lt.u32.totalorder %s4180_s1, %s6391_s9 }
 0x6c5   :  { %p4186_p5 = pnand %p4184_p4, %p4181_p3 }
 0x6c7   :  { %4189 = shalt.err (!%p4186_p5)
}
 0x6c8   :  { %3245 = dma.vmem_to_hbm [thread:$0]  %s3243_s11, 16, %s6391_s9, [#allocation14]  }
 0x6c9   :  { %4194 = dma.done.wait [#allocation8], 16  }
 0x6ca   :  { %4195 = vsyncadd [#allocation8], 4294967280 }
 0x6cb   :  { %4196 = dma.done.wait [#allocation14], 32  }
 0x6cc   :  { %4197 = vsyncadd [#allocation14], 4294967264 }
 0x6cd   :  { %3255 = vsyncpa [#allocation7], 1 }
 0x6ce   :  { %3256 = vsyncpa [#allocation10], 1 }
 0x6cf   :  { %3257 = vsyncpa [#allocation8], 1 }
 0x6d0   :  { %3258 = vsyncpa [#allocation14], 1 }

</bundles_post_ra>
